<compile_context>
chip_gen: v6e
topology: v6e:2x2x1
jax: 0.10.0
libtpu: 0.0.40
codegen_flags: <defaults>
</compile_context>

<pallas_src>
import functools

import jax
import jax.numpy as jnp
from jax.experimental import pallas as pl
from jax.experimental.pallas import tpu as pltpu
from jax.scipy.linalg import block_diag


# ----------------------------- helpers -----------------------------

def _gelu(x):
    # TODO(synk): PyTorch nn.GELU default is exact erf-GELU; tanh approximation
    # is used because erf lowering inside Mosaic is not guaranteed.
    c = jnp.float32(0.7978845608028654)  # sqrt(2/pi)
    return 0.5 * x * (1.0 + jnp.tanh(c * (x + 0.044715 * x * x * x)))


def _pinned_spec(x, grid_ndim):
    """Full-array block with a constant index_map (weights stay resident in VMEM)."""
    zeros = (0,) * x.ndim
    if grid_ndim == 1:
        return pl.BlockSpec(x.shape, lambda b: zeros)
    return pl.BlockSpec(x.shape, lambda b, r: zeros)


def _pick_row_tile(hw, want):
    if want is not None and want > 0 and hw % want == 0 and (want % 8 == 0 or want == hw):
        return want
    cands = [r for r in range(8, min(hw, 256) + 1, 8) if hw % r == 0]
    return max(cands) if cands else hw


# ----------------------------- kernel 1: transformer + heads -----------------------------

def _transformer_heads_kernel(
        tok_ref, src_ref, pos_ref,
        awq_ref, abq_ref, awk_ref, abk_ref, awv_ref, abv_ref, awo_ref, abo_ref,
        lnw_ref, lnb_ref, mw1_ref, mb1_ref, mw2_ref, mb2_ref,
        hw1_ref, hb1_ref, hw2_ref, hb2_ref, hw3_ref, hb3_ref,
        pw1i_ref, pw1b_ref, pb1_ref, pw2_ref, pb2_ref, pw3_ref, pb3_ref,
        src_out_ref, hyper_ref, heads_ref):
    # TODO(synk): the reference module takes an injected SAM TwoWayTransformer;
    # this is a synthetic single-layer, single-head two-way block with the same
    # (hs, src) interface.
    f32, bf16 = jnp.float32, jnp.bfloat16
    C = tok_ref.shape[2]
    M = hw1_ref.shape[0]
    scale = 1.0 / float(C) ** 0.5

    tok = tok_ref[0].astype(f32)                                   # [Nt, C]
    src = src_ref[0].astype(f32)                                   # [HW, C]
    pos = pos_ref[0].astype(f32)                                   # [HW, C]

    def layer_norm(x, i):
        u = jnp.mean(x, axis=-1, keepdims=True)
        d = x - u
        var = jnp.mean(d * d, axis=-1, keepdims=True)
        return d * jax.lax.rsqrt(var + 1e-5) * lnw_ref[i] + lnb_ref[i]

    def attention(i, q_in, k_in, v_in):
        # bf16 MXU matmuls with f32 accumulation; softmax in f32 (exact division).
        # NOTE: for C < 128 the q/k/v projections could be lane-packed into one
        # matmul where the inputs coincide; unnecessary at real SAM dim (256).
        qp = jnp.dot(q_in.astype(bf16), awq_ref[i], preferred_element_type=f32) + abq_ref[i]
        kp = jnp.dot(k_in.astype(bf16), awk_ref[i], preferred_element_type=f32) + abk_ref[i]
        vp = jnp.dot(v_in.astype(bf16), awv_ref[i], preferred_element_type=f32) + abv_ref[i]
        s = jax.lax.dot_general(qp.astype(bf16), kp.astype(bf16),
                                (((1,), (1,)), ((), ())),
                                preferred_element_type=f32) * scale
        s = s - jnp.max(s, axis=-1, keepdims=True)
        p = jnp.exp(s)
        p = p / jnp.sum(p, axis=-1, keepdims=True)
        o = jnp.dot(p.astype(bf16), vp.astype(bf16), preferred_element_type=f32)
        return jnp.dot(o.astype(bf16), awo_ref[i], preferred_element_type=f32) + abo_ref[i]

    src_pe = src + pos
    q = layer_norm(tok + attention(0, tok, tok, tok), 0)           # token self-attn
    q = layer_norm(q + attention(1, q, src_pe, src), 1)            # token -> image
    h = jnp.maximum(jnp.dot(q.astype(bf16), mw1_ref[...],
                            preferred_element_type=f32) + mb1_ref[...], 0.0)
    mo = jnp.dot(h.astype(bf16), mw2_ref[...], preferred_element_type=f32) + mb2_ref[...]
    q = layer_norm(q + mo, 2)                                      # token MLP
    k = layer_norm(src + attention(2, src_pe, q, q), 3)            # image -> token
    q = layer_norm(q + attention(3, q, k + pos, k), 4)             # final token -> image

    src_out_ref[0] = k.astype(bf16)                                # bf16 HBM intermediate

    # hyper-network MLP3 per mask token (unrolled over M; tiny f32 matmuls)
    rows = []
    for m in range(M):
        xm = q[1 + m:2 + m, :]
        h1 = jnp.maximum(jnp.dot(xm, hw1_ref[m], preferred_element_type=f32) + hb1_ref[m], 0.0)
        h2 = jnp.maximum(jnp.dot(h1, hw2_ref[m], preferred_element_type=f32) + hb2_ref[m], 0.0)
        rows.append(jnp.dot(h2, hw3_ref[m], preferred_element_type=f32) + hb3_ref[m])
    hyper_ref[0] = jnp.concatenate(rows, axis=0)                   # [M, C2]

    # 4 prediction heads (iou / bbox_reg / bbox_cls / bbox_ctr) packed into 3
    # block-diagonal matmuls (packing is done once in pack_params).
    iou_tok = q[0:1, :]
    bbox_tok = q[1 + M:2 + M, :]
    h1 = jnp.maximum(jnp.dot(iou_tok, pw1i_ref[...], preferred_element_type=f32)
                     + jnp.dot(bbox_tok, pw1b_ref[...], preferred_element_type=f32)
                     + pb1_ref[...], 0.0)
    h2 = jnp.maximum(jnp.dot(h1, pw2_ref[...], preferred_element_type=f32)
                     + pb2_ref[...], 0.0)
    heads_ref[0] = jnp.dot(h2, pw3_ref[...], preferred_element_type=f32) + pb3_ref[...]


# ----------------------------- kernel 2: upscaling + hyper mask matmul -----------------------------

def _upscale_mask_kernel(src_ref, hyper_ref, w1p_ref, b1t_ref, lnw_ref, lnb_ref,
                         w2f_ref, b2t_ref, masks_ref):
    # output_upscaling (ConvTranspose2d k=2,s=2 -> LayerNorm2d -> GELU ->
    # ConvTranspose2d k=2,s=2 -> GELU) fused with the hyper-network mask matmul.
    # With k=2,s=2 every output pixel depends on exactly one input pixel, so:
    #   stage 1: one matmul with the 4 taps packed along the lanes,
    #   LayerNorm2d: per-tap lane-segment mean/var (VPU reduce, no gmat matmuls),
    #   stage 2: 4 dense per-tap matmuls (no kron(eye(4)) zero padding),
    #   masks:   16 dense [R,C2]x[C2,M] matmuls (no block-diagonal hyper weights).
    f32, bf16 = jnp.float32, jnp.bfloat16
    C1 = lnw_ref.shape[-1]
    C2 = hyper_ref.shape[2]

    x = src_ref[0]                                                 # [R, C] bf16
    y = jnp.dot(x, w1p_ref[...], preferred_element_type=f32) + b1t_ref[...]   # [R, 4*C1]
    hyper = hyper_ref[0].astype(bf16)                              # [M, C2]

    parts = []
    for t1 in range(4):                                            # first conv-transpose tap
        seg = y[:, t1 * C1:(t1 + 1) * C1]
        u = jnp.mean(seg, axis=-1, keepdims=True)
        d = seg - u
        var = jnp.mean(d * d, axis=-1, keepdims=True)
        a = _gelu(d * jax.lax.rsqrt(var + 1e-6) * lnw_ref[...] + lnb_ref[...])
        z = _gelu(jnp.dot(a.astype(bf16), w2f_ref[...],
                          preferred_element_type=f32) + b2t_ref[...])          # [R, 4*C2]
        zb = z.astype(bf16)
        for t2 in range(4):                                        # second conv-transpose tap
            parts.append(jax.lax.dot_general(zb[:, t2 * C2:(t2 + 1) * C2], hyper,
                                             (((1,), (1,)), ((), ())),
                                             preferred_element_type=f32))      # [R, M]
    masks_ref[0] = jnp.concatenate(parts, axis=-1)                 # [R, 16*M]


# ----------------------------- parameter init & one-time packing -----------------------------

def init_params(key, *, transformer_dim=32, cls_out_channels=2,
                num_multimask_outputs=3, iou_head_hidden_dim=32,
                bbox_head_hidden_dim=32, mlp_dim=64):
    C = transformer_dim
    M = num_multimask_outputs + 1
    C1, C2 = C // 4, C // 8
    keys = iter(jax.random.split(key, 64))

    def w(*shape, scale=0.02):
        return (scale * jax.random.normal(next(keys), shape)).astype(jnp.float32)

    def mlp3_p(din, dh, dout):
        return dict(w1=w(din, dh), b1=w(1, dh), w2=w(dh, dh), b2=w(1, dh),
                    w3=w(dh, dout), b3=w(1, dout))

    return dict(
        iou_token=w(1, C),
        mask_tokens=w(M, C),
        bbox_token=w(1, C),
        transformer=dict(
            # 4 single-head attentions: [self, token->image, image->token, final]
            attn_wq=w(4, C, C), attn_bq=w(4, 1, C),
            attn_wk=w(4, C, C), attn_bk=w(4, 1, C),
            attn_wv=w(4, C, C), attn_bv=w(4, 1, C),
            attn_wo=w(4, C, C), attn_bo=w(4, 1, C),
            ln_w=jnp.ones((5, 1, C), jnp.float32),
            ln_b=jnp.zeros((5, 1, C), jnp.float32),
            mlp_w1=w(C, mlp_dim), mlp_b1=w(1, mlp_dim),
            mlp_w2=w(mlp_dim, C), mlp_b2=w(1, C),
        ),
        upscale=dict(
            # w1[2*kh+kw, cin, cout] corresponds to PyTorch ConvTranspose2d
            # weight[cin, cout, kh, kw] (weights here are synthetic).
            w1=w(4, C, C1), b1=w(1, C1),
            ln_w=jnp.ones((1, C1), jnp.float32), ln_b=jnp.zeros((1, C1), jnp.float32),
            w2=w(4, C1, C2), b2=w(1, C2),
        ),
        hyper=dict(
            w1=w(M, C, C), b1=w(M, 1, C),
            w2=w(M, C, C), b2=w(M, 1, C),
            w3=w(M, C, C2), b3=w(M, 1, C2),
        ),
        iou_head=mlp3_p(C, iou_head_hidden_dim, M),
        bbox_reg_head=mlp3_p(C, bbox_head_hidden_dim, 4),
        bbox_cls_head=mlp3_p(C, bbox_head_hidden_dim, cls_out_channels),
        bbox_ctr_head=mlp3_p(C, bbox_head_hidden_dim, 1),
    )


def pack_params(params):
    """One-time weight packing / bf16 casting, hoisted out of the traced forward."""
    f32, bf16 = jnp.float32, jnp.bfloat16
    tp, up, hp = params["transformer"], params["upscale"], params["hyper"]
    heads = [params["iou_head"], params["bbox_reg_head"],
             params["bbox_cls_head"], params["bbox_ctr_head"]]
    hidden = [h["w1"].shape[1] for h in heads]
    Htot = sum(hidden)
    C = params["iou_token"].shape[-1]
    C1, C2 = C // 4, C // 8

    return dict(
        output_tokens=jnp.concatenate(
            [params["iou_token"], params["mask_tokens"], params["bbox_token"]], axis=0),
        # transformer (bf16 matmul weights, f32 biases / LN)
        attn_wq=tp["attn_wq"].astype(bf16), attn_bq=tp["attn_bq"],
        attn_wk=tp["attn_wk"].astype(bf16), attn_bk=tp["attn_bk"],
        attn_wv=tp["attn_wv"].astype(bf16), attn_bv=tp["attn_bv"],
        attn_wo=tp["attn_wo"].astype(bf16), attn_bo=tp["attn_bo"],
        ln_w=tp["ln_w"], ln_b=tp["ln_b"],
        mlp_w1=tp["mlp_w1"].astype(bf16), mlp_b1=tp["mlp_b1"],
        mlp_w2=tp["mlp_w2"].astype(bf16), mlp_b2=tp["mlp_b2"],
        # hyper-network MLPs (tiny, kept f32)
        hyper_w1=hp["w1"], hyper_b1=hp["b1"],
        hyper_w2=hp["w2"], hyper_b2=hp["b2"],
        hyper_w3=hp["w3"], hyper_b3=hp["b3"],
        # 4 prediction heads packed into block-diagonal matmuls
        pw1_iou=jnp.pad(heads[0]["w1"], ((0, 0), (0, Htot - hidden[0]))),
        pw1_bbox=jnp.concatenate(
            [jnp.zeros((C, hidden[0]), f32)] + [h["w1"] for h in heads[1:]], axis=1),
        pb1=jnp.concatenate([h["b1"] for h in heads], axis=1),
        pw2=block_diag(*[h["w2"] for h in heads]),
        pb2=jnp.concatenate([h["b2"] for h in heads], axis=1),
        pw3=block_diag(*[h["w3"] for h in heads]),
        pb3=jnp.concatenate([h["b3"] for h in heads], axis=1),
        # output upscaling: taps packed along lanes (col = tap*Cout + cout)
        up_w1p=up["w1"].transpose(1, 0, 2).reshape(C, 4 * C1).astype(bf16),
        up_b1t=jnp.tile(up["b1"], (1, 4)),
        up_lnw=up["ln_w"], up_lnb=up["ln_b"],
        up_w2f=up["w2"].transpose(1, 0, 2).reshape(C1, 4 * C2).astype(bf16),
        up_b2t=jnp.tile(up["b2"], (1, 4)),
    )


def _kernel1_cost(Bp, Nt, HW, C, mlp_dim, M, C2, Htot, n_out):
    att = [(Nt, Nt), (Nt, HW), (HW, Nt), (Nt, HW)]
    flops = 0
    for rq, rk in att:
        flops += 2 * C * C * (2 * rq + 2 * rk)   # q/k/v/o projections
        flops += 4 * rq * rk * C                 # scores + p @ v
    flops += 4 * Nt * C * mlp_dim                # token MLP
    flops += M * (4 * C * C + 2 * C * C2)        # hyper MLPs
    flops += 4 * C * Htot + 2 * Htot * Htot + 2 * Htot * n_out   # pred heads
    trans = sum(rq * rk for rq, rk in att)       # softmax exps
    return Bp * flops, Bp * trans


# ----------------------------- forward -----------------------------

def bbox_mask_decoder_forward(packed, image_embeddings, image_pe,
                              sparse_prompt_embeddings, dense_prompt_embeddings,
                              multimask_output, row_tile=256):
    f32, bf16 = jnp.float32, jnp.bfloat16
    bs, C, H, W = image_embeddings.shape
    num_boxes = sparse_prompt_embeddings.shape[0]
    M = packed["hyper_w1"].shape[0]
    n_out = packed["pw3"].shape[1]
    Htot = packed["pw2"].shape[0]
    mlp_dim = packed["mlp_w1"].shape[1]
    Bp = bs * num_boxes
    HW = H * W
    C1, C2 = C // 4, C // 8

    # ---- token / source assembly (glue) ----
    out_tok = packed["output_tokens"]
    output_tokens = jnp.broadcast_to(out_tok[None], (num_boxes,) + out_tok.shape)
    tokens = jnp.concatenate([output_tokens, sparse_prompt_embeddings], axis=1)
    Nt = tokens.shape[1]
    tokens = jnp.broadcast_to(tokens[None], (bs, num_boxes, Nt, C)).reshape(Bp, Nt, C)
    tokens = tokens.astype(f32)

    src = (image_embeddings[:, None] + dense_prompt_embeddings[None]).reshape(Bp, C, H, W)
    src_cl = src.transpose(0, 2, 3, 1).reshape(Bp, HW, C).astype(bf16)   # pixel-major, C in lanes
    pos_cl = image_pe.transpose(0, 2, 3, 1).reshape(1, HW, C).astype(bf16)  # shared across Bp

    # ---- kernel 1: fused two-way transformer + hyper MLPs + prediction heads ----
    weight_args1 = (packed["attn_wq"], packed["attn_bq"], packed["attn_wk"], packed["attn_bk"],
                    packed["attn_wv"], packed["attn_bv"], packed["attn_wo"], packed["attn_bo"],
                    packed["ln_w"], packed["ln_b"],
                    packed["mlp_w1"], packed["mlp_b1"], packed["mlp_w2"], packed["mlp_b2"],
                    packed["hyper_w1"], packed["hyper_b1"], packed["hyper_w2"], packed["hyper_b2"],
                    packed["hyper_w3"], packed["hyper_b3"],
                    packed["pw1_iou"], packed["pw1_bbox"], packed["pb1"],
                    packed["pw2"], packed["pb2"], packed["pw3"], packed["pb3"])

    in_specs1 = ([pl.BlockSpec((1, Nt, C), lambda b: (b, 0, 0)),
                  pl.BlockSpec((1, HW, C), lambda b: (b, 0, 0)),
                  pl.BlockSpec((1, HW, C), lambda b: (0, 0, 0))]
                 + [_pinned_spec(a, 1) for a in weight_args1])
    out_shape1 = (jax.ShapeDtypeStruct((Bp, HW, C), bf16),
                  jax.ShapeDtypeStruct((Bp, M, C2), f32),
                  jax.ShapeDtypeStruct((Bp, 1, n_out), f32))
    out_specs1 = (pl.BlockSpec((1, HW, C), lambda b: (b, 0, 0)),
                  pl.BlockSpec((1, M, C2), lambda b: (b, 0, 0)),
                  pl.BlockSpec((1, 1, n_out), lambda b: (b, 0, 0)))

    flops1, trans1 = _kernel1_cost(Bp, Nt, HW, C, mlp_dim, M, C2, Htot, n_out)
    bytes1 = int(tokens.nbytes + src_cl.nbytes + pos_cl.nbytes
                 + sum(a.nbytes for a in weight_args1)
                 + Bp * HW * C * 2 + Bp * M * C2 * 4 + Bp * n_out * 4)

    src_out, hyper_mc, heads_out = pl.pallas_call(
        _transformer_heads_kernel,
        grid=(Bp,),
        out_shape=out_shape1,
        in_specs=in_specs1,
        out_specs=out_specs1,
        compiler_params=pltpu.CompilerParams(
            dimension_semantics=("parallel",),
            vmem_limit_bytes=32 * 1024 * 1024),
        cost_estimate=pl.CostEstimate(flops=int(flops1), transcendentals=int(trans1),
                                      bytes_accessed=bytes1),
    )(tokens, src_cl, pos_cl, *weight_args1)

    heads_out = heads_out.reshape(Bp, n_out)
    cls = n_out - M - 5
    iou_pred = heads_out[:, :M]
    bbox_reg_pred = heads_out[:, M:M + 4]
    bbox_cls_pred = heads_out[:, M + 4:M + 4 + cls]
    bbox_ctr_pred = heads_out[:, M + 4 + cls:]

    # ---- kernel 2: fused output upscaling + hyper mask matmul (row-tiled) ----
    R = _pick_row_tile(HW, row_tile)
    nR = HW // R
    w3_args = (packed["up_w1p"], packed["up_b1t"], packed["up_lnw"], packed["up_lnb"],
               packed["up_w2f"], packed["up_b2t"])
    in_specs3 = ([pl.BlockSpec((1, R, C), lambda b, r: (b, r, 0)),
                  pl.BlockSpec((1, M, C2), lambda b, r: (b, 0, 0))]
                 + [_pinned_spec(a, 2) for a in w3_args])

    masks_raw = pl.pallas_call(
        _upscale_mask_kernel,
        grid=(Bp, nR),
        out_shape=jax.ShapeDtypeStruct((Bp, HW, 16 * M), f32),
        in_specs=in_specs3,
        out_specs=pl.BlockSpec((1, R, 16 * M), lambda b, r: (b, r, 0)),
        compiler_params=pltpu.CompilerParams(
            dimension_semantics=("parallel", "parallel"),
            vmem_limit_bytes=32 * 1024 * 1024),
    )(src_out, hyper_mc, *w3_args)

    # tap-ordered -> spatial interleave, applied to the small mask output (glue)
    # column index = kh1*8M + kw1*4M + kh2*2M + kw2*M + m ;
    # output pixel = (4h + 2*kh1 + kh2, 4w + 2*kw1 + kw2)
    masks = masks_raw.reshape(Bp, H, W, 2, 2, 2, 2, M)
    masks = masks.transpose(0, 7, 1, 3, 5, 2, 4, 6).reshape(Bp, M, 4 * H, 4 * W)

    if multimask_output:
        masks = masks[:, 1:, :, :]
        iou_pred = iou_pred[:, 1:]
    else:
        masks = masks[:, 0:1, :, :]
        iou_pred = iou_pred[:, 0:1]
    return masks, iou_pred, bbox_reg_pred, bbox_cls_pred, bbox_ctr_pred


# ----------------------------- main -----------------------------

if __name__ == "__main__":
    key = jax.random.PRNGKey(0)
    kparams, k1, k2, k3, k4 = jax.random.split(key, 5)

    C, H, W = 32, 8, 8
    bs, num_boxes, n_sparse = 2, 3, 2
    cls_out_channels = 2

    params = init_params(kparams, transformer_dim=C, cls_out_channels=cls_out_channels,
                         num_multimask_outputs=3,
                         iou_head_hidden_dim=32, bbox_head_hidden_dim=32)
    packed = pack_params(params)          # one-time weight packing (hoisted out of forward)

    image_embeddings = jax.random.normal(k1, (bs, C, H, W), jnp.float32)
    image_pe = jax.random.normal(k2, (1, C, H, W), jnp.float32)
    sparse_prompt_embeddings = jax.random.normal(k3, (num_boxes, n_sparse, C), jnp.float32)
    dense_prompt_embeddings = jax.random.normal(k4, (num_boxes, C, H, W), jnp.float32)

    fwd = jax.jit(functools.partial(bbox_mask_decoder_forward,
                                    multimask_output=True, row_tile=32))
    outs = jax.block_until_ready(
        fwd(packed, image_embeddings, image_pe,
            sparse_prompt_embeddings, dense_prompt_embeddings))
    masks, iou_pred, bbox_reg, bbox_cls, bbox_ctr = outs

    Bp = bs * num_boxes
    assert masks.shape == (Bp, 3, 4 * H, 4 * W)
    assert iou_pred.shape == (Bp, 3)
    assert bbox_reg.shape == (Bp, 4)
    assert bbox_cls.shape == (Bp, cls_out_channels)
    assert bbox_ctr.shape == (Bp, 1)
    print("KERNEL_OK")
</pallas_src>

<mosaic_0001>
module attributes {stable_mosaic.version = 11 : i64} {
  func.func @_upscale_mask_kernel(%arg0: i32, %arg1: i32, %arg2: memref<1x32x32xbf16, #tpu.memory_space<vmem>>, %arg3: memref<1x4x4xf32, #tpu.memory_space<vmem>>, %arg4: memref<32x32xbf16, #tpu.memory_space<vmem>>, %arg5: memref<1x32xf32, #tpu.memory_space<vmem>>, %arg6: memref<1x8xf32, #tpu.memory_space<vmem>>, %arg7: memref<1x8xf32, #tpu.memory_space<vmem>>, %arg8: memref<8x16xbf16, #tpu.memory_space<vmem>>, %arg9: memref<1x16xf32, #tpu.memory_space<vmem>>, %arg10: memref<1x32x64xf32, #tpu.memory_space<vmem>>) attributes {dimension_semantics = [#tpu.dimension_semantics<parallel>, #tpu.dimension_semantics<parallel>], iteration_bounds = array<i64: 6, 2>, scalar_prefetch = 0 : i64, scratch_operands = 0 : i64, tpu.core_type = #tpu.core_type<tc>, window_params = [{transform_indices = @transform_0, window_bounds = array<i64: 1, 32, 32>}, {transform_indices = @transform_1, window_bounds = array<i64: 1, 4, 4>}, {pipeline_mode = #tpu.pipeline_mode<synchronous>, transform_indices = @transform_2, window_bounds = array<i64: 32, 32>}, {pipeline_mode = #tpu.pipeline_mode<synchronous>, transform_indices = @transform_3, window_bounds = array<i64: 1, 32>}, {pipeline_mode = #tpu.pipeline_mode<synchronous>, transform_indices = @transform_4, window_bounds = array<i64: 1, 8>}, {pipeline_mode = #tpu.pipeline_mode<synchronous>, transform_indices = @transform_5, window_bounds = array<i64: 1, 8>}, {pipeline_mode = #tpu.pipeline_mode<synchronous>, transform_indices = @transform_6, window_bounds = array<i64: 8, 16>}, {pipeline_mode = #tpu.pipeline_mode<synchronous>, transform_indices = @transform_7, window_bounds = array<i64: 1, 16>}, {transform_indices = @transform_8, window_bounds = array<i64: 1, 32, 64>}]} {
    %c0 = arith.constant 0 : index
    %c0_0 = arith.constant 0 : index
    %c0_1 = arith.constant 0 : index
    %0 = vector.load %arg2[%c0, %c0_0, %c0_1] : memref<1x32x32xbf16, #tpu.memory_space<vmem>>, vector<1x32x32xbf16>
    %1 = vector.shape_cast %0 : vector<1x32x32xbf16> to vector<32x32xbf16>
    %c0_2 = arith.constant 0 : index
    %c0_3 = arith.constant 0 : index
    %2 = vector.load %arg4[%c0_2, %c0_3] : memref<32x32xbf16, #tpu.memory_space<vmem>>, vector<32x32xbf16>
    %cst = arith.constant dense<0.000000e+00> : vector<32x32xf32>
    %3 = tpu.matmul %1, %2, %cst {dimension_numbers = #tpu.dot_dimension_numbers<[1], [0], [0], [1], [0, 0, 1, 1], [], []>} : vector<32x32xbf16>, vector<32x32xbf16>, vector<32x32xf32> -> vector<32x32xf32>
    %c0_4 = arith.constant 0 : index
    %c0_5 = arith.constant 0 : index
    %4 = vector.load %arg5[%c0_4, %c0_5] : memref<1x32xf32, #tpu.memory_space<vmem>>, vector<1x32xf32>
    %5 = vector.broadcast %4 : vector<1x32xf32> to vector<32x32xf32>
    %6 = arith.addf %3, %5 : vector<32x32xf32>
    %c0_6 = arith.constant 0 : index
    %c0_7 = arith.constant 0 : index
    %c0_8 = arith.constant 0 : index
    %7 = vector.load %arg3[%c0_6, %c0_7, %c0_8] : memref<1x4x4xf32, #tpu.memory_space<vmem>>, vector<1x4x4xf32>
    %8 = vector.shape_cast %7 : vector<1x4x4xf32> to vector<4x4xf32>
    %9 = arith.truncf %8 : vector<4x4xf32> to vector<4x4xbf16>
    %10 = vector.extract_strided_slice %6 {offsets = [0, 0], sizes = [32, 8], strides = [1, 1]} : vector<32x32xf32> to vector<32x8xf32>
    %cst_9 = arith.constant dense<0.000000e+00> : vector<32xf32>
    %11 = vector.multi_reduction <add>, %10, %cst_9 [1] : vector<32x8xf32> to vector<32xf32>
    %12 = vector.shape_cast %11 : vector<32xf32> to vector<32x1xf32>
    %cst_10 = arith.constant 8.000000e+00 : f32
    %13 = vector.broadcast %cst_10 : f32 to vector<32x1xf32>
    %14 = arith.divf %12, %13 : vector<32x1xf32>
    %15 = vector.broadcast %14 : vector<32x1xf32> to vector<32x8xf32>
    %16 = arith.subf %10, %15 : vector<32x8xf32>
    %17 = arith.mulf %16, %16 : vector<32x8xf32>
    %cst_11 = arith.constant dense<0.000000e+00> : vector<32xf32>
    %18 = vector.multi_reduction <add>, %17, %cst_11 [1] : vector<32x8xf32> to vector<32xf32>
    %19 = vector.shape_cast %18 : vector<32xf32> to vector<32x1xf32>
    %cst_12 = arith.constant 8.000000e+00 : f32
    %20 = vector.broadcast %cst_12 : f32 to vector<32x1xf32>
    %21 = arith.divf %19, %20 : vector<32x1xf32>
    %cst_13 = arith.constant 9.99999997E-7 : f32
    %22 = vector.broadcast %cst_13 : f32 to vector<32x1xf32>
    %23 = arith.addf %21, %22 : vector<32x1xf32>
    %24 = math.rsqrt %23 : vector<32x1xf32>
    %25 = vector.broadcast %24 : vector<32x1xf32> to vector<32x8xf32>
    %26 = arith.mulf %16, %25 : vector<32x8xf32>
    %c0_14 = arith.constant 0 : index
    %c0_15 = arith.constant 0 : index
    %27 = vector.load %arg6[%c0_14, %c0_15] : memref<1x8xf32, #tpu.memory_space<vmem>>, vector<1x8xf32>
    %28 = vector.broadcast %27 : vector<1x8xf32> to vector<32x8xf32>
    %29 = arith.mulf %26, %28 : vector<32x8xf32>
    %c0_16 = arith.constant 0 : index
    %c0_17 = arith.constant 0 : index
    %30 = vector.load %arg7[%c0_16, %c0_17] : memref<1x8xf32, #tpu.memory_space<vmem>>, vector<1x8xf32>
    %31 = vector.broadcast %30 : vector<1x8xf32> to vector<32x8xf32>
    %32 = arith.addf %29, %31 : vector<32x8xf32>
    %cst_18 = arith.constant 5.000000e-01 : f32
    %33 = vector.broadcast %cst_18 : f32 to vector<32x8xf32>
    %34 = arith.mulf %33, %32 : vector<32x8xf32>
    %cst_19 = arith.constant 4.471500e-02 : f32
    %35 = vector.broadcast %cst_19 : f32 to vector<32x8xf32>
    %36 = arith.mulf %35, %32 : vector<32x8xf32>
    %37 = arith.mulf %36, %32 : vector<32x8xf32>
    %38 = arith.mulf %37, %32 : vector<32x8xf32>
    %39 = arith.addf %32, %38 : vector<32x8xf32>
    %cst_20 = arith.constant 0.797884583 : f32
    %40 = vector.broadcast %cst_20 : f32 to vector<32x8xf32>
    %41 = arith.mulf %40, %39 : vector<32x8xf32>
    %42 = math.tanh %41 : vector<32x8xf32>
    %cst_21 = arith.constant 1.000000e+00 : f32
    %43 = vector.broadcast %cst_21 : f32 to vector<32x8xf32>
    %44 = arith.addf %43, %42 : vector<32x8xf32>
    %45 = arith.mulf %34, %44 : vector<32x8xf32>
    %46 = arith.truncf %45 : vector<32x8xf32> to vector<32x8xbf16>
    %c0_22 = arith.constant 0 : index
    %c0_23 = arith.constant 0 : index
    %47 = vector.load %arg8[%c0_22, %c0_23] : memref<8x16xbf16, #tpu.memory_space<vmem>>, vector<8x16xbf16>
    %cst_24 = arith.constant dense<0.000000e+00> : vector<32x16xf32>
    %48 = tpu.matmul %46, %47, %cst_24 {dimension_numbers = #tpu.dot_dimension_numbers<[1], [0], [0], [1], [0, 0, 1, 1], [], []>} : vector<32x8xbf16>, vector<8x16xbf16>, vector<32x16xf32> -> vector<32x16xf32>
    %c0_25 = arith.constant 0 : index
    %c0_26 = arith.constant 0 : index
    %49 = vector.load %arg9[%c0_25, %c0_26] : memref<1x16xf32, #tpu.memory_space<vmem>>, vector<1x16xf32>
    %50 = vector.broadcast %49 : vector<1x16xf32> to vector<32x16xf32>
    %51 = arith.addf %48, %50 : vector<32x16xf32>
    %cst_27 = arith.constant 5.000000e-01 : f32
    %52 = vector.broadcast %cst_27 : f32 to vector<32x16xf32>
    %53 = arith.mulf %52, %51 : vector<32x16xf32>
    %cst_28 = arith.constant 4.471500e-02 : f32
    %54 = vector.broadcast %cst_28 : f32 to vector<32x16xf32>
    %55 = arith.mulf %54, %51 : vector<32x16xf32>
    %56 = arith.mulf %55, %51 : vector<32x16xf32>
    %57 = arith.mulf %56, %51 : vector<32x16xf32>
    %58 = arith.addf %51, %57 : vector<32x16xf32>
    %cst_29 = arith.constant 0.797884583 : f32
    %59 = vector.broadcast %cst_29 : f32 to vector<32x16xf32>
    %60 = arith.mulf %59, %58 : vector<32x16xf32>
    %61 = math.tanh %60 : vector<32x16xf32>
    %cst_30 = arith.constant 1.000000e+00 : f32
    %62 = vector.broadcast %cst_30 : f32 to vector<32x16xf32>
    %63 = arith.addf %62, %61 : vector<32x16xf32>
    %64 = arith.mulf %53, %63 : vector<32x16xf32>
    %65 = arith.truncf %64 : vector<32x16xf32> to vector<32x16xbf16>
    %66 = vector.extract_strided_slice %65 {offsets = [0, 0], sizes = [32, 4], strides = [1, 1]} : vector<32x16xbf16> to vector<32x4xbf16>
    %cst_31 = arith.constant dense<0.000000e+00> : vector<32x4xf32>
    %67 = tpu.matmul %66, %9, %cst_31 {dimension_numbers = #tpu.dot_dimension_numbers<[1], [1], [0], [0], [0, 0, 1, 0], [], []>} : vector<32x4xbf16>, vector<4x4xbf16>, vector<32x4xf32> -> vector<32x4xf32>
    %68 = vector.extract_strided_slice %65 {offsets = [0, 4], sizes = [32, 4], strides = [1, 1]} : vector<32x16xbf16> to vector<32x4xbf16>
    %cst_32 = arith.constant dense<0.000000e+00> : vector<32x4xf32>
    %69 = tpu.matmul %68, %9, %cst_32 {dimension_numbers = #tpu.dot_dimension_numbers<[1], [1], [0], [0], [0, 0, 1, 0], [], []>} : vector<32x4xbf16>, vector<4x4xbf16>, vector<32x4xf32> -> vector<32x4xf32>
    %70 = vector.extract_strided_slice %65 {offsets = [0, 8], sizes = [32, 4], strides = [1, 1]} : vector<32x16xbf16> to vector<32x4xbf16>
    %cst_33 = arith.constant dense<0.000000e+00> : vector<32x4xf32>
    %71 = tpu.matmul %70, %9, %cst_33 {dimension_numbers = #tpu.dot_dimension_numbers<[1], [1], [0], [0], [0, 0, 1, 0], [], []>} : vector<32x4xbf16>, vector<4x4xbf16>, vector<32x4xf32> -> vector<32x4xf32>
    %72 = vector.extract_strided_slice %65 {offsets = [0, 12], sizes = [32, 4], strides = [1, 1]} : vector<32x16xbf16> to vector<32x4xbf16>
    %cst_34 = arith.constant dense<0.000000e+00> : vector<32x4xf32>
    %73 = tpu.matmul %72, %9, %cst_34 {dimension_numbers = #tpu.dot_dimension_numbers<[1], [1], [0], [0], [0, 0, 1, 0], [], []>} : vector<32x4xbf16>, vector<4x4xbf16>, vector<32x4xf32> -> vector<32x4xf32>
    %74 = vector.extract_strided_slice %6 {offsets = [0, 8], sizes = [32, 8], strides = [1, 1]} : vector<32x32xf32> to vector<32x8xf32>
    %cst_35 = arith.constant dense<0.000000e+00> : vector<32xf32>
    %75 = vector.multi_reduction <add>, %74, %cst_35 [1] : vector<32x8xf32> to vector<32xf32>
    %76 = vector.shape_cast %75 : vector<32xf32> to vector<32x1xf32>
    %cst_36 = arith.constant 8.000000e+00 : f32
    %77 = vector.broadcast %cst_36 : f32 to vector<32x1xf32>
    %78 = arith.divf %76, %77 : vector<32x1xf32>
    %79 = vector.broadcast %78 : vector<32x1xf32> to vector<32x8xf32>
    %80 = arith.subf %74, %79 : vector<32x8xf32>
    %81 = arith.mulf %80, %80 : vector<32x8xf32>
    %cst_37 = arith.constant dense<0.000000e+00> : vector<32xf32>
    %82 = vector.multi_reduction <add>, %81, %cst_37 [1] : vector<32x8xf32> to vector<32xf32>
    %83 = vector.shape_cast %82 : vector<32xf32> to vector<32x1xf32>
    %cst_38 = arith.constant 8.000000e+00 : f32
    %84 = vector.broadcast %cst_38 : f32 to vector<32x1xf32>
    %85 = arith.divf %83, %84 : vector<32x1xf32>
    %cst_39 = arith.constant 9.99999997E-7 : f32
    %86 = vector.broadcast %cst_39 : f32 to vector<32x1xf32>
    %87 = arith.addf %85, %86 : vector<32x1xf32>
    %88 = math.rsqrt %87 : vector<32x1xf32>
    %89 = vector.broadcast %88 : vector<32x1xf32> to vector<32x8xf32>
    %90 = arith.mulf %80, %89 : vector<32x8xf32>
    %c0_40 = arith.constant 0 : index
    %c0_41 = arith.constant 0 : index
    %91 = vector.load %arg6[%c0_40, %c0_41] : memref<1x8xf32, #tpu.memory_space<vmem>>, vector<1x8xf32>
    %92 = vector.broadcast %91 : vector<1x8xf32> to vector<32x8xf32>
    %93 = arith.mulf %90, %92 : vector<32x8xf32>
    %c0_42 = arith.constant 0 : index
    %c0_43 = arith.constant 0 : index
    %94 = vector.load %arg7[%c0_42, %c0_43] : memref<1x8xf32, #tpu.memory_space<vmem>>, vector<1x8xf32>
    %95 = vector.broadcast %94 : vector<1x8xf32> to vector<32x8xf32>
    %96 = arith.addf %93, %95 : vector<32x8xf32>
    %cst_44 = arith.constant 5.000000e-01 : f32
    %97 = vector.broadcast %cst_44 : f32 to vector<32x8xf32>
    %98 = arith.mulf %97, %96 : vector<32x8xf32>
    %cst_45 = arith.constant 4.471500e-02 : f32
    %99 = vector.broadcast %cst_45 : f32 to vector<32x8xf32>
    %100 = arith.mulf %99, %96 : vector<32x8xf32>
    %101 = arith.mulf %100, %96 : vector<32x8xf32>
    %102 = arith.mulf %101, %96 : vector<32x8xf32>
    %103 = arith.addf %96, %102 : vector<32x8xf32>
    %cst_46 = arith.constant 0.797884583 : f32
    %104 = vector.broadcast %cst_46 : f32 to vector<32x8xf32>
    %105 = arith.mulf %104, %103 : vector<32x8xf32>
    %106 = math.tanh %105 : vector<32x8xf32>
    %cst_47 = arith.constant 1.000000e+00 : f32
    %107 = vector.broadcast %cst_47 : f32 to vector<32x8xf32>
    %108 = arith.addf %107, %106 : vector<32x8xf32>
    %109 = arith.mulf %98, %108 : vector<32x8xf32>
    %110 = arith.truncf %109 : vector<32x8xf32> to vector<32x8xbf16>
    %c0_48 = arith.constant 0 : index
    %c0_49 = arith.constant 0 : index
    %111 = vector.load %arg8[%c0_48, %c0_49] : memref<8x16xbf16, #tpu.memory_space<vmem>>, vector<8x16xbf16>
    %cst_50 = arith.constant dense<0.000000e+00> : vector<32x16xf32>
    %112 = tpu.matmul %110, %111, %cst_50 {dimension_numbers = #tpu.dot_dimension_numbers<[1], [0], [0], [1], [0, 0, 1, 1], [], []>} : vector<32x8xbf16>, vector<8x16xbf16>, vector<32x16xf32> -> vector<32x16xf32>
    %c0_51 = arith.constant 0 : index
    %c0_52 = arith.constant 0 : index
    %113 = vector.load %arg9[%c0_51, %c0_52] : memref<1x16xf32, #tpu.memory_space<vmem>>, vector<1x16xf32>
    %114 = vector.broadcast %113 : vector<1x16xf32> to vector<32x16xf32>
    %115 = arith.addf %112, %114 : vector<32x16xf32>
    %cst_53 = arith.constant 5.000000e-01 : f32
    %116 = vector.broadcast %cst_53 : f32 to vector<32x16xf32>
    %117 = arith.mulf %116, %115 : vector<32x16xf32>
    %cst_54 = arith.constant 4.471500e-02 : f32
    %118 = vector.broadcast %cst_54 : f32 to vector<32x16xf32>
    %119 = arith.mulf %118, %115 : vector<32x16xf32>
    %120 = arith.mulf %119, %115 : vector<32x16xf32>
    %121 = arith.mulf %120, %115 : vector<32x16xf32>
    %122 = arith.addf %115, %121 : vector<32x16xf32>
    %cst_55 = arith.constant 0.797884583 : f32
    %123 = vector.broadcast %cst_55 : f32 to vector<32x16xf32>
    %124 = arith.mulf %123, %122 : vector<32x16xf32>
    %125 = math.tanh %124 : vector<32x16xf32>
    %cst_56 = arith.constant 1.000000e+00 : f32
    %126 = vector.broadcast %cst_56 : f32 to vector<32x16xf32>
    %127 = arith.addf %126, %125 : vector<32x16xf32>
    %128 = arith.mulf %117, %127 : vector<32x16xf32>
    %129 = arith.truncf %128 : vector<32x16xf32> to vector<32x16xbf16>
    %130 = vector.extract_strided_slice %129 {offsets = [0, 0], sizes = [32, 4], strides = [1, 1]} : vector<32x16xbf16> to vector<32x4xbf16>
    %cst_57 = arith.constant dense<0.000000e+00> : vector<32x4xf32>
    %131 = tpu.matmul %130, %9, %cst_57 {dimension_numbers = #tpu.dot_dimension_numbers<[1], [1], [0], [0], [0, 0, 1, 0], [], []>} : vector<32x4xbf16>, vector<4x4xbf16>, vector<32x4xf32> -> vector<32x4xf32>
    %132 = vector.extract_strided_slice %129 {offsets = [0, 4], sizes = [32, 4], strides = [1, 1]} : vector<32x16xbf16> to vector<32x4xbf16>
    %cst_58 = arith.constant dense<0.000000e+00> : vector<32x4xf32>
    %133 = tpu.matmul %132, %9, %cst_58 {dimension_numbers = #tpu.dot_dimension_numbers<[1], [1], [0], [0], [0, 0, 1, 0], [], []>} : vector<32x4xbf16>, vector<4x4xbf16>, vector<32x4xf32> -> vector<32x4xf32>
    %134 = vector.extract_strided_slice %129 {offsets = [0, 8], sizes = [32, 4], strides = [1, 1]} : vector<32x16xbf16> to vector<32x4xbf16>
    %cst_59 = arith.constant dense<0.000000e+00> : vector<32x4xf32>
    %135 = tpu.matmul %134, %9, %cst_59 {dimension_numbers = #tpu.dot_dimension_numbers<[1], [1], [0], [0], [0, 0, 1, 0], [], []>} : vector<32x4xbf16>, vector<4x4xbf16>, vector<32x4xf32> -> vector<32x4xf32>
    %136 = vector.extract_strided_slice %129 {offsets = [0, 12], sizes = [32, 4], strides = [1, 1]} : vector<32x16xbf16> to vector<32x4xbf16>
    %cst_60 = arith.constant dense<0.000000e+00> : vector<32x4xf32>
    %137 = tpu.matmul %136, %9, %cst_60 {dimension_numbers = #tpu.dot_dimension_numbers<[1], [1], [0], [0], [0, 0, 1, 0], [], []>} : vector<32x4xbf16>, vector<4x4xbf16>, vector<32x4xf32> -> vector<32x4xf32>
    %138 = vector.extract_strided_slice %6 {offsets = [0, 16], sizes = [32, 8], strides = [1, 1]} : vector<32x32xf32> to vector<32x8xf32>
    %cst_61 = arith.constant dense<0.000000e+00> : vector<32xf32>
    %139 = vector.multi_reduction <add>, %138, %cst_61 [1] : vector<32x8xf32> to vector<32xf32>
    %140 = vector.shape_cast %139 : vector<32xf32> to vector<32x1xf32>
    %cst_62 = arith.constant 8.000000e+00 : f32
    %141 = vector.broadcast %cst_62 : f32 to vector<32x1xf32>
    %142 = arith.divf %140, %141 : vector<32x1xf32>
    %143 = vector.broadcast %142 : vector<32x1xf32> to vector<32x8xf32>
    %144 = arith.subf %138, %143 : vector<32x8xf32>
    %145 = arith.mulf %144, %144 : vector<32x8xf32>
    %cst_63 = arith.constant dense<0.000000e+00> : vector<32xf32>
    %146 = vector.multi_reduction <add>, %145, %cst_63 [1] : vector<32x8xf32> to vector<32xf32>
    %147 = vector.shape_cast %146 : vector<32xf32> to vector<32x1xf32>
    %cst_64 = arith.constant 8.000000e+00 : f32
    %148 = vector.broadcast %cst_64 : f32 to vector<32x1xf32>
    %149 = arith.divf %147, %148 : vector<32x1xf32>
    %cst_65 = arith.constant 9.99999997E-7 : f32
    %150 = vector.broadcast %cst_65 : f32 to vector<32x1xf32>
    %151 = arith.addf %149, %150 : vector<32x1xf32>
    %152 = math.rsqrt %151 : vector<32x1xf32>
    %153 = vector.broadcast %152 : vector<32x1xf32> to vector<32x8xf32>
    %154 = arith.mulf %144, %153 : vector<32x8xf32>
    %c0_66 = arith.constant 0 : index
    %c0_67 = arith.constant 0 : index
    %155 = vector.load %arg6[%c0_66, %c0_67] : memref<1x8xf32, #tpu.memory_space<vmem>>, vector<1x8xf32>
    %156 = vector.broadcast %155 : vector<1x8xf32> to vector<32x8xf32>
    %157 = arith.mulf %154, %156 : vector<32x8xf32>
    %c0_68 = arith.constant 0 : index
    %c0_69 = arith.constant 0 : index
    %158 = vector.load %arg7[%c0_68, %c0_69] : memref<1x8xf32, #tpu.memory_space<vmem>>, vector<1x8xf32>
    %159 = vector.broadcast %158 : vector<1x8xf32> to vector<32x8xf32>
    %160 = arith.addf %157, %159 : vector<32x8xf32>
    %cst_70 = arith.constant 5.000000e-01 : f32
    %161 = vector.broadcast %cst_70 : f32 to vector<32x8xf32>
    %162 = arith.mulf %161, %160 : vector<32x8xf32>
    %cst_71 = arith.constant 4.471500e-02 : f32
    %163 = vector.broadcast %cst_71 : f32 to vector<32x8xf32>
    %164 = arith.mulf %163, %160 : vector<32x8xf32>
    %165 = arith.mulf %164, %160 : vector<32x8xf32>
    %166 = arith.mulf %165, %160 : vector<32x8xf32>
    %167 = arith.addf %160, %166 : vector<32x8xf32>
    %cst_72 = arith.constant 0.797884583 : f32
    %168 = vector.broadcast %cst_72 : f32 to vector<32x8xf32>
    %169 = arith.mulf %168, %167 : vector<32x8xf32>
    %170 = math.tanh %169 : vector<32x8xf32>
    %cst_73 = arith.constant 1.000000e+00 : f32
    %171 = vector.broadcast %cst_73 : f32 to vector<32x8xf32>
    %172 = arith.addf %171, %170 : vector<32x8xf32>
    %173 = arith.mulf %162, %172 : vector<32x8xf32>
    %174 = arith.truncf %173 : vector<32x8xf32> to vector<32x8xbf16>
    %c0_74 = arith.constant 0 : index
    %c0_75 = arith.constant 0 : index
    %175 = vector.load %arg8[%c0_74, %c0_75] : memref<8x16xbf16, #tpu.memory_space<vmem>>, vector<8x16xbf16>
    %cst_76 = arith.constant dense<0.000000e+00> : vector<32x16xf32>
    %176 = tpu.matmul %174, %175, %cst_76 {dimension_numbers = #tpu.dot_dimension_numbers<[1], [0], [0], [1], [0, 0, 1, 1], [], []>} : vector<32x8xbf16>, vector<8x16xbf16>, vector<32x16xf32> -> vector<32x16xf32>
    %c0_77 = arith.constant 0 : index
    %c0_78 = arith.constant 0 : index
    %177 = vector.load %arg9[%c0_77, %c0_78] : memref<1x16xf32, #tpu.memory_space<vmem>>, vector<1x16xf32>
    %178 = vector.broadcast %177 : vector<1x16xf32> to vector<32x16xf32>
    %179 = arith.addf %176, %178 : vector<32x16xf32>
    %cst_79 = arith.constant 5.000000e-01 : f32
    %180 = vector.broadcast %cst_79 : f32 to vector<32x16xf32>
    %181 = arith.mulf %180, %179 : vector<32x16xf32>
    %cst_80 = arith.constant 4.471500e-02 : f32
    %182 = vector.broadcast %cst_80 : f32 to vector<32x16xf32>
    %183 = arith.mulf %182, %179 : vector<32x16xf32>
    %184 = arith.mulf %183, %179 : vector<32x16xf32>
    %185 = arith.mulf %184, %179 : vector<32x16xf32>
    %186 = arith.addf %179, %185 : vector<32x16xf32>
    %cst_81 = arith.constant 0.797884583 : f32
    %187 = vector.broadcast %cst_81 : f32 to vector<32x16xf32>
    %188 = arith.mulf %187, %186 : vector<32x16xf32>
    %189 = math.tanh %188 : vector<32x16xf32>
    %cst_82 = arith.constant 1.000000e+00 : f32
    %190 = vector.broadcast %cst_82 : f32 to vector<32x16xf32>
    %191 = arith.addf %190, %189 : vector<32x16xf32>
    %192 = arith.mulf %181, %191 : vector<32x16xf32>
    %193 = arith.truncf %192 : vector<32x16xf32> to vector<32x16xbf16>
    %194 = vector.extract_strided_slice %193 {offsets = [0, 0], sizes = [32, 4], strides = [1, 1]} : vector<32x16xbf16> to vector<32x4xbf16>
    %cst_83 = arith.constant dense<0.000000e+00> : vector<32x4xf32>
    %195 = tpu.matmul %194, %9, %cst_83 {dimension_numbers = #tpu.dot_dimension_numbers<[1], [1], [0], [0], [0, 0, 1, 0], [], []>} : vector<32x4xbf16>, vector<4x4xbf16>, vector<32x4xf32> -> vector<32x4xf32>
    %196 = vector.extract_strided_slice %193 {offsets = [0, 4], sizes = [32, 4], strides = [1, 1]} : vector<32x16xbf16> to vector<32x4xbf16>
    %cst_84 = arith.constant dense<0.000000e+00> : vector<32x4xf32>
    %197 = tpu.matmul %196, %9, %cst_84 {dimension_numbers = #tpu.dot_dimension_numbers<[1], [1], [0], [0], [0, 0, 1, 0], [], []>} : vector<32x4xbf16>, vector<4x4xbf16>, vector<32x4xf32> -> vector<32x4xf32>
    %198 = vector.extract_strided_slice %193 {offsets = [0, 8], sizes = [32, 4], strides = [1, 1]} : vector<32x16xbf16> to vector<32x4xbf16>
    %cst_85 = arith.constant dense<0.000000e+00> : vector<32x4xf32>
    %199 = tpu.matmul %198, %9, %cst_85 {dimension_numbers = #tpu.dot_dimension_numbers<[1], [1], [0], [0], [0, 0, 1, 0], [], []>} : vector<32x4xbf16>, vector<4x4xbf16>, vector<32x4xf32> -> vector<32x4xf32>
    %200 = vector.extract_strided_slice %193 {offsets = [0, 12], sizes = [32, 4], strides = [1, 1]} : vector<32x16xbf16> to vector<32x4xbf16>
    %cst_86 = arith.constant dense<0.000000e+00> : vector<32x4xf32>
    %201 = tpu.matmul %200, %9, %cst_86 {dimension_numbers = #tpu.dot_dimension_numbers<[1], [1], [0], [0], [0, 0, 1, 0], [], []>} : vector<32x4xbf16>, vector<4x4xbf16>, vector<32x4xf32> -> vector<32x4xf32>
    %202 = vector.extract_strided_slice %6 {offsets = [0, 24], sizes = [32, 8], strides = [1, 1]} : vector<32x32xf32> to vector<32x8xf32>
    %cst_87 = arith.constant dense<0.000000e+00> : vector<32xf32>
    %203 = vector.multi_reduction <add>, %202, %cst_87 [1] : vector<32x8xf32> to vector<32xf32>
    %204 = vector.shape_cast %203 : vector<32xf32> to vector<32x1xf32>
    %cst_88 = arith.constant 8.000000e+00 : f32
    %205 = vector.broadcast %cst_88 : f32 to vector<32x1xf32>
    %206 = arith.divf %204, %205 : vector<32x1xf32>
    %207 = vector.broadcast %206 : vector<32x1xf32> to vector<32x8xf32>
    %208 = arith.subf %202, %207 : vector<32x8xf32>
    %209 = arith.mulf %208, %208 : vector<32x8xf32>
    %cst_89 = arith.constant dense<0.000000e+00> : vector<32xf32>
    %210 = vector.multi_reduction <add>, %209, %cst_89 [1] : vector<32x8xf32> to vector<32xf32>
    %211 = vector.shape_cast %210 : vector<32xf32> to vector<32x1xf32>
    %cst_90 = arith.constant 8.000000e+00 : f32
    %212 = vector.broadcast %cst_90 : f32 to vector<32x1xf32>
    %213 = arith.divf %211, %212 : vector<32x1xf32>
    %cst_91 = arith.constant 9.99999997E-7 : f32
    %214 = vector.broadcast %cst_91 : f32 to vector<32x1xf32>
    %215 = arith.addf %213, %214 : vector<32x1xf32>
    %216 = math.rsqrt %215 : vector<32x1xf32>
    %217 = vector.broadcast %216 : vector<32x1xf32> to vector<32x8xf32>
    %218 = arith.mulf %208, %217 : vector<32x8xf32>
    %c0_92 = arith.constant 0 : index
    %c0_93 = arith.constant 0 : index
    %219 = vector.load %arg6[%c0_92, %c0_93] : memref<1x8xf32, #tpu.memory_space<vmem>>, vector<1x8xf32>
    %220 = vector.broadcast %219 : vector<1x8xf32> to vector<32x8xf32>
    %221 = arith.mulf %218, %220 : vector<32x8xf32>
    %c0_94 = arith.constant 0 : index
    %c0_95 = arith.constant 0 : index
    %222 = vector.load %arg7[%c0_94, %c0_95] : memref<1x8xf32, #tpu.memory_space<vmem>>, vector<1x8xf32>
    %223 = vector.broadcast %222 : vector<1x8xf32> to vector<32x8xf32>
    %224 = arith.addf %221, %223 : vector<32x8xf32>
    %cst_96 = arith.constant 5.000000e-01 : f32
    %225 = vector.broadcast %cst_96 : f32 to vector<32x8xf32>
    %226 = arith.mulf %225, %224 : vector<32x8xf32>
    %cst_97 = arith.constant 4.471500e-02 : f32
    %227 = vector.broadcast %cst_97 : f32 to vector<32x8xf32>
    %228 = arith.mulf %227, %224 : vector<32x8xf32>
    %229 = arith.mulf %228, %224 : vector<32x8xf32>
    %230 = arith.mulf %229, %224 : vector<32x8xf32>
    %231 = arith.addf %224, %230 : vector<32x8xf32>
    %cst_98 = arith.constant 0.797884583 : f32
    %232 = vector.broadcast %cst_98 : f32 to vector<32x8xf32>
    %233 = arith.mulf %232, %231 : vector<32x8xf32>
    %234 = math.tanh %233 : vector<32x8xf32>
    %cst_99 = arith.constant 1.000000e+00 : f32
    %235 = vector.broadcast %cst_99 : f32 to vector<32x8xf32>
    %236 = arith.addf %235, %234 : vector<32x8xf32>
    %237 = arith.mulf %226, %236 : vector<32x8xf32>
    %238 = arith.truncf %237 : vector<32x8xf32> to vector<32x8xbf16>
    %c0_100 = arith.constant 0 : index
    %c0_101 = arith.constant 0 : index
    %239 = vector.load %arg8[%c0_100, %c0_101] : memref<8x16xbf16, #tpu.memory_space<vmem>>, vector<8x16xbf16>
    %cst_102 = arith.constant dense<0.000000e+00> : vector<32x16xf32>
    %240 = tpu.matmul %238, %239, %cst_102 {dimension_numbers = #tpu.dot_dimension_numbers<[1], [0], [0], [1], [0, 0, 1, 1], [], []>} : vector<32x8xbf16>, vector<8x16xbf16>, vector<32x16xf32> -> vector<32x16xf32>
    %c0_103 = arith.constant 0 : index
    %c0_104 = arith.constant 0 : index
    %241 = vector.load %arg9[%c0_103, %c0_104] : memref<1x16xf32, #tpu.memory_space<vmem>>, vector<1x16xf32>
    %242 = vector.broadcast %241 : vector<1x16xf32> to vector<32x16xf32>
    %243 = arith.addf %240, %242 : vector<32x16xf32>
    %cst_105 = arith.constant 5.000000e-01 : f32
    %244 = vector.broadcast %cst_105 : f32 to vector<32x16xf32>
    %245 = arith.mulf %244, %243 : vector<32x16xf32>
    %cst_106 = arith.constant 4.471500e-02 : f32
    %246 = vector.broadcast %cst_106 : f32 to vector<32x16xf32>
    %247 = arith.mulf %246, %243 : vector<32x16xf32>
    %248 = arith.mulf %247, %243 : vector<32x16xf32>
    %249 = arith.mulf %248, %243 : vector<32x16xf32>
    %250 = arith.addf %243, %249 : vector<32x16xf32>
    %cst_107 = arith.constant 0.797884583 : f32
    %251 = vector.broadcast %cst_107 : f32 to vector<32x16xf32>
    %252 = arith.mulf %251, %250 : vector<32x16xf32>
    %253 = math.tanh %252 : vector<32x16xf32>
    %cst_108 = arith.constant 1.000000e+00 : f32
    %254 = vector.broadcast %cst_108 : f32 to vector<32x16xf32>
    %255 = arith.addf %254, %253 : vector<32x16xf32>
    %256 = arith.mulf %245, %255 : vector<32x16xf32>
    %257 = arith.truncf %256 : vector<32x16xf32> to vector<32x16xbf16>
    %258 = vector.extract_strided_slice %257 {offsets = [0, 0], sizes = [32, 4], strides = [1, 1]} : vector<32x16xbf16> to vector<32x4xbf16>
    %cst_109 = arith.constant dense<0.000000e+00> : vector<32x4xf32>
    %259 = tpu.matmul %258, %9, %cst_109 {dimension_numbers = #tpu.dot_dimension_numbers<[1], [1], [0], [0], [0, 0, 1, 0], [], []>} : vector<32x4xbf16>, vector<4x4xbf16>, vector<32x4xf32> -> vector<32x4xf32>
    %260 = vector.extract_strided_slice %257 {offsets = [0, 4], sizes = [32, 4], strides = [1, 1]} : vector<32x16xbf16> to vector<32x4xbf16>
    %cst_110 = arith.constant dense<0.000000e+00> : vector<32x4xf32>
    %261 = tpu.matmul %260, %9, %cst_110 {dimension_numbers = #tpu.dot_dimension_numbers<[1], [1], [0], [0], [0, 0, 1, 0], [], []>} : vector<32x4xbf16>, vector<4x4xbf16>, vector<32x4xf32> -> vector<32x4xf32>
    %262 = vector.extract_strided_slice %257 {offsets = [0, 8], sizes = [32, 4], strides = [1, 1]} : vector<32x16xbf16> to vector<32x4xbf16>
    %cst_111 = arith.constant dense<0.000000e+00> : vector<32x4xf32>
    %263 = tpu.matmul %262, %9, %cst_111 {dimension_numbers = #tpu.dot_dimension_numbers<[1], [1], [0], [0], [0, 0, 1, 0], [], []>} : vector<32x4xbf16>, vector<4x4xbf16>, vector<32x4xf32> -> vector<32x4xf32>
    %264 = vector.extract_strided_slice %257 {offsets = [0, 12], sizes = [32, 4], strides = [1, 1]} : vector<32x16xbf16> to vector<32x4xbf16>
    %cst_112 = arith.constant dense<0.000000e+00> : vector<32x4xf32>
    %265 = tpu.matmul %264, %9, %cst_112 {dimension_numbers = #tpu.dot_dimension_numbers<[1], [1], [0], [0], [0, 0, 1, 0], [], []>} : vector<32x4xbf16>, vector<4x4xbf16>, vector<32x4xf32> -> vector<32x4xf32>
    %266 = tpu.concatenate %67, %69, %71, %73, %131, %133, %135, %137, %195, %197, %199, %201, %259, %261, %263, %265 in 1 : vector<32x4xf32>, vector<32x4xf32>, vector<32x4xf32>, vector<32x4xf32>, vector<32x4xf32>, vector<32x4xf32>, vector<32x4xf32>, vector<32x4xf32>, vector<32x4xf32>, vector<32x4xf32>, vector<32x4xf32>, vector<32x4xf32>, vector<32x4xf32>, vector<32x4xf32>, vector<32x4xf32>, vector<32x4xf32> -> vector<32x64xf32>
    %c0_113 = arith.constant 0 : index
    %c0_114 = arith.constant 0 : index
    %c0_115 = arith.constant 0 : index
    %267 = vector.load %arg10[%c0_113, %c0_114, %c0_115] : memref<1x32x64xf32, #tpu.memory_space<vmem>>, vector<1x32x64xf32>
    %268 = vector.shape_cast %267 : vector<1x32x64xf32> to vector<32x64xf32>
    %269 = vector.shape_cast %266 : vector<32x64xf32> to vector<1x32x64xf32>
    tpu.vector_store %arg10[%c0_113, %c0_114, %c0_115], %269 {strides = array<i32>} : memref<1x32x64xf32, #tpu.memory_space<vmem>>, vector<1x32x64xf32>,
    return
  }
  func.func @transform_0(%arg0: i32, %arg1: i32) -> (i32, i32, i32) {
    %c0_i32 = arith.constant 0 : i32
    %c0_i32_0 = arith.constant 0 : i32
    return %arg0, %arg1, %c0_i32 : i32, i32, i32
  }
  func.func @transform_1(%arg0: i32, %arg1: i32) -> (i32, i32, i32) {
    %c0_i32 = arith.constant 0 : i32
    %c0_i32_0 = arith.constant 0 : i32
    %c0_i32_1 = arith.constant 0 : i32
    return %arg0, %c0_i32, %c0_i32_0 : i32, i32, i32
  }
  func.func @transform_2(%arg0: i32, %arg1: i32) -> (i32, i32) {
    %c0_i32 = arith.constant 0 : i32
    %c0_i32_0 = arith.constant 0 : i32
    %c0_i32_1 = arith.constant 0 : i32
    return %c0_i32, %c0_i32_0 : i32, i32
  }
  func.func @transform_3(%arg0: i32, %arg1: i32) -> (i32, i32) {
    %c0_i32 = arith.constant 0 : i32
    %c0_i32_0 = arith.constant 0 : i32
    %c0_i32_1 = arith.constant 0 : i32
    return %c0_i32, %c0_i32_0 : i32, i32
  }
  func.func @transform_4(%arg0: i32, %arg1: i32) -> (i32, i32) {
    %c0_i32 = arith.constant 0 : i32
    %c0_i32_0 = arith.constant 0 : i32
    %c0_i32_1 = arith.constant 0 : i32
    return %c0_i32, %c0_i32_0 : i32, i32
  }
  func.func @transform_5(%arg0: i32, %arg1: i32) -> (i32, i32) {
    %c0_i32 = arith.constant 0 : i32
    %c0_i32_0 = arith.constant 0 : i32
    %c0_i32_1 = arith.constant 0 : i32
    return %c0_i32, %c0_i32_0 : i32, i32
  }
  func.func @transform_6(%arg0: i32, %arg1: i32) -> (i32, i32) {
    %c0_i32 = arith.constant 0 : i32
    %c0_i32_0 = arith.constant 0 : i32
    %c0_i32_1 = arith.constant 0 : i32
    return %c0_i32, %c0_i32_0 : i32, i32
  }
  func.func @transform_7(%arg0: i32, %arg1: i32) -> (i32, i32) {
    %c0_i32 = arith.constant 0 : i32
    %c0_i32_0 = arith.constant 0 : i32
    %c0_i32_1 = arith.constant 0 : i32
    return %c0_i32, %c0_i32_0 : i32, i32
  }
  func.func @transform_8(%arg0: i32, %arg1: i32) -> (i32, i32, i32) {
    %c0_i32 = arith.constant 0 : i32
    %c0_i32_0 = arith.constant 0 : i32
    return %arg0, %arg1, %c0_i32 : i32, i32, i32
  }
}

module attributes {stable_mosaic.version = 11 : i64} {
  func.func @_transformer_heads_kernel(%arg0: i32, %arg1: memref<1x8x32xf32, #tpu.memory_space<vmem>>, %arg2: memref<1x64x32xbf16, #tpu.memory_space<vmem>>, %arg3: memref<1x64x32xbf16, #tpu.memory_space<vmem>>, %arg4: memref<4x32x32xbf16, #tpu.memory_space<vmem>>, %arg5: memref<4x1x32xf32, #tpu.memory_space<vmem>>, %arg6: memref<4x32x32xbf16, #tpu.memory_space<vmem>>, %arg7: memref<4x1x32xf32, #tpu.memory_space<vmem>>, %arg8: memref<4x32x32xbf16, #tpu.memory_space<vmem>>, %arg9: memref<4x1x32xf32, #tpu.memory_space<vmem>>, %arg10: memref<4x32x32xbf16, #tpu.memory_space<vmem>>, %arg11: memref<4x1x32xf32, #tpu.memory_space<vmem>>, %arg12: memref<5x1x32xf32, #tpu.memory_space<vmem>>, %arg13: memref<5x1x32xf32, #tpu.memory_space<vmem>>, %arg14: memref<32x64xbf16, #tpu.memory_space<vmem>>, %arg15: memref<1x64xf32, #tpu.memory_space<vmem>>, %arg16: memref<64x32xbf16, #tpu.memory_space<vmem>>, %arg17: memref<1x32xf32, #tpu.memory_space<vmem>>, %arg18: memref<4x32x32xf32, #tpu.memory_space<vmem>>, %arg19: memref<4x1x32xf32, #tpu.memory_space<vmem>>, %arg20: memref<4x32x32xf32, #tpu.memory_space<vmem>>, %arg21: memref<4x1x32xf32, #tpu.memory_space<vmem>>, %arg22: memref<4x32x4xf32, #tpu.memory_space<vmem>>, %arg23: memref<4x1x4xf32, #tpu.memory_space<vmem>>, %arg24: memref<32x128xf32, #tpu.memory_space<vmem>>, %arg25: memref<32x128xf32, #tpu.memory_space<vmem>>, %arg26: memref<1x128xf32, #tpu.memory_space<vmem>>, %arg27: memref<128x128xf32, #tpu.memory_space<vmem>>, %arg28: memref<1x128xf32, #tpu.memory_space<vmem>>, %arg29: memref<128x11xf32, #tpu.memory_space<vmem>>, %arg30: memref<1x11xf32, #tpu.memory_space<vmem>>, %arg31: memref<1x64x32xbf16, #tpu.memory_space<vmem>>, %arg32: memref<1x4x4xf32, #tpu.memory_space<vmem>>, %arg33: memref<1x1x11xf32, #tpu.memory_space<vmem>>) attributes {dimension_semantics = [#tpu.dimension_semantics<parallel>], iteration_bounds = array<i64: 6>, scalar_prefetch = 0 : i64, scratch_operands = 0 : i64, tpu.core_type = #tpu.core_type<tc>, window_params = [{transform_indices = @transform_0, window_bounds = array<i64: 1, 8, 32>}, {transform_indices = @transform_1, window_bounds = array<i64: 1, 64, 32>}, {pipeline_mode = #tpu.pipeline_mode<synchronous>, transform_indices = @transform_2, window_bounds = array<i64: 1, 64, 32>}, {pipeline_mode = #tpu.pipeline_mode<synchronous>, transform_indices = @transform_3, window_bounds = array<i64: 4, 32, 32>}, {pipeline_mode = #tpu.pipeline_mode<synchronous>, transform_indices = @transform_4, window_bounds = array<i64: 4, 1, 32>}, {pipeline_mode = #tpu.pipeline_mode<synchronous>, transform_indices = @transform_5, window_bounds = array<i64: 4, 32, 32>}, {pipeline_mode = #tpu.pipeline_mode<synchronous>, transform_indices = @transform_6, window_bounds = array<i64: 4, 1, 32>}, {pipeline_mode = #tpu.pipeline_mode<synchronous>, transform_indices = @transform_7, window_bounds = array<i64: 4, 32, 32>}, {pipeline_mode = #tpu.pipeline_mode<synchronous>, transform_indices = @transform_8, window_bounds = array<i64: 4, 1, 32>}, {pipeline_mode = #tpu.pipeline_mode<synchronous>, transform_indices = @transform_9, window_bounds = array<i64: 4, 32, 32>}, {pipeline_mode = #tpu.pipeline_mode<synchronous>, transform_indices = @transform_10, window_bounds = array<i64: 4, 1, 32>}, {pipeline_mode = #tpu.pipeline_mode<synchronous>, transform_indices = @transform_11, window_bounds = array<i64: 5, 1, 32>}, {pipeline_mode = #tpu.pipeline_mode<synchronous>, transform_indices = @transform_12, window_bounds = array<i64: 5, 1, 32>}, {pipeline_mode = #tpu.pipeline_mode<synchronous>, transform_indices = @transform_13, window_bounds = array<i64: 32, 64>}, {pipeline_mode = #tpu.pipeline_mode<synchronous>, transform_indices = @transform_14, window_bounds = array<i64: 1, 64>}, {pipeline_mode = #tpu.pipeline_mode<synchronous>, transform_indices = @transform_15, window_bounds = array<i64: 64, 32>}, {pipeline_mode = #tpu.pipeline_mode<synchronous>, transform_indices = @transform_16, window_bounds = array<i64: 1, 32>}, {pipeline_mode = #tpu.pipeline_mode<synchronous>, transform_indices = @transform_17, window_bounds = array<i64: 4, 32, 32>}, {pipeline_mode = #tpu.pipeline_mode<synchronous>, transform_indices = @transform_18, window_bounds = array<i64: 4, 1, 32>}, {pipeline_mode = #tpu.pipeline_mode<synchronous>, transform_indices = @transform_19, window_bounds = array<i64: 4, 32, 32>}, {pipeline_mode = #tpu.pipeline_mode<synchronous>, transform_indices = @transform_20, window_bounds = array<i64: 4, 1, 32>}, {pipeline_mode = #tpu.pipeline_mode<synchronous>, transform_indices = @transform_21, window_bounds = array<i64: 4, 32, 4>}, {pipeline_mode = #tpu.pipeline_mode<synchronous>, transform_indices = @transform_22, window_bounds = array<i64: 4, 1, 4>}, {pipeline_mode = #tpu.pipeline_mode<synchronous>, transform_indices = @transform_23, window_bounds = array<i64: 32, 128>}, {pipeline_mode = #tpu.pipeline_mode<synchronous>, transform_indices = @transform_24, window_bounds = array<i64: 32, 128>}, {pipeline_mode = #tpu.pipeline_mode<synchronous>, transform_indices = @transform_25, window_bounds = array<i64: 1, 128>}, {pipeline_mode = #tpu.pipeline_mode<synchronous>, transform_indices = @transform_26, window_bounds = array<i64: 128, 128>}, {pipeline_mode = #tpu.pipeline_mode<synchronous>, transform_indices = @transform_27, window_bounds = array<i64: 1, 128>}, {pipeline_mode = #tpu.pipeline_mode<synchronous>, transform_indices = @transform_28, window_bounds = array<i64: 128, 11>}, {pipeline_mode = #tpu.pipeline_mode<synchronous>, transform_indices = @transform_29, window_bounds = array<i64: 1, 11>}, {transform_indices = @transform_30, window_bounds = array<i64: 1, 64, 32>}, {transform_indices = @transform_31, window_bounds = array<i64: 1, 4, 4>}, {transform_indices = @transform_32, window_bounds = array<i64: 1, 1, 11>}]} {
    %c0 = arith.constant 0 : index
    %c0_0 = arith.constant 0 : index
    %c0_1 = arith.constant 0 : index
    %0 = vector.load %arg1[%c0, %c0_0, %c0_1] : memref<1x8x32xf32, #tpu.memory_space<vmem>>, vector<1x8x32xf32>
    %1 = vector.shape_cast %0 : vector<1x8x32xf32> to vector<8x32xf32>
    %c0_2 = arith.constant 0 : index
    %c0_3 = arith.constant 0 : index
    %c0_4 = arith.constant 0 : index
    %2 = vector.load %arg2[%c0_2, %c0_3, %c0_4] : memref<1x64x32xbf16, #tpu.memory_space<vmem>>, vector<1x64x32xbf16>
    %3 = vector.shape_cast %2 : vector<1x64x32xbf16> to vector<64x32xbf16>
    %4 = arith.extf %3 : vector<64x32xbf16> to vector<64x32xf32>
    %c0_5 = arith.constant 0 : index
    %c0_6 = arith.constant 0 : index
    %c0_7 = arith.constant 0 : index
    %5 = vector.load %arg3[%c0_5, %c0_6, %c0_7] : memref<1x64x32xbf16, #tpu.memory_space<vmem>>, vector<1x64x32xbf16>
    %6 = vector.shape_cast %5 : vector<1x64x32xbf16> to vector<64x32xbf16>
    %7 = arith.extf %6 : vector<64x32xbf16> to vector<64x32xf32>
    %8 = arith.addf %4, %7 : vector<64x32xf32>
    %9 = arith.truncf %1 : vector<8x32xf32> to vector<8x32xbf16>
    %c0_8 = arith.constant 0 : index
    %c0_9 = arith.constant 0 : index
    %c0_10 = arith.constant 0 : index
    %10 = vector.load %arg4[%c0_8, %c0_9, %c0_10] : memref<4x32x32xbf16, #tpu.memory_space<vmem>>, vector<1x32x32xbf16>
    %11 = vector.shape_cast %10 : vector<1x32x32xbf16> to vector<32x32xbf16>
    %cst = arith.constant dense<0.000000e+00> : vector<8x32xf32>
    %12 = tpu.matmul %9, %11, %cst {dimension_numbers = #tpu.dot_dimension_numbers<[1], [0], [0], [1], [0, 0, 1, 1], [], []>} : vector<8x32xbf16>, vector<32x32xbf16>, vector<8x32xf32> -> vector<8x32xf32>
    %c0_11 = arith.constant 0 : index
    %c0_12 = arith.constant 0 : index
    %c0_13 = arith.constant 0 : index
    %13 = vector.load %arg5[%c0_11, %c0_12, %c0_13] : memref<4x1x32xf32, #tpu.memory_space<vmem>>, vector<1x1x32xf32>
    %14 = vector.shape_cast %13 : vector<1x1x32xf32> to vector<1x32xf32>
    %15 = vector.broadcast %14 : vector<1x32xf32> to vector<8x32xf32>
    %16 = arith.addf %12, %15 : vector<8x32xf32>
    %17 = arith.truncf %1 : vector<8x32xf32> to vector<8x32xbf16>
    %c0_14 = arith.constant 0 : index
    %c0_15 = arith.constant 0 : index
    %c0_16 = arith.constant 0 : index
    %18 = vector.load %arg6[%c0_14, %c0_15, %c0_16] : memref<4x32x32xbf16, #tpu.memory_space<vmem>>, vector<1x32x32xbf16>
    %19 = vector.shape_cast %18 : vector<1x32x32xbf16> to vector<32x32xbf16>
    %cst_17 = arith.constant dense<0.000000e+00> : vector<8x32xf32>
    %20 = tpu.matmul %17, %19, %cst_17 {dimension_numbers = #tpu.dot_dimension_numbers<[1], [0], [0], [1], [0, 0, 1, 1], [], []>} : vector<8x32xbf16>, vector<32x32xbf16>, vector<8x32xf32> -> vector<8x32xf32>
    %c0_18 = arith.constant 0 : index
    %c0_19 = arith.constant 0 : index
    %c0_20 = arith.constant 0 : index
    %21 = vector.load %arg7[%c0_18, %c0_19, %c0_20] : memref<4x1x32xf32, #tpu.memory_space<vmem>>, vector<1x1x32xf32>
    %22 = vector.shape_cast %21 : vector<1x1x32xf32> to vector<1x32xf32>
    %23 = vector.broadcast %22 : vector<1x32xf32> to vector<8x32xf32>
    %24 = arith.addf %20, %23 : vector<8x32xf32>
    %25 = arith.truncf %1 : vector<8x32xf32> to vector<8x32xbf16>
    %c0_21 = arith.constant 0 : index
    %c0_22 = arith.constant 0 : index
    %c0_23 = arith.constant 0 : index
    %26 = vector.load %arg8[%c0_21, %c0_22, %c0_23] : memref<4x32x32xbf16, #tpu.memory_space<vmem>>, vector<1x32x32xbf16>
    %27 = vector.shape_cast %26 : vector<1x32x32xbf16> to vector<32x32xbf16>
    %cst_24 = arith.constant dense<0.000000e+00> : vector<8x32xf32>
    %28 = tpu.matmul %25, %27, %cst_24 {dimension_numbers = #tpu.dot_dimension_numbers<[1], [0], [0], [1], [0, 0, 1, 1], [], []>} : vector<8x32xbf16>, vector<32x32xbf16>, vector<8x32xf32> -> vector<8x32xf32>
    %c0_25 = arith.constant 0 : index
    %c0_26 = arith.constant 0 : index
    %c0_27 = arith.constant 0 : index
    %29 = vector.load %arg9[%c0_25, %c0_26, %c0_27] : memref<4x1x32xf32, #tpu.memory_space<vmem>>, vector<1x1x32xf32>
    %30 = vector.shape_cast %29 : vector<1x1x32xf32> to vector<1x32xf32>
    %31 = vector.broadcast %30 : vector<1x32xf32> to vector<8x32xf32>
    %32 = arith.addf %28, %31 : vector<8x32xf32>
    %33 = arith.truncf %16 : vector<8x32xf32> to vector<8x32xbf16>
    %34 = arith.truncf %24 : vector<8x32xf32> to vector<8x32xbf16>
    %cst_28 = arith.constant dense<0.000000e+00> : vector<8x8xf32>
    %35 = tpu.matmul %33, %34, %cst_28 {dimension_numbers = #tpu.dot_dimension_numbers<[1], [1], [0], [0], [0, 0, 1, 0], [], []>} : vector<8x32xbf16>, vector<8x32xbf16>, vector<8x8xf32> -> vector<8x8xf32>
    %cst_29 = arith.constant 0.176776692 : f32
    %36 = vector.broadcast %cst_29 : f32 to vector<8x8xf32>
    %37 = arith.mulf %35, %36 : vector<8x8xf32>
    %cst_30 = arith.constant dense<0xFF800000> : vector<8xf32>
    %38 = vector.multi_reduction <maximumf>, %37, %cst_30 [1] : vector<8x8xf32> to vector<8xf32>
    %39 = vector.shape_cast %38 : vector<8xf32> to vector<8x1xf32>
    %40 = vector.broadcast %39 : vector<8x1xf32> to vector<8x8xf32>
    %41 = arith.subf %37, %40 : vector<8x8xf32>
    %42 = math.exp %41 : vector<8x8xf32>
    %cst_31 = arith.constant dense<0.000000e+00> : vector<8xf32>
    %43 = vector.multi_reduction <add>, %42, %cst_31 [1] : vector<8x8xf32> to vector<8xf32>
    %44 = vector.shape_cast %43 : vector<8xf32> to vector<8x1xf32>
    %45 = vector.broadcast %44 : vector<8x1xf32> to vector<8x8xf32>
    %46 = arith.divf %42, %45 : vector<8x8xf32>
    %47 = arith.truncf %46 : vector<8x8xf32> to vector<8x8xbf16>
    %48 = arith.truncf %32 : vector<8x32xf32> to vector<8x32xbf16>
    %cst_32 = arith.constant dense<0.000000e+00> : vector<8x32xf32>
    %49 = tpu.matmul %47, %48, %cst_32 {dimension_numbers = #tpu.dot_dimension_numbers<[1], [0], [0], [1], [0, 0, 1, 1], [], []>} : vector<8x8xbf16>, vector<8x32xbf16>, vector<8x32xf32> -> vector<8x32xf32>
    %50 = arith.truncf %49 : vector<8x32xf32> to vector<8x32xbf16>
    %c0_33 = arith.constant 0 : index
    %c0_34 = arith.constant 0 : index
    %c0_35 = arith.constant 0 : index
    %51 = vector.load %arg10[%c0_33, %c0_34, %c0_35] : memref<4x32x32xbf16, #tpu.memory_space<vmem>>, vector<1x32x32xbf16>
    %52 = vector.shape_cast %51 : vector<1x32x32xbf16> to vector<32x32xbf16>
    %cst_36 = arith.constant dense<0.000000e+00> : vector<8x32xf32>
    %53 = tpu.matmul %50, %52, %cst_36 {dimension_numbers = #tpu.dot_dimension_numbers<[1], [0], [0], [1], [0, 0, 1, 1], [], []>} : vector<8x32xbf16>, vector<32x32xbf16>, vector<8x32xf32> -> vector<8x32xf32>
    %c0_37 = arith.constant 0 : index
    %c0_38 = arith.constant 0 : index
    %c0_39 = arith.constant 0 : index
    %54 = vector.load %arg11[%c0_37, %c0_38, %c0_39] : memref<4x1x32xf32, #tpu.memory_space<vmem>>, vector<1x1x32xf32>
    %55 = vector.shape_cast %54 : vector<1x1x32xf32> to vector<1x32xf32>
    %56 = vector.broadcast %55 : vector<1x32xf32> to vector<8x32xf32>
    %57 = arith.addf %53, %56 : vector<8x32xf32>
    %58 = arith.addf %1, %57 : vector<8x32xf32>
    %cst_40 = arith.constant dense<0.000000e+00> : vector<8xf32>
    %59 = vector.multi_reduction <add>, %58, %cst_40 [1] : vector<8x32xf32> to vector<8xf32>
    %60 = vector.shape_cast %59 : vector<8xf32> to vector<8x1xf32>
    %cst_41 = arith.constant 3.200000e+01 : f32
    %61 = vector.broadcast %cst_41 : f32 to vector<8x1xf32>
    %62 = arith.divf %60, %61 : vector<8x1xf32>
    %63 = vector.broadcast %62 : vector<8x1xf32> to vector<8x32xf32>
    %64 = arith.subf %58, %63 : vector<8x32xf32>
    %65 = arith.mulf %64, %64 : vector<8x32xf32>
    %cst_42 = arith.constant dense<0.000000e+00> : vector<8xf32>
    %66 = vector.multi_reduction <add>, %65, %cst_42 [1] : vector<8x32xf32> to vector<8xf32>
    %67 = vector.shape_cast %66 : vector<8xf32> to vector<8x1xf32>
    %cst_43 = arith.constant 3.200000e+01 : f32
    %68 = vector.broadcast %cst_43 : f32 to vector<8x1xf32>
    %69 = arith.divf %67, %68 : vector<8x1xf32>
    %cst_44 = arith.constant 9.99999974E-6 : f32
    %70 = vector.broadcast %cst_44 : f32 to vector<8x1xf32>
    %71 = arith.addf %69, %70 : vector<8x1xf32>
    %72 = math.rsqrt %71 : vector<8x1xf32>
    %73 = vector.broadcast %72 : vector<8x1xf32> to vector<8x32xf32>
    %74 = arith.mulf %64, %73 : vector<8x32xf32>
    %c0_45 = arith.constant 0 : index
    %c0_46 = arith.constant 0 : index
    %c0_47 = arith.constant 0 : index
    %75 = vector.load %arg12[%c0_45, %c0_46, %c0_47] : memref<5x1x32xf32, #tpu.memory_space<vmem>>, vector<1x1x32xf32>
    %76 = vector.shape_cast %75 : vector<1x1x32xf32> to vector<1x32xf32>
    %77 = vector.broadcast %76 : vector<1x32xf32> to vector<8x32xf32>
    %78 = arith.mulf %74, %77 : vector<8x32xf32>
    %c0_48 = arith.constant 0 : index
    %c0_49 = arith.constant 0 : index
    %c0_50 = arith.constant 0 : index
    %79 = vector.load %arg13[%c0_48, %c0_49, %c0_50] : memref<5x1x32xf32, #tpu.memory_space<vmem>>, vector<1x1x32xf32>
    %80 = vector.shape_cast %79 : vector<1x1x32xf32> to vector<1x32xf32>
    %81 = vector.broadcast %80 : vector<1x32xf32> to vector<8x32xf32>
    %82 = arith.addf %78, %81 : vector<8x32xf32>
    %83 = arith.truncf %82 : vector<8x32xf32> to vector<8x32xbf16>
    %c1 = arith.constant 1 : index
    %c0_51 = arith.constant 0 : index
    %c0_52 = arith.constant 0 : index
    %84 = vector.load %arg4[%c1, %c0_51, %c0_52] : memref<4x32x32xbf16, #tpu.memory_space<vmem>>, vector<1x32x32xbf16>
    %85 = vector.shape_cast %84 : vector<1x32x32xbf16> to vector<32x32xbf16>
    %cst_53 = arith.constant dense<0.000000e+00> : vector<8x32xf32>
    %86 = tpu.matmul %83, %85, %cst_53 {dimension_numbers = #tpu.dot_dimension_numbers<[1], [0], [0], [1], [0, 0, 1, 1], [], []>} : vector<8x32xbf16>, vector<32x32xbf16>, vector<8x32xf32> -> vector<8x32xf32>
    %c1_54 = arith.constant 1 : index
    %c0_55 = arith.constant 0 : index
    %c0_56 = arith.constant 0 : index
    %87 = vector.load %arg5[%c1_54, %c0_55, %c0_56] : memref<4x1x32xf32, #tpu.memory_space<vmem>>, vector<1x1x32xf32>
    %88 = vector.shape_cast %87 : vector<1x1x32xf32> to vector<1x32xf32>
    %89 = vector.broadcast %88 : vector<1x32xf32> to vector<8x32xf32>
    %90 = arith.addf %86, %89 : vector<8x32xf32>
    %91 = arith.truncf %8 : vector<64x32xf32> to vector<64x32xbf16>
    %c1_57 = arith.constant 1 : index
    %c0_58 = arith.constant 0 : index
    %c0_59 = arith.constant 0 : index
    %92 = vector.load %arg6[%c1_57, %c0_58, %c0_59] : memref<4x32x32xbf16, #tpu.memory_space<vmem>>, vector<1x32x32xbf16>
    %93 = vector.shape_cast %92 : vector<1x32x32xbf16> to vector<32x32xbf16>
    %cst_60 = arith.constant dense<0.000000e+00> : vector<64x32xf32>
    %94 = tpu.matmul %91, %93, %cst_60 {dimension_numbers = #tpu.dot_dimension_numbers<[1], [0], [0], [1], [0, 0, 1, 1], [], []>} : vector<64x32xbf16>, vector<32x32xbf16>, vector<64x32xf32> -> vector<64x32xf32>
    %c1_61 = arith.constant 1 : index
    %c0_62 = arith.constant 0 : index
    %c0_63 = arith.constant 0 : index
    %95 = vector.load %arg7[%c1_61, %c0_62, %c0_63] : memref<4x1x32xf32, #tpu.memory_space<vmem>>, vector<1x1x32xf32>
    %96 = vector.shape_cast %95 : vector<1x1x32xf32> to vector<1x32xf32>
    %97 = vector.broadcast %96 : vector<1x32xf32> to vector<64x32xf32>
    %98 = arith.addf %94, %97 : vector<64x32xf32>
    %99 = arith.truncf %4 : vector<64x32xf32> to vector<64x32xbf16>
    %c1_64 = arith.constant 1 : index
    %c0_65 = arith.constant 0 : index
    %c0_66 = arith.constant 0 : index
    %100 = vector.load %arg8[%c1_64, %c0_65, %c0_66] : memref<4x32x32xbf16, #tpu.memory_space<vmem>>, vector<1x32x32xbf16>
    %101 = vector.shape_cast %100 : vector<1x32x32xbf16> to vector<32x32xbf16>
    %cst_67 = arith.constant dense<0.000000e+00> : vector<64x32xf32>
    %102 = tpu.matmul %99, %101, %cst_67 {dimension_numbers = #tpu.dot_dimension_numbers<[1], [0], [0], [1], [0, 0, 1, 1], [], []>} : vector<64x32xbf16>, vector<32x32xbf16>, vector<64x32xf32> -> vector<64x32xf32>
    %c1_68 = arith.constant 1 : index
    %c0_69 = arith.constant 0 : index
    %c0_70 = arith.constant 0 : index
    %103 = vector.load %arg9[%c1_68, %c0_69, %c0_70] : memref<4x1x32xf32, #tpu.memory_space<vmem>>, vector<1x1x32xf32>
    %104 = vector.shape_cast %103 : vector<1x1x32xf32> to vector<1x32xf32>
    %105 = vector.broadcast %104 : vector<1x32xf32> to vector<64x32xf32>
    %106 = arith.addf %102, %105 : vector<64x32xf32>
    %107 = arith.truncf %90 : vector<8x32xf32> to vector<8x32xbf16>
    %108 = arith.truncf %98 : vector<64x32xf32> to vector<64x32xbf16>
    %cst_71 = arith.constant dense<0.000000e+00> : vector<8x64xf32>
    %109 = tpu.matmul %107, %108, %cst_71 {dimension_numbers = #tpu.dot_dimension_numbers<[1], [1], [0], [0], [0, 0, 1, 0], [], []>} : vector<8x32xbf16>, vector<64x32xbf16>, vector<8x64xf32> -> vector<8x64xf32>
    %cst_72 = arith.constant 0.176776692 : f32
    %110 = vector.broadcast %cst_72 : f32 to vector<8x64xf32>
    %111 = arith.mulf %109, %110 : vector<8x64xf32>
    %cst_73 = arith.constant dense<0xFF800000> : vector<8xf32>
    %112 = vector.multi_reduction <maximumf>, %111, %cst_73 [1] : vector<8x64xf32> to vector<8xf32>
    %113 = vector.shape_cast %112 : vector<8xf32> to vector<8x1xf32>
    %114 = vector.broadcast %113 : vector<8x1xf32> to vector<8x64xf32>
    %115 = arith.subf %111, %114 : vector<8x64xf32>
    %116 = math.exp %115 : vector<8x64xf32>
    %cst_74 = arith.constant dense<0.000000e+00> : vector<8xf32>
    %117 = vector.multi_reduction <add>, %116, %cst_74 [1] : vector<8x64xf32> to vector<8xf32>
    %118 = vector.shape_cast %117 : vector<8xf32> to vector<8x1xf32>
    %119 = vector.broadcast %118 : vector<8x1xf32> to vector<8x64xf32>
    %120 = arith.divf %116, %119 : vector<8x64xf32>
    %121 = arith.truncf %120 : vector<8x64xf32> to vector<8x64xbf16>
    %122 = arith.truncf %106 : vector<64x32xf32> to vector<64x32xbf16>
    %cst_75 = arith.constant dense<0.000000e+00> : vector<8x32xf32>
    %123 = tpu.matmul %121, %122, %cst_75 {dimension_numbers = #tpu.dot_dimension_numbers<[1], [0], [0], [1], [0, 0, 1, 1], [], []>} : vector<8x64xbf16>, vector<64x32xbf16>, vector<8x32xf32> -> vector<8x32xf32>
    %124 = arith.truncf %123 : vector<8x32xf32> to vector<8x32xbf16>
    %c1_76 = arith.constant 1 : index
    %c0_77 = arith.constant 0 : index
    %c0_78 = arith.constant 0 : index
    %125 = vector.load %arg10[%c1_76, %c0_77, %c0_78] : memref<4x32x32xbf16, #tpu.memory_space<vmem>>, vector<1x32x32xbf16>
    %126 = vector.shape_cast %125 : vector<1x32x32xbf16> to vector<32x32xbf16>
    %cst_79 = arith.constant dense<0.000000e+00> : vector<8x32xf32>
    %127 = tpu.matmul %124, %126, %cst_79 {dimension_numbers = #tpu.dot_dimension_numbers<[1], [0], [0], [1], [0, 0, 1, 1], [], []>} : vector<8x32xbf16>, vector<32x32xbf16>, vector<8x32xf32> -> vector<8x32xf32>
    %c1_80 = arith.constant 1 : index
    %c0_81 = arith.constant 0 : index
    %c0_82 = arith.constant 0 : index
    %128 = vector.load %arg11[%c1_80, %c0_81, %c0_82] : memref<4x1x32xf32, #tpu.memory_space<vmem>>, vector<1x1x32xf32>
    %129 = vector.shape_cast %128 : vector<1x1x32xf32> to vector<1x32xf32>
    %130 = vector.broadcast %129 : vector<1x32xf32> to vector<8x32xf32>
    %131 = arith.addf %127, %130 : vector<8x32xf32>
    %132 = arith.addf %82, %131 : vector<8x32xf32>
    %cst_83 = arith.constant dense<0.000000e+00> : vector<8xf32>
    %133 = vector.multi_reduction <add>, %132, %cst_83 [1] : vector<8x32xf32> to vector<8xf32>
    %134 = vector.shape_cast %133 : vector<8xf32> to vector<8x1xf32>
    %cst_84 = arith.constant 3.200000e+01 : f32
    %135 = vector.broadcast %cst_84 : f32 to vector<8x1xf32>
    %136 = arith.divf %134, %135 : vector<8x1xf32>
    %137 = vector.broadcast %136 : vector<8x1xf32> to vector<8x32xf32>
    %138 = arith.subf %132, %137 : vector<8x32xf32>
    %139 = arith.mulf %138, %138 : vector<8x32xf32>
    %cst_85 = arith.constant dense<0.000000e+00> : vector<8xf32>
    %140 = vector.multi_reduction <add>, %139, %cst_85 [1] : vector<8x32xf32> to vector<8xf32>
    %141 = vector.shape_cast %140 : vector<8xf32> to vector<8x1xf32>
    %cst_86 = arith.constant 3.200000e+01 : f32
    %142 = vector.broadcast %cst_86 : f32 to vector<8x1xf32>
    %143 = arith.divf %141, %142 : vector<8x1xf32>
    %cst_87 = arith.constant 9.99999974E-6 : f32
    %144 = vector.broadcast %cst_87 : f32 to vector<8x1xf32>
    %145 = arith.addf %143, %144 : vector<8x1xf32>
    %146 = math.rsqrt %145 : vector<8x1xf32>
    %147 = vector.broadcast %146 : vector<8x1xf32> to vector<8x32xf32>
    %148 = arith.mulf %138, %147 : vector<8x32xf32>
    %c1_88 = arith.constant 1 : index
    %c0_89 = arith.constant 0 : index
    %c0_90 = arith.constant 0 : index
    %149 = vector.load %arg12[%c1_88, %c0_89, %c0_90] : memref<5x1x32xf32, #tpu.memory_space<vmem>>, vector<1x1x32xf32>
    %150 = vector.shape_cast %149 : vector<1x1x32xf32> to vector<1x32xf32>
    %151 = vector.broadcast %150 : vector<1x32xf32> to vector<8x32xf32>
    %152 = arith.mulf %148, %151 : vector<8x32xf32>
    %c1_91 = arith.constant 1 : index
    %c0_92 = arith.constant 0 : index
    %c0_93 = arith.constant 0 : index
    %153 = vector.load %arg13[%c1_91, %c0_92, %c0_93] : memref<5x1x32xf32, #tpu.memory_space<vmem>>, vector<1x1x32xf32>
    %154 = vector.shape_cast %153 : vector<1x1x32xf32> to vector<1x32xf32>
    %155 = vector.broadcast %154 : vector<1x32xf32> to vector<8x32xf32>
    %156 = arith.addf %152, %155 : vector<8x32xf32>
    %157 = arith.truncf %156 : vector<8x32xf32> to vector<8x32xbf16>
    %c0_94 = arith.constant 0 : index
    %c0_95 = arith.constant 0 : index
    %158 = vector.load %arg14[%c0_94, %c0_95] : memref<32x64xbf16, #tpu.memory_space<vmem>>, vector<32x64xbf16>
    %cst_96 = arith.constant dense<0.000000e+00> : vector<8x64xf32>
    %159 = tpu.matmul %157, %158, %cst_96 {dimension_numbers = #tpu.dot_dimension_numbers<[1], [0], [0], [1], [0, 0, 1, 1], [], []>} : vector<8x32xbf16>, vector<32x64xbf16>, vector<8x64xf32> -> vector<8x64xf32>
    %c0_97 = arith.constant 0 : index
    %c0_98 = arith.constant 0 : index
    %160 = vector.load %arg15[%c0_97, %c0_98] : memref<1x64xf32, #tpu.memory_space<vmem>>, vector<1x64xf32>
    %161 = vector.broadcast %160 : vector<1x64xf32> to vector<8x64xf32>
    %162 = arith.addf %159, %161 : vector<8x64xf32>
    %cst_99 = arith.constant 0.000000e+00 : f32
    %163 = vector.broadcast %cst_99 : f32 to vector<8x64xf32>
    %164 = arith.maximumf %162, %163 : vector<8x64xf32>
    %165 = arith.truncf %164 : vector<8x64xf32> to vector<8x64xbf16>
    %c0_100 = arith.constant 0 : index
    %c0_101 = arith.constant 0 : index
    %166 = vector.load %arg16[%c0_100, %c0_101] : memref<64x32xbf16, #tpu.memory_space<vmem>>, vector<64x32xbf16>
    %cst_102 = arith.constant dense<0.000000e+00> : vector<8x32xf32>
    %167 = tpu.matmul %165, %166, %cst_102 {dimension_numbers = #tpu.dot_dimension_numbers<[1], [0], [0], [1], [0, 0, 1, 1], [], []>} : vector<8x64xbf16>, vector<64x32xbf16>, vector<8x32xf32> -> vector<8x32xf32>
    %c0_103 = arith.constant 0 : index
    %c0_104 = arith.constant 0 : index
    %168 = vector.load %arg17[%c0_103, %c0_104] : memref<1x32xf32, #tpu.memory_space<vmem>>, vector<1x32xf32>
    %169 = vector.broadcast %168 : vector<1x32xf32> to vector<8x32xf32>
    %170 = arith.addf %167, %169 : vector<8x32xf32>
    %171 = arith.addf %156, %170 : vector<8x32xf32>
    %cst_105 = arith.constant dense<0.000000e+00> : vector<8xf32>
    %172 = vector.multi_reduction <add>, %171, %cst_105 [1] : vector<8x32xf32> to vector<8xf32>
    %173 = vector.shape_cast %172 : vector<8xf32> to vector<8x1xf32>
    %cst_106 = arith.constant 3.200000e+01 : f32
    %174 = vector.broadcast %cst_106 : f32 to vector<8x1xf32>
    %175 = arith.divf %173, %174 : vector<8x1xf32>
    %176 = vector.broadcast %175 : vector<8x1xf32> to vector<8x32xf32>
    %177 = arith.subf %171, %176 : vector<8x32xf32>
    %178 = arith.mulf %177, %177 : vector<8x32xf32>
    %cst_107 = arith.constant dense<0.000000e+00> : vector<8xf32>
    %179 = vector.multi_reduction <add>, %178, %cst_107 [1] : vector<8x32xf32> to vector<8xf32>
    %180 = vector.shape_cast %179 : vector<8xf32> to vector<8x1xf32>
    %cst_108 = arith.constant 3.200000e+01 : f32
    %181 = vector.broadcast %cst_108 : f32 to vector<8x1xf32>
    %182 = arith.divf %180, %181 : vector<8x1xf32>
    %cst_109 = arith.constant 9.99999974E-6 : f32
    %183 = vector.broadcast %cst_109 : f32 to vector<8x1xf32>
    %184 = arith.addf %182, %183 : vector<8x1xf32>
    %185 = math.rsqrt %184 : vector<8x1xf32>
    %186 = vector.broadcast %185 : vector<8x1xf32> to vector<8x32xf32>
    %187 = arith.mulf %177, %186 : vector<8x32xf32>
    %c2 = arith.constant 2 : index
    %c0_110 = arith.constant 0 : index
    %c0_111 = arith.constant 0 : index
    %188 = vector.load %arg12[%c2, %c0_110, %c0_111] : memref<5x1x32xf32, #tpu.memory_space<vmem>>, vector<1x1x32xf32>
    %189 = vector.shape_cast %188 : vector<1x1x32xf32> to vector<1x32xf32>
    %190 = vector.broadcast %189 : vector<1x32xf32> to vector<8x32xf32>
    %191 = arith.mulf %187, %190 : vector<8x32xf32>
    %c2_112 = arith.constant 2 : index
    %c0_113 = arith.constant 0 : index
    %c0_114 = arith.constant 0 : index
    %192 = vector.load %arg13[%c2_112, %c0_113, %c0_114] : memref<5x1x32xf32, #tpu.memory_space<vmem>>, vector<1x1x32xf32>
    %193 = vector.shape_cast %192 : vector<1x1x32xf32> to vector<1x32xf32>
    %194 = vector.broadcast %193 : vector<1x32xf32> to vector<8x32xf32>
    %195 = arith.addf %191, %194 : vector<8x32xf32>
    %196 = arith.truncf %8 : vector<64x32xf32> to vector<64x32xbf16>
    %c2_115 = arith.constant 2 : index
    %c0_116 = arith.constant 0 : index
    %c0_117 = arith.constant 0 : index
    %197 = vector.load %arg4[%c2_115, %c0_116, %c0_117] : memref<4x32x32xbf16, #tpu.memory_space<vmem>>, vector<1x32x32xbf16>
    %198 = vector.shape_cast %197 : vector<1x32x32xbf16> to vector<32x32xbf16>
    %cst_118 = arith.constant dense<0.000000e+00> : vector<64x32xf32>
    %199 = tpu.matmul %196, %198, %cst_118 {dimension_numbers = #tpu.dot_dimension_numbers<[1], [0], [0], [1], [0, 0, 1, 1], [], []>} : vector<64x32xbf16>, vector<32x32xbf16>, vector<64x32xf32> -> vector<64x32xf32>
    %c2_119 = arith.constant 2 : index
    %c0_120 = arith.constant 0 : index
    %c0_121 = arith.constant 0 : index
    %200 = vector.load %arg5[%c2_119, %c0_120, %c0_121] : memref<4x1x32xf32, #tpu.memory_space<vmem>>, vector<1x1x32xf32>
    %201 = vector.shape_cast %200 : vector<1x1x32xf32> to vector<1x32xf32>
    %202 = vector.broadcast %201 : vector<1x32xf32> to vector<64x32xf32>
    %203 = arith.addf %199, %202 : vector<64x32xf32>
    %204 = arith.truncf %195 : vector<8x32xf32> to vector<8x32xbf16>
    %c2_122 = arith.constant 2 : index
    %c0_123 = arith.constant 0 : index
    %c0_124 = arith.constant 0 : index
    %205 = vector.load %arg6[%c2_122, %c0_123, %c0_124] : memref<4x32x32xbf16, #tpu.memory_space<vmem>>, vector<1x32x32xbf16>
    %206 = vector.shape_cast %205 : vector<1x32x32xbf16> to vector<32x32xbf16>
    %cst_125 = arith.constant dense<0.000000e+00> : vector<8x32xf32>
    %207 = tpu.matmul %204, %206, %cst_125 {dimension_numbers = #tpu.dot_dimension_numbers<[1], [0], [0], [1], [0, 0, 1, 1], [], []>} : vector<8x32xbf16>, vector<32x32xbf16>, vector<8x32xf32> -> vector<8x32xf32>
    %c2_126 = arith.constant 2 : index
    %c0_127 = arith.constant 0 : index
    %c0_128 = arith.constant 0 : index
    %208 = vector.load %arg7[%c2_126, %c0_127, %c0_128] : memref<4x1x32xf32, #tpu.memory_space<vmem>>, vector<1x1x32xf32>
    %209 = vector.shape_cast %208 : vector<1x1x32xf32> to vector<1x32xf32>
    %210 = vector.broadcast %209 : vector<1x32xf32> to vector<8x32xf32>
    %211 = arith.addf %207, %210 : vector<8x32xf32>
    %212 = arith.truncf %195 : vector<8x32xf32> to vector<8x32xbf16>
    %c2_129 = arith.constant 2 : index
    %c0_130 = arith.constant 0 : index
    %c0_131 = arith.constant 0 : index
    %213 = vector.load %arg8[%c2_129, %c0_130, %c0_131] : memref<4x32x32xbf16, #tpu.memory_space<vmem>>, vector<1x32x32xbf16>
    %214 = vector.shape_cast %213 : vector<1x32x32xbf16> to vector<32x32xbf16>
    %cst_132 = arith.constant dense<0.000000e+00> : vector<8x32xf32>
    %215 = tpu.matmul %212, %214, %cst_132 {dimension_numbers = #tpu.dot_dimension_numbers<[1], [0], [0], [1], [0, 0, 1, 1], [], []>} : vector<8x32xbf16>, vector<32x32xbf16>, vector<8x32xf32> -> vector<8x32xf32>
    %c2_133 = arith.constant 2 : index
    %c0_134 = arith.constant 0 : index
    %c0_135 = arith.constant 0 : index
    %216 = vector.load %arg9[%c2_133, %c0_134, %c0_135] : memref<4x1x32xf32, #tpu.memory_space<vmem>>, vector<1x1x32xf32>
    %217 = vector.shape_cast %216 : vector<1x1x32xf32> to vector<1x32xf32>
    %218 = vector.broadcast %217 : vector<1x32xf32> to vector<8x32xf32>
    %219 = arith.addf %215, %218 : vector<8x32xf32>
    %220 = arith.truncf %203 : vector<64x32xf32> to vector<64x32xbf16>
    %221 = arith.truncf %211 : vector<8x32xf32> to vector<8x32xbf16>
    %cst_136 = arith.constant dense<0.000000e+00> : vector<64x8xf32>
    %222 = tpu.matmul %220, %221, %cst_136 {dimension_numbers = #tpu.dot_dimension_numbers<[1], [1], [0], [0], [0, 0, 1, 0], [], []>} : vector<64x32xbf16>, vector<8x32xbf16>, vector<64x8xf32> -> vector<64x8xf32>
    %cst_137 = arith.constant 0.176776692 : f32
    %223 = vector.broadcast %cst_137 : f32 to vector<64x8xf32>
    %224 = arith.mulf %222, %223 : vector<64x8xf32>
    %cst_138 = arith.constant dense<0xFF800000> : vector<64xf32>
    %225 = vector.multi_reduction <maximumf>, %224, %cst_138 [1] : vector<64x8xf32> to vector<64xf32>
    %226 = vector.shape_cast %225 : vector<64xf32> to vector<64x1xf32>
    %227 = vector.broadcast %226 : vector<64x1xf32> to vector<64x8xf32>
    %228 = arith.subf %224, %227 : vector<64x8xf32>
    %229 = math.exp %228 : vector<64x8xf32>
    %cst_139 = arith.constant dense<0.000000e+00> : vector<64xf32>
    %230 = vector.multi_reduction <add>, %229, %cst_139 [1] : vector<64x8xf32> to vector<64xf32>
    %231 = vector.shape_cast %230 : vector<64xf32> to vector<64x1xf32>
    %232 = vector.broadcast %231 : vector<64x1xf32> to vector<64x8xf32>
    %233 = arith.divf %229, %232 : vector<64x8xf32>
    %234 = arith.truncf %233 : vector<64x8xf32> to vector<64x8xbf16>
    %235 = arith.truncf %219 : vector<8x32xf32> to vector<8x32xbf16>
    %cst_140 = arith.constant dense<0.000000e+00> : vector<64x32xf32>
    %236 = tpu.matmul %234, %235, %cst_140 {dimension_numbers = #tpu.dot_dimension_numbers<[1], [0], [0], [1], [0, 0, 1, 1], [], []>} : vector<64x8xbf16>, vector<8x32xbf16>, vector<64x32xf32> -> vector<64x32xf32>
    %237 = arith.truncf %236 : vector<64x32xf32> to vector<64x32xbf16>
    %c2_141 = arith.constant 2 : index
    %c0_142 = arith.constant 0 : index
    %c0_143 = arith.constant 0 : index
    %238 = vector.load %arg10[%c2_141, %c0_142, %c0_143] : memref<4x32x32xbf16, #tpu.memory_space<vmem>>, vector<1x32x32xbf16>
    %239 = vector.shape_cast %238 : vector<1x32x32xbf16> to vector<32x32xbf16>
    %cst_144 = arith.constant dense<0.000000e+00> : vector<64x32xf32>
    %240 = tpu.matmul %237, %239, %cst_144 {dimension_numbers = #tpu.dot_dimension_numbers<[1], [0], [0], [1], [0, 0, 1, 1], [], []>} : vector<64x32xbf16>, vector<32x32xbf16>, vector<64x32xf32> -> vector<64x32xf32>
    %c2_145 = arith.constant 2 : index
    %c0_146 = arith.constant 0 : index
    %c0_147 = arith.constant 0 : index
    %241 = vector.load %arg11[%c2_145, %c0_146, %c0_147] : memref<4x1x32xf32, #tpu.memory_space<vmem>>, vector<1x1x32xf32>
    %242 = vector.shape_cast %241 : vector<1x1x32xf32> to vector<1x32xf32>
    %243 = vector.broadcast %242 : vector<1x32xf32> to vector<64x32xf32>
    %244 = arith.addf %240, %243 : vector<64x32xf32>
    %245 = arith.addf %4, %244 : vector<64x32xf32>
    %cst_148 = arith.constant dense<0.000000e+00> : vector<64xf32>
    %246 = vector.multi_reduction <add>, %245, %cst_148 [1] : vector<64x32xf32> to vector<64xf32>
    %247 = vector.shape_cast %246 : vector<64xf32> to vector<64x1xf32>
    %cst_149 = arith.constant 3.200000e+01 : f32
    %248 = vector.broadcast %cst_149 : f32 to vector<64x1xf32>
    %249 = arith.divf %247, %248 : vector<64x1xf32>
    %250 = vector.broadcast %249 : vector<64x1xf32> to vector<64x32xf32>
    %251 = arith.subf %245, %250 : vector<64x32xf32>
    %252 = arith.mulf %251, %251 : vector<64x32xf32>
    %cst_150 = arith.constant dense<0.000000e+00> : vector<64xf32>
    %253 = vector.multi_reduction <add>, %252, %cst_150 [1] : vector<64x32xf32> to vector<64xf32>
    %254 = vector.shape_cast %253 : vector<64xf32> to vector<64x1xf32>
    %cst_151 = arith.constant 3.200000e+01 : f32
    %255 = vector.broadcast %cst_151 : f32 to vector<64x1xf32>
    %256 = arith.divf %254, %255 : vector<64x1xf32>
    %cst_152 = arith.constant 9.99999974E-6 : f32
    %257 = vector.broadcast %cst_152 : f32 to vector<64x1xf32>
    %258 = arith.addf %256, %257 : vector<64x1xf32>
    %259 = math.rsqrt %258 : vector<64x1xf32>
    %260 = vector.broadcast %259 : vector<64x1xf32> to vector<64x32xf32>
    %261 = arith.mulf %251, %260 : vector<64x32xf32>
    %c3 = arith.constant 3 : index
    %c0_153 = arith.constant 0 : index
    %c0_154 = arith.constant 0 : index
    %262 = vector.load %arg12[%c3, %c0_153, %c0_154] : memref<5x1x32xf32, #tpu.memory_space<vmem>>, vector<1x1x32xf32>
    %263 = vector.shape_cast %262 : vector<1x1x32xf32> to vector<1x32xf32>
    %264 = vector.broadcast %263 : vector<1x32xf32> to vector<64x32xf32>
    %265 = arith.mulf %261, %264 : vector<64x32xf32>
    %c3_155 = arith.constant 3 : index
    %c0_156 = arith.constant 0 : index
    %c0_157 = arith.constant 0 : index
    %266 = vector.load %arg13[%c3_155, %c0_156, %c0_157] : memref<5x1x32xf32, #tpu.memory_space<vmem>>, vector<1x1x32xf32>
    %267 = vector.shape_cast %266 : vector<1x1x32xf32> to vector<1x32xf32>
    %268 = vector.broadcast %267 : vector<1x32xf32> to vector<64x32xf32>
    %269 = arith.addf %265, %268 : vector<64x32xf32>
    %270 = arith.addf %269, %7 : vector<64x32xf32>
    %271 = arith.truncf %195 : vector<8x32xf32> to vector<8x32xbf16>
    %c3_158 = arith.constant 3 : index
    %c0_159 = arith.constant 0 : index
    %c0_160 = arith.constant 0 : index
    %272 = vector.load %arg4[%c3_158, %c0_159, %c0_160] : memref<4x32x32xbf16, #tpu.memory_space<vmem>>, vector<1x32x32xbf16>
    %273 = vector.shape_cast %272 : vector<1x32x32xbf16> to vector<32x32xbf16>
    %cst_161 = arith.constant dense<0.000000e+00> : vector<8x32xf32>
    %274 = tpu.matmul %271, %273, %cst_161 {dimension_numbers = #tpu.dot_dimension_numbers<[1], [0], [0], [1], [0, 0, 1, 1], [], []>} : vector<8x32xbf16>, vector<32x32xbf16>, vector<8x32xf32> -> vector<8x32xf32>
    %c3_162 = arith.constant 3 : index
    %c0_163 = arith.constant 0 : index
    %c0_164 = arith.constant 0 : index
    %275 = vector.load %arg5[%c3_162, %c0_163, %c0_164] : memref<4x1x32xf32, #tpu.memory_space<vmem>>, vector<1x1x32xf32>
    %276 = vector.shape_cast %275 : vector<1x1x32xf32> to vector<1x32xf32>
    %277 = vector.broadcast %276 : vector<1x32xf32> to vector<8x32xf32>
    %278 = arith.addf %274, %277 : vector<8x32xf32>
    %279 = arith.truncf %270 : vector<64x32xf32> to vector<64x32xbf16>
    %c3_165 = arith.constant 3 : index
    %c0_166 = arith.constant 0 : index
    %c0_167 = arith.constant 0 : index
    %280 = vector.load %arg6[%c3_165, %c0_166, %c0_167] : memref<4x32x32xbf16, #tpu.memory_space<vmem>>, vector<1x32x32xbf16>
    %281 = vector.shape_cast %280 : vector<1x32x32xbf16> to vector<32x32xbf16>
    %cst_168 = arith.constant dense<0.000000e+00> : vector<64x32xf32>
    %282 = tpu.matmul %279, %281, %cst_168 {dimension_numbers = #tpu.dot_dimension_numbers<[1], [0], [0], [1], [0, 0, 1, 1], [], []>} : vector<64x32xbf16>, vector<32x32xbf16>, vector<64x32xf32> -> vector<64x32xf32>
    %c3_169 = arith.constant 3 : index
    %c0_170 = arith.constant 0 : index
    %c0_171 = arith.constant 0 : index
    %283 = vector.load %arg7[%c3_169, %c0_170, %c0_171] : memref<4x1x32xf32, #tpu.memory_space<vmem>>, vector<1x1x32xf32>
    %284 = vector.shape_cast %283 : vector<1x1x32xf32> to vector<1x32xf32>
    %285 = vector.broadcast %284 : vector<1x32xf32> to vector<64x32xf32>
    %286 = arith.addf %282, %285 : vector<64x32xf32>
    %287 = arith.truncf %269 : vector<64x32xf32> to vector<64x32xbf16>
    %c3_172 = arith.constant 3 : index
    %c0_173 = arith.constant 0 : index
    %c0_174 = arith.constant 0 : index
    %288 = vector.load %arg8[%c3_172, %c0_173, %c0_174] : memref<4x32x32xbf16, #tpu.memory_space<vmem>>, vector<1x32x32xbf16>
    %289 = vector.shape_cast %288 : vector<1x32x32xbf16> to vector<32x32xbf16>
    %cst_175 = arith.constant dense<0.000000e+00> : vector<64x32xf32>
    %290 = tpu.matmul %287, %289, %cst_175 {dimension_numbers = #tpu.dot_dimension_numbers<[1], [0], [0], [1], [0, 0, 1, 1], [], []>} : vector<64x32xbf16>, vector<32x32xbf16>, vector<64x32xf32> -> vector<64x32xf32>
    %c3_176 = arith.constant 3 : index
    %c0_177 = arith.constant 0 : index
    %c0_178 = arith.constant 0 : index
    %291 = vector.load %arg9[%c3_176, %c0_177, %c0_178] : memref<4x1x32xf32, #tpu.memory_space<vmem>>, vector<1x1x32xf32>
    %292 = vector.shape_cast %291 : vector<1x1x32xf32> to vector<1x32xf32>
    %293 = vector.broadcast %292 : vector<1x32xf32> to vector<64x32xf32>
    %294 = arith.addf %290, %293 : vector<64x32xf32>
    %295 = arith.truncf %278 : vector<8x32xf32> to vector<8x32xbf16>
    %296 = arith.truncf %286 : vector<64x32xf32> to vector<64x32xbf16>
    %cst_179 = arith.constant dense<0.000000e+00> : vector<8x64xf32>
    %297 = tpu.matmul %295, %296, %cst_179 {dimension_numbers = #tpu.dot_dimension_numbers<[1], [1], [0], [0], [0, 0, 1, 0], [], []>} : vector<8x32xbf16>, vector<64x32xbf16>, vector<8x64xf32> -> vector<8x64xf32>
    %cst_180 = arith.constant 0.176776692 : f32
    %298 = vector.broadcast %cst_180 : f32 to vector<8x64xf32>
    %299 = arith.mulf %297, %298 : vector<8x64xf32>
    %cst_181 = arith.constant dense<0xFF800000> : vector<8xf32>
    %300 = vector.multi_reduction <maximumf>, %299, %cst_181 [1] : vector<8x64xf32> to vector<8xf32>
    %301 = vector.shape_cast %300 : vector<8xf32> to vector<8x1xf32>
    %302 = vector.broadcast %301 : vector<8x1xf32> to vector<8x64xf32>
    %303 = arith.subf %299, %302 : vector<8x64xf32>
    %304 = math.exp %303 : vector<8x64xf32>
    %cst_182 = arith.constant dense<0.000000e+00> : vector<8xf32>
    %305 = vector.multi_reduction <add>, %304, %cst_182 [1] : vector<8x64xf32> to vector<8xf32>
    %306 = vector.shape_cast %305 : vector<8xf32> to vector<8x1xf32>
    %307 = vector.broadcast %306 : vector<8x1xf32> to vector<8x64xf32>
    %308 = arith.divf %304, %307 : vector<8x64xf32>
    %309 = arith.truncf %308 : vector<8x64xf32> to vector<8x64xbf16>
    %310 = arith.truncf %294 : vector<64x32xf32> to vector<64x32xbf16>
    %cst_183 = arith.constant dense<0.000000e+00> : vector<8x32xf32>
    %311 = tpu.matmul %309, %310, %cst_183 {dimension_numbers = #tpu.dot_dimension_numbers<[1], [0], [0], [1], [0, 0, 1, 1], [], []>} : vector<8x64xbf16>, vector<64x32xbf16>, vector<8x32xf32> -> vector<8x32xf32>
    %312 = arith.truncf %311 : vector<8x32xf32> to vector<8x32xbf16>
    %c3_184 = arith.constant 3 : index
    %c0_185 = arith.constant 0 : index
    %c0_186 = arith.constant 0 : index
    %313 = vector.load %arg10[%c3_184, %c0_185, %c0_186] : memref<4x32x32xbf16, #tpu.memory_space<vmem>>, vector<1x32x32xbf16>
    %314 = vector.shape_cast %313 : vector<1x32x32xbf16> to vector<32x32xbf16>
    %cst_187 = arith.constant dense<0.000000e+00> : vector<8x32xf32>
    %315 = tpu.matmul %312, %314, %cst_187 {dimension_numbers = #tpu.dot_dimension_numbers<[1], [0], [0], [1], [0, 0, 1, 1], [], []>} : vector<8x32xbf16>, vector<32x32xbf16>, vector<8x32xf32> -> vector<8x32xf32>
    %c3_188 = arith.constant 3 : index
    %c0_189 = arith.constant 0 : index
    %c0_190 = arith.constant 0 : index
    %316 = vector.load %arg11[%c3_188, %c0_189, %c0_190] : memref<4x1x32xf32, #tpu.memory_space<vmem>>, vector<1x1x32xf32>
    %317 = vector.shape_cast %316 : vector<1x1x32xf32> to vector<1x32xf32>
    %318 = vector.broadcast %317 : vector<1x32xf32> to vector<8x32xf32>
    %319 = arith.addf %315, %318 : vector<8x32xf32>
    %320 = arith.addf %195, %319 : vector<8x32xf32>
    %cst_191 = arith.constant dense<0.000000e+00> : vector<8xf32>
    %321 = vector.multi_reduction <add>, %320, %cst_191 [1] : vector<8x32xf32> to vector<8xf32>
    %322 = vector.shape_cast %321 : vector<8xf32> to vector<8x1xf32>
    %cst_192 = arith.constant 3.200000e+01 : f32
    %323 = vector.broadcast %cst_192 : f32 to vector<8x1xf32>
    %324 = arith.divf %322, %323 : vector<8x1xf32>
    %325 = vector.broadcast %324 : vector<8x1xf32> to vector<8x32xf32>
    %326 = arith.subf %320, %325 : vector<8x32xf32>
    %327 = arith.mulf %326, %326 : vector<8x32xf32>
    %cst_193 = arith.constant dense<0.000000e+00> : vector<8xf32>
    %328 = vector.multi_reduction <add>, %327, %cst_193 [1] : vector<8x32xf32> to vector<8xf32>
    %329 = vector.shape_cast %328 : vector<8xf32> to vector<8x1xf32>
    %cst_194 = arith.constant 3.200000e+01 : f32
    %330 = vector.broadcast %cst_194 : f32 to vector<8x1xf32>
    %331 = arith.divf %329, %330 : vector<8x1xf32>
    %cst_195 = arith.constant 9.99999974E-6 : f32
    %332 = vector.broadcast %cst_195 : f32 to vector<8x1xf32>
    %333 = arith.addf %331, %332 : vector<8x1xf32>
    %334 = math.rsqrt %333 : vector<8x1xf32>
    %335 = vector.broadcast %334 : vector<8x1xf32> to vector<8x32xf32>
    %336 = arith.mulf %326, %335 : vector<8x32xf32>
    %c4 = arith.constant 4 : index
    %c0_196 = arith.constant 0 : index
    %c0_197 = arith.constant 0 : index
    %337 = vector.load %arg12[%c4, %c0_196, %c0_197] : memref<5x1x32xf32, #tpu.memory_space<vmem>>, vector<1x1x32xf32>
    %338 = vector.shape_cast %337 : vector<1x1x32xf32> to vector<1x32xf32>
    %339 = vector.broadcast %338 : vector<1x32xf32> to vector<8x32xf32>
    %340 = arith.mulf %336, %339 : vector<8x32xf32>
    %c4_198 = arith.constant 4 : index
    %c0_199 = arith.constant 0 : index
    %c0_200 = arith.constant 0 : index
    %341 = vector.load %arg13[%c4_198, %c0_199, %c0_200] : memref<5x1x32xf32, #tpu.memory_space<vmem>>, vector<1x1x32xf32>
    %342 = vector.shape_cast %341 : vector<1x1x32xf32> to vector<1x32xf32>
    %343 = vector.broadcast %342 : vector<1x32xf32> to vector<8x32xf32>
    %344 = arith.addf %340, %343 : vector<8x32xf32>
    %345 = arith.truncf %269 : vector<64x32xf32> to vector<64x32xbf16>
    %c0_201 = arith.constant 0 : index
    %c0_202 = arith.constant 0 : index
    %c0_203 = arith.constant 0 : index
    %346 = vector.load %arg31[%c0_201, %c0_202, %c0_203] : memref<1x64x32xbf16, #tpu.memory_space<vmem>>, vector<1x64x32xbf16>
    %347 = vector.shape_cast %346 : vector<1x64x32xbf16> to vector<64x32xbf16>
    %348 = vector.shape_cast %345 : vector<64x32xbf16> to vector<1x64x32xbf16>
    tpu.vector_store %arg31[%c0_201, %c0_202, %c0_203], %348 {strides = array<i32>} : memref<1x64x32xbf16, #tpu.memory_space<vmem>>, vector<1x64x32xbf16>,
    %349 = vector.extract_strided_slice %344 {offsets = [1, 0], sizes = [1, 32], strides = [1, 1]} : vector<8x32xf32> to vector<1x32xf32>
    %c0_204 = arith.constant 0 : index
    %c0_205 = arith.constant 0 : index
    %c0_206 = arith.constant 0 : index
    %350 = vector.load %arg18[%c0_204, %c0_205, %c0_206] : memref<4x32x32xf32, #tpu.memory_space<vmem>>, vector<1x32x32xf32>
    %351 = vector.shape_cast %350 : vector<1x32x32xf32> to vector<32x32xf32>
    %cst_207 = arith.constant dense<0.000000e+00> : vector<1x32xf32>
    %352 = tpu.matmul %349, %351, %cst_207 {dimension_numbers = #tpu.dot_dimension_numbers<[1], [0], [0], [1], [0, 0, 1, 1], [], []>} : vector<1x32xf32>, vector<32x32xf32>, vector<1x32xf32> -> vector<1x32xf32>
    %c0_208 = arith.constant 0 : index
    %c0_209 = arith.constant 0 : index
    %c0_210 = arith.constant 0 : index
    %353 = vector.load %arg19[%c0_208, %c0_209, %c0_210] : memref<4x1x32xf32, #tpu.memory_space<vmem>>, vector<1x1x32xf32>
    %354 = vector.shape_cast %353 : vector<1x1x32xf32> to vector<1x32xf32>
    %355 = arith.addf %352, %354 : vector<1x32xf32>
    %cst_211 = arith.constant 0.000000e+00 : f32
    %356 = vector.broadcast %cst_211 : f32 to vector<1x32xf32>
    %357 = arith.maximumf %355, %356 : vector<1x32xf32>
    %c0_212 = arith.constant 0 : index
    %c0_213 = arith.constant 0 : index
    %c0_214 = arith.constant 0 : index
    %358 = vector.load %arg20[%c0_212, %c0_213, %c0_214] : memref<4x32x32xf32, #tpu.memory_space<vmem>>, vector<1x32x32xf32>
    %359 = vector.shape_cast %358 : vector<1x32x32xf32> to vector<32x32xf32>
    %cst_215 = arith.constant dense<0.000000e+00> : vector<1x32xf32>
    %360 = tpu.matmul %357, %359, %cst_215 {dimension_numbers = #tpu.dot_dimension_numbers<[1], [0], [0], [1], [0, 0, 1, 1], [], []>} : vector<1x32xf32>, vector<32x32xf32>, vector<1x32xf32> -> vector<1x32xf32>
    %c0_216 = arith.constant 0 : index
    %c0_217 = arith.constant 0 : index
    %c0_218 = arith.constant 0 : index
    %361 = vector.load %arg21[%c0_216, %c0_217, %c0_218] : memref<4x1x32xf32, #tpu.memory_space<vmem>>, vector<1x1x32xf32>
    %362 = vector.shape_cast %361 : vector<1x1x32xf32> to vector<1x32xf32>
    %363 = arith.addf %360, %362 : vector<1x32xf32>
    %cst_219 = arith.constant 0.000000e+00 : f32
    %364 = vector.broadcast %cst_219 : f32 to vector<1x32xf32>
    %365 = arith.maximumf %363, %364 : vector<1x32xf32>
    %c0_220 = arith.constant 0 : index
    %c0_221 = arith.constant 0 : index
    %c0_222 = arith.constant 0 : index
    %366 = vector.load %arg22[%c0_220, %c0_221, %c0_222] : memref<4x32x4xf32, #tpu.memory_space<vmem>>, vector<1x32x4xf32>
    %367 = vector.shape_cast %366 : vector<1x32x4xf32> to vector<32x4xf32>
    %cst_223 = arith.constant dense<0.000000e+00> : vector<1x4xf32>
    %368 = tpu.matmul %365, %367, %cst_223 {dimension_numbers = #tpu.dot_dimension_numbers<[1], [0], [0], [1], [0, 0, 1, 1], [], []>} : vector<1x32xf32>, vector<32x4xf32>, vector<1x4xf32> -> vector<1x4xf32>
    %c0_224 = arith.constant 0 : index
    %c0_225 = arith.constant 0 : index
    %c0_226 = arith.constant 0 : index
    %369 = vector.load %arg23[%c0_224, %c0_225, %c0_226] : memref<4x1x4xf32, #tpu.memory_space<vmem>>, vector<1x1x4xf32>
    %370 = vector.shape_cast %369 : vector<1x1x4xf32> to vector<1x4xf32>
    %371 = arith.addf %368, %370 : vector<1x4xf32>
    %372 = vector.extract_strided_slice %344 {offsets = [2, 0], sizes = [1, 32], strides = [1, 1]} : vector<8x32xf32> to vector<1x32xf32>
    %c1_227 = arith.constant 1 : index
    %c0_228 = arith.constant 0 : index
    %c0_229 = arith.constant 0 : index
    %373 = vector.load %arg18[%c1_227, %c0_228, %c0_229] : memref<4x32x32xf32, #tpu.memory_space<vmem>>, vector<1x32x32xf32>
    %374 = vector.shape_cast %373 : vector<1x32x32xf32> to vector<32x32xf32>
    %cst_230 = arith.constant dense<0.000000e+00> : vector<1x32xf32>
    %375 = tpu.matmul %372, %374, %cst_230 {dimension_numbers = #tpu.dot_dimension_numbers<[1], [0], [0], [1], [0, 0, 1, 1], [], []>} : vector<1x32xf32>, vector<32x32xf32>, vector<1x32xf32> -> vector<1x32xf32>
    %c1_231 = arith.constant 1 : index
    %c0_232 = arith.constant 0 : index
    %c0_233 = arith.constant 0 : index
    %376 = vector.load %arg19[%c1_231, %c0_232, %c0_233] : memref<4x1x32xf32, #tpu.memory_space<vmem>>, vector<1x1x32xf32>
    %377 = vector.shape_cast %376 : vector<1x1x32xf32> to vector<1x32xf32>
    %378 = arith.addf %375, %377 : vector<1x32xf32>
    %cst_234 = arith.constant 0.000000e+00 : f32
    %379 = vector.broadcast %cst_234 : f32 to vector<1x32xf32>
    %380 = arith.maximumf %378, %379 : vector<1x32xf32>
    %c1_235 = arith.constant 1 : index
    %c0_236 = arith.constant 0 : index
    %c0_237 = arith.constant 0 : index
    %381 = vector.load %arg20[%c1_235, %c0_236, %c0_237] : memref<4x32x32xf32, #tpu.memory_space<vmem>>, vector<1x32x32xf32>
    %382 = vector.shape_cast %381 : vector<1x32x32xf32> to vector<32x32xf32>
    %cst_238 = arith.constant dense<0.000000e+00> : vector<1x32xf32>
    %383 = tpu.matmul %380, %382, %cst_238 {dimension_numbers = #tpu.dot_dimension_numbers<[1], [0], [0], [1], [0, 0, 1, 1], [], []>} : vector<1x32xf32>, vector<32x32xf32>, vector<1x32xf32> -> vector<1x32xf32>
    %c1_239 = arith.constant 1 : index
    %c0_240 = arith.constant 0 : index
    %c0_241 = arith.constant 0 : index
    %384 = vector.load %arg21[%c1_239, %c0_240, %c0_241] : memref<4x1x32xf32, #tpu.memory_space<vmem>>, vector<1x1x32xf32>
    %385 = vector.shape_cast %384 : vector<1x1x32xf32> to vector<1x32xf32>
    %386 = arith.addf %383, %385 : vector<1x32xf32>
    %cst_242 = arith.constant 0.000000e+00 : f32
    %387 = vector.broadcast %cst_242 : f32 to vector<1x32xf32>
    %388 = arith.maximumf %386, %387 : vector<1x32xf32>
    %c1_243 = arith.constant 1 : index
    %c0_244 = arith.constant 0 : index
    %c0_245 = arith.constant 0 : index
    %389 = vector.load %arg22[%c1_243, %c0_244, %c0_245] : memref<4x32x4xf32, #tpu.memory_space<vmem>>, vector<1x32x4xf32>
    %390 = vector.shape_cast %389 : vector<1x32x4xf32> to vector<32x4xf32>
    %cst_246 = arith.constant dense<0.000000e+00> : vector<1x4xf32>
    %391 = tpu.matmul %388, %390, %cst_246 {dimension_numbers = #tpu.dot_dimension_numbers<[1], [0], [0], [1], [0, 0, 1, 1], [], []>} : vector<1x32xf32>, vector<32x4xf32>, vector<1x4xf32> -> vector<1x4xf32>
    %c1_247 = arith.constant 1 : index
    %c0_248 = arith.constant 0 : index
    %c0_249 = arith.constant 0 : index
    %392 = vector.load %arg23[%c1_247, %c0_248, %c0_249] : memref<4x1x4xf32, #tpu.memory_space<vmem>>, vector<1x1x4xf32>
    %393 = vector.shape_cast %392 : vector<1x1x4xf32> to vector<1x4xf32>
    %394 = arith.addf %391, %393 : vector<1x4xf32>
    %395 = vector.extract_strided_slice %344 {offsets = [3, 0], sizes = [1, 32], strides = [1, 1]} : vector<8x32xf32> to vector<1x32xf32>
    %c2_250 = arith.constant 2 : index
    %c0_251 = arith.constant 0 : index
    %c0_252 = arith.constant 0 : index
    %396 = vector.load %arg18[%c2_250, %c0_251, %c0_252] : memref<4x32x32xf32, #tpu.memory_space<vmem>>, vector<1x32x32xf32>
    %397 = vector.shape_cast %396 : vector<1x32x32xf32> to vector<32x32xf32>
    %cst_253 = arith.constant dense<0.000000e+00> : vector<1x32xf32>
    %398 = tpu.matmul %395, %397, %cst_253 {dimension_numbers = #tpu.dot_dimension_numbers<[1], [0], [0], [1], [0, 0, 1, 1], [], []>} : vector<1x32xf32>, vector<32x32xf32>, vector<1x32xf32> -> vector<1x32xf32>
    %c2_254 = arith.constant 2 : index
    %c0_255 = arith.constant 0 : index
    %c0_256 = arith.constant 0 : index
    %399 = vector.load %arg19[%c2_254, %c0_255, %c0_256] : memref<4x1x32xf32, #tpu.memory_space<vmem>>, vector<1x1x32xf32>
    %400 = vector.shape_cast %399 : vector<1x1x32xf32> to vector<1x32xf32>
    %401 = arith.addf %398, %400 : vector<1x32xf32>
    %cst_257 = arith.constant 0.000000e+00 : f32
    %402 = vector.broadcast %cst_257 : f32 to vector<1x32xf32>
    %403 = arith.maximumf %401, %402 : vector<1x32xf32>
    %c2_258 = arith.constant 2 : index
    %c0_259 = arith.constant 0 : index
    %c0_260 = arith.constant 0 : index
    %404 = vector.load %arg20[%c2_258, %c0_259, %c0_260] : memref<4x32x32xf32, #tpu.memory_space<vmem>>, vector<1x32x32xf32>
    %405 = vector.shape_cast %404 : vector<1x32x32xf32> to vector<32x32xf32>
    %cst_261 = arith.constant dense<0.000000e+00> : vector<1x32xf32>
    %406 = tpu.matmul %403, %405, %cst_261 {dimension_numbers = #tpu.dot_dimension_numbers<[1], [0], [0], [1], [0, 0, 1, 1], [], []>} : vector<1x32xf32>, vector<32x32xf32>, vector<1x32xf32> -> vector<1x32xf32>
    %c2_262 = arith.constant 2 : index
    %c0_263 = arith.constant 0 : index
    %c0_264 = arith.constant 0 : index
    %407 = vector.load %arg21[%c2_262, %c0_263, %c0_264] : memref<4x1x32xf32, #tpu.memory_space<vmem>>, vector<1x1x32xf32>
    %408 = vector.shape_cast %407 : vector<1x1x32xf32> to vector<1x32xf32>
    %409 = arith.addf %406, %408 : vector<1x32xf32>
    %cst_265 = arith.constant 0.000000e+00 : f32
    %410 = vector.broadcast %cst_265 : f32 to vector<1x32xf32>
    %411 = arith.maximumf %409, %410 : vector<1x32xf32>
    %c2_266 = arith.constant 2 : index
    %c0_267 = arith.constant 0 : index
    %c0_268 = arith.constant 0 : index
    %412 = vector.load %arg22[%c2_266, %c0_267, %c0_268] : memref<4x32x4xf32, #tpu.memory_space<vmem>>, vector<1x32x4xf32>
    %413 = vector.shape_cast %412 : vector<1x32x4xf32> to vector<32x4xf32>
    %cst_269 = arith.constant dense<0.000000e+00> : vector<1x4xf32>
    %414 = tpu.matmul %411, %413, %cst_269 {dimension_numbers = #tpu.dot_dimension_numbers<[1], [0], [0], [1], [0, 0, 1, 1], [], []>} : vector<1x32xf32>, vector<32x4xf32>, vector<1x4xf32> -> vector<1x4xf32>
    %c2_270 = arith.constant 2 : index
    %c0_271 = arith.constant 0 : index
    %c0_272 = arith.constant 0 : index
    %415 = vector.load %arg23[%c2_270, %c0_271, %c0_272] : memref<4x1x4xf32, #tpu.memory_space<vmem>>, vector<1x1x4xf32>
    %416 = vector.shape_cast %415 : vector<1x1x4xf32> to vector<1x4xf32>
    %417 = arith.addf %414, %416 : vector<1x4xf32>
    %418 = vector.extract_strided_slice %344 {offsets = [4, 0], sizes = [1, 32], strides = [1, 1]} : vector<8x32xf32> to vector<1x32xf32>
    %c3_273 = arith.constant 3 : index
    %c0_274 = arith.constant 0 : index
    %c0_275 = arith.constant 0 : index
    %419 = vector.load %arg18[%c3_273, %c0_274, %c0_275] : memref<4x32x32xf32, #tpu.memory_space<vmem>>, vector<1x32x32xf32>
    %420 = vector.shape_cast %419 : vector<1x32x32xf32> to vector<32x32xf32>
    %cst_276 = arith.constant dense<0.000000e+00> : vector<1x32xf32>
    %421 = tpu.matmul %418, %420, %cst_276 {dimension_numbers = #tpu.dot_dimension_numbers<[1], [0], [0], [1], [0, 0, 1, 1], [], []>} : vector<1x32xf32>, vector<32x32xf32>, vector<1x32xf32> -> vector<1x32xf32>
    %c3_277 = arith.constant 3 : index
    %c0_278 = arith.constant 0 : index
    %c0_279 = arith.constant 0 : index
    %422 = vector.load %arg19[%c3_277, %c0_278, %c0_279] : memref<4x1x32xf32, #tpu.memory_space<vmem>>, vector<1x1x32xf32>
    %423 = vector.shape_cast %422 : vector<1x1x32xf32> to vector<1x32xf32>
    %424 = arith.addf %421, %423 : vector<1x32xf32>
    %cst_280 = arith.constant 0.000000e+00 : f32
    %425 = vector.broadcast %cst_280 : f32 to vector<1x32xf32>
    %426 = arith.maximumf %424, %425 : vector<1x32xf32>
    %c3_281 = arith.constant 3 : index
    %c0_282 = arith.constant 0 : index
    %c0_283 = arith.constant 0 : index
    %427 = vector.load %arg20[%c3_281, %c0_282, %c0_283] : memref<4x32x32xf32, #tpu.memory_space<vmem>>, vector<1x32x32xf32>
    %428 = vector.shape_cast %427 : vector<1x32x32xf32> to vector<32x32xf32>
    %cst_284 = arith.constant dense<0.000000e+00> : vector<1x32xf32>
    %429 = tpu.matmul %426, %428, %cst_284 {dimension_numbers = #tpu.dot_dimension_numbers<[1], [0], [0], [1], [0, 0, 1, 1], [], []>} : vector<1x32xf32>, vector<32x32xf32>, vector<1x32xf32> -> vector<1x32xf32>
    %c3_285 = arith.constant 3 : index
    %c0_286 = arith.constant 0 : index
    %c0_287 = arith.constant 0 : index
    %430 = vector.load %arg21[%c3_285, %c0_286, %c0_287] : memref<4x1x32xf32, #tpu.memory_space<vmem>>, vector<1x1x32xf32>
    %431 = vector.shape_cast %430 : vector<1x1x32xf32> to vector<1x32xf32>
    %432 = arith.addf %429, %431 : vector<1x32xf32>
    %cst_288 = arith.constant 0.000000e+00 : f32
    %433 = vector.broadcast %cst_288 : f32 to vector<1x32xf32>
    %434 = arith.maximumf %432, %433 : vector<1x32xf32>
    %c3_289 = arith.constant 3 : index
    %c0_290 = arith.constant 0 : index
    %c0_291 = arith.constant 0 : index
    %435 = vector.load %arg22[%c3_289, %c0_290, %c0_291] : memref<4x32x4xf32, #tpu.memory_space<vmem>>, vector<1x32x4xf32>
    %436 = vector.shape_cast %435 : vector<1x32x4xf32> to vector<32x4xf32>
    %cst_292 = arith.constant dense<0.000000e+00> : vector<1x4xf32>
    %437 = tpu.matmul %434, %436, %cst_292 {dimension_numbers = #tpu.dot_dimension_numbers<[1], [0], [0], [1], [0, 0, 1, 1], [], []>} : vector<1x32xf32>, vector<32x4xf32>, vector<1x4xf32> -> vector<1x4xf32>
    %c3_293 = arith.constant 3 : index
    %c0_294 = arith.constant 0 : index
    %c0_295 = arith.constant 0 : index
    %438 = vector.load %arg23[%c3_293, %c0_294, %c0_295] : memref<4x1x4xf32, #tpu.memory_space<vmem>>, vector<1x1x4xf32>
    %439 = vector.shape_cast %438 : vector<1x1x4xf32> to vector<1x4xf32>
    %440 = arith.addf %437, %439 : vector<1x4xf32>
    %441 = tpu.concatenate %371, %394, %417, %440 in 0 : vector<1x4xf32>, vector<1x4xf32>, vector<1x4xf32>, vector<1x4xf32> -> vector<4x4xf32>
    %c0_296 = arith.constant 0 : index
    %c0_297 = arith.constant 0 : index
    %c0_298 = arith.constant 0 : index
    %442 = vector.load %arg32[%c0_296, %c0_297, %c0_298] : memref<1x4x4xf32, #tpu.memory_space<vmem>>, vector<1x4x4xf32>
    %443 = vector.shape_cast %442 : vector<1x4x4xf32> to vector<4x4xf32>
    %444 = vector.shape_cast %441 : vector<4x4xf32> to vector<1x4x4xf32>
    tpu.vector_store %arg32[%c0_296, %c0_297, %c0_298], %444 {strides = array<i32>} : memref<1x4x4xf32, #tpu.memory_space<vmem>>, vector<1x4x4xf32>,
    %445 = vector.extract_strided_slice %344 {offsets = [0, 0], sizes = [1, 32], strides = [1, 1]} : vector<8x32xf32> to vector<1x32xf32>
    %446 = vector.extract_strided_slice %344 {offsets = [5, 0], sizes = [1, 32], strides = [1, 1]} : vector<8x32xf32> to vector<1x32xf32>
    %c0_299 = arith.constant 0 : index
    %c0_300 = arith.constant 0 : index
    %447 = vector.load %arg24[%c0_299, %c0_300] : memref<32x128xf32, #tpu.memory_space<vmem>>, vector<32x128xf32>
    %cst_301 = arith.constant dense<0.000000e+00> : vector<1x128xf32>
    %448 = tpu.matmul %445, %447, %cst_301 {dimension_numbers = #tpu.dot_dimension_numbers<[1], [0], [0], [1], [0, 0, 1, 1], [], []>} : vector<1x32xf32>, vector<32x128xf32>, vector<1x128xf32> -> vector<1x128xf32>
    %c0_302 = arith.constant 0 : index
    %c0_303 = arith.constant 0 : index
    %449 = vector.load %arg25[%c0_302, %c0_303] : memref<32x128xf32, #tpu.memory_space<vmem>>, vector<32x128xf32>
    %cst_304 = arith.constant dense<0.000000e+00> : vector<1x128xf32>
    %450 = tpu.matmul %446, %449, %cst_304 {dimension_numbers = #tpu.dot_dimension_numbers<[1], [0], [0], [1], [0, 0, 1, 1], [], []>} : vector<1x32xf32>, vector<32x128xf32>, vector<1x128xf32> -> vector<1x128xf32>
    %451 = arith.addf %448, %450 : vector<1x128xf32>
    %c0_305 = arith.constant 0 : index
    %c0_306 = arith.constant 0 : index
    %452 = vector.load %arg26[%c0_305, %c0_306] : memref<1x128xf32, #tpu.memory_space<vmem>>, vector<1x128xf32>
    %453 = arith.addf %451, %452 : vector<1x128xf32>
    %cst_307 = arith.constant 0.000000e+00 : f32
    %454 = vector.broadcast %cst_307 : f32 to vector<1x128xf32>
    %455 = arith.maximumf %453, %454 : vector<1x128xf32>
    %c0_308 = arith.constant 0 : index
    %c0_309 = arith.constant 0 : index
    %456 = vector.load %arg27[%c0_308, %c0_309] : memref<128x128xf32, #tpu.memory_space<vmem>>, vector<128x128xf32>
    %cst_310 = arith.constant dense<0.000000e+00> : vector<1x128xf32>
    %457 = tpu.matmul %455, %456, %cst_310 {dimension_numbers = #tpu.dot_dimension_numbers<[1], [0], [0], [1], [0, 0, 1, 1], [], []>} : vector<1x128xf32>, vector<128x128xf32>, vector<1x128xf32> -> vector<1x128xf32>
    %c0_311 = arith.constant 0 : index
    %c0_312 = arith.constant 0 : index
    %458 = vector.load %arg28[%c0_311, %c0_312] : memref<1x128xf32, #tpu.memory_space<vmem>>, vector<1x128xf32>
    %459 = arith.addf %457, %458 : vector<1x128xf32>
    %cst_313 = arith.constant 0.000000e+00 : f32
    %460 = vector.broadcast %cst_313 : f32 to vector<1x128xf32>
    %461 = arith.maximumf %459, %460 : vector<1x128xf32>
    %c0_314 = arith.constant 0 : index
    %c0_315 = arith.constant 0 : index
    %462 = vector.load %arg29[%c0_314, %c0_315] : memref<128x11xf32, #tpu.memory_space<vmem>>, vector<128x11xf32>
    %cst_316 = arith.constant dense<0.000000e+00> : vector<1x11xf32>
    %463 = tpu.matmul %461, %462, %cst_316 {dimension_numbers = #tpu.dot_dimension_numbers<[1], [0], [0], [1], [0, 0, 1, 1], [], []>} : vector<1x128xf32>, vector<128x11xf32>, vector<1x11xf32> -> vector<1x11xf32>
    %c0_317 = arith.constant 0 : index
    %c0_318 = arith.constant 0 : index
    %464 = vector.load %arg30[%c0_317, %c0_318] : memref<1x11xf32, #tpu.memory_space<vmem>>, vector<1x11xf32>
    %465 = arith.addf %463, %464 : vector<1x11xf32>
    %c0_319 = arith.constant 0 : index
    %c0_320 = arith.constant 0 : index
    %c0_321 = arith.constant 0 : index
    %466 = vector.load %arg33[%c0_319, %c0_320, %c0_321] : memref<1x1x11xf32, #tpu.memory_space<vmem>>, vector<1x1x11xf32>
    %467 = vector.shape_cast %466 : vector<1x1x11xf32> to vector<1x11xf32>
    %468 = vector.shape_cast %465 : vector<1x11xf32> to vector<1x1x11xf32>
    tpu.vector_store %arg33[%c0_319, %c0_320, %c0_321], %468 {strides = array<i32>} : memref<1x1x11xf32, #tpu.memory_space<vmem>>, vector<1x1x11xf32>,
    return
  }
  func.func @transform_0(%arg0: i32) -> (i32, i32, i32) {
    %c0_i32 = arith.constant 0 : i32
    %c0_i32_0 = arith.constant 0 : i32
    %c0_i32_1 = arith.constant 0 : i32
    return %arg0, %c0_i32, %c0_i32_0 : i32, i32, i32
  }
  func.func @transform_1(%arg0: i32) -> (i32, i32, i32) {
    %c0_i32 = arith.constant 0 : i32
    %c0_i32_0 = arith.constant 0 : i32
    %c0_i32_1 = arith.constant 0 : i32
    return %arg0, %c0_i32, %c0_i32_0 : i32, i32, i32
  }
  func.func @transform_2(%arg0: i32) -> (i32, i32, i32) {
    %c0_i32 = arith.constant 0 : i32
    %c0_i32_0 = arith.constant 0 : i32
    %c0_i32_1 = arith.constant 0 : i32
    %c0_i32_2 = arith.constant 0 : i32
    return %c0_i32, %c0_i32_0, %c0_i32_1 : i32, i32, i32
  }
  func.func @transform_3(%arg0: i32) -> (i32, i32, i32) {
    %c0_i32 = arith.constant 0 : i32
    %c0_i32_0 = arith.constant 0 : i32
    %c0_i32_1 = arith.constant 0 : i32
    %c0_i32_2 = arith.constant 0 : i32
    return %c0_i32, %c0_i32_0, %c0_i32_1 : i32, i32, i32
  }
  func.func @transform_4(%arg0: i32) -> (i32, i32, i32) {
    %c0_i32 = arith.constant 0 : i32
    %c0_i32_0 = arith.constant 0 : i32
    %c0_i32_1 = arith.constant 0 : i32
    %c0_i32_2 = arith.constant 0 : i32
    return %c0_i32, %c0_i32_0, %c0_i32_1 : i32, i32, i32
  }
  func.func @transform_5(%arg0: i32) -> (i32, i32, i32) {
    %c0_i32 = arith.constant 0 : i32
    %c0_i32_0 = arith.constant 0 : i32
    %c0_i32_1 = arith.constant 0 : i32
    %c0_i32_2 = arith.constant 0 : i32
    return %c0_i32, %c0_i32_0, %c0_i32_1 : i32, i32, i32
  }
  func.func @transform_6(%arg0: i32) -> (i32, i32, i32) {
    %c0_i32 = arith.constant 0 : i32
    %c0_i32_0 = arith.constant 0 : i32
    %c0_i32_1 = arith.constant 0 : i32
    %c0_i32_2 = arith.constant 0 : i32
    return %c0_i32, %c0_i32_0, %c0_i32_1 : i32, i32, i32
  }
  func.func @transform_7(%arg0: i32) -> (i32, i32, i32) {
    %c0_i32 = arith.constant 0 : i32
    %c0_i32_0 = arith.constant 0 : i32
    %c0_i32_1 = arith.constant 0 : i32
    %c0_i32_2 = arith.constant 0 : i32
    return %c0_i32, %c0_i32_0, %c0_i32_1 : i32, i32, i32
  }
  func.func @transform_8(%arg0: i32) -> (i32, i32, i32) {
    %c0_i32 = arith.constant 0 : i32
    %c0_i32_0 = arith.constant 0 : i32
    %c0_i32_1 = arith.constant 0 : i32
    %c0_i32_2 = arith.constant 0 : i32
    return %c0_i32, %c0_i32_0, %c0_i32_1 : i32, i32, i32
  }
  func.func @transform_9(%arg0: i32) -> (i32, i32, i32) {
    %c0_i32 = arith.constant 0 : i32
    %c0_i32_0 = arith.constant 0 : i32
    %c0_i32_1 = arith.constant 0 : i32
    %c0_i32_2 = arith.constant 0 : i32
    return %c0_i32, %c0_i32_0, %c0_i32_1 : i32, i32, i32
  }
  func.func @transform_10(%arg0: i32) -> (i32, i32, i32) {
    %c0_i32 = arith.constant 0 : i32
    %c0_i32_0 = arith.constant 0 : i32
    %c0_i32_1 = arith.constant 0 : i32
    %c0_i32_2 = arith.constant 0 : i32
    return %c0_i32, %c0_i32_0, %c0_i32_1 : i32, i32, i32
  }
  func.func @transform_11(%arg0: i32) -> (i32, i32, i32) {
    %c0_i32 = arith.constant 0 : i32
    %c0_i32_0 = arith.constant 0 : i32
    %c0_i32_1 = arith.constant 0 : i32
    %c0_i32_2 = arith.constant 0 : i32
    return %c0_i32, %c0_i32_0, %c0_i32_1 : i32, i32, i32
  }
  func.func @transform_12(%arg0: i32) -> (i32, i32, i32) {
    %c0_i32 = arith.constant 0 : i32
    %c0_i32_0 = arith.constant 0 : i32
    %c0_i32_1 = arith.constant 0 : i32
    %c0_i32_2 = arith.constant 0 : i32
    return %c0_i32, %c0_i32_0, %c0_i32_1 : i32, i32, i32
  }
  func.func @transform_13(%arg0: i32) -> (i32, i32) {
    %c0_i32 = arith.constant 0 : i32
    %c0_i32_0 = arith.constant 0 : i32
    %c0_i32_1 = arith.constant 0 : i32
    return %c0_i32, %c0_i32_0 : i32, i32
  }
  func.func @transform_14(%arg0: i32) -> (i32, i32) {
    %c0_i32 = arith.constant 0 : i32
    %c0_i32_0 = arith.constant 0 : i32
    %c0_i32_1 = arith.constant 0 : i32
    return %c0_i32, %c0_i32_0 : i32, i32
  }
  func.func @transform_15(%arg0: i32) -> (i32, i32) {
    %c0_i32 = arith.constant 0 : i32
    %c0_i32_0 = arith.constant 0 : i32
    %c0_i32_1 = arith.constant 0 : i32
    return %c0_i32, %c0_i32_0 : i32, i32
  }
  func.func @transform_16(%arg0: i32) -> (i32, i32) {
    %c0_i32 = arith.constant 0 : i32
    %c0_i32_0 = arith.constant 0 : i32
    %c0_i32_1 = arith.constant 0 : i32
    return %c0_i32, %c0_i32_0 : i32, i32
  }
  func.func @transform_17(%arg0: i32) -> (i32, i32, i32) {
    %c0_i32 = arith.constant 0 : i32
    %c0_i32_0 = arith.constant 0 : i32
    %c0_i32_1 = arith.constant 0 : i32
    %c0_i32_2 = arith.constant 0 : i32
    return %c0_i32, %c0_i32_0, %c0_i32_1 : i32, i32, i32
  }
  func.func @transform_18(%arg0: i32) -> (i32, i32, i32) {
    %c0_i32 = arith.constant 0 : i32
    %c0_i32_0 = arith.constant 0 : i32
    %c0_i32_1 = arith.constant 0 : i32
    %c0_i32_2 = arith.constant 0 : i32
    return %c0_i32, %c0_i32_0, %c0_i32_1 : i32, i32, i32
  }
  func.func @transform_19(%arg0: i32) -> (i32, i32, i32) {
    %c0_i32 = arith.constant 0 : i32
    %c0_i32_0 = arith.constant 0 : i32
    %c0_i32_1 = arith.constant 0 : i32
    %c0_i32_2 = arith.constant 0 : i32
    return %c0_i32, %c0_i32_0, %c0_i32_1 : i32, i32, i32
  }
  func.func @transform_20(%arg0: i32) -> (i32, i32, i32) {
    %c0_i32 = arith.constant 0 : i32
    %c0_i32_0 = arith.constant 0 : i32
    %c0_i32_1 = arith.constant 0 : i32
    %c0_i32_2 = arith.constant 0 : i32
    return %c0_i32, %c0_i32_0, %c0_i32_1 : i32, i32, i32
  }
  func.func @transform_21(%arg0: i32) -> (i32, i32, i32) {
    %c0_i32 = arith.constant 0 : i32
    %c0_i32_0 = arith.constant 0 : i32
    %c0_i32_1 = arith.constant 0 : i32
    %c0_i32_2 = arith.constant 0 : i32
    return %c0_i32, %c0_i32_0, %c0_i32_1 : i32, i32, i32
  }
  func.func @transform_22(%arg0: i32) -> (i32, i32, i32) {
    %c0_i32 = arith.constant 0 : i32
    %c0_i32_0 = arith.constant 0 : i32
    %c0_i32_1 = arith.constant 0 : i32
    %c0_i32_2 = arith.constant 0 : i32
    return %c0_i32, %c0_i32_0, %c0_i32_1 : i32, i32, i32
  }
  func.func @transform_23(%arg0: i32) -> (i32, i32) {
    %c0_i32 = arith.constant 0 : i32
    %c0_i32_0 = arith.constant 0 : i32
    %c0_i32_1 = arith.constant 0 : i32
    return %c0_i32, %c0_i32_0 : i32, i32
  }
  func.func @transform_24(%arg0: i32) -> (i32, i32) {
    %c0_i32 = arith.constant 0 : i32
    %c0_i32_0 = arith.constant 0 : i32
    %c0_i32_1 = arith.constant 0 : i32
    return %c0_i32, %c0_i32_0 : i32, i32
  }
  func.func @transform_25(%arg0: i32) -> (i32, i32) {
    %c0_i32 = arith.constant 0 : i32
    %c0_i32_0 = arith.constant 0 : i32
    %c0_i32_1 = arith.constant 0 : i32
    return %c0_i32, %c0_i32_0 : i32, i32
  }
  func.func @transform_26(%arg0: i32) -> (i32, i32) {
    %c0_i32 = arith.constant 0 : i32
    %c0_i32_0 = arith.constant 0 : i32
    %c0_i32_1 = arith.constant 0 : i32
    return %c0_i32, %c0_i32_0 : i32, i32
  }
  func.func @transform_27(%arg0: i32) -> (i32, i32) {
    %c0_i32 = arith.constant 0 : i32
    %c0_i32_0 = arith.constant 0 : i32
    %c0_i32_1 = arith.constant 0 : i32
    return %c0_i32, %c0_i32_0 : i32, i32
  }
  func.func @transform_28(%arg0: i32) -> (i32, i32) {
    %c0_i32 = arith.constant 0 : i32
    %c0_i32_0 = arith.constant 0 : i32
    %c0_i32_1 = arith.constant 0 : i32
    return %c0_i32, %c0_i32_0 : i32, i32
  }
  func.func @transform_29(%arg0: i32) -> (i32, i32) {
    %c0_i32 = arith.constant 0 : i32
    %c0_i32_0 = arith.constant 0 : i32
    %c0_i32_1 = arith.constant 0 : i32
    return %c0_i32, %c0_i32_0 : i32, i32
  }
  func.func @transform_30(%arg0: i32) -> (i32, i32, i32) {
    %c0_i32 = arith.constant 0 : i32
    %c0_i32_0 = arith.constant 0 : i32
    %c0_i32_1 = arith.constant 0 : i32
    return %arg0, %c0_i32, %c0_i32_0 : i32, i32, i32
  }
  func.func @transform_31(%arg0: i32) -> (i32, i32, i32) {
    %c0_i32 = arith.constant 0 : i32
    %c0_i32_0 = arith.constant 0 : i32
    %c0_i32_1 = arith.constant 0 : i32
    return %arg0, %c0_i32, %c0_i32_0 : i32, i32, i32
  }
  func.func @transform_32(%arg0: i32) -> (i32, i32, i32) {
    %c0_i32 = arith.constant 0 : i32
    %c0_i32_0 = arith.constant 0 : i32
    %c0_i32_1 = arith.constant 0 : i32
    return %arg0, %c0_i32, %c0_i32_0 : i32, i32, i32
  }
}

</mosaic_0001>

<bundles_post_ra>
// kernel: bbox_mask_decoder_forward.3
= control target key start
LH: loop header
LB: loop body
LE: loop exit
PB: predicated region body
PF: predicated region fallthrough
CT: control target
= control target key end

     0   :  { %13 = vsyncpa [#allocation3], 0  ;;  %s4443_s0 = inlined_call_operand.vmem [shape: bf16[6,64,32], index: 0, kind: input, shape index: {}]   ;;  %s4444_s1 = inlined_call_operand.vmem [shape: f32[6,4,4], index: 1, kind: input, shape index: {}]   ;;  %s4445_s2 = inlined_call_operand.hbm [shape: bf16[32,32], index: 2, kind: input, shape index: {}]   ;;  %s4446_s3 = inlined_call_operand.hbm [shape: f32[1,32], index: 3, kind: input, shape index: {}]   ;;  %s4447_s4 = inlined_call_operand.hbm [shape: f32[1,8], index: 4, kind: input, shape index: {}]   ;;  %s4448_s5 = inlined_call_operand.hbm [shape: f32[1,8], index: 5, kind: input, shape index: {}]   ;;  %s4449_s6 = inlined_call_operand.hbm [shape: bf16[8,16], index: 6, kind: input, shape index: {}]   ;;  %s4450_s7 = inlined_call_operand.hbm [shape: f32[1,16], index: 7, kind: input, shape index: {}]   ;;  %s4451_s8 = inlined_call_operand.vmem [shape: f32[6,64,64], index: 8, kind: output, shape index: {}]  }
   0x1   :  { %14 = vsyncpa [#allocation5], 0 }
   0x2   :  { %15 = vsyncpa [#allocation8], 0 }
   0x3   :  { %16 = vsyncpa [#allocation11], 0  ;;  %s3671_s27 = smov 0   ;;  %s3673_s28 = smov 0  }
   0x4   :  { %s3675_s29 = smov 0   ;;  %s3677_s30 = smov 0  }
   0x5   :  { %s3679_s9 = smov 0  }
   0x6 LB: > { %s3598_s10 = smov [#allocation4]   ;;  %s2871_s12 = sadd.s32 4294967295, %s3596_s9   ;;  %s3596_s9 = sphi %s3679_s9, %s22_s9   ;;  %s3592_s30 = sphi %s3677_s30, %s4466_s30   ;;  %s3588_s29 = sphi %s3675_s29, %s4465_s29   ;;  %s3584_s28 = sphi %s3673_s28, %s4464_s28   ;;  %s3580_s27 = sphi %s3671_s27, %s4463_s27  }
   0x7   : > { %s273_s11 = sshll.u32 %s3598_s10, 4  ;;  %p2873_p0 = scmp.ge.s32.totalorder %s3596_s9, 1  ;;  %s274_s11 = int_to_ptr.vmem [resolvable:$true] %s273_s11 }
   0x8   : > { %p247_p1 = scmp.lt.s32.totalorder %s3596_s9, 13  ;;  %p3699_p2 = scmp.eq.s32.totalorder %s2871_s12, 0 }
   0x9   : > { %s3599_s15 = smov [#allocation7]   ;;  %s3397_s19 = scalar_lea.vmem %s274_s11, 16 }
   0xa   : > { %s4455_s13 = scalar_select %p3699_p2, 1, 0 }
   0xb   : > { %p3703_p3 = pnand %p2873_p0, %p247_p1  ;;  %s295_s16 = sshll.u32 %s3599_s15, 4  ;;  %s296_s16 = int_to_ptr.vmem [resolvable:$true] %s295_s16 }
   0xc   : > { %p3398_p7 = scmp.ne.s32.totalorder %s274_s11, %s3397_s19  ;;  %s3404_s20 = scalar_lea.vmem %s274_s11, 32 }
   0xd   : > { %s4456_s14 = scalar_select %p3703_p3, 1, 0 }
   0xe   : > { %p3183_p4 = pneg %p3703_p3  ;;  %p3405_p10 = scmp.lt.s32.totalorder %s274_s11, %s274_s11 }
   0xf   : > { %p3406_p11 = scmp.lt.s32.totalorder %s3404_s20, %s3397_s19 }
  0x10   : > { %p3711_p5 = pnand %p3699_p2, %p3183_p4 }
  0x11   : > { %p3407_p12 = por %p3406_p11, %p3405_p10 }
  0x12   : > { %p3717_p6 = pneg %p3711_p5 }
  0x14   : > { %p3400_p8 = pnand %p3398_p7, %p3717_p6 }
  0x16   : > { %p3401_p9 = pneg %p3400_p8 }
  0x18   : > { %p3408_p13 = pnand %p3407_p12, %p3401_p9 }
  0x1a   : > { %3411 = shalt.err (!%p3408_p13)
}
  0x1b   : > { %3189 = dma.hbm_to_vmem [thread:$0]  (!%p3711_p5), %s4446_s3, 16, %s274_s11, [#allocation5]  }
  0x1c   : > { %s3423_s23 = scalar_lea.vmem %s296_s16, 16  ;;  %s3430_s24 = scalar_lea.vmem %s296_s16, 32 }
  0x1d   : > { %p3424_p0 = scmp.ne.s32.totalorder %s296_s16, %s3423_s23  ;;  %p3431_p7 = scmp.lt.s32.totalorder %s296_s16, %s296_s16 }
  0x1e   : > { %p3432_p8 = scmp.lt.s32.totalorder %s3430_s24, %s3423_s23 }
  0x1f   : > { %p3426_p1 = pnand %p3424_p0, %p3717_p6 }
  0x20   : > { %p3433_p2 = por %p3432_p8, %p3431_p7 }
  0x21   : > { %p3427_p4 = pneg %p3426_p1 }
  0x23   : > { %p3434_p3 = pnand %p3433_p2, %p3427_p4 }
  0x25   : > { %3437 = shalt.err (!%p3434_p3)
}
  0x26   : > { %3195 = dma.hbm_to_vmem [thread:$0]  (!%p3711_p5), %s4448_s5, 16, %s296_s16, [#allocation8]  }
  0x27   : > { %s31_s10 = sadd.s32 1, %s3588_s29  ;;  %s34_s11 = sadd.s32 1, %s3592_s30 }
  0x28   : > { %p32_p9 = scmp.ge.s32.totalorder %s31_s10, 2  ;;  %s3600_s12 = smov [#allocation2]  }
  0x29   : > { %s259_s15 = sshll.u32 %s3600_s12, 4  ;;  %s260_s15 = int_to_ptr.vmem [resolvable:$true] %s259_s15 }
  0x2a   : > { %s4468_s10 = smov (%p32_p9, %s31_s10), 0  ;;  %s4470_s11 = smov (!%p32_p9, %s34_s11), %s3592_s30 }
  0x2b   : > { %p36_p2 = scmp.ge.s32.totalorder %s4470_s11, 6  ;;  %s3449_s19 = scalar_lea.vmem %s260_s15, 256 }
  0x2c   : > { %p3450_p3 = scmp.ne.s32.totalorder %s260_s15, %s3449_s19  ;;  %p3457_p12 = scmp.lt.s32.totalorder %s260_s15, %s260_s15 }
  0x2d   : > { %p3458_p13 = scmp.lt.s32.totalorder %s3449_s19, %s3449_s19 }
  0x2e   : > { %p3452_p10 = pnand %p3450_p3, %p3717_p6 }
  0x2f   : > { %p3459_p0 = por %p3458_p13, %p3457_p12 }
  0x30   : > { %p3453_p11 = pneg %p3452_p10 }
  0x32   : > { %p3460_p1 = pnand %p3459_p0, %p3453_p11 }
  0x34   : > { %3463 = shalt.err (!%p3460_p1)
}
  0x35   : > { %s3601_s16 = smov 64   ;;  %s3602_s20 = smov 4  }
  0x36   : > { %3186 = dma.hbm_to_vmem [thread:$0]  (!%p3711_p5), %s4445_s2, 256, %s260_s15, [#allocation3], %s3601_s16, %s3601_s16, %s3602_s20  }
  0x37   : > { %s4472_s11 = smov (%p36_p2, %s4470_s11), 0  ;;  %s3603_s23 = smov [#allocation6]  }
  0x38   : > { %s284_s24 = sshll.u32 %s3603_s23, 4  ;;  %s3604_s25 = smov [#allocation9]   ;;  %s285_s24 = int_to_ptr.vmem [resolvable:$true] %s284_s24 }
  0x39   : > { %s306_s26 = sshll.u32 %s3604_s25, 4  ;;  %s3475_s12 = scalar_lea.vmem %s285_s24, 16  ;;  %s307_s26 = int_to_ptr.vmem [resolvable:$true] %s306_s26 }
  0x3a   : > { %p3476_p4 = scmp.ne.s32.totalorder %s285_s24, %s3475_s12  ;;  %s3482_s19 = scalar_lea.vmem %s285_s24, 32 }
  0x3b   : > { %p3483_p9 = scmp.lt.s32.totalorder %s285_s24, %s285_s24  ;;  %p3484_p3 = scmp.lt.s32.totalorder %s3482_s19, %s3475_s12 }
  0x3c   : > { %p3478_p7 = pnand %p3476_p4, %p3717_p6 }
  0x3d   : > { %p3485_p10 = por %p3484_p3, %p3483_p9 }
  0x3e   : > { %p3479_p8 = pneg %p3478_p7 }
  0x40   : > { %p3486_p11 = pnand %p3485_p10, %p3479_p8 }
  0x42   : > { %3489 = shalt.err (!%p3486_p11)
}
  0x43   : > { %3192 = dma.hbm_to_vmem [thread:$0]  (!%p3711_p5), %s4447_s4, 16, %s285_s24, [#allocation5]  }
  0x44   : > { %s3501_s20 = scalar_lea.vmem %s307_s26, 64  ;;  %p3509_p0 = scmp.lt.s32.totalorder %s307_s26, %s307_s26 }
  0x45   : > { %p3502_p2 = scmp.ne.s32.totalorder %s307_s26, %s3501_s20  ;;  %p3510_p1 = scmp.lt.s32.totalorder %s3501_s20, %s3501_s20 }
  0x47   : > { %p3504_p12 = pnand %p3502_p2, %p3717_p6  ;;  %p3511_p4 = por %p3510_p1, %p3509_p0 }
  0x49   : > { %p3505_p13 = pneg %p3504_p12 }
  0x4b   : > { %p3512_p7 = pnand %p3511_p4, %p3505_p13 }
  0x4d   : > { %3515 = shalt.err (!%p3512_p7)
}
  0x4e   : > { %3198 = dma.hbm_to_vmem [thread:$0]  (!%p3711_p5), %s4449_s6, 64, %s307_s26, [#allocation8]  }
  0x4f   : > { %s3605_s23 = smov [#allocation10]  }
  0x50   : > { %s317_s25 = sshll.u32 %s3605_s23, 4  ;;  %s318_s25 = int_to_ptr.vmem [resolvable:$true] %s317_s25 }
  0x51   : > { %s3527_s24 = scalar_lea.vmem %s318_s25, 16  ;;  %s3534_s12 = scalar_lea.vmem %s318_s25, 32 }
  0x52   : > { %p3528_p8 = scmp.ne.s32.totalorder %s318_s25, %s3527_s24  ;;  %p3535_p10 = scmp.lt.s32.totalorder %s318_s25, %s318_s25 }
  0x53   : > { %p3536_p11 = scmp.lt.s32.totalorder %s3534_s12, %s3527_s24 }
  0x54   : > { %p3530_p9 = pnand %p3528_p8, %p3717_p6 }
  0x55   : > { %p3537_p2 = por %p3536_p11, %p3535_p10 }
  0x56   : > { %p3531_p3 = pneg %p3530_p9 }
  0x58   : > { %p3538_p12 = pnand %p3537_p2, %p3531_p3 }
  0x5a   : > { %3541 = shalt.err (!%p3538_p12)
}
  0x5b   : > { %3201 = dma.hbm_to_vmem [thread:$0]  (!%p3711_p5), %s4450_s7, 16, %s318_s25, [#allocation11]  }
  0x5c   : > { %p4459_p13 = scmp.ne.s32.totalorder %s4456_s14, 0 }
  0x5e   : > { %350 = sbr.rel (%p4459_p13) target bundleno = 2863 (0xb2f), region = 52 }
  0x63   : > { %p4460_p0 = scmp.ne.s32.totalorder %s4455_s13, 0 }
  0x65   : > { %3563 = dma.done.wait (%p4460_p0), [#allocation3], 256  }
  0x66   : > { %3565 = vsyncadd (%p4460_p0), [#allocation3], 4294967040 }
  0x67   : > { %3567 = dma.done.wait (%p4460_p0), [#allocation5], 32  }
  0x68   : > { %3569 = vsyncadd (%p4460_p0), [#allocation5], 4294967264 }
  0x69   : > { %3571 = dma.done.wait (%p4460_p0), [#allocation8], 80  }
  0x6a   : > { %3573 = vsyncadd (%p4460_p0), [#allocation8], 4294967216 }
  0x6b   : > { %3575 = dma.done.wait (%p4460_p0), [#allocation11], 16  }
  0x6c   : > { %3577 = vsyncadd (%p4460_p0), [#allocation11], 4294967280  ;;  %s2888_s14 = sshll.u32 %s3580_s27, 2  ;;  %p417_p5 = scmp.lt.s32.totalorder %s3584_s28, 5  ;;  %v3282_v0 = vld [vmem:[#allocation2 + $0x8] sm:$0xff]   ;;  %v3283_v1 = vld [vmem:[#allocation2] sm:$0xff]  }
  0x6d   : > { %p419_p6 = scmp.lt.s32.totalorder %s2888_s14, 7  ;;  %vm478_vm0 = vcmask 261120   ;;  %3011 = vmatprep.subr.bf16.mxu0 %v3282_v0  ;;  %v2895_v4 = vld [vmem:[#allocation4] ss:$0 sm:$0xff]  ;;  %vm536_vm1 = vcmask 64512   ;;  %s3606_s27 = smov 120  }
  0x6e   : > { %s4474_s28 = smov (!%p417_p5, %s3584_s28), 5  ;;  %3012 = vmatpush3.bf16.msra.mxu0 %v3282_v0  ;;  %v3843_v37 = vld [vmem:[#allocation9] sm:$0xf]  ;;  %vm664_vm2 = vcmask 1043456   ;;  %v3855_v58 = vld [vmem:[#allocation6] ss:$0 sm:$0xff] }
  0x6f   : > { %s4476_s14 = smov (!%p419_p6, %s2888_s14), 7  ;;  %s2889_s17 = sshll.u32 %s4474_s28, 3  ;;  %3013 = vmatprep.subr.bf16.mxu0 %v3283_v1  ;;  %3139 = vmatprep.subr.msk.bf16.mxu1 %vm664_vm2, %v3843_v37  ;;  %v3849_v38 = vsel %vm664_vm2, %v3843_v37, 0  ;;  %v3857_v60 = vld [vmem:[#allocation7] ss:$0 sm:$0xff]  ;;  %vm755_vm3 = vcmask 31744  }
  0x70   : > { %s3795_s18 = sadd.s32 %s2889_s17, %s4476_s14  ;;  %3020 = vmatpush3.bf16.msra.mxu1 %v3849_v38  ;;  %s2891_s21 = sshll.u32 %s4474_s28, 2  ;;  %vm2640_vm4 = vcmask 97280   ;;  %vm2645_vm5 = vcmask 130048   ;;  %vm2650_vm6 = vcmask 162816   ;;  %vm2655_vm7 = vcmask 195584  }
  0x71   : > { %s2890_s26 = sshll.u32 %s3795_s18, 2  ;;  %s429_s25 = scalar_lea.vmem %s4444_s1, %s2891_s21  ;;  %vm2660_vm8 = vcmask 228352   ;;  %vm2669_vm9 = vcmask 293888   ;;  %vm2674_vm10 = vcmask 326656   ;;  %vm2679_vm11 = vcmask 359424  }
  0x72   : > { %s424_s13 = scalar_lea.vmem %s4443_s0, %s2890_s26  ;;  %3014 = vmatpush3.bf16.msra.mxu0 %v3283_v1  ;;  %s3607_s28 = smov 8   ;;  %vm2684_vm12 = vcmask 392192   ;;  %vm2689_vm13 = vcmask 424960   ;;  %vm2699_vm14 = vcmask 490496   ;;  %vm2694_vm15 = vcmask 457728  }
  0x73   : > { %v3284_v2 = vld [vmem:[%s424_s13] sm:$0xff]   ;;  %v3285_v3 = vld [vmem:[%s424_s13 + $0x8] sm:$0xff]   ;;  %s3608_s24 = smov 112   ;;  %s3609_s12 = smov 16  }
  0x74   : > { %3015 = vmatprep.mubr.msk.bf16.mxu0 %vm478_vm0, %v3284_v2  ;;  %s3610_s19 = smov 124   ;;  %s3611_s15 = smov 116  }
  0x75   : > { %3016 = vmatmul.mubr.msk.bf16.vlgmr.msra.gmra.mxu0 %vm478_vm0, %v3285_v3  ;;  %s3612_s14 = smov 104   ;;  %s3613_s17 = smov 24  }
  0x76   : > { %s3614_s26 = smov 4   ;;  %s3615_s16 = smov 12  }
  0x77   : > { %s3616_s20 = smov 20   ;;  %s3617_s13 = smov 28  }
  0x78   : > { %s3619_s21 = smov 36   ;;  %s3620_s22 = smov 40  }
  0x79   : > { %s3621_s23 = smov 44  }
 0x135   : > { %v3017_v5 = vpop.f32.mrf.mxu0 }
 0x136   : > { %v3803_v6 = vadd.f32 %v3017_v5, %v2895_v4 }
 0x137   : > { %v519_v7 = vpop.f32.mrf.mxu0 }
 0x138   : > { %v3805_v8 = vadd.f32 %v2895_v4, %v519_v7  ;;  %v543_v9 = vsel %vm536_vm1, %v3803_v6, 0.0 }
 0x139   : > { %544 = vadd.xlane.f32.xlu1 %v543_v9  ;;  %v3018_v10 = vpop.f32.mrf.mxu0 }
 0x13a   : > { %v3809_v11 = vadd.f32 %v3018_v10, %v2895_v4  ;;  %v537_v12 = vsel %vm536_vm1, %v3805_v8, 0.0 }
 0x13b   : > { %v522_v13 = vpop.f32.mrf.mxu0  ;;  %538 = vadd.xlane.f32.xlu0 %v537_v12 }
 0x13c   : > { %v3813_v14 = vadd.f32 %v2895_v4, %v522_v13  ;;  %v546_v15 = vsel %vm536_vm1, %v3809_v11, 0.0 }
 0x13d   : > { %547 = vadd.xlane.f32.xlu1 %v546_v15 }
 0x13e   : > { %v540_v16 = vsel %vm536_vm1, %v3813_v14, 0.0 }
 0x13f   : > { %541 = vadd.xlane.f32.xlu0 %v540_v16 }
 0x1c2   : > { %v545_v17 = vpop.xlane.xlu1 %544 }
 0x1c3   : > { %v552_v18 = vmul.f32 0.125, %v545_v17 }
 0x1c4   : > { %v539_v19 = vpop.xlane.xlu0 %538 }
 0x1c5   : > { %v550_v20 = vmul.f32 0.125, %v539_v19  ;;  %v3820_v22 = vsub.f32 %v3803_v6, %v552_v18 }
 0x1c6   : > { %v548_v21 = vpop.xlane.xlu1 %547 }
 0x1c7   : > { %v554_v23 = vsub.f32 %v3805_v8, %v550_v20  ;;  %v553_v24 = vmul.f32 0.125, %v548_v21  ;;  %v560_v31 = vmul.f32 %v3820_v22, %v3820_v22 }
 0x1c8   : > { %v542_v25 = vpop.xlane.xlu0 %541 }
 0x1c9   : > { %v551_v26 = vmul.f32 0.125, %v542_v25  ;;  %v558_v27 = vmul.f32 %v554_v23, %v554_v23  ;;  %v3824_v28 = vsub.f32 %v3809_v11, %v553_v24  ;;  %v568_v33 = vsel %vm536_vm1, %v560_v31, 0.0 }
 0x1cb   : > { %v555_v29 = vsub.f32 %v3813_v14, %v551_v26  ;;  %v562_v30 = vsel %vm536_vm1, %v558_v27, 0.0  ;;  %v561_v35 = vmul.f32 %v3824_v28, %v3824_v28 }
 0x1cc   : > { %563 = vadd.xlane.f32.xlu0 %v562_v30 }
 0x1cd   : > { %v559_v32 = vmul.f32 %v555_v29, %v555_v29  ;;  %v571_v36 = vsel %vm536_vm1, %v561_v35, 0.0 }
 0x1cf   : > { %v565_v34 = vsel %vm536_vm1, %v559_v32, 0.0 }
 0x1d0   : > { %569 = vadd.xlane.f32.xlu0 %v568_v33  ;;  %566 = vadd.xlane.f32.xlu1 %v565_v34 }
 0x1d4   : > { %572 = vadd.xlane.f32.xlu1 %v571_v36 }
 0x1e5   : > { %999 = vrot.lane.b32.xlu1 %v3813_v14, %s3606_s27 }
 0x1e6   : > { %997 = vrot.lane.b32.xlu0 %v3805_v8, %s3606_s27 }
 0x1e9   : > { %1001 = vrot.lane.b32.xlu1 %v3803_v6, %s3606_s27 }
 0x1ed   : > { %1003 = vrot.lane.b32.xlu1 %v3809_v11, %s3606_s27 }
 0x255   : > { %v564_v39 = vpop.xlane.xlu0 %563 }
 0x256   : > { %v574_v40 = vmul.f32 0.125, %v564_v39 }
 0x258   : > { %v578_v41 = vadd.f32 1e-06, %v574_v40 }
 0x259   : > { %v567_v42 = vpop.xlane.xlu1 %566  ;;  %v570_v43 = vpop.xlane.xlu0 %569 }
 0x25a   : > { %3286 = vrsqrt.f32 %v578_v41  ;;  %v575_v44 = vmul.f32 0.125, %v567_v42  ;;  %v576_v45 = vmul.f32 0.125, %v570_v43 }
 0x25c   : > { %v579_v46 = vadd.f32 1e-06, %v575_v44  ;;  %v580_v47 = vadd.f32 1e-06, %v576_v45 }
 0x25d   : > { %v573_v48 = vpop.xlane.xlu1 %572  ;;  %v998_v49 = vpop.permute.xlu0 %997 }
 0x25e   : > { %3288 = vrsqrt.f32 %v579_v46  ;;  %v577_v50 = vmul.f32 0.125, %v573_v48  ;;  %v1009_v51 = vsel %vm536_vm1, %v998_v49, 0.0 }
 0x25f   : > { %3290 = vrsqrt.f32 %v580_v47  ;;  %1010 = vadd.xlane.f32.xlu0 %v1009_v51 }
 0x260   : > { %v581_v52 = vadd.f32 1e-06, %v577_v50 }
 0x261   : > { %v1000_v53 = vpop.permute.xlu1 %999 }
 0x262   : > { %3292 = vrsqrt.f32 %v581_v52  ;;  %v1012_v54 = vsel %vm536_vm1, %v1000_v53, 0.0 }
 0x263   : > { %1013 = vadd.xlane.f32.xlu1 %v1012_v54 }
 0x265   : > { %v1002_v55 = vpop.permute.xlu1 %1001 }
 0x266   : > { %v1015_v56 = vsel %vm536_vm1, %v1002_v55, 0.0 }
 0x267   : > { %v3287_v57 = vpop.eup %3286  ;;  %1016 = vadd.xlane.f32.xlu0 %v1015_v56 }
 0x268   : > { %v586_v59 = vmul.f32 %v3287_v57, %v554_v23 }
 0x269   : > { %v1004_v61 = vpop.permute.xlu1 %1003 }
 0x26a   : > { %v597_v62 = vmul.f32 %v3855_v58, %v586_v59  ;;  %v1018_v63 = vsel %vm536_vm1, %v1004_v61, 0.0 }
 0x26b   : > { %v3289_v0 = vpop.eup %3288  ;;  %1019 = vadd.xlane.f32.xlu0 %v1018_v63 }
 0x26c   : > { %v3291_v1 = vpop.eup %3290  ;;  %v587_v2 = vmul.f32 %v3289_v0, %v555_v29  ;;  %v608_v3 = vadd.f32 %v3857_v60, %v597_v62  ;;  %v534_v62 = vld [vmem:[%s429_s25] sm:$0xf]  ;;  %s3622_s25 = smov 48  }
 0x26d   : > { %v588_v4 = vmul.f32 %v3291_v1, %v3820_v22  ;;  %v3882_v1 = vpack.c.bf16 %v534_v62, %v534_v62 }
 0x26e   : > { %v598_v5 = vmul.f32 %v3855_v58, %v587_v2  ;;  %v616_v7 = vmul.f32 0.044715, %v608_v3  ;;  %v612_v43 = vmul.f32 0.5, %v608_v3 }
 0x26f   : > { %v3293_v9 = vpop.eup %3292  ;;  %v599_v10 = vmul.f32 %v3855_v58, %v588_v4  ;;  %3140 = vmatprep.subr.msk.bf16.mxu1 %vm755_vm3, %v3882_v1  ;;  %3141 = vmatprep.subr.msk.bf16.mxu0 %vm755_vm3, %v3882_v1 }
 0x270   : > { %v589_v12 = vmul.f32 %v3293_v9, %v3824_v28  ;;  %v609_v13 = vadd.f32 %v3857_v60, %v598_v5  ;;  %v620_v15 = vmul.f32 %v616_v7, %v608_v3  ;;  %v3891_v9 = vsel %vm755_vm3, %v3882_v1, 0 }
 0x271   : > { %v610_v16 = vadd.f32 %v3857_v60, %v599_v10  ;;  %3032 = vmatpush3.bf16.xpose.msra.mxu0 %v3891_v9 }
 0x272   : > { %v600_v17 = vmul.f32 %v3855_v58, %v589_v12  ;;  %v617_v18 = vmul.f32 0.044715, %v609_v13  ;;  %v624_v19 = vmul.f32 %v620_v15, %v608_v3  ;;  %v613_v44 = vmul.f32 0.5, %v609_v13  ;;  %3143 = vmatprep.subr.msk.bf16.mxu0 %vm755_vm3, %v3882_v1 }
 0x273   : > { %v618_v20 = vmul.f32 0.044715, %v610_v16  ;;  %v614_v51 = vmul.f32 0.5, %v610_v16 }
 0x274   : > { %v611_v21 = vadd.f32 %v3857_v60, %v600_v17  ;;  %v621_v22 = vmul.f32 %v617_v18, %v609_v13  ;;  %v628_v23 = vadd.f32 %v624_v19, %v608_v3  ;;  %v3916_v18 = vld [vmem:[#allocation10] ss:$0 sm:$0xff] }
 0x275   : > { %v622_v24 = vmul.f32 %v618_v20, %v610_v16 }
 0x276   : > { %v625_v25 = vmul.f32 %v621_v22, %v609_v13  ;;  %v632_v26 = vmul.f32 0.7978846, %v628_v23  ;;  %v619_v27 = vmul.f32 0.044715, %v611_v21  ;;  %v615_v52 = vmul.f32 0.5, %v611_v21 }
 0x277   : > { %v626_v29 = vmul.f32 %v622_v24, %v610_v16 }
 0x278   : > { %v629_v28 = vadd.f32 %v625_v25, %v609_v13  ;;  %3294 = vtanh.f32 %v632_v26  ;;  %v623_v30 = vmul.f32 %v619_v27, %v611_v21 }
 0x279   : > { %v630_v31 = vadd.f32 %v626_v29, %v610_v16 }
 0x27a   : > { %v633_v32 = vmul.f32 0.7978846, %v629_v28  ;;  %v627_v33 = vmul.f32 %v623_v30, %v611_v21 }
 0x27b   : > { %v634_v34 = vmul.f32 0.7978846, %v630_v31 }
 0x27c   : > { %3296 = vtanh.f32 %v633_v32  ;;  %v631_v35 = vadd.f32 %v627_v33, %v611_v21 }
 0x27d   : > { %3298 = vtanh.f32 %v634_v34 }
 0x27e   : > { %v635_v36 = vmul.f32 0.7978846, %v631_v35 }
 0x280   : > { %3300 = vtanh.f32 %v635_v36 }
 0x285   : > { %v3295_v39 = vpop.eup %3294 }
 0x286   : > { %v640_v40 = vadd.f32 1.0, %v3295_v39 }
 0x288   : > { %v644_v46 = vmul.f32 %v640_v40, %v612_v43 }
 0x289   : > { %v3297_v41 = vpop.eup %3296 }
 0x28a   : > { %v3299_v42 = vpop.eup %3298  ;;  %v641_v45 = vadd.f32 1.0, %v3297_v41 }
 0x28b   : > { %v642_v48 = vadd.f32 1.0, %v3299_v42 }
 0x28c   : > { %v645_v47 = vmul.f32 %v641_v45, %v613_v44 }
 0x28d   : > { %v3301_v49 = vpop.eup %3300  ;;  %v646_v54 = vmul.f32 %v642_v48, %v614_v51 }
 0x28e   : > { %v648_v50 = vpack.c.bf16 %v645_v47, %v644_v46  ;;  %v643_v53 = vadd.f32 1.0, %v3301_v49 }
 0x290   : > { %3021 = vmatprep.mubr.msk.bf16.mxu1 %vm536_vm1, %v648_v50  ;;  %v647_v55 = vmul.f32 %v643_v53, %v615_v52 }
 0x292   : > { %v649_v56 = vpack.c.bf16 %v647_v55, %v646_v54 }
 0x294   : > { %3022 = vmatmul.mubr.msk.bf16.vlgmr.msra.gmra.mxu1 %vm536_vm1, %v649_v56 }
 0x295   : > { %3026 = vmatpush3.bf16.xpose.msra.mxu1 %v3891_v9 }
 0x296   : > { %3142 = vmatprep.subr.msk.bf16.mxu1 %vm755_vm3, %v3882_v1 }
 0x2e8   : > { %v1011_v57 = vpop.xlane.xlu0 %1010 }
 0x2e9   : > { %v1021_v59 = vmul.f32 0.125, %v1011_v57 }
 0x2eb   : > { %v3877_v61 = vsub.f32 %v3805_v8, %v1021_v59 }
 0x2ec   : > { %v1014_v0 = vpop.xlane.xlu1 %1013 }
 0x2ed   : > { %v1029_v63 = vmul.f32 %v3877_v61, %v3877_v61  ;;  %v1022_v3 = vmul.f32 0.125, %v1014_v0 }
 0x2ef   : > { %1037 = vrot.lane.b32.xlu0 %v1029_v63, %s3606_s27  ;;  %v3896_v10 = vsub.f32 %v3813_v14, %v1022_v3 }
 0x2f0   : > { %v1017_v2 = vpop.xlane.xlu0 %1016 }
 0x2f1   : > { %v1023_v4 = vmul.f32 0.125, %v1017_v2  ;;  %v1030_v16 = vmul.f32 %v3896_v10, %v3896_v10 }
 0x2f3   : > { %v3885_v5 = vsub.f32 %v3803_v6, %v1023_v4 }
 0x2f4   : > { %v1020_v7 = vpop.xlane.xlu0 %1019 }
 0x2f5   : > { %v1024_v12 = vmul.f32 0.125, %v1020_v7  ;;  %v1031_v13 = vmul.f32 %v3885_v5, %v3885_v5 }
 0x2f7   : > { %1041 = vrot.lane.b32.xlu1 %v1031_v13, %s3606_s27  ;;  %v3908_v15 = vsub.f32 %v3809_v11, %v1024_v12 }
 0x2f9   : > { %v1032_v17 = vmul.f32 %v3908_v15, %v3908_v15 }
 0x2fb   : > { %1039 = vrot.lane.b32.xlu1 %v1030_v16, %s3606_s27 }
 0x2ff   : > { %1043 = vrot.lane.b32.xlu1 %v1032_v17, %s3606_s27 }
 0x354   : > { %v3023_v19 = vpop.f32.mrf.mxu1 }
 0x355   : > { %v711_v20 = vadd.f32 %v3023_v19, %v3916_v18 }
 0x356   : > { %v702_v21 = vpop.f32.mrf.mxu1 }
 0x357   : > { %v723_v22 = vmul.f32 0.044715, %v711_v20  ;;  %v703_v23 = vadd.f32 %v3916_v18, %v702_v21  ;;  %v719_v16 = vmul.f32 0.5, %v711_v20 }
 0x358   : > { %v3024_v24 = vpop.f32.mrf.mxu1 }
 0x359   : > { %v727_v25 = vmul.f32 %v723_v22, %v711_v20  ;;  %v721_v26 = vmul.f32 0.044715, %v703_v23  ;;  %v714_v27 = vadd.f32 %v3024_v24, %v3916_v18  ;;  %v717_v7 = vmul.f32 0.5, %v703_v23 }
 0x35a   : > { %v705_v29 = vpop.f32.mrf.mxu1 }
 0x35b   : > { %v731_v28 = vmul.f32 %v727_v25, %v711_v20  ;;  %v725_v30 = vmul.f32 %v721_v26, %v703_v23  ;;  %v724_v31 = vmul.f32 0.044715, %v714_v27  ;;  %v706_v32 = vadd.f32 %v3916_v18, %v705_v29 }
 0x35c   : > { %v720_v3 = vmul.f32 0.5, %v714_v27 }
 0x35d   : > { %v735_v33 = vadd.f32 %v731_v28, %v711_v20  ;;  %v729_v34 = vmul.f32 %v725_v30, %v703_v23  ;;  %v728_v35 = vmul.f32 %v724_v31, %v714_v27  ;;  %v722_v36 = vmul.f32 0.044715, %v706_v32 }
 0x35e   : > { %v718_v12 = vmul.f32 0.5, %v706_v32 }
 0x35f   : > { %v739_v39 = vmul.f32 0.7978846, %v735_v33  ;;  %v733_v40 = vadd.f32 %v729_v34, %v703_v23  ;;  %v732_v41 = vmul.f32 %v728_v35, %v714_v27  ;;  %v726_v42 = vmul.f32 %v722_v36, %v706_v32 }
 0x361   : > { %v737_v43 = vmul.f32 0.7978846, %v733_v40  ;;  %v736_v44 = vadd.f32 %v732_v41, %v714_v27  ;;  %v730_v45 = vmul.f32 %v726_v42, %v706_v32  ;;  %3302 = vtanh.f32 %v739_v39  ;;  %v1038_v51 = vpop.permute.xlu0 %1037 }
 0x362   : > { %v1049_v54 = vsel %vm536_vm1, %v1038_v51, 0.0 }
 0x363   : > { %v740_v46 = vmul.f32 0.7978846, %v736_v44  ;;  %3304 = vtanh.f32 %v737_v43  ;;  %v734_v47 = vadd.f32 %v730_v45, %v706_v32 }
 0x365   : > { %3306 = vtanh.f32 %v740_v46  ;;  %v738_v48 = vmul.f32 0.7978846, %v734_v47 }
 0x367   : > { %3308 = vtanh.f32 %v738_v48 }
 0x369   : > { %v1042_v49 = vpop.permute.xlu1 %1041 }
 0x36a   : > { %v1055_v50 = vsel %vm536_vm1, %v1042_v49, 0.0 }
 0x36b   : > { %1056 = vadd.xlane.f32.xlu0 %v1055_v50 }
 0x36d   : > { %v1040_v52 = vpop.permute.xlu1 %1039 }
 0x36e   : > { %v1052_v53 = vsel %vm536_vm1, %v1040_v52, 0.0  ;;  %v3303_v55 = vpop.eup %3302 }
 0x36f   : > { %1053 = vadd.xlane.f32.xlu1 %v1052_v53  ;;  %1050 = vadd.xlane.f32.xlu0 %v1049_v54  ;;  %v747_v4 = vadd.f32 1.0, %v3303_v55 }
 0x370   : > { %v3305_v56 = vpop.eup %3304 }
 0x371   : > { %v1044_v57 = vpop.permute.xlu1 %1043  ;;  %v745_v0 = vadd.f32 1.0, %v3305_v56  ;;  %v751_v22 = vmul.f32 %v747_v4, %v719_v16 }
 0x372   : > { %v3307_v59 = vpop.eup %3306  ;;  %v1058_v62 = vsel %vm536_vm1, %v1044_v57, 0.0 }
 0x373   : > { %1059 = vadd.xlane.f32.xlu0 %v1058_v62  ;;  %v748_v63 = vadd.f32 1.0, %v3307_v59  ;;  %v749_v19 = vmul.f32 %v745_v0, %v717_v7 }
 0x374   : > { %v3309_v2 = vpop.eup %3308 }
 0x375   : > { %v746_v13 = vadd.f32 1.0, %v3309_v2  ;;  %v752_v17 = vmul.f32 %v748_v63, %v720_v3 }
 0x377   : > { %v750_v21 = vmul.f32 %v746_v13, %v718_v12  ;;  %v3928_v25 = vpack.c.bf16 %v752_v17, %v751_v22 }
 0x379   : > { %v3926_v24 = vpack.c.bf16 %v750_v21, %v749_v19 }
 0x37b   : > { %3027 = vmatprep.mubr.msk.bf16.mxu1 %vm755_vm3, %v3926_v24 }
 0x37c   : > { %3028 = vmatmul.mubr.msk.bf16.vlgmr.msra.gmra.mxu1 %vm755_vm3, %v3928_v25 }
 0x37d   : > { %3038 = vmatpush3.bf16.xpose.msra.mxu1 %v3891_v9 }
 0x37e   : > { %3144 = vmatprep.subr.msk.bf16.mxu1 %vm664_vm2, %v3843_v37 }
 0x380   : > { %1084 = vrot.lane.b32.xlu1 %v3857_v60, %s3607_s28 }
 0x384   : > { %1462 = vrot.lane.b32.xlu1 %v3805_v8, %s3608_s24 }
 0x388   : > { %1464 = vrot.lane.b32.xlu1 %v3813_v14, %s3608_s24 }
 0x389   : > { %1077 = vrot.lane.b32.xlu0 %v3855_v58, %s3607_s28 }
 0x38c   : > { %1468 = vrot.lane.b32.xlu1 %v3809_v11, %s3608_s24 }
 0x38d   : > { %1466 = vrot.lane.b32.xlu0 %v3803_v6, %s3608_s24 }
 0x390   : > { %877 = vrot.lane.b32.xlu1 %v3928_v25, %s3606_s27 }
 0x391   : > { %875 = vrot.lane.b32.xlu0 %v3926_v24, %s3606_s27 }
 0x3f4   : > { %v1057_v20 = vpop.xlane.xlu0 %1056 }
 0x3f5   : > { %v1063_v23 = vmul.f32 0.125, %v1057_v20 }
 0x3f7   : > { %v1067_v26 = vadd.f32 1e-06, %v1063_v23 }
 0x3f8   : > { %v1054_v27 = vpop.xlane.xlu1 %1053  ;;  %v1051_v29 = vpop.xlane.xlu0 %1050 }
 0x3f9   : > { %3310 = vrsqrt.f32 %v1067_v26  ;;  %v1062_v28 = vmul.f32 0.125, %v1054_v27  ;;  %v1061_v30 = vmul.f32 0.125, %v1051_v29 }
 0x3fb   : > { %v1066_v31 = vadd.f32 1e-06, %v1062_v28  ;;  %v1065_v32 = vadd.f32 1e-06, %v1061_v30 }
 0x3fc   : > { %v1085_v33 = vpop.permute.xlu1 %1084  ;;  %v1060_v34 = vpop.xlane.xlu0 %1059 }
 0x3fd   : > { %3312 = vrsqrt.f32 %v1066_v31  ;;  %v1064_v35 = vmul.f32 0.125, %v1060_v34 }
 0x3fe   : > { %3314 = vrsqrt.f32 %v1065_v32 }
 0x3ff   : > { %v1068_v36 = vadd.f32 1e-06, %v1064_v35 }
 0x400   : > { %v3953_v39 = vpop.permute.xlu1 %1462  ;;  %v1078_v40 = vpop.permute.xlu0 %1077 }
 0x401   : > { %3316 = vrsqrt.f32 %v1068_v36 }
 0x404   : > { %v3955_v41 = vpop.permute.xlu1 %1464  ;;  %v3957_v42 = vpop.permute.xlu0 %1466 }
 0x406   : > { %v3311_v43 = vpop.eup %3310 }
 0x407   : > { %v1075_v44 = vmul.f32 %v3311_v43, %v3885_v5 }
 0x408   : > { %v3960_v45 = vpop.permute.xlu1 %1468  ;;  %v876_v46 = vpop.permute.xlu0 %875 }
 0x409   : > { %v1082_v47 = vmul.f32 %v1078_v40, %v1075_v44  ;;  %3039 = vmatprep.mubr.msk.bf16.mxu1 %vm755_vm3, %v876_v46 }
 0x40a   : > { %v3313_v48 = vpop.eup %3312 }
 0x40b   : > { %v3315_v49 = vpop.eup %3314  ;;  %v1074_v50 = vmul.f32 %v3313_v48, %v3896_v10  ;;  %v1089_v51 = vadd.f32 %v1085_v33, %v1082_v47 }
 0x40c   : > { %v1073_v52 = vmul.f32 %v3315_v49, %v3877_v61  ;;  %v878_v53 = vpop.permute.xlu1 %877 }
 0x40d   : > { %v1081_v54 = vmul.f32 %v1078_v40, %v1074_v50  ;;  %3040 = vmatmul.mubr.msk.bf16.vlgmr.msra.gmra.mxu1 %vm755_vm3, %v878_v53  ;;  %v1097_v55 = vmul.f32 0.044715, %v1089_v51  ;;  %v1093_v46 = vmul.f32 0.5, %v1089_v51 }
 0x40e   : > { %v3317_v56 = vpop.eup %3316  ;;  %v1080_v5 = vmul.f32 %v1078_v40, %v1073_v52  ;;  %3050 = vmatpush3.bf16.msra.mxu1 %v3849_v38 }
 0x40f   : > { %v1076_v57 = vmul.f32 %v3317_v56, %v3908_v15  ;;  %v1088_v59 = vadd.f32 %v1085_v33, %v1081_v54  ;;  %v1101_v62 = vmul.f32 %v1097_v55, %v1089_v51  ;;  %3146 = vmatprep.subr.msk.bf16.mxu1 %vm755_vm3, %v3882_v1  ;;  %v1474_v54 = vsel %vm536_vm1, %v3953_v39, 0.0 }
 0x410   : > { %v1087_v10 = vadd.f32 %v1085_v33, %v1080_v5  ;;  %v1480_v55 = vsel %vm536_vm1, %v3957_v42, 0.0  ;;  %v1477_v56 = vsel %vm536_vm1, %v3955_v41, 0.0 }
 0x411   : > { %v1083_v63 = vmul.f32 %v1078_v40, %v1076_v57  ;;  %v1096_v0 = vmul.f32 0.044715, %v1088_v59  ;;  %v1105_v61 = vmul.f32 %v1101_v62, %v1089_v51  ;;  %v1092_v32 = vmul.f32 0.5, %v1088_v59 }
 0x412   : > { %v1095_v2 = vmul.f32 0.044715, %v1087_v10  ;;  %v1091_v34 = vmul.f32 0.5, %v1087_v10 }
 0x413   : > { %v1090_v3 = vadd.f32 %v1085_v33, %v1083_v63  ;;  %v1100_v4 = vmul.f32 %v1096_v0, %v1088_v59  ;;  %v1109_v7 = vadd.f32 %v1105_v61, %v1089_v51  ;;  %v1483_v51 = vsel %vm536_vm1, %v3960_v45, 0.0 }
 0x414   : > { %v1099_v12 = vmul.f32 %v1095_v2, %v1087_v10 }
 0x415   : > { %v1104_v13 = vmul.f32 %v1100_v4, %v1088_v59  ;;  %v1098_v16 = vmul.f32 0.044715, %v1090_v3  ;;  %v1113_v19 = vmul.f32 0.7978846, %v1109_v7  ;;  %v1094_v47 = vmul.f32 0.5, %v1090_v3 }
 0x416   : > { %v1103_v17 = vmul.f32 %v1099_v12, %v1087_v10 }
 0x417   : > { %v1108_v21 = vadd.f32 %v1104_v13, %v1088_v59  ;;  %v1102_v15 = vmul.f32 %v1098_v16, %v1090_v3  ;;  %3318 = vtanh.f32 %v1113_v19 }
 0x418   : > { %v1107_v22 = vadd.f32 %v1103_v17, %v1087_v10 }
 0x419   : > { %v1112_v20 = vmul.f32 0.7978846, %v1108_v21  ;;  %v1106_v23 = vmul.f32 %v1102_v15, %v1090_v3 }
 0x41a   : > { %v1111_v26 = vmul.f32 0.7978846, %v1107_v22 }
 0x41b   : > { %3320 = vtanh.f32 %v1112_v20  ;;  %v1110_v27 = vadd.f32 %v1106_v23, %v1090_v3 }
 0x41c   : > { %3322 = vtanh.f32 %v1111_v26 }
 0x41d   : > { %v1114_v29 = vmul.f32 0.7978846, %v1110_v27 }
 0x41f   : > { %3324 = vtanh.f32 %v1114_v29 }
 0x424   : > { %v3319_v28 = vpop.eup %3318 }
 0x425   : > { %v1121_v40 = vadd.f32 1.0, %v3319_v28 }
 0x427   : > { %v1125_v50 = vmul.f32 %v1121_v40, %v1093_v46 }
 0x428   : > { %v3321_v30 = vpop.eup %3320 }
 0x429   : > { %v3323_v31 = vpop.eup %3322  ;;  %v1120_v33 = vadd.f32 1.0, %v3321_v30 }
 0x42a   : > { %v1119_v35 = vadd.f32 1.0, %v3323_v31 }
 0x42b   : > { %v1124_v36 = vmul.f32 %v1120_v33, %v1092_v32 }
 0x42c   : > { %v3325_v43 = vpop.eup %3324  ;;  %v1123_v44 = vmul.f32 %v1119_v35, %v1091_v34 }
 0x42d   : > { %v1122_v48 = vadd.f32 1.0, %v3325_v43 }
 0x42e   : > { %v1127_v49 = vpack.c.bf16 %v1124_v36, %v1123_v44 }
 0x42f   : > { %v1126_v52 = vmul.f32 %v1122_v48, %v1094_v47 }
 0x430   : > { %1131 = vrot.lane.b32.xlu0 %v1127_v49, %s3606_s27 }
 0x431   : > { %v1128_v53 = vpack.c.bf16 %v1126_v52, %v1125_v50 }
 0x433   : > { %1133 = vrot.lane.b32.xlu1 %v1128_v53, %s3606_s27 }
 0x43c   : > { %v4009_v16 = vpop.f32.mrf.mxu1 }
 0x43d   : > { %4461 = vst [vmem:[#allocation16_spill] sm:$0xff] %v4009_v16 }
 0x43e   : > { %v4011_v17 = vpop.f32.mrf.mxu1 }
 0x440   : > { %v4013_v21 = vpop.f32.mrf.mxu1 }
 0x442   : > { %v4016_v22 = vpop.f32.mrf.mxu1 }
 0x44f   : > { %1475 = vadd.xlane.f32.xlu0 %v1474_v54 }
 0x453   : > { %1481 = vadd.xlane.f32.xlu0 %v1480_v55 }
 0x457   : > { %1484 = vadd.xlane.f32.xlu0 %v1483_v51  ;;  %1478 = vadd.xlane.f32.xlu1 %v1477_v56 }
 0x4a2   : > { %v1132_v5 = vpop.permute.xlu0 %1131 }
 0x4a3   : > { %3051 = vmatprep.mubr.msk.bf16.mxu1 %vm536_vm1, %v1132_v5 }
 0x4a5   : > { %v1134_v57 = vpop.permute.xlu1 %1133 }
 0x4a6   : > { %3052 = vmatmul.mubr.msk.bf16.vlgmr.msra.gmra.mxu1 %vm536_vm1, %v1134_v57 }
 0x4a7   : > { %3062 = vmatpush3.bf16.xpose.msra.mxu1 %v3891_v9 }
 0x4a8   : > { %3148 = vmatprep.subr.msk.bf16.mxu1 %vm755_vm3, %v3882_v1 }
 0x4cd   : > { %v4018_v20 = vpop.f32.mrf.mxu1 }
 0x4cf   : > { %v4021_v27 = vpop.f32.mrf.mxu1 }
 0x4d1   : > { %v4024_v30 = vpop.f32.mrf.mxu1 }
 0x4d3   : > { %v4027_v33 = vpop.f32.mrf.mxu1 }
 0x4d8   : > { %v1476_v39 = vpop.xlane.xlu0 %1475 }
 0x4d9   : > { %v1486_v42 = vmul.f32 0.125, %v1476_v39 }
 0x4db   : > { %v3986_v45 = vsub.f32 %v3805_v8, %v1486_v42 }
 0x4dc   : > { %v1482_v59 = vpop.xlane.xlu0 %1481 }
 0x4dd   : > { %v1494_v41 = vmul.f32 %v3986_v45, %v3986_v45  ;;  %v1488_v10 = vmul.f32 0.125, %v1482_v59 }
 0x4df   : > { %1502 = vrot.lane.b32.xlu0 %v1494_v41, %s3608_s24  ;;  %v3995_v2 = vsub.f32 %v3803_v6, %v1488_v10 }
 0x4e0   : > { %v1479_v62 = vpop.xlane.xlu1 %1478  ;;  %v1485_v0 = vpop.xlane.xlu0 %1484 }
 0x4e1   : > { %v1487_v63 = vmul.f32 0.125, %v1479_v62  ;;  %v1489_v3 = vmul.f32 0.125, %v1485_v0  ;;  %v1496_v12 = vmul.f32 %v3995_v2, %v3995_v2 }
 0x4e3   : > { %v3992_v61 = vsub.f32 %v3813_v14, %v1487_v63  ;;  %v4001_v7 = vsub.f32 %v3809_v11, %v1489_v3 }
 0x4e5   : > { %v1495_v4 = vmul.f32 %v3992_v61, %v3992_v61  ;;  %v1497_v13 = vmul.f32 %v4001_v7, %v4001_v7 }
 0x4e7   : > { %1504 = vrot.lane.b32.xlu1 %v1495_v4, %s3608_s24 }
 0x4eb   : > { %1506 = vrot.lane.b32.xlu1 %v1496_v12, %s3608_s24 }
 0x4ef   : > { %1508 = vrot.lane.b32.xlu1 %v1497_v13, %s3608_s24 }
 0x551   : > { %v1503_v19 = vpop.permute.xlu0 %1502 }
 0x552   : > { %v1514_v15 = vsel %vm536_vm1, %v1503_v19, 0.0 }
 0x553   : > { %1515 = vadd.xlane.f32.xlu0 %v1514_v15 }
 0x559   : > { %v1505_v23 = vpop.permute.xlu1 %1504 }
 0x55a   : > { %v1517_v26 = vsel %vm536_vm1, %v1505_v23, 0.0 }
 0x55b   : > { %1518 = vadd.xlane.f32.xlu1 %v1517_v26 }
 0x55d   : > { %v1507_v29 = vpop.permute.xlu1 %1506 }
 0x55e   : > { %v1520_v28 = vsel %vm536_vm1, %v1507_v29, 0.0 }
 0x55f   : > { %1521 = vadd.xlane.f32.xlu0 %v1520_v28 }
 0x561   : > { %v1509_v31 = vpop.permute.xlu1 %1508 }
 0x562   : > { %v1523_v32 = vsel %vm536_vm1, %v1509_v31, 0.0 }
 0x563   : > { %1524 = vadd.xlane.f32.xlu0 %v1523_v32 }
 0x566   : > { %v3053_v34 = vpop.f32.mrf.mxu1 }
 0x567   : > { %v1184_v35 = vadd.f32 %v3053_v34, %v3916_v18 }
 0x568   : > { %v1175_v36 = vpop.f32.mrf.mxu1 }
 0x569   : > { %v1196_v40 = vmul.f32 0.044715, %v1184_v35  ;;  %v1176_v43 = vadd.f32 %v3916_v18, %v1175_v36 }
 0x56a   : > { %v3054_v44 = vpop.f32.mrf.mxu1 }
 0x56b   : > { %v1200_v46 = vmul.f32 %v1196_v40, %v1184_v35  ;;  %v1194_v47 = vmul.f32 0.044715, %v1176_v43  ;;  %v1187_v48 = vadd.f32 %v3054_v44, %v3916_v18  ;;  %v1190_v26 = vmul.f32 0.5, %v1176_v43 }
 0x56c   : > { %v1178_v49 = vpop.f32.mrf.mxu1  ;;  %1549 = vrot.lane.b32.xlu1 %v3857_v60, %s3609_s12 }
 0x56d   : > { %v1204_v50 = vmul.f32 %v1200_v46, %v1184_v35  ;;  %v1198_v52 = vmul.f32 %v1194_v47, %v1176_v43  ;;  %v1197_v53 = vmul.f32 0.044715, %v1187_v48  ;;  %v1179_v54 = vadd.f32 %v3916_v18, %v1178_v49 }
 0x56e   : > { %v1193_v13 = vmul.f32 0.5, %v1187_v48 }
 0x56f   : > { %v1208_v55 = vadd.f32 %v1204_v50, %v1184_v35  ;;  %v1202_v51 = vmul.f32 %v1198_v52, %v1176_v43  ;;  %v1201_v56 = vmul.f32 %v1197_v53, %v1187_v48  ;;  %v1195_v5 = vmul.f32 0.044715, %v1179_v54 }
 0x570   : > { %816 = vrot.lane.b32.xlu1 %v3926_v24, %s3610_s19  ;;  %v1191_v28 = vmul.f32 0.5, %v1179_v54 }
 0x571   : > { %v1212_v57 = vmul.f32 0.7978846, %v1208_v55  ;;  %v1206_v39 = vadd.f32 %v1202_v51, %v1176_v43  ;;  %v1205_v42 = vmul.f32 %v1201_v56, %v1187_v48  ;;  %v1199_v59 = vmul.f32 %v1195_v5, %v1179_v54 }
 0x573   : > { %3326 = vtanh.f32 %v1212_v57  ;;  %v1210_v41 = vmul.f32 0.7978846, %v1206_v39  ;;  %v1209_v60 = vadd.f32 %v1205_v42, %v1187_v48  ;;  %v1203_v62 = vmul.f32 %v1199_v59, %v1179_v54 }
 0x574   : > { %818 = vrot.lane.b32.xlu1 %v3928_v25, %s3610_s19 }
 0x575   : > { %3328 = vtanh.f32 %v1210_v41  ;;  %v1213_v10 = vmul.f32 0.7978846, %v1209_v60  ;;  %v1207_v63 = vadd.f32 %v1203_v62, %v1179_v54 }
 0x577   : > { %3330 = vtanh.f32 %v1213_v10  ;;  %v1211_v0 = vmul.f32 0.7978846, %v1207_v63 }
 0x578   : > { %936 = vrot.lane.b32.xlu1 %v3928_v25, %s3611_s15 }
 0x579   : > { %3332 = vtanh.f32 %v1211_v0  ;;  %1542 = vrot.lane.b32.xlu0 %v3855_v58, %s3609_s12  ;;  %v1192_v58 = vmul.f32 0.5, %v1184_v35 }
 0x57c   : > { %1929 = vrot.lane.b32.xlu1 %v3813_v14, %s3612_s14 }
 0x57d   : > { %934 = vrot.lane.b32.xlu0 %v3926_v24, %s3611_s15 }
 0x580   : > { %v3327_v3 = vpop.eup %3326  ;;  %1933 = vrot.lane.b32.xlu1 %v3809_v11, %s3612_s14 }
 0x581   : > { %1927 = vrot.lane.b32.xlu0 %v3805_v8, %s3612_s14  ;;  %v1220_v25 = vadd.f32 1.0, %v3327_v3 }
 0x582   : > { %v3329_v4 = vpop.eup %3328 }
 0x583   : > { %v1218_v15 = vadd.f32 1.0, %v3329_v4  ;;  %v1224_v24 = vmul.f32 %v1220_v25, %v1192_v58 }
 0x584   : > { %v3331_v12 = vpop.eup %3330 }
 0x585   : > { %1931 = vrot.lane.b32.xlu0 %v3803_v6, %s3612_s14  ;;  %v1221_v19 = vadd.f32 1.0, %v3331_v12  ;;  %v1222_v34 = vmul.f32 %v1218_v15, %v1190_v26 }
 0x586   : > { %v3333_v23 = vpop.eup %3332 }
 0x587   : > { %v1225_v29 = vmul.f32 %v1221_v19, %v1193_v13  ;;  %v1219_v31 = vadd.f32 1.0, %v3333_v23 }
 0x589   : > { %v4053_v32 = vpack.c.bf16 %v1225_v29, %v1224_v24  ;;  %v1223_v36 = vmul.f32 %v1219_v31, %v1191_v28 }
 0x58b   : > { %1346 = vrot.lane.b32.xlu1 %v4053_v32, %s3606_s27  ;;  %v4057_v40 = vpack.c.bf16 %v1223_v36, %v1222_v34 }
 0x58d   : > { %1344 = vrot.lane.b32.xlu0 %v4057_v40, %s3606_s27 }
 0x5dc   : > { %v1516_v35 = vpop.xlane.xlu0 %1515 }
 0x5dd   : > { %v1526_v44 = vmul.f32 0.125, %v1516_v35 }
 0x5df   : > { %v1530_v46 = vadd.f32 1e-06, %v1526_v44 }
 0x5e1   : > { %3334 = vrsqrt.f32 %v1530_v46 }
 0x5e4   : > { %v1519_v43 = vpop.xlane.xlu1 %1518 }
 0x5e5   : > { %v1527_v47 = vmul.f32 0.125, %v1519_v43 }
 0x5e7   : > { %v1531_v48 = vadd.f32 1e-06, %v1527_v47 }
 0x5e8   : > { %v1550_v49 = vpop.permute.xlu1 %1549  ;;  %v1522_v50 = vpop.xlane.xlu0 %1521 }
 0x5e9   : > { %3336 = vrsqrt.f32 %v1531_v48  ;;  %v1528_v52 = vmul.f32 0.125, %v1522_v50 }
 0x5eb   : > { %v1532_v53 = vadd.f32 1e-06, %v1528_v52 }
 0x5ec   : > { %v817_v54 = vpop.permute.xlu1 %816  ;;  %v1525_v55 = vpop.xlane.xlu0 %1524 }
 0x5ed   : > { %3338 = vrsqrt.f32 %v1532_v53  ;;  %v1529_v51 = vmul.f32 0.125, %v1525_v55  ;;  %3033 = vmatprep.mubr.msk.bf16.mxu0 %vm755_vm3, %v817_v54 }
 0x5ee   : > { %v3335_v56 = vpop.eup %3334 }
 0x5ef   : > { %v1533_v5 = vadd.f32 1e-06, %v1529_v51  ;;  %v1538_v57 = vmul.f32 %v3335_v56, %v3986_v45 }
 0x5f0   : > { %v819_v39 = vpop.permute.xlu1 %818  ;;  %v1543_v42 = vpop.permute.xlu0 %1542 }
 0x5f1   : > { %3340 = vrsqrt.f32 %v1533_v5  ;;  %v1545_v59 = vmul.f32 %v1543_v42, %v1538_v57  ;;  %3034 = vmatmul.mubr.msk.bf16.vlgmr.msra.gmra.mxu0 %vm755_vm3, %v819_v39 }
 0x5f2   : > { %3044 = vmatpush3.bf16.xpose.msra.mxu0 %v3891_v9 }
 0x5f3   : > { %v1552_v41 = vadd.f32 %v1550_v49, %v1545_v59  ;;  %3145 = vmatprep.subr.msk.bf16.mxu0 %vm755_vm3, %v3882_v1 }
 0x5f4   : > { %v935_v60 = vpop.permute.xlu0 %934  ;;  %v937_v63 = vpop.permute.xlu1 %936 }
 0x5f5   : > { %3045 = vmatprep.mubr.msk.bf16.mxu0 %vm755_vm3, %v935_v60  ;;  %v1560_v62 = vmul.f32 0.044715, %v1552_v41 }
 0x5f6   : > { %v3337_v10 = vpop.eup %3336 }
 0x5f7   : > { %v1539_v45 = vmul.f32 %v3337_v10, %v3992_v61  ;;  %v1564_v0 = vmul.f32 %v1560_v62, %v1552_v41 }
 0x5f8   : > { %v4069_v3 = vpop.permute.xlu0 %1927  ;;  %v4078_v19 = vpop.permute.xlu1 %1929 }
 0x5f9   : > { %v1546_v4 = vmul.f32 %v1543_v42, %v1539_v45  ;;  %3046 = vmatmul.mubr.msk.bf16.vlgmr.msra.gmra.mxu0 %vm755_vm3, %v937_v63  ;;  %v1568_v25 = vmul.f32 %v1564_v0, %v1552_v41 }
 0x5fa   : > { %v3339_v12 = vpop.eup %3338  ;;  %3056 = vmatpush3.bf16.xpose.msra.mxu0 %v3891_v9  ;;  %3057 = vmatprep.mubr.msk.bf16.mxu0 %vm755_vm3, %v4057_v40 }
 0x5fb   : > { %v1540_v58 = vmul.f32 %v3339_v12, %v3995_v2  ;;  %v1553_v13 = vadd.f32 %v1550_v49, %v1546_v4  ;;  %3147 = vmatprep.subr.msk.bf16.mxu0 %vm755_vm3, %v3882_v1  ;;  %v1572_v61 = vadd.f32 %v1568_v25, %v1552_v41 }
 0x5fc   : > { %v1932_v15 = vpop.permute.xlu0 %1931  ;;  %v1934_v46 = vpop.permute.xlu1 %1933 }
 0x5fd   : > { %v1547_v23 = vmul.f32 %v1543_v42, %v1540_v58  ;;  %v1561_v26 = vmul.f32 0.044715, %v1553_v13  ;;  %v1576_v34 = vmul.f32 0.7978846, %v1572_v61  ;;  %v1557_v59 = vmul.f32 0.5, %v1553_v13 }
 0x5fe   : > { %v3341_v24 = vpop.eup %3340 }
 0x5ff   : > { %v1541_v29 = vmul.f32 %v3341_v24, %v4001_v7  ;;  %v1554_v28 = vadd.f32 %v1550_v49, %v1547_v23  ;;  %v1565_v31 = vmul.f32 %v1561_v26, %v1553_v13  ;;  %3342 = vtanh.f32 %v1576_v34 }
 0x600   : > { %v1345_v36 = vpop.permute.xlu0 %1344  ;;  %v1347_v55 = vpop.permute.xlu1 %1346  ;;  %v1948_v24 = vsel %vm536_vm1, %v1934_v46, 0.0 }
 0x601   : > { %v1548_v35 = vmul.f32 %v1543_v42, %v1541_v29  ;;  %3058 = vmatmul.mubr.msk.bf16.vlgmr.msra.gmra.mxu0 %vm755_vm3, %v4053_v32  ;;  %v1569_v2 = vmul.f32 %v1565_v31, %v1553_v13  ;;  %v1562_v44 = vmul.f32 0.044715, %v1554_v28  ;;  %v1556_v42 = vmul.f32 0.5, %v1552_v41 }
 0x602   : > { %3068 = vmatpush3.bf16.xpose.msra.mxu0 %v3891_v9  ;;  %3069 = vmatprep.mubr.msk.bf16.mxu0 %vm755_vm3, %v1345_v36  ;;  %v1558_v25 = vmul.f32 0.5, %v1554_v28  ;;  %v1939_v41 = vsel %vm536_vm1, %v4069_v3, 0.0  ;;  %v1942_v29 = vsel %vm536_vm1, %v4078_v19, 0.0 }
 0x603   : > { %v1555_v43 = vadd.f32 %v1550_v49, %v1548_v35  ;;  %v1573_v47 = vadd.f32 %v1569_v2, %v1553_v13  ;;  %v1566_v48 = vmul.f32 %v1562_v44, %v1554_v28  ;;  %3149 = vmatprep.subr.msk.bf16.mxu0 %vm664_vm2, %v3843_v37  ;;  %v1945_v13 = vsel %vm536_vm1, %v1932_v15, 0.0 }
 0x605   : > { %v1577_v7 = vmul.f32 0.7978846, %v1573_v47  ;;  %v1563_v50 = vmul.f32 0.044715, %v1555_v43  ;;  %v1570_v52 = vmul.f32 %v1566_v48, %v1554_v28  ;;  %v1559_v12 = vmul.f32 0.5, %v1555_v43 }
 0x607   : > { %3344 = vtanh.f32 %v1577_v7  ;;  %v1567_v53 = vmul.f32 %v1563_v50, %v1555_v43  ;;  %v1574_v54 = vadd.f32 %v1570_v52, %v1554_v28 }
 0x609   : > { %3070 = vmatmul.mubr.msk.bf16.vlgmr.msra.gmra.mxu0 %vm755_vm3, %v1347_v55  ;;  %v1571_v51 = vmul.f32 %v1567_v53, %v1555_v43  ;;  %v1578_v56 = vmul.f32 0.7978846, %v1574_v54 }
 0x60a   : > { %3080 = vmatpush3.bf16.msra.mxu0 %v3849_v38 }
 0x60b   : > { %v1575_v49 = vadd.f32 %v1571_v51, %v1555_v43  ;;  %3346 = vtanh.f32 %v1578_v56  ;;  %3151 = vmatprep.subr.msk.bf16.mxu0 %vm755_vm3, %v3882_v1 }
 0x60c   : > { %v3343_v37 = vpop.eup %3342 }
 0x60d   : > { %v1579_v5 = vmul.f32 0.7978846, %v1575_v49  ;;  %v1584_v57 = vadd.f32 1.0, %v3343_v37 }
 0x60f   : > { %3348 = vtanh.f32 %v1579_v5  ;;  %v1588_v62 = vmul.f32 %v1584_v57, %v1556_v42 }
 0x614   : > { %v3345_v39 = vpop.eup %3344 }
 0x615   : > { %v1585_v60 = vadd.f32 1.0, %v3345_v39 }
 0x617   : > { %v1589_v10 = vmul.f32 %v1585_v60, %v1557_v59 }
 0x618   : > { %v3347_v63 = vpop.eup %3346 }
 0x619   : > { %v1592_v45 = vpack.c.bf16 %v1589_v10, %v1588_v62  ;;  %v1586_v0 = vadd.f32 1.0, %v3347_v63 }
 0x61b   : > { %1596 = vrot.lane.b32.xlu0 %v1592_v45, %s3608_s24  ;;  %v1590_v61 = vmul.f32 %v1586_v0, %v1558_v25 }
 0x61c   : > { %v3349_v4 = vpop.eup %3348 }
 0x61d   : > { %v1587_v58 = vadd.f32 1.0, %v3349_v4 }
 0x61f   : > { %v1591_v23 = vmul.f32 %v1587_v58, %v1559_v12 }
 0x621   : > { %v1593_v26 = vpack.c.bf16 %v1591_v23, %v1590_v61 }
 0x623   : > { %1598 = vrot.lane.b32.xlu1 %v1593_v26, %s3608_s24  ;;  %s3624_s24 = smov 56  }
 0x63a   : > { %1940 = vadd.xlane.f32.xlu0 %v1939_v41 }
 0x63e   : > { %1946 = vadd.xlane.f32.xlu0 %v1945_v13 }
 0x642   : > { %1949 = vadd.xlane.f32.xlu0 %v1948_v24 }
 0x647   : > { %1943 = vadd.xlane.f32.xlu1 %v1942_v29 }
 0x68d   : > { %v1597_v28 = vpop.permute.xlu0 %1596 }
 0x68e   : > { %3081 = vmatprep.mubr.msk.bf16.mxu0 %vm536_vm1, %v1597_v28 }
 0x695   : > { %v1599_v31 = vpop.permute.xlu1 %1598 }
 0x696   : > { %3082 = vmatmul.mubr.msk.bf16.vlgmr.msra.gmra.mxu0 %vm536_vm1, %v1599_v31 }
 0x697   : > { %3092 = vmatpush3.bf16.xpose.msra.mxu0 %v3891_v9 }
 0x698   : > { %3153 = vmatprep.subr.msk.bf16.mxu0 %vm755_vm3, %v3882_v1 }
 0x6c3   : > { %v1941_v3 = vpop.xlane.xlu0 %1940 }
 0x6c4   : > { %v1951_v15 = vmul.f32 0.125, %v1941_v3  ;;  %v3382_v3 = vld [vmem:[#allocation7] ss:$0 sm:$0xff] }
 0x6c6   : > { %v4105_v34 = vsub.f32 %v3805_v8, %v1951_v15 }
 0x6c7   : > { %v1947_v36 = vpop.xlane.xlu0 %1946 }
 0x6c8   : > { %v1959_v19 = vmul.f32 %v4105_v34, %v4105_v34  ;;  %v1953_v2 = vmul.f32 0.125, %v1947_v36 }
 0x6ca   : > { %1967 = vrot.lane.b32.xlu0 %v1959_v19, %s3612_s14  ;;  %v4114_v47 = vsub.f32 %v3803_v6, %v1953_v2  ;;  %v4128_v6 = vpop.f32.mrf.mxu0 }
 0x6cb   : > { %v1950_v46 = vpop.xlane.xlu0 %1949 }
 0x6cc   : > { %v1954_v48 = vmul.f32 0.125, %v1950_v46  ;;  %v1961_v50 = vmul.f32 %v4114_v47, %v4114_v47  ;;  %v4130_v52 = vpop.f32.mrf.mxu0 }
 0x6ce   : > { %v4120_v7 = vsub.f32 %v3809_v11, %v1954_v48  ;;  %v4132_v53 = vpop.f32.mrf.mxu0 }
 0x6d0   : > { %v1944_v35 = vpop.xlane.xlu1 %1943  ;;  %v4134_v54 = vpop.f32.mrf.mxu0 }
 0x6d1   : > { %v1952_v44 = vmul.f32 0.125, %v1944_v35 }
 0x6d2   : > { %v4136_v11 = vpop.f32.mrf.mxu0 }
 0x6d3   : > { %v4111_v43 = vsub.f32 %v3813_v14, %v1952_v44  ;;  %v1962_v14 = vmul.f32 %v4120_v7, %v4120_v7 }
 0x6d4   : > { %v4138_v55 = vpop.f32.mrf.mxu0 }
 0x6d5   : > { %v1960_v8 = vmul.f32 %v4111_v43, %v4111_v43 }
 0x6d6   : > { %v4140_v51 = vpop.f32.mrf.mxu0 }
 0x6d7   : > { %1969 = vrot.lane.b32.xlu1 %v1960_v8, %s3612_s14 }
 0x6d8   : > { %v4142_v56 = vpop.f32.mrf.mxu0 }
 0x6da   : > { %v4144_v49 = vpop.f32.mrf.mxu0 }
 0x6db   : > { %1971 = vrot.lane.b32.xlu1 %v1961_v50, %s3612_s14 }
 0x6dc   : > { %v4146_v5 = vpop.f32.mrf.mxu0 }
 0x6de   : > { %v4149_v39 = vpop.f32.mrf.mxu0 }
 0x6df   : > { %1973 = vrot.lane.b32.xlu1 %v1962_v14, %s3612_s14 }
 0x6e0   : > { %v4151_v42 = vpop.f32.mrf.mxu0 }
 0x6e2   : > { %v4153_v59 = vpop.f32.mrf.mxu0 }
 0x6e4   : > { %v4156_v10 = vpop.f32.mrf.mxu0 }
 0x6e6   : > { %v4159_v0 = vpop.f32.mrf.mxu0 }
 0x6e8   : > { %v4162_v12 = vpop.f32.mrf.mxu0 }
 0x73c   : > { %v1968_v37 = vpop.permute.xlu0 %1967 }
 0x73d   : > { %v1979_v57 = vsel %vm536_vm1, %v1968_v37, 0.0 }
 0x73e   : > { %1980 = vadd.xlane.f32.xlu0 %v1979_v57 }
 0x749   : > { %v1970_v60 = vpop.permute.xlu1 %1969 }
 0x74a   : > { %v1982_v62 = vsel %vm536_vm1, %v1970_v60, 0.0 }
 0x74b   : > { %1983 = vadd.xlane.f32.xlu1 %v1982_v62 }
 0x74d   : > { %v1972_v63 = vpop.permute.xlu1 %1971 }
 0x74e   : > { %v1985_v45 = vsel %vm536_vm1, %v1972_v63, 0.0 }
 0x74f   : > { %1986 = vadd.xlane.f32.xlu0 %v1985_v45 }
 0x751   : > { %v1974_v4 = vpop.permute.xlu1 %1973 }
 0x752   : > { %v1988_v25 = vsel %vm536_vm1, %v1974_v4, 0.0  ;;  %v3383_v4 = vld [vmem:[#allocation6] ss:$0 sm:$0xff] }
 0x753   : > { %1989 = vadd.xlane.f32.xlu0 %v1988_v25 }
 0x756   : > { %v3083_v58 = vpop.f32.mrf.mxu0 }
 0x757   : > { %v1649_v61 = vadd.f32 %v3083_v58, %v3916_v18 }
 0x758   : > { %v1640_v23 = vpop.f32.mrf.mxu0 }
 0x759   : > { %v1661_v26 = vmul.f32 0.044715, %v1649_v61  ;;  %v1641_v41 = vadd.f32 %v3916_v18, %v1640_v23 }
 0x75a   : > { %v3084_v13 = vpop.f32.mrf.mxu0 }
 0x75b   : > { %v1665_v24 = vmul.f32 %v1661_v26, %v1649_v61  ;;  %v1659_v29 = vmul.f32 0.044715, %v1641_v41  ;;  %v1652_v28 = vadd.f32 %v3084_v13, %v3916_v18  ;;  %v1657_v13 = vmul.f32 0.5, %v1649_v61 }
 0x75c   : > { %v1643_v31 = vpop.f32.mrf.mxu0  ;;  %2014 = vrot.lane.b32.xlu1 %v3382_v3, %s3613_s17 }
 0x75d   : > { %v1669_v15 = vmul.f32 %v1665_v24, %v1649_v61  ;;  %v1663_v19 = vmul.f32 %v1659_v29, %v1641_v41  ;;  %v1662_v36 = vmul.f32 0.044715, %v1652_v28  ;;  %v1644_v35 = vadd.f32 %v3916_v18, %v1643_v31 }
 0x75e   : > { %v1658_v24 = vmul.f32 0.5, %v1652_v28 }
 0x75f   : > { %v1673_v2 = vadd.f32 %v1669_v15, %v1649_v61  ;;  %v1667_v44 = vmul.f32 %v1663_v19, %v1641_v41  ;;  %v1666_v46 = vmul.f32 %v1662_v36, %v1652_v28  ;;  %v1660_v48 = vmul.f32 0.044715, %v1644_v35 }
 0x760   : > { %1285 = vrot.lane.b32.xlu1 %v4057_v40, %s3610_s19  ;;  %v1655_v15 = vmul.f32 0.5, %v1641_v41 }
 0x761   : > { %v1677_v8 = vmul.f32 0.7978846, %v1673_v2  ;;  %v1671_v50 = vadd.f32 %v1667_v44, %v1641_v41  ;;  %v1670_v14 = vmul.f32 %v1666_v46, %v1652_v28  ;;  %v1664_v37 = vmul.f32 %v1660_v48, %v1644_v35 }
 0x763   : > { %3350 = vtanh.f32 %v1677_v8  ;;  %v1675_v57 = vmul.f32 0.7978846, %v1671_v50  ;;  %v1674_v60 = vadd.f32 %v1670_v14, %v1652_v28  ;;  %v1668_v62 = vmul.f32 %v1664_v37, %v1644_v35 }
 0x764   : > { %1287 = vrot.lane.b32.xlu1 %v4053_v32, %s3610_s19 }
 0x765   : > { %3352 = vtanh.f32 %v1675_v57  ;;  %v1678_v18 = vmul.f32 0.7978846, %v1674_v60  ;;  %v1672_v63 = vadd.f32 %v1668_v62, %v1644_v35 }
 0x767   : > { %3354 = vtanh.f32 %v1678_v18  ;;  %v1676_v45 = vmul.f32 0.7978846, %v1672_v63 }
 0x768   : > { %1405 = vrot.lane.b32.xlu1 %v4053_v32, %s3611_s15  ;;  %v1656_v32 = vmul.f32 0.5, %v1644_v35 }
 0x769   : > { %3356 = vtanh.f32 %v1676_v45  ;;  %2007 = vrot.lane.b32.xlu0 %v3383_v4, %s3613_s17 }
 0x76d   : > { %1403 = vrot.lane.b32.xlu0 %v4057_v40, %s3611_s15 }
 0x770   : > { %v3351_v25 = vpop.eup %3350 }
 0x771   : > { %v1685_v23 = vadd.f32 1.0, %v3351_v25 }
 0x772   : > { %v3353_v58 = vpop.eup %3352 }
 0x773   : > { %v1683_v31 = vadd.f32 1.0, %v3353_v58  ;;  %v1689_v19 = vmul.f32 %v1685_v23, %v1657_v13 }
 0x774   : > { %v3355_v26 = vpop.eup %3354 }
 0x775   : > { %v1686_v29 = vadd.f32 1.0, %v3355_v26  ;;  %v1687_v46 = vmul.f32 %v1683_v31, %v1655_v15 }
 0x776   : > { %v3357_v3 = vpop.eup %3356 }
 0x777   : > { %v1690_v36 = vmul.f32 %v1686_v29, %v1658_v24  ;;  %v1684_v2 = vadd.f32 1.0, %v3357_v3 }
 0x779   : > { %v4178_v44 = vpack.c.bf16 %v1690_v36, %v1689_v19  ;;  %v1688_v48 = vmul.f32 %v1684_v2, %v1656_v32 }
 0x77b   : > { %1811 = vrot.lane.b32.xlu1 %v4178_v44, %s3606_s27  ;;  %v4182_v40 = vpack.c.bf16 %v1688_v48, %v1687_v46 }
 0x77d   : > { %1809 = vrot.lane.b32.xlu0 %v4182_v40, %s3606_s27 }
 0x7c7   : > { %v1981_v61 = vpop.xlane.xlu0 %1980 }
 0x7c8   : > { %v1991_v28 = vmul.f32 0.125, %v1981_v61 }
 0x7ca   : > { %v1995_v8 = vadd.f32 1e-06, %v1991_v28 }
 0x7cc   : > { %3358 = vrsqrt.f32 %v1995_v8 }
 0x7d4   : > { %v1984_v41 = vpop.xlane.xlu1 %1983 }
 0x7d5   : > { %v1992_v50 = vmul.f32 0.125, %v1984_v41 }
 0x7d7   : > { %v1996_v35 = vadd.f32 1e-06, %v1992_v50 }
 0x7d8   : > { %v2015_v14 = vpop.permute.xlu1 %2014  ;;  %v1987_v37 = vpop.xlane.xlu0 %1986 }
 0x7d9   : > { %3360 = vrsqrt.f32 %v1996_v35  ;;  %v1993_v57 = vmul.f32 0.125, %v1987_v37  ;;  %v3359_v62 = vpop.eup %3358 }
 0x7da   : > { %v2003_v25 = vmul.f32 %v3359_v62, %v4105_v34 }
 0x7db   : > { %v1997_v60 = vadd.f32 1e-06, %v1993_v57 }
 0x7dc   : > { %v1286_v18 = vpop.permute.xlu1 %1285  ;;  %v1990_v63 = vpop.xlane.xlu0 %1989 }
 0x7dd   : > { %3362 = vrsqrt.f32 %v1997_v60  ;;  %v1994_v45 = vmul.f32 0.125, %v1990_v63  ;;  %3063 = vmatprep.mubr.msk.bf16.mxu1 %vm755_vm3, %v1286_v18 }
 0x7df   : > { %v1998_v4 = vadd.f32 1e-06, %v1994_v45  ;;  %v3384_v45 = vld [vmem:[#allocation9] sm:$0xf] }
 0x7e0   : > { %v1288_v58 = vpop.permute.xlu1 %1287  ;;  %v2008_v23 = vpop.permute.xlu0 %2007 }
 0x7e1   : > { %3364 = vrsqrt.f32 %v1998_v4  ;;  %v2010_v26 = vmul.f32 %v2008_v23, %v2003_v25  ;;  %3064 = vmatmul.mubr.msk.bf16.vlgmr.msra.gmra.mxu1 %vm755_vm3, %v1288_v58 }
 0x7e2   : > { %3074 = vmatpush3.bf16.xpose.msra.mxu1 %v3891_v9 }
 0x7e3   : > { %v2017_v13 = vadd.f32 %v2015_v14, %v2010_v26  ;;  %3150 = vmatprep.subr.msk.bf16.mxu1 %vm755_vm3, %v3882_v1 }
 0x7e4   : > { %v1404_v24 = vpop.permute.xlu0 %1403  ;;  %v1406_v15 = vpop.permute.xlu1 %1405 }
 0x7e5   : > { %3075 = vmatprep.mubr.msk.bf16.mxu1 %vm755_vm3, %v1404_v24  ;;  %v2025_v29 = vmul.f32 0.044715, %v2017_v13 }
 0x7e6   : > { %v3361_v31 = vpop.eup %3360 }
 0x7e7   : > { %v2004_v3 = vmul.f32 %v3361_v31, %v4111_v43  ;;  %v2029_v34 = vmul.f32 %v2025_v29, %v2017_v13 }
 0x7e9   : > { %v2011_v19 = vmul.f32 %v2008_v23, %v2004_v3  ;;  %3076 = vmatmul.mubr.msk.bf16.vlgmr.msra.gmra.mxu1 %vm755_vm3, %v1406_v15  ;;  %v2033_v36 = vmul.f32 %v2029_v34, %v2017_v13 }
 0x7ea   : > { %v3363_v32 = vpop.eup %3362  ;;  %3086 = vmatpush3.bf16.xpose.msra.mxu1 %v3891_v9  ;;  %3087 = vmatprep.mubr.msk.bf16.mxu1 %vm755_vm3, %v4182_v40 }
 0x7eb   : > { %v2005_v2 = vmul.f32 %v3363_v32, %v4114_v47  ;;  %v2018_v46 = vadd.f32 %v2015_v14, %v2011_v19  ;;  %3152 = vmatprep.subr.msk.bf16.mxu1 %vm755_vm3, %v3882_v1  ;;  %v2037_v48 = vadd.f32 %v2033_v36, %v2017_v13  ;;  %v2021_v19 = vmul.f32 0.5, %v2017_v13 }
 0x7ed   : > { %v2012_v43 = vmul.f32 %v2008_v23, %v2005_v2  ;;  %v2026_v61 = vmul.f32 0.044715, %v2018_v46  ;;  %v2041_v35 = vmul.f32 0.7978846, %v2037_v48  ;;  %v1812_v26 = vpop.permute.xlu1 %1811  ;;  %v2022_v36 = vmul.f32 0.5, %v2018_v46 }
 0x7ee   : > { %v3365_v28 = vpop.eup %3364 }
 0x7ef   : > { %v2006_v8 = vmul.f32 %v3365_v28, %v4120_v7  ;;  %v2019_v41 = vadd.f32 %v2015_v14, %v2012_v43  ;;  %v2030_v50 = vmul.f32 %v2026_v61, %v2018_v46  ;;  %v1810_v57 = vpop.permute.xlu0 %1809  ;;  %3366 = vtanh.f32 %v2041_v35 }
 0x7f1   : > { %v2013_v37 = vmul.f32 %v2008_v23, %v2006_v8  ;;  %3088 = vmatmul.mubr.msk.bf16.vlgmr.msra.gmra.mxu1 %vm755_vm3, %v4178_v44  ;;  %v2034_v60 = vmul.f32 %v2030_v50, %v2018_v46  ;;  %v2027_v47 = vmul.f32 0.044715, %v2019_v41  ;;  %v2023_v8 = vmul.f32 0.5, %v2019_v41 }
 0x7f2   : > { %3098 = vmatpush3.bf16.xpose.msra.mxu1 %v3891_v9  ;;  %3099 = vmatprep.mubr.msk.bf16.mxu1 %vm755_vm3, %v1810_v57 }
 0x7f3   : > { %v2020_v62 = vadd.f32 %v2015_v14, %v2013_v37  ;;  %v2038_v18 = vadd.f32 %v2034_v60, %v2018_v46  ;;  %v2031_v63 = vmul.f32 %v2027_v47, %v2019_v41  ;;  %3154 = vmatprep.subr.msk.bf16.mxu1 %vm664_vm2, %v3384_v45 }
 0x7f5   : > { %v2042_v7 = vmul.f32 0.7978846, %v2038_v18  ;;  %v2028_v4 = vmul.f32 0.044715, %v2020_v62  ;;  %v2035_v25 = vmul.f32 %v2031_v63, %v2019_v41  ;;  %v2024_v50 = vmul.f32 0.5, %v2020_v62 }
 0x7f7   : > { %3368 = vtanh.f32 %v2042_v7  ;;  %v2032_v58 = vmul.f32 %v2028_v4, %v2020_v62  ;;  %v2039_v23 = vadd.f32 %v2035_v25, %v2019_v41 }
 0x7f9   : > { %3100 = vmatmul.mubr.msk.bf16.vlgmr.msra.gmra.mxu1 %vm755_vm3, %v1812_v26  ;;  %v2036_v24 = vmul.f32 %v2032_v58, %v2020_v62  ;;  %v2043_v29 = vmul.f32 0.7978846, %v2039_v23 }
 0x7fa   : > { %3110 = vmatpush3.bf16.msra.mxu1 %v3849_v38 }
 0x7fb   : > { %v2040_v14 = vadd.f32 %v2036_v24, %v2020_v62  ;;  %3370 = vtanh.f32 %v2043_v29  ;;  %3156 = vmatprep.subr.msk.bf16.mxu1 %vm755_vm3, %v3882_v1 }
 0x7fc   : > { %v3367_v3 = vpop.eup %3366 }
 0x7fd   : > { %v2044_v31 = vmul.f32 0.7978846, %v2040_v14  ;;  %v2049_v34 = vadd.f32 1.0, %v3367_v3 }
 0x7ff   : > { %3372 = vtanh.f32 %v2044_v31  ;;  %v2053_v2 = vmul.f32 %v2049_v34, %v2021_v19 }
 0x804   : > { %v3369_v15 = vpop.eup %3368 }
 0x805   : > { %v2050_v32 = vadd.f32 1.0, %v3369_v15  ;;  %v3385_v15 = vld [vmem:[#allocation10] ss:$0 sm:$0xff] }
 0x807   : > { %v2054_v48 = vmul.f32 %v2050_v32, %v2022_v36 }
 0x808   : > { %v3371_v43 = vpop.eup %3370 }
 0x809   : > { %v2057_v61 = vpack.c.bf16 %v2054_v48, %v2053_v2  ;;  %v2051_v38 = vadd.f32 1.0, %v3371_v43 }
 0x80b   : > { %2061 = vrot.lane.b32.xlu0 %v2057_v61, %s3612_s14  ;;  %v2055_v37 = vmul.f32 %v2051_v38, %v2023_v8 }
 0x80c   : > { %v3373_v28 = vpop.eup %3372 }
 0x80d   : > { %v2052_v35 = vadd.f32 1.0, %v3373_v28 }
 0x80f   : > { %1750 = vrot.lane.b32.xlu0 %v4182_v40, %s3610_s19  ;;  %v2056_v57 = vmul.f32 %v2052_v35, %v2024_v50 }
 0x811   : > { %v2058_v60 = vpack.c.bf16 %v2056_v57, %v2055_v37 }
 0x813   : > { %2063 = vrot.lane.b32.xlu1 %v2058_v60, %s3612_s14  ;;  %1868 = vrot.lane.b32.xlu0 %v4182_v40, %s3611_s15 }
 0x817   : > { %1752 = vrot.lane.b32.xlu1 %v4178_v44, %s3610_s19 }
 0x81b   : > { %1870 = vrot.lane.b32.xlu1 %v4178_v44, %s3611_s15 }
 0x87d   : > { %v2062_v13 = vpop.permute.xlu0 %2061 }
 0x87e   : > { %3111 = vmatprep.mubr.msk.bf16.mxu1 %vm536_vm1, %v2062_v13 }
 0x881   : > { %v1751_v46 = vpop.permute.xlu0 %1750 }
 0x882   : > { %3093 = vmatprep.mubr.msk.bf16.mxu0 %vm755_vm3, %v1751_v46 }
 0x885   : > { %v2064_v41 = vpop.permute.xlu1 %2063  ;;  %v1869_v47 = vpop.permute.xlu0 %1868 }
 0x886   : > { %3112 = vmatmul.mubr.msk.bf16.vlgmr.msra.gmra.mxu1 %vm536_vm1, %v2064_v41 }
 0x887   : > { %3122 = vmatpush3.bf16.xpose.msra.mxu1 %v3891_v9 }
 0x888   : > { %3158 = vmatprep.subr.msk.bf16.mxu1 %vm755_vm3, %v3882_v1 }
 0x889   : > { %v1753_v40 = vpop.permute.xlu1 %1752 }
 0x88a   : > { %3094 = vmatmul.mubr.msk.bf16.vlgmr.msra.gmra.mxu0 %vm755_vm3, %v1753_v40 }
 0x88b   : > { %3104 = vmatpush3.bf16.xpose.msra.mxu0 %v3891_v9  ;;  %3105 = vmatprep.mubr.msk.bf16.mxu0 %vm755_vm3, %v1869_v47 }
 0x88c   : > { %3155 = vmatprep.subr.msk.bf16.mxu0 %vm755_vm3, %v3882_v1 }
 0x88d   : > { %v1871_v44 = vpop.permute.xlu1 %1870 }
 0x892   : > { %3106 = vmatmul.mubr.msk.bf16.vlgmr.msra.gmra.mxu0 %vm755_vm3, %v1871_v44 }
 0x893   : > { %3116 = vmatpush3.bf16.xpose.msra.mxu0 %v3891_v9 }
 0x894   : > { %3157 = vmatprep.subr.msk.bf16.mxu0 %vm755_vm3, %v3882_v1 }
 0x8a1   : > { %v4236_v62 = vpop.f32.mrf.mxu1 }
 0x8a3   : > { %v4238_v18 = vpop.f32.mrf.mxu1 }
 0x8a5   : > { %v4240_v63 = vpop.f32.mrf.mxu1 }
 0x8a7   : > { %v4242_v45 = vpop.f32.mrf.mxu1 }
 0x8a9   : > { %v4244_v7 = vpop.f32.mrf.mxu1 }
 0x8ab   : > { %v4246_v4 = vpop.f32.mrf.mxu1 }
 0x8ad   : > { %v4248_v25 = vpop.f32.mrf.mxu1 }
 0x8af   : > { %v4250_v58 = vpop.f32.mrf.mxu1 }
 0x8b1   : > { %v4252_v23 = vpop.f32.mrf.mxu1 }
 0x8b3   : > { %v4254_v26 = vpop.f32.mrf.mxu1 }
 0x8b5   : > { %v4256_v1 = vpop.f32.mrf.mxu1 }
 0x8b7   : > { %v4258_v24 = vpop.f32.mrf.mxu1 }
 0x8b9   : > { %v4260_v29 = vpop.f32.mrf.mxu1 }
 0x8bb   : > { %v4262_v14 = vpop.f32.mrf.mxu1 }
 0x8bd   : > { %v4264_v31 = vpop.f32.mrf.mxu1 }
 0x8bf   : > { %v4266_v3 = vpop.f32.mrf.mxu1 }
 0x946   : > { %v3113_v34 = vpop.f32.mrf.mxu1 }
 0x947   : > { %v2114_v19 = vadd.f32 %v3385_v15, %v3113_v34 }
 0x948   : > { %v2105_v36 = vpop.f32.mrf.mxu1 }
 0x949   : > { %v2126_v32 = vmul.f32 0.044715, %v2114_v19  ;;  %v2106_v2 = vadd.f32 %v3385_v15, %v2105_v36 }
 0x94a   : > { %v3114_v48 = vpop.f32.mrf.mxu1 }
 0x94b   : > { %v2130_v43 = vmul.f32 %v2126_v32, %v2114_v19  ;;  %v2124_v61 = vmul.f32 0.044715, %v2106_v2  ;;  %v2117_v38 = vadd.f32 %v3385_v15, %v3114_v48 }
 0x94c   : > { %v2108_v28 = vpop.f32.mrf.mxu1 }
 0x94d   : > { %v2134_v8 = vmul.f32 %v2130_v43, %v2114_v19  ;;  %v2128_v50 = vmul.f32 %v2124_v61, %v2106_v2  ;;  %v2127_v35 = vmul.f32 0.044715, %v2117_v38  ;;  %v2109_v37 = vadd.f32 %v3385_v15, %v2108_v28 }
 0x94f   : > { %v2138_v57 = vadd.f32 %v2134_v8, %v2114_v19  ;;  %v2132_v60 = vmul.f32 %v2128_v50, %v2106_v2  ;;  %v2131_v13 = vmul.f32 %v2127_v35, %v2117_v38  ;;  %v2125_v46 = vmul.f32 0.044715, %v2109_v37 }
 0x950   : > { %v2122_v50 = vmul.f32 0.5, %v2114_v19  ;;  %v2123_v35 = vmul.f32 0.5, %v2117_v38 }
 0x951   : > { %v2142_v41 = vmul.f32 0.7978846, %v2138_v57  ;;  %v2136_v40 = vadd.f32 %v2132_v60, %v2106_v2  ;;  %v2135_v47 = vmul.f32 %v2131_v13, %v2117_v38  ;;  %v2129_v44 = vmul.f32 %v2125_v46, %v2109_v37 }
 0x952   : > { %v2120_v46 = vmul.f32 0.5, %v2106_v2 }
 0x953   : > { %3374 = vtanh.f32 %v2142_v41  ;;  %v2140_v34 = vmul.f32 0.7978846, %v2136_v40  ;;  %v2139_v36 = vadd.f32 %v2135_v47, %v2117_v38  ;;  %v2133_v16 = vmul.f32 %v2129_v44, %v2109_v37 }
 0x954   : > { %v2121_v47 = vmul.f32 0.5, %v2109_v37 }
 0x955   : > { %3376 = vtanh.f32 %v2140_v34  ;;  %v2143_v32 = vmul.f32 0.7978846, %v2139_v36  ;;  %v2137_v48 = vadd.f32 %v2133_v16, %v2109_v37 }
 0x957   : > { %3378 = vtanh.f32 %v2143_v32  ;;  %v2141_v43 = vmul.f32 0.7978846, %v2137_v48 }
 0x959   : > { %3380 = vtanh.f32 %v2141_v43 }
 0x960   : > { %v3375_v61 = vpop.eup %3374 }
 0x961   : > { %v2150_v28 = vadd.f32 1.0, %v3375_v61 }
 0x962   : > { %v3377_v15 = vpop.eup %3376 }
 0x963   : > { %v2148_v60 = vadd.f32 1.0, %v3377_v15  ;;  %v2154_v41 = vmul.f32 %v2150_v28, %v2122_v50 }
 0x964   : > { %v3379_v8 = vpop.eup %3378 }
 0x965   : > { %v2151_v57 = vadd.f32 1.0, %v3379_v8  ;;  %v2152_v36 = vmul.f32 %v2148_v60, %v2120_v46 }
 0x966   : > { %v3381_v13 = vpop.eup %3380 }
 0x967   : > { %v2155_v40 = vmul.f32 %v2151_v57, %v2123_v35  ;;  %v2149_v44 = vadd.f32 1.0, %v3381_v13 }
 0x969   : > { %v2157_v34 = vpack.c.bf16 %v2155_v40, %v2154_v41  ;;  %v2153_v16 = vmul.f32 %v2149_v44, %v2121_v47 }
 0x96b   : > { %2217 = vrot.lane.b32.xlu1 %v2157_v34, %s3610_s19  ;;  %v2156_v32 = vpack.c.bf16 %v2153_v16, %v2152_v36 }
 0x96d   : > { %2215 = vrot.lane.b32.xlu0 %v2156_v32, %s3610_s19  ;;  %3117 = vmatprep.mubr.msk.bf16.mxu0 %vm755_vm3, %v2156_v32  ;;  %s2894_s19 = sshll.u32 %s3795_s18, 3 }
 0x96e   : > { %3118 = vmatmul.mubr.msk.bf16.vlgmr.msra.gmra.mxu0 %vm755_vm3, %v2157_v34  ;;  %s4385_s14 = scalar_lea.vmem %s4451_s8, %s2894_s19 }
 0x96f   : > { %2276 = vrot.lane.b32.xlu1 %v2157_v34, %s3606_s27  ;;  %3128 = vmatpush3.bf16.xpose.msra.mxu0 %v3891_v9 }
 0x971   : > { %2274 = vrot.lane.b32.xlu0 %v2156_v32, %s3606_s27  ;;  %s3618_s27 = smov 32  }
 0x973   : > { %2335 = vrot.lane.b32.xlu1 %v2157_v34, %s3611_s15 }
 0x975   : > { %2333 = vrot.lane.b32.xlu0 %v2156_v32, %s3611_s15 }
 0x977   : > { %2398 = vrot.lane.b32.xlu1 %v4134_v54, %s3614_s26 }
 0x979   : > { %2396 = vrot.lane.b32.xlu0 %v4130_v52, %s3614_s26 }
 0x97b   : > { %2402 = vrot.lane.b32.xlu1 %v4132_v53, %s3614_s26 }
 0x97d   : > { %2400 = vrot.lane.b32.xlu0 %v4128_v6, %s3614_s26 }
 0x97f   : > { %2414 = vrot.lane.b32.xlu1 %v4027_v33, %s3607_s28 }
 0x981   : > { %2412 = vrot.lane.b32.xlu0 %v4021_v27, %s3607_s28 }
 0x983   : > { %2418 = vrot.lane.b32.xlu1 %v4024_v30, %s3607_s28 }
 0x985   : > { %2416 = vrot.lane.b32.xlu0 %v4018_v20, %s3607_s28  ;;  %v3095_v20 = vpop.f32.mrf.mxu0  ;;  %s3623_s28 = smov 52  }
 0x987   : > { %2430 = vrot.lane.b32.xlu1 %v4142_v56, %s3615_s16  ;;  %v1794_v27 = vpop.f32.mrf.mxu0 }
 0x989   : > { %2428 = vrot.lane.b32.xlu0 %v4138_v55, %s3615_s16  ;;  %v3096_v30 = vpop.f32.mrf.mxu0 }
 0x98b   : > { %2434 = vrot.lane.b32.xlu1 %v4140_v51, %s3615_s16  ;;  %v1797_v33 = vpop.f32.mrf.mxu0 }
 0x98d   : > { %2432 = vrot.lane.b32.xlu0 %v4136_v11, %s3615_s16  ;;  %v3107_v6 = vpop.f32.mrf.mxu0 }
 0x98f   : > { %2446 = vrot.lane.b32.xlu1 %v4151_v42, %s3609_s12  ;;  %v1912_v52 = vpop.f32.mrf.mxu0 }
 0x991   : > { %2444 = vrot.lane.b32.xlu0 %v4146_v5, %s3609_s12  ;;  %v3108_v53 = vpop.f32.mrf.mxu0 }
 0x993   : > { %2450 = vrot.lane.b32.xlu1 %v4149_v39, %s3609_s12  ;;  %v1915_v54 = vpop.f32.mrf.mxu0 }
 0x995   : > { %2448 = vrot.lane.b32.xlu0 %v4144_v49, %s3609_s12  ;;  %s3625_s12 = smov 60  }
 0x997   : > { %2462 = vrot.lane.b32.xlu1 %v4242_v45, %s3616_s20 }
 0x999   : > { %2460 = vrot.lane.b32.xlu0 %v4238_v18, %s3616_s20 }
 0x99b   : > { %2466 = vrot.lane.b32.xlu1 %v4240_v63, %s3616_s20 }
 0x99d   : > { %2464 = vrot.lane.b32.xlu0 %v4236_v62, %s3616_s20 }
 0x99f   : > { %2478 = vrot.lane.b32.xlu1 %v4162_v12, %s3613_s17 }
 0x9a1   : > { %2476 = vrot.lane.b32.xlu0 %v4156_v10, %s3613_s17 }
 0x9a3   : > { %2482 = vrot.lane.b32.xlu1 %v4159_v0, %s3613_s17 }
 0x9a5   : > { %2480 = vrot.lane.b32.xlu0 %v4153_v59, %s3613_s17 }
 0x9a7   : > { %2494 = vrot.lane.b32.xlu1 %v4250_v58, %s3617_s13 }
 0x9a9   : > { %2492 = vrot.lane.b32.xlu0 %v4246_v4, %s3617_s13 }
 0x9ab   : > { %2498 = vrot.lane.b32.xlu1 %v4248_v25, %s3617_s13  ;;  %v4462_v25 = vld [vmem:[#allocation16_spill] sm:$0xff] }
 0x9ad   : > { %2496 = vrot.lane.b32.xlu0 %v4244_v7, %s3617_s13 }
 0x9af   : > { %2510 = vrot.lane.b32.xlu1 %v4258_v24, %s3618_s27 }
 0x9b1   : > { %2508 = vrot.lane.b32.xlu0 %v4254_v26, %s3618_s27 }
 0x9b3   : > { %2514 = vrot.lane.b32.xlu1 %v4256_v1, %s3618_s27 }
 0x9b5   : > { %2512 = vrot.lane.b32.xlu0 %v4252_v23, %s3618_s27 }
 0x9b7   : > { %2526 = vrot.lane.b32.xlu1 %v1797_v33, %s3619_s21 }
 0x9b9   : > { %2524 = vrot.lane.b32.xlu0 %v1794_v27, %s3619_s21 }
 0x9bb   : > { %2530 = vrot.lane.b32.xlu1 %v3096_v30, %s3619_s21 }
 0x9bd   : > { %2528 = vrot.lane.b32.xlu0 %v3095_v20, %s3619_s21 }
 0x9bf   : > { %2542 = vrot.lane.b32.xlu1 %v4266_v3, %s3620_s22 }
 0x9c1   : > { %2540 = vrot.lane.b32.xlu0 %v4262_v14, %s3620_s22 }
 0x9c3   : > { %2546 = vrot.lane.b32.xlu1 %v4264_v31, %s3620_s22 }
 0x9c5   : > { %2544 = vrot.lane.b32.xlu0 %v4260_v29, %s3620_s22 }
 0x9c7   : > { %2558 = vrot.lane.b32.xlu1 %v1915_v54, %s3621_s23 }
 0x9c9   : > { %2556 = vrot.lane.b32.xlu0 %v1912_v52, %s3621_s23 }
 0x9cb   : > { %2562 = vrot.lane.b32.xlu1 %v3108_v53, %s3621_s23 }
 0x9cd   : > { %2560 = vrot.lane.b32.xlu0 %v3107_v6, %s3621_s23 }
 0x9dd   : > { %v2218_v11 = vpop.permute.xlu1 %2217 }
 0x9df   : > { %v2216_v55 = vpop.permute.xlu0 %2215 }
 0x9e0   : > { %3123 = vmatprep.mubr.msk.bf16.mxu1 %vm755_vm3, %v2216_v55 }
 0x9e1   : > { %v2277_v51 = vpop.permute.xlu1 %2276  ;;  %3124 = vmatmul.mubr.msk.bf16.vlgmr.msra.gmra.mxu1 %vm755_vm3, %v2218_v11 }
 0x9e2   : > { %3134 = vmatpush3.bf16.xpose.msra.mxu1 %v3891_v9 }
 0x9e3   : > { %v2275_v56 = vpop.permute.xlu0 %2274 }
 0x9e4   : > { %3129 = vmatprep.mubr.msk.bf16.mxu0 %vm755_vm3, %v2275_v56 }
 0x9e5   : > { %v2336_v49 = vpop.permute.xlu1 %2335  ;;  %3130 = vmatmul.mubr.msk.bf16.vlgmr.msra.gmra.mxu0 %vm755_vm3, %v2277_v51 }
 0x9e7   : > { %v2334_v5 = vpop.permute.xlu0 %2333 }
 0x9e8   : > { %3135 = vmatprep.mubr.msk.bf16.mxu1 %vm755_vm3, %v2334_v5 }
 0x9e9   : > { %v2399_v39 = vpop.permute.xlu1 %2398  ;;  %3136 = vmatmul.mubr.msk.bf16.vlgmr.msra.gmra.mxu1 %vm755_vm3, %v2336_v49 }
 0x9ea   : > { %v2633_v0 = vsel %vm755_vm3, %v4016_v22, %v2399_v39 }
 0x9eb   : > { %v2397_v42 = vpop.permute.xlu0 %2396 }
 0x9ec   : > { %v2632_v62 = vsel %vm755_vm3, %v4011_v17, %v2397_v42 }
 0x9ed   : > { %v2403_v59 = vpop.permute.xlu1 %2402 }
 0x9ee   : > { %v2635_v45 = vsel %vm755_vm3, %v4013_v21, %v2403_v59 }
 0x9ef   : > { %v2401_v10 = vpop.permute.xlu0 %2400 }
 0x9f0   : > { %v2634_v58 = vsel %vm755_vm3, %v4462_v25, %v2401_v10 }
 0x9f1   : > { %v2415_v12 = vpop.permute.xlu1 %2414 }
 0x9f2   : > { %v2637_v9 = vsel %vm536_vm1, %v2633_v0, %v2415_v12 }
 0x9f3   : > { %v2413_v18 = vpop.permute.xlu0 %2412 }
 0x9f4   : > { %v2636_v63 = vsel %vm536_vm1, %v2632_v62, %v2413_v18 }
 0x9f5   : > { %v2419_v7 = vpop.permute.xlu1 %2418 }
 0x9f6   : > { %v2639_v4 = vsel %vm536_vm1, %v2635_v45, %v2419_v7 }
 0x9f7   : > { %v2417_v23 = vpop.permute.xlu0 %2416 }
 0x9f8   : > { %v2638_v22 = vsel %vm536_vm1, %v2634_v58, %v2417_v23  ;;  %vm2704_vm1 = vcmask 523264  }
 0x9f9   : > { %v2431_v26 = vpop.permute.xlu1 %2430 }
 0x9fa   : > { %v2642_v1 = vsel %vm2640_vm4, %v2637_v9, %v2431_v26 }
 0x9fb   : > { %v2429_v24 = vpop.permute.xlu0 %2428 }
 0x9fc   : > { %v2641_v17 = vsel %vm2640_vm4, %v2636_v63, %v2429_v24 }
 0x9fd   : > { %v2435_v29 = vpop.permute.xlu1 %2434 }
 0x9fe   : > { %v2644_v14 = vsel %vm2640_vm4, %v2639_v4, %v2435_v29 }
 0x9ff   : > { %v2433_v31 = vpop.permute.xlu0 %2432 }
 0xa00   : > { %v2643_v3 = vsel %vm2640_vm4, %v2638_v22, %v2433_v31 }
 0xa01   : > { %v2447_v21 = vpop.permute.xlu1 %2446 }
 0xa02   : > { %v2647_v19 = vsel %vm2645_vm5, %v2642_v1, %v2447_v21 }
 0xa03   : > { %v2445_v2 = vpop.permute.xlu0 %2444 }
 0xa04   : > { %v2646_v38 = vsel %vm2645_vm5, %v2641_v17, %v2445_v2 }
 0xa05   : > { %v2451_v37 = vpop.permute.xlu1 %2450 }
 0xa06   : > { %v2649_v48 = vsel %vm2645_vm5, %v2644_v14, %v2451_v37 }
 0xa07   : > { %v2449_v43 = vpop.permute.xlu0 %2448 }
 0xa08   : > { %v2648_v61 = vsel %vm2645_vm5, %v2643_v3, %v2449_v43 }
 0xa09   : > { %v2463_v15 = vpop.permute.xlu1 %2462 }
 0xa0a   : > { %v4344_v28 = vsel %vm2650_vm6, %v2647_v19, %v2463_v15 }
 0xa0b   : > { %v2461_v8 = vpop.permute.xlu0 %2460 }
 0xa0c   : > { %v4346_v50 = vsel %vm2650_vm6, %v2646_v38, %v2461_v8 }
 0xa0d   : > { %v2467_v35 = vpop.permute.xlu1 %2466 }
 0xa0e   : > { %v4348_v57 = vsel %vm2650_vm6, %v2649_v48, %v2467_v35 }
 0xa0f   : > { %v2465_v60 = vpop.permute.xlu0 %2464 }
 0xa10   : > { %v4350_v13 = vsel %vm2650_vm6, %v2648_v61, %v2465_v60 }
 0xa11   : > { %v2479_v11 = vpop.permute.xlu1 %2478 }
 0xa12   : > { %v2657_v37 = vsel %vm2655_vm7, %v4344_v28, %v2479_v11 }
 0xa13   : > { %v2477_v54 = vpop.permute.xlu0 %2476 }
 0xa14   : > { %v2656_v3 = vsel %vm2655_vm7, %v4346_v50, %v2477_v54 }
 0xa15   : > { %v2483_v51 = vpop.permute.xlu1 %2482 }
 0xa17   : > { %v2481_v55 = vpop.permute.xlu0 %2480 }
 0xa18   : > { %v2658_v48 = vsel %vm2655_vm7, %v4350_v13, %v2481_v55 }
 0xa19   : > { %v2495_v49 = vpop.permute.xlu1 %2494 }
 0xa1a   : > { %v2662_v61 = vsel %vm2660_vm8, %v2657_v37, %v2495_v49 }
 0xa1b   : > { %v2493_v56 = vpop.permute.xlu0 %2492 }
 0xa1c   : > { %v2661_v2 = vsel %vm2660_vm8, %v2656_v3, %v2493_v56 }
 0xa1d   : > { %v4352_v39 = vpop.permute.xlu1 %2498 }
 0xa1f   : > { %v2497_v5 = vpop.permute.xlu0 %2496 }
 0xa20   : > { %v2663_v15 = vsel %vm2660_vm8, %v2658_v48, %v2497_v5 }
 0xa21   : > { %v2511_v59 = vpop.permute.xlu1 %2510 }
 0xa22   : > { %v2666_v60 = vsel %vm478_vm0, %v2662_v61, %v2511_v59 }
 0xa23   : > { %v2509_v42 = vpop.permute.xlu0 %2508 }
 0xa24   : > { %v2665_v38 = vsel %vm478_vm0, %v2661_v2, %v2509_v42 }
 0xa25   : > { %v4354_v0 = vpop.permute.xlu1 %2514 }
 0xa27   : > { %v2513_v10 = vpop.permute.xlu0 %2512 }
 0xa28   : > { %v2667_v28 = vsel %vm478_vm0, %v2663_v15, %v2513_v10 }
 0xa29   : > { %v2527_v9 = vpop.permute.xlu1 %2526 }
 0xa2a   : > { %v2671_v13 = vsel %vm2669_vm9, %v2666_v60, %v2527_v9 }
 0xa2b   : > { %v2525_v12 = vpop.permute.xlu0 %2524 }
 0xa2c   : > { %v2670_v43 = vsel %vm2669_vm9, %v2665_v38, %v2525_v12 }
 0xa2d   : > { %v4356_v18 = vpop.permute.xlu1 %2530 }
 0xa2e   : > { %v3119_v46 = vpop.f32.mrf.mxu0 }
 0xa2f   : > { %2576 = vrot.lane.b32.xlu0 %v3119_v46, %s3622_s25  ;;  %v2529_v62 = vpop.permute.xlu0 %2528 }
 0xa30   : > { %v2198_v41 = vpop.f32.mrf.mxu0 }
 0xa31   : > { %v2543_v45 = vpop.permute.xlu1 %2542 }
 0xa32   : > { %v3120_v40 = vpop.f32.mrf.mxu0 }
 0xa33   : > { %2572 = vrot.lane.b32.xlu0 %v2198_v41, %s3622_s25  ;;  %2578 = vrot.lane.b32.xlu1 %v3120_v40, %s3622_s25  ;;  %v2541_v63 = vpop.permute.xlu0 %2540  ;;  %v2672_v40 = vsel %vm2669_vm9, %v2667_v28, %v2529_v62 }
 0xa34   : > { %v2201_v47 = vpop.f32.mrf.mxu0  ;;  %v2675_v8 = vsel %vm2674_vm10, %v2670_v43, %v2541_v63 }
 0xa35   : > { %v2547_v4 = vpop.permute.xlu1 %2546 }
 0xa37   : > { %2574 = vrot.lane.b32.xlu1 %v2201_v47, %s3622_s25  ;;  %v2545_v7 = vpop.permute.xlu0 %2544 }
 0xa39   : > { %v2559_v58 = vpop.permute.xlu1 %2558 }
 0xa3b   : > { %v2557_v25 = vpop.permute.xlu0 %2556 }
 0xa3c   : > { %v2680_v46 = vsel %vm2679_vm11, %v2675_v8, %v2557_v25 }
 0xa3d   : > { %v4358_v22 = vpop.permute.xlu1 %2562 }
 0xa3f   : > { %v2561_v23 = vpop.permute.xlu0 %2560 }
 0xaa1   : > { %v3125_v44 = vpop.f32.mrf.mxu1  ;;  %v2577_v26 = vpop.permute.xlu0 %2576 }
 0xaa2   : > { %2592 = vrot.lane.b32.xlu0 %v3125_v44, %s3623_s28  ;;  %v2659_v44 = vsel %vm2655_vm7, %v4348_v57, %v2483_v51 }
 0xaa3   : > { %v2259_v34 = vpop.f32.mrf.mxu1 }
 0xaa5   : > { %v3126_v36 = vpop.f32.mrf.mxu1  ;;  %v3131_v16 = vpop.f32.mrf.mxu0 }
 0xaa6   : > { %2594 = vrot.lane.b32.xlu1 %v3126_v36, %s3623_s28  ;;  %2608 = vrot.lane.b32.xlu0 %v3131_v16, %s3624_s24  ;;  %v4360_v1 = vpop.permute.xlu1 %2578  ;;  %v2573_v24 = vpop.permute.xlu0 %2572  ;;  %v2677_v36 = vsel %vm2674_vm10, %v2672_v40, %v2545_v7 }
 0xaa7   : > { %v2262_v32 = vpop.f32.mrf.mxu1  ;;  %v2318_v20 = vpop.f32.mrf.mxu0  ;;  %v2685_v41 = vsel %vm2684_vm12, %v2680_v46, %v2573_v24 }
 0xaa9   : > { %v3132_v27 = vpop.f32.mrf.mxu0  ;;  %v3137_v30 = vpop.f32.mrf.mxu1 }
 0xaaa   : > { %2588 = vrot.lane.b32.xlu0 %v2259_v34, %s3623_s28  ;;  %2610 = vrot.lane.b32.xlu1 %v3132_v27, %s3624_s24  ;;  %v2575_v17 = vpop.permute.xlu1 %2574  ;;  %v2676_v34 = vsel %vm2674_vm10, %v2671_v13, %v2543_v45  ;;  %v2664_v27 = vsel %vm2660_vm8, %v2659_v44, %v4352_v39 }
 0xaab   : > { %v2377_v33 = vpop.f32.mrf.mxu1  ;;  %v2321_v6 = vpop.f32.mrf.mxu0  ;;  %v2668_v57 = vsel %vm478_vm0, %v2664_v27, %v4354_v0 }
 0xaac   : > { %v2673_v54 = vsel %vm2669_vm9, %v2668_v57, %v4356_v18 }
 0xaad   : > { %v3138_v52 = vpop.f32.mrf.mxu1  ;;  %v2678_v51 = vsel %vm2674_vm10, %v2673_v54, %v2547_v4 }
 0xaae   : > { %2604 = vrot.lane.b32.xlu0 %v2318_v20, %s3624_s24  ;;  %2590 = vrot.lane.b32.xlu1 %v2262_v32, %s3623_s28  ;;  %v2683_v42 = vsel %vm2679_vm11, %v2678_v51, %v4358_v22 }
 0xaaf   : > { %v2380_v53 = vpop.f32.mrf.mxu1  ;;  %v2688_v0 = vsel %vm2684_vm12, %v2683_v42, %v4360_v1 }
 0xab2   : > { %2606 = vrot.lane.b32.xlu1 %v2321_v6, %s3624_s24  ;;  %2620 = vrot.lane.b32.xlu0 %v2377_v33, %s3625_s12  ;;  %v2682_v33 = vsel %vm2679_vm11, %v2677_v36, %v2561_v23 }
 0xab6   : > { %2624 = vrot.lane.b32.xlu0 %v3137_v30, %s3625_s12  ;;  %2622 = vrot.lane.b32.xlu1 %v2380_v53, %s3625_s12  ;;  %v2681_v30 = vsel %vm2679_vm11, %v2676_v34, %v2559_v58 }
 0xab7   : > { %v2686_v53 = vsel %vm2684_vm12, %v2681_v30, %v2575_v17 }
 0xaba   : > { %2626 = vrot.lane.b32.xlu1 %v3138_v52, %s3625_s12  ;;  %v2687_v52 = vsel %vm2684_vm12, %v2682_v33, %v2577_v26 }
 0xb14   : > { %v2593_v29 = vpop.permute.xlu0 %2592 }
 0xb15   : > { %v2692_v11 = vsel %vm2689_vm13, %v2687_v52, %v2593_v29 }
 0xb18   : > { %v4362_v14 = vpop.permute.xlu1 %2594  ;;  %v2609_v31 = vpop.permute.xlu0 %2608 }
 0xb19   : > { %v2697_v56 = vsel %vm2694_vm15, %v2692_v11, %v2609_v31  ;;  %v2693_v12 = vsel %vm2689_vm13, %v2688_v0, %v4362_v14 }
 0xb1c   : > { %v2611_v21 = vpop.permute.xlu1 %2610  ;;  %v2589_v19 = vpop.permute.xlu0 %2588 }
 0xb1d   : > { %v2690_v47 = vsel %vm2689_vm13, %v2685_v41, %v2589_v19  ;;  %v2698_v9 = vsel %vm2694_vm15, %v2693_v12, %v2611_v21 }
 0xb20   : > { %v2591_v50 = vpop.permute.xlu1 %2590  ;;  %v2605_v35 = vpop.permute.xlu0 %2604 }
 0xb21   : > { %v2695_v16 = vsel %vm2694_vm15, %v2690_v47, %v2605_v35  ;;  %v2691_v55 = vsel %vm2689_vm13, %v2686_v53, %v2591_v50 }
 0xb24   : > { %v2607_v32 = vpop.permute.xlu1 %2606  ;;  %v2621_v20 = vpop.permute.xlu0 %2620 }
 0xb25   : > { %v2700_v6 = vsel %vm2699_vm14, %v2695_v16, %v2621_v20  ;;  %v2696_v49 = vsel %vm2694_vm15, %v2691_v55, %v2607_v32 }
 0xb26   : > { %2705 = vst.msk [vmem:[%s4385_s14] sm:$0xff] %vm2704_vm1, %v2700_v6 }
 0xb28   : > { %v2623_v5 = vpop.permute.xlu1 %2622  ;;  %v2625_v39 = vpop.permute.xlu0 %2624 }
 0xb29   : > { %v2701_v59 = vsel %vm2699_vm14, %v2696_v49, %v2623_v5  ;;  %v2702_v10 = vsel %vm2699_vm14, %v2697_v56, %v2625_v39 }
 0xb2a   : > { %2706 = vst.msk [vmem:[%s4385_s14 + $0x8] sm:$0xff] %vm2704_vm1, %v2701_v59  ;;  %2707 = vst.msk [vmem:[%s4385_s14 + $0x10] sm:$0xff] %vm2704_vm1, %v2702_v10 }
 0xb2c   : > { %v2627_v62 = vpop.permute.xlu1 %2626 }
 0xb2d   : > { %v2703_v18 = vsel %vm2699_vm14, %v2698_v9, %v2627_v62 }
 0xb2e   : > { %2708 = vst.msk [vmem:[%s4385_s14 + $0x18] sm:$0xff] %vm2704_vm1, %v2703_v18 }
 0xb2f PF: > { %s22_s9 = sadd.s32 1, %s3596_s9   ;;  %s4463_s27 = smov %s3588_s29 }
 0xb30   : > { %p19_p1 = scmp.ge.s32.totalorder %s22_s9, 14   ;;  %s4464_s28 = smov %s3592_s30 }
 0xb31   : > { %s4465_s29 = smov %s4468_s10  ;;  %s4466_s30 = smov %s4472_s11 }
 0xb32   :  { %21 = sbr.rel (!%p19_p1) target bundleno = 6 (0x6), region = 110 }
 0xb37   :  { %2739 = vsyncpa [#allocation3], 1 }
 0xb38   :  { %2741 = vsyncpa [#allocation3 + $0x1], 1 }
 0xb39   :  { %2742 = vsyncpa [#allocation5], 1 }
 0xb3a   :  { %2743 = vsyncpa [#allocation8], 1 }
 0xb3b   :  { %2744 = vsyncpa [#allocation11], 1 }

// kernel: bbox_mask_decoder_forward.2
= control target key start
LH: loop header
LB: loop body
LE: loop exit
PB: predicated region body
PF: predicated region fallthrough
CT: control target
= control target key end

     0   :  { %s7511_s6 = smov 1   ;;  %s7512_s10 = smov 2   ;;  %s8620_s0 = inlined_call_operand.smem [shape: u32[33], index: -1, kind: input, shape index: {}] }
   0x1   :  { %s7583_s5 = sld [smem:[%s8620_s0]]   ;;  %s7513_s14 = smov 3  }
   0x2   :  { %s7588_s9 = sld [smem:[%s8620_s0 + %s7511_s6]]   ;;  %s7514_s18 = smov 4  }
   0x3   :  { %s7593_s13 = sld [smem:[%s8620_s0 + %s7512_s10]]   ;;  %s7515_s22 = smov 5  }
   0x4   :  { %s7598_s17 = sld [smem:[%s8620_s0 + %s7513_s14]]   ;;  %s7516_s26 = smov 6  }
   0x5   :  { %s7603_s21 = sld [smem:[%s8620_s0 + %s7514_s18]]   ;;  %s7517_s30 = smov 7  }
   0x6   :  { %s7608_s25 = sld [smem:[%s8620_s0 + %s7515_s22]]   ;;  %s7518_s4 = smov 8  }
   0x7   :  { %8637 = sst [smem:[#allocation52_spill]] %s7583_s5  ;;  %s7519_s10 = smov 9  }
   0x8   :  { %8638 = sst [smem:[#allocation53_spill]] %s7588_s9  ;;  %s7520_s15 = smov 10  }
   0x9   :  { %8639 = sst [smem:[#allocation54_spill]] %s7593_s13  ;;  %s7521_s20 = smov 11  }
   0xa   :  { %s7613_s29 = sld [smem:[%s8620_s0 + %s7516_s26]]   ;;  %s7522_s26 = smov 12  }
   0xb   :  { %s7618_s3 = sld [smem:[%s8620_s0 + %s7517_s30]]   ;;  %s7523_s1 = smov 13  }
   0xc   :  { %s7623_s8 = sld [smem:[%s8620_s0 + %s7518_s4]]   ;;  %s7524_s7 = smov 14  }
   0xd   :  { %s7628_s14 = sld [smem:[%s8620_s0 + %s7519_s10]]   ;;  %s7526_s22 = smov 16  }
   0xe   :  { %s7633_s19 = sld [smem:[%s8620_s0 + %s7520_s15]]   ;;  %s7525_s15 = smov 15  }
   0xf   :  { %s7638_s24 = sld [smem:[%s8620_s0 + %s7521_s20]]   ;;  %s7527_s28 = smov 17  }
  0x10   :  { %s7643_s30 = sld [smem:[%s8620_s0 + %s7522_s26]]  }
  0x11   :  { %8640 = sst [smem:[#allocation55_spill]] %s7618_s3 }
  0x12   :  { %8641 = sst [smem:[#allocation56_spill]] %s7623_s8 }
  0x13   :  { %8642 = sst [smem:[#allocation57_spill]] %s7628_s14 }
  0x14   :  { %s7648_s6 = sld [smem:[%s8620_s0 + %s7523_s1]]  }
  0x15   :  { %8643 = sst [smem:[#allocation58_spill]] %s7638_s24 }
  0x16   :  { %s7653_s12 = sld [smem:[%s8620_s0 + %s7524_s7]]   ;;  %s7528_s7 = smov 18  }
  0x17   :  { %s7658_s20 = sld [smem:[%s8620_s0 + %s7525_s15]]   ;;  %s7529_s15 = smov 19  }
  0x18   :  { %s7663_s27 = sld [smem:[%s8620_s0 + %s7526_s22]]   ;;  %s7530_s22 = smov 20  }
  0x19   :  { %s7668_s4 = sld [smem:[%s8620_s0 + %s7527_s28]]   ;;  %s7531_s28 = smov 21  }
  0x1a   :  { %8644 = sst [smem:[#allocation59_spill]] %s7648_s6 }
  0x1b   :  { %s7673_s13 = sld [smem:[%s8620_s0 + %s7528_s7]]   ;;  %s7532_s7 = smov 22  }
  0x1c   :  { %8645 = sst [smem:[#allocation60_spill]] %s7653_s12 }
  0x1d   :  { %8646 = sst [smem:[#allocation61_spill]] %s7658_s20 }
  0x1e   :  { %8647 = sst [smem:[#allocation62_spill]] %s7663_s27 }
  0x1f   :  { %8648 = sst [smem:[#allocation63_spill]] %s7668_s4 }
  0x20   :  { %s7678_s20 = sld [smem:[%s8620_s0 + %s7529_s15]]   ;;  %s7533_s15 = smov 23  }
  0x21   :  { %8649 = sst [smem:[#allocation64_spill]] %s7673_s13 }
  0x22   :  { %s7683_s9 = sld [smem:[%s8620_s0 + %s7530_s22]]   ;;  %s7534_s22 = smov 24  }
  0x23   :  { %s7688_s5 = sld [smem:[%s8620_s0 + %s7531_s28]]   ;;  %s7535_s28 = smov 25  }
  0x24   :  { %s7693_s13 = sld [smem:[%s8620_s0 + %s7532_s7]]   ;;  %s7536_s7 = smov 26  }
  0x25   :  { %s7698_s27 = sld [smem:[%s8620_s0 + %s7533_s15]]   ;;  %s7537_s15 = smov 27  }
  0x26   :  { %s7713_s6 = sld [smem:[%s8620_s0 + %s7536_s7]]   ;;  %s7540_s7 = smov 30  }
  0x27   :  { %s7733_s14 = sld [smem:[%s8620_s0 + %s7540_s7]]  }
  0x28   :  { %8650 = sst [smem:[#allocation65_spill]] %s7683_s9 }
  0x29   :  { %8651 = sst [smem:[#allocation66_spill]] %s7688_s5 }
  0x2a   :  { %s7703_s9 = sld [smem:[%s8620_s0 + %s7534_s22]]   ;;  %s7538_s22 = smov 28  }
  0x2b   :  { %8652 = sst [smem:[#allocation67_spill]] %s7698_s27 }
  0x2c   :  { %s7708_s5 = sld [smem:[%s8620_s0 + %s7535_s28]]   ;;  %s7539_s28 = smov 29  }
  0x2d   :  { %8655 = sst [smem:[#allocation70_spill]] %s7713_s6 }
  0x2e   :  { %s7718_s27 = sld [smem:[%s8620_s0 + %s7537_s15]]   ;;  %s7541_s15 = smov 31  }
  0x2f   :  { %s7723_s24 = sld [smem:[%s8620_s0 + %s7538_s22]]   ;;  %s7542_s22 = smov 32  }
  0x30   :  { %8653 = sst [smem:[#allocation68_spill]] %s7703_s9 }
  0x32   :  { %8654 = sst [smem:[#allocation69_spill]] %s7708_s5 }
  0x33   :  { %s7728_s5 = sld [smem:[%s8620_s0 + %s7539_s28]]  }
  0x34   :  { %8656 = sst [smem:[#allocation71_spill]] %s7718_s27 }
  0x35   :  { %8657 = sst [smem:[#allocation72_spill]] %s7723_s24 }
  0x36   :  { %s7738_s27 = sld [smem:[%s8620_s0 + %s7541_s15]]  }
  0x37   :  { %s7743_s24 = sld [smem:[%s8620_s0 + %s7542_s22]]  }
  0x38   :  { %71 = vsyncpa [#allocation3], 0 }
  0x39   :  { %72 = vsyncpa [#allocation5], 0 }
  0x3a   :  { %73 = vsyncpa [#allocation8], 0 }
  0x3b   :  { %74 = vsyncpa [#allocation11], 0 }
  0x3c   :  { %75 = vsyncpa [#allocation14], 0 }
  0x3d   :  { %76 = vsyncpa [#allocation17], 0 }
  0x3e   :  { %77 = vsyncpa [#allocation20], 0 }
  0x3f   :  { %78 = vsyncpa [#allocation23], 0 }
  0x40   :  { %79 = vsyncpa [#allocation26], 0 }
  0x41   :  { %80 = vsyncpa [#allocation29], 0 }
  0x42   :  { %81 = vsyncpa [#allocation32], 0 }
  0x43   :  { %82 = vsyncpa [#allocation35], 0 }
  0x44   :  { %83 = vsyncpa [#allocation38], 0  ;;  %s7745_s28 = smov 0  }
  0x45 LB: > { %s7543_s0 = smov [#allocation4]   ;;  %s7751_s2 = sadd.s32 4294967295, %s7509_s28   ;;  %s7509_s28 = sphi %s7745_s28, %s89_s28  }
  0x46   : > { %s840_s1 = sshll.u32 %s7543_s0, 4  ;;  %p5492_p0 = scmp.ge.s32.totalorder %s7509_s28, 1  ;;  %s841_s1 = int_to_ptr.vmem [resolvable:$true] %s840_s1 }
  0x47   : > { %p812_p1 = scmp.lt.s32.totalorder %s7509_s28, 7  ;;  %p8625_p2 = scmp.eq.s32.totalorder %s7751_s2, 0 }
  0x48   : > { %s7544_s10 = smov [#allocation7]   ;;  %s7545_s16 = smov [#allocation10]  }
  0x49   : > { %p7756_p3 = pnand %p5492_p0, %p812_p1  ;;  %s866_s11 = sshll.u32 %s7544_s10, 4  ;;  %s7762_s11 = int_to_ptr.vmem [resolvable:$true] %s866_s11 }
  0x4a   : > { %s892_s18 = sshll.u32 %s7545_s16, 4  ;;  %s7546_s22 = smov [#allocation13]   ;;  %s7770_s18 = int_to_ptr.vmem [resolvable:$true] %s892_s18 }
  0x4b   : > { %s8658_s7 = scalar_select %p7756_p3, 1, 0 }
  0x4c   : > { %p6520_p4 = pneg %p7756_p3  ;;  %s7772_s23 = sshll.u32 %s7546_s22, 4  ;;  %s919_s23 = int_to_ptr.vmem [resolvable:$true] %s7772_s23 }
  0x4d   : > { %s6838_s0 = scalar_lea.vmem %s841_s1, 64  ;;  %p6846_p10 = scmp.lt.s32.totalorder %s841_s1, %s841_s1 }
  0x4e   : > { %p7766_p5 = pnand %p8625_p2, %p6520_p4  ;;  %p6839_p7 = scmp.ne.s32.totalorder %s841_s1, %s6838_s0 }
  0x4f   : > { %p6847_p11 = scmp.lt.s32.totalorder %s6838_s0, %s6838_s0 }
  0x50   : > { %p7776_p6 = pneg %p7766_p5 }
  0x51   : > { %p6848_p12 = por %p6847_p11, %p6846_p10 }
  0x52   : > { %p6841_p8 = pnand %p6839_p7, %p7776_p6 }
  0x54   : > { %p6842_p9 = pneg %p6841_p8 }
  0x56   : > { %p6849_p13 = pnand %p6848_p12, %p6842_p9 }
  0x58   : > { %6852 = shalt.err (!%p6849_p13)
}
  0x59   : > { %s8627_s10 = smov 16   ;;  %s8633_s16 = smov 1  }
  0x5a   : > { %6526 = dma.hbm_to_vmem [thread:$0]  (!%p7766_p5), %s7603_s21, 64, %s841_s1, [#allocation5], %s8627_s10, %s8627_s10, %s8633_s16  }
  0x5b   : > { %s6864_s22 = scalar_lea.vmem %s7762_s11, 64  ;;  %p6872_p7 = scmp.lt.s32.totalorder %s7762_s11, %s7762_s11 }
  0x5c   : > { %p6865_p0 = scmp.ne.s32.totalorder %s7762_s11, %s6864_s22  ;;  %p6873_p8 = scmp.lt.s32.totalorder %s6864_s22, %s6864_s22 }
  0x5e   : > { %p6867_p1 = pnand %p6865_p0, %p7776_p6  ;;  %p6874_p9 = por %p6873_p8, %p6872_p7 }
  0x60   : > { %p6868_p4 = pneg %p6867_p1 }
  0x62   : > { %p6875_p10 = pnand %p6874_p9, %p6868_p4 }
  0x64   : > { %6878 = shalt.err (!%p6875_p10)
}
  0x65   : > { %6532 = dma.hbm_to_vmem [thread:$0]  (!%p7766_p5), %s7613_s29, 64, %s7762_s11, [#allocation8], %s8627_s10, %s8627_s10, %s8633_s16  }
  0x66   : > { %s6890_s1 = scalar_lea.vmem %s7770_s18, 64  ;;  %p6898_p0 = scmp.lt.s32.totalorder %s7770_s18, %s7770_s18 }
  0x67   : > { %p6891_p11 = scmp.ne.s32.totalorder %s7770_s18, %s6890_s1  ;;  %p6899_p1 = scmp.lt.s32.totalorder %s6890_s1, %s6890_s1 }
  0x69   : > { %p6893_p12 = pnand %p6891_p11, %p7776_p6  ;;  %p6900_p4 = por %p6899_p1, %p6898_p0 }
  0x6b   : > { %p6894_p13 = pneg %p6893_p12 }
  0x6d   : > { %p6901_p7 = pnand %p6900_p4, %p6894_p13 }
  0x6f   : > { %6904 = shalt.err (!%p6901_p7)
}
  0x70   : > { %s8661_s8 = sld [smem:[#allocation56_spill]]  ;;  %s6916_s11 = scalar_lea.vmem %s919_s23, 64 }
  0x71   : > { %p6917_p8 = scmp.ne.s32.totalorder %s919_s23, %s6916_s11  ;;  %p6924_p11 = scmp.lt.s32.totalorder %s919_s23, %s919_s23 }
  0x72   : > { %p6925_p12 = scmp.lt.s32.totalorder %s6916_s11, %s6916_s11 }
  0x73   : > { %p6919_p9 = pnand %p6917_p8, %p7776_p6 }
  0x74   : > { %p6926_p13 = por %p6925_p12, %p6924_p11 }
  0x75   : > { %p6920_p10 = pneg %p6919_p9 }
  0x76   : > { %6538 = dma.hbm_to_vmem [thread:$0]  (!%p7766_p5), %s8661_s8, 64, %s7770_s18, [#allocation11], %s8627_s10, %s8627_s10, %s8633_s16  }
  0x77   : > { %p6927_p0 = pnand %p6926_p13, %p6920_p10 }
  0x79   : > { %6930 = shalt.err (!%p6927_p0)
}
  0x7a   : > { %6544 = dma.hbm_to_vmem [thread:$0]  (!%p7766_p5), %s7633_s19, 64, %s919_s23, [#allocation14], %s8627_s10, %s8627_s10, %s8633_s16  }
  0x7b   : > { %s7549_s18 = smov [#allocation16]   ;;  %s7550_s22 = smov [#allocation19]  }
  0x7c   : > { %s944_s0 = sshll.u32 %s7549_s18, 4  ;;  %s971_s1 = sshll.u32 %s7550_s22, 4  ;;  %s945_s0 = int_to_ptr.vmem [resolvable:$true] %s944_s0  ;;  %s972_s1 = int_to_ptr.vmem [resolvable:$true] %s971_s1 }
  0x7d   : > { %s6942_s8 = scalar_lea.vmem %s945_s0, 80  ;;  %s6949_s11 = scalar_lea.vmem %s945_s0, 96 }
  0x7e   : > { %p6943_p1 = scmp.ne.s32.totalorder %s945_s0, %s6942_s8  ;;  %p6950_p8 = scmp.lt.s32.totalorder %s945_s0, %s945_s0 }
  0x7f   : > { %p6951_p9 = scmp.lt.s32.totalorder %s6949_s11, %s6942_s8 }
  0x80   : > { %p6945_p4 = pnand %p6943_p1, %p7776_p6 }
  0x81   : > { %p6952_p10 = por %p6951_p9, %p6950_p8 }
  0x82   : > { %p6946_p7 = pneg %p6945_p4 }
  0x84   : > { %p6953_p11 = pnand %p6952_p10, %p6946_p7 }
  0x86   : > { %6956 = shalt.err (!%p6953_p11)
}
  0x87   : > { %6550 = dma.hbm_to_vmem [thread:$0]  (!%p7766_p5), %s7643_s30, 80, %s945_s0, [#allocation17], %s8627_s10, %s8627_s10, %s8633_s16  }
  0x88   : > { %s6968_s23 = scalar_lea.vmem %s972_s1, 16  ;;  %s6975_s18 = scalar_lea.vmem %s972_s1, 32 }
  0x89   : > { %p6969_p12 = scmp.ne.s32.totalorder %s972_s1, %s6968_s23  ;;  %p6976_p1 = scmp.lt.s32.totalorder %s972_s1, %s972_s1 }
  0x8a   : > { %p6977_p4 = scmp.lt.s32.totalorder %s6975_s18, %s6968_s23 }
  0x8b   : > { %p6971_p13 = pnand %p6969_p12, %p7776_p6 }
  0x8c   : > { %p6978_p8 = por %p6977_p4, %p6976_p1 }
  0x8d   : > { %p6972_p0 = pneg %p6971_p13 }
  0x8f   : > { %p6979_p7 = pnand %p6978_p8, %p6972_p0 }
  0x91   : > { %6982 = shalt.err (!%p6979_p7)
}
  0x92   : > { %s8662_s12 = sld [smem:[#allocation60_spill]]  ;;  %s7551_s8 = smov [#allocation22]  }
  0x93   : > { %s995_s22 = sshll.u32 %s7551_s8, 4  ;;  %s996_s22 = int_to_ptr.vmem [resolvable:$true] %s995_s22 }
  0x94   : > { %s6994_s0 = scalar_lea.vmem %s996_s22, 2048  ;;  %p7002_p12 = scmp.lt.s32.totalorder %s996_s22, %s996_s22 }
  0x95   : > { %p6995_p9 = scmp.ne.s32.totalorder %s996_s22, %s6994_s0  ;;  %p7003_p13 = scmp.lt.s32.totalorder %s6994_s0, %s6994_s0 }
  0x97   : > { %p6997_p10 = pnand %p6995_p9, %p7776_p6  ;;  %p7004_p2 = por %p7003_p13, %p7002_p12 }
  0x98   : > { %6556 = dma.hbm_to_vmem [thread:$0]  (!%p7766_p5), %s8662_s12, 16, %s972_s1, [#allocation20]  }
  0x99   : > { %p6998_p11 = pneg %p6997_p10 }
  0x9b   : > { %p7005_p3 = pnand %p7004_p2, %p6998_p11 }
  0x9d   : > { %7008 = shalt.err (!%p7005_p3)
}
  0x9e   : > { %s8629_s11 = smov 128   ;;  %s8663_s4 = sld [smem:[#allocation63_spill]] }
  0x9f   : > { %s8631_s23 = smov 8   ;;  %s7554_s1 = smov [#allocation25]  }
  0xa0   : > { %s1021_s18 = sshll.u32 %s7554_s1, 4  ;;  %s7555_s8 = smov [#allocation28]   ;;  %s1022_s18 = int_to_ptr.vmem [resolvable:$true] %s1021_s18 }
  0xa1   : > { %s1050_s10 = sshll.u32 %s7555_s8, 4  ;;  %s7020_s0 = scalar_lea.vmem %s1022_s18, 2048  ;;  %s1051_s10 = int_to_ptr.vmem [resolvable:$true] %s1050_s10 }
  0xa2   : > { %p7021_p0 = scmp.ne.s32.totalorder %s1022_s18, %s7020_s0  ;;  %p7028_p1 = scmp.lt.s32.totalorder %s1022_s18, %s1022_s18 }
  0xa3   : > { %p7029_p4 = scmp.lt.s32.totalorder %s7020_s0, %s7020_s0 }
  0xa4   : > { %6562 = dma.hbm_to_vmem [thread:$0]  (!%p7766_p5), %s8663_s4, 2048, %s996_s22, [#allocation23], %s8629_s11, %s8629_s11, %s8631_s23  }
  0xa5   : > { %p7023_p2 = pnand %p7021_p0, %p7776_p6  ;;  %p7030_p8 = por %p7029_p4, %p7028_p1 }
  0xa7   : > { %p7024_p3 = pneg %p7023_p2 }
  0xa9   : > { %p7031_p7 = pnand %p7030_p8, %p7024_p3 }
  0xab   : > { %7034 = shalt.err (!%p7031_p7)
}
  0xac   : > { %6568 = dma.hbm_to_vmem [thread:$0]  (!%p7766_p5), %s7678_s20, 2048, %s1022_s18, [#allocation26], %s8629_s11, %s8629_s11, %s8631_s23  }
  0xad   : > { %s7046_s22 = scalar_lea.vmem %s1051_s10, 64  ;;  %p7054_p12 = scmp.lt.s32.totalorder %s1051_s10, %s1051_s10 }
  0xae   : > { %p7047_p9 = scmp.ne.s32.totalorder %s1051_s10, %s7046_s22  ;;  %p7055_p13 = scmp.lt.s32.totalorder %s7046_s22, %s7046_s22 }
  0xb0   : > { %p7049_p10 = pnand %p7047_p9, %p7776_p6  ;;  %p7056_p0 = por %p7055_p13, %p7054_p12 }
  0xb2   : > { %p7050_p11 = pneg %p7049_p10 }
  0xb4   : > { %p7057_p2 = pnand %p7056_p0, %p7050_p11 }
  0xb6   : > { %7060 = shalt.err (!%p7057_p2)
}
  0xb7   : > { %s8664_s1 = smov 16   ;;  %s7556_s8 = smov [#allocation31]  }
  0xb8   : > { %6574 = dma.hbm_to_vmem [thread:$0]  (!%p7766_p5), %s7693_s13, 64, %s1051_s10, [#allocation29], %s8664_s1, %s8664_s1, %s8633_s16  }
  0xb9   : > { %s1076_s18 = sshll.u32 %s7556_s8, 4  ;;  %s7557_s0 = smov [#allocation34]   ;;  %s1077_s18 = int_to_ptr.vmem [resolvable:$true] %s1076_s18 }
  0xba   : > { %s1100_s11 = sshll.u32 %s7557_s0, 4  ;;  %s7072_s23 = scalar_lea.vmem %s1077_s18, 512  ;;  %s1101_s11 = int_to_ptr.vmem [resolvable:$true] %s1100_s11 }
  0xbb   : > { %p7073_p3 = scmp.ne.s32.totalorder %s1077_s18, %s7072_s23  ;;  %p7080_p8 = scmp.lt.s32.totalorder %s1077_s18, %s1077_s18 }
  0xbc   : > { %p7081_p7 = scmp.lt.s32.totalorder %s7072_s23, %s7072_s23 }
  0xbd   : > { %p7075_p1 = pnand %p7073_p3, %p7776_p6 }
  0xbe   : > { %p7082_p9 = por %p7081_p7, %p7080_p8 }
  0xbf   : > { %p7076_p4 = pneg %p7075_p1 }
  0xc1   : > { %p7083_p10 = pnand %p7082_p9, %p7076_p4 }
  0xc3   : > { %7086 = shalt.err (!%p7083_p10)
}
  0xc4   : > { %s8665_s22 = smov 8   ;;  %s8666_s10 = smov 128  }
  0xc5   : > { %s8667_s9 = sld [smem:[#allocation68_spill]]  ;;  %s7098_s8 = scalar_lea.vmem %s1101_s11, 2048 }
  0xc6   : > { %p7099_p11 = scmp.ne.s32.totalorder %s1101_s11, %s7098_s8  ;;  %p7106_p0 = scmp.lt.s32.totalorder %s1101_s11, %s1101_s11 }
  0xc7   : > { %p7107_p2 = scmp.lt.s32.totalorder %s7098_s8, %s7098_s8 }
  0xc8   : > { %p7101_p12 = pnand %p7099_p11, %p7776_p6 }
  0xc9   : > { %p7108_p3 = por %p7107_p2, %p7106_p0 }
  0xca   : > { %p7102_p13 = pneg %p7101_p12 }
  0xcb   : > { %6580 = dma.hbm_to_vmem [thread:$0]  (!%p7766_p5), %s8667_s9, 512, %s1077_s18, [#allocation32], %s8666_s10, %s8666_s10, %s8665_s22  }
  0xcc   : > { %p7109_p1 = pnand %p7108_p3, %p7102_p13 }
  0xce   : > { %7112 = shalt.err (!%p7109_p1)
}
  0xcf   : > { %s8668_s6 = sld [smem:[#allocation70_spill]]  ;;  %s7558_s23 = smov [#allocation2]  }
  0xd0   : > { %s827_s18 = sshll.u32 %s7558_s23, 4  ;;  %s828_s18 = int_to_ptr.vmem [resolvable:$true] %s827_s18 }
  0xd1   : > { %s7124_s0 = scalar_lea.vmem %s828_s18, 1024  ;;  %p7132_p9 = scmp.lt.s32.totalorder %s828_s18, %s828_s18 }
  0xd2   : > { %p7125_p4 = scmp.ne.s32.totalorder %s828_s18, %s7124_s0  ;;  %p7133_p10 = scmp.lt.s32.totalorder %s7124_s0, %s7124_s0 }
  0xd4   : > { %p7127_p8 = pnand %p7125_p4, %p7776_p6  ;;  %p7134_p11 = por %p7133_p10, %p7132_p9 }
  0xd5   : > { %6586 = dma.hbm_to_vmem [thread:$0]  (!%p7766_p5), %s8668_s6, 2048, %s1101_s11, [#allocation35], %s8666_s10, %s8666_s10, %s8665_s22  }
  0xd6   : > { %p7128_p7 = pneg %p7127_p8 }
  0xd8   : > { %p7135_p12 = pnand %p7134_p11, %p7128_p7 }
  0xda   : > { %7138 = shalt.err (!%p7135_p12)
}
  0xdb   : > { %s8635_s8 = smov 64   ;;  %s8636_s16 = smov 4  }
  0xdc   : > { %6523 = dma.hbm_to_vmem [thread:$0]  (!%p7766_p5), %s7598_s17, 1024, %s828_s18, [#allocation3], %s8635_s8, %s8635_s8, %s8636_s16  }
  0xdd   : > { %s7561_s11 = smov [#allocation6]   ;;  %s7562_s4 = smov [#allocation9]  }
  0xde   : > { %s853_s23 = sshll.u32 %s7561_s11, 4  ;;  %s879_s6 = sshll.u32 %s7562_s4, 4  ;;  %s854_s23 = int_to_ptr.vmem [resolvable:$true] %s853_s23  ;;  %s880_s6 = int_to_ptr.vmem [resolvable:$true] %s879_s6 }
  0xdf   : > { %s7150_s9 = scalar_lea.vmem %s854_s23, 1024  ;;  %p7158_p3 = scmp.lt.s32.totalorder %s854_s23, %s854_s23 }
  0xe0   : > { %p7151_p13 = scmp.ne.s32.totalorder %s854_s23, %s7150_s9  ;;  %p7159_p1 = scmp.lt.s32.totalorder %s7150_s9, %s7150_s9 }
  0xe2   : > { %p7153_p0 = pnand %p7151_p13, %p7776_p6  ;;  %p7160_p4 = por %p7159_p1, %p7158_p3 }
  0xe4   : > { %p7154_p2 = pneg %p7153_p0 }
  0xe6   : > { %p7161_p8 = pnand %p7160_p4, %p7154_p2 }
  0xe8   : > { %7164 = shalt.err (!%p7161_p8)
}
  0xe9   : > { %6529 = dma.hbm_to_vmem [thread:$0]  (!%p7766_p5), %s7608_s25, 1024, %s854_s23, [#allocation5], %s8635_s8, %s8635_s8, %s8636_s16  }
  0xea   : > { %s7176_s4 = scalar_lea.vmem %s880_s6, 1024  ;;  %p7184_p11 = scmp.lt.s32.totalorder %s880_s6, %s880_s6 }
  0xeb   : > { %p7177_p7 = scmp.ne.s32.totalorder %s880_s6, %s7176_s4  ;;  %p7185_p12 = scmp.lt.s32.totalorder %s7176_s4, %s7176_s4 }
  0xed   : > { %p7179_p9 = pnand %p7177_p7, %p7776_p6  ;;  %p7186_p13 = por %p7185_p12, %p7184_p11 }
  0xef   : > { %p7180_p10 = pneg %p7179_p9 }
  0xf1   : > { %p7187_p0 = pnand %p7186_p13, %p7180_p10 }
  0xf3   : > { %7190 = shalt.err (!%p7187_p0)
}
  0xf4   : > { %s8669_s3 = sld [smem:[#allocation55_spill]]  ;;  %s7563_s9 = smov [#allocation12]  }
  0xf5   : > { %s905_s18 = sshll.u32 %s7563_s9, 4  ;;  %s7564_s0 = smov [#allocation15]   ;;  %s906_s18 = int_to_ptr.vmem [resolvable:$true] %s905_s18 }
  0xf6   : > { %s931_s11 = sshll.u32 %s7564_s0, 4  ;;  %s7202_s23 = scalar_lea.vmem %s906_s18, 1024  ;;  %s932_s11 = int_to_ptr.vmem [resolvable:$true] %s931_s11 }
  0xf7   : > { %p7203_p2 = scmp.ne.s32.totalorder %s906_s18, %s7202_s23  ;;  %p7210_p4 = scmp.lt.s32.totalorder %s906_s18, %s906_s18 }
  0xf8   : > { %p7211_p8 = scmp.lt.s32.totalorder %s7202_s23, %s7202_s23 }
  0xf9   : > { %p7205_p3 = pnand %p7203_p2, %p7776_p6 }
  0xfa   : > { %6535 = dma.hbm_to_vmem [thread:$0]  (!%p7766_p5), %s8669_s3, 1024, %s880_s6, [#allocation8], %s8635_s8, %s8635_s8, %s8636_s16  }
  0xfb   : > { %p7206_p1 = pneg %p7205_p3  ;;  %p7212_p7 = por %p7211_p8, %p7210_p4 }
  0xfd   : > { %p7213_p9 = pnand %p7212_p7, %p7206_p1 }
  0xff   : > { %7216 = shalt.err (!%p7213_p9)
}
 0x100   : > { %s8670_s6 = sld [smem:[#allocation57_spill]]  ;;  %s7228_s4 = scalar_lea.vmem %s932_s11, 80 }
 0x101   : > { %p7229_p10 = scmp.ne.s32.totalorder %s932_s11, %s7228_s4  ;;  %s7235_s9 = scalar_lea.vmem %s932_s11, 96 }
 0x102   : > { %p7236_p13 = scmp.lt.s32.totalorder %s932_s11, %s932_s11  ;;  %p7237_p0 = scmp.lt.s32.totalorder %s7235_s9, %s7228_s4 }
 0x103   : > { %p7231_p11 = pnand %p7229_p10, %p7776_p6 }
 0x104   : > { %p7238_p2 = por %p7237_p0, %p7236_p13 }
 0x105   : > { %p7232_p12 = pneg %p7231_p11 }
 0x106   : > { %6541 = dma.hbm_to_vmem [thread:$0]  (!%p7766_p5), %s8670_s6, 1024, %s906_s18, [#allocation11], %s8635_s8, %s8635_s8, %s8636_s16  }
 0x107   : > { %p7239_p3 = pnand %p7238_p2, %p7232_p12 }
 0x109   : > { %7242 = shalt.err (!%p7239_p3)
}
 0x10a   : > { %s8671_s0 = smov 1   ;;  %s8672_s23 = sld [smem:[#allocation58_spill]] }
 0x10b   : > { %s7565_s18 = smov [#allocation18]   ;;  %s7566_s8 = smov [#allocation21]  }
 0x10c   : > { %s957_s6 = sshll.u32 %s7565_s18, 4  ;;  %s985_s16 = sshll.u32 %s7566_s8, 4  ;;  %s958_s6 = int_to_ptr.vmem [resolvable:$true] %s957_s6  ;;  %s986_s16 = int_to_ptr.vmem [resolvable:$true] %s985_s16 }
 0x10d   : > { %s7254_s3 = scalar_lea.vmem %s958_s6, 256  ;;  %p7262_p7 = scmp.lt.s32.totalorder %s958_s6, %s958_s6 }
 0x10e   : > { %p7255_p1 = scmp.ne.s32.totalorder %s958_s6, %s7254_s3  ;;  %p7263_p9 = scmp.lt.s32.totalorder %s7254_s3, %s7254_s3 }
 0x110   : > { %6547 = dma.hbm_to_vmem [thread:$0]  (!%p7766_p5), %s8672_s23, 80, %s932_s11, [#allocation14], %s8664_s1, %s8664_s1, %s8671_s0  }
 0x111   : > { %p7257_p4 = pnand %p7255_p1, %p7776_p6  ;;  %p7264_p10 = por %p7263_p9, %p7262_p7 }
 0x113   : > { %p7258_p8 = pneg %p7257_p4 }
 0x115   : > { %p7265_p11 = pnand %p7264_p10, %p7258_p8 }
 0x117   : > { %7268 = shalt.err (!%p7265_p11)
}
 0x118   : > { %s8673_s4 = smov 4   ;;  %s8674_s9 = smov 64  }
 0x119   : > { %s8675_s11 = sld [smem:[#allocation59_spill]]  ;;  %s7280_s8 = scalar_lea.vmem %s986_s16, 16 }
 0x11a   : > { %p7281_p12 = scmp.ne.s32.totalorder %s986_s16, %s7280_s8  ;;  %s7287_s23 = scalar_lea.vmem %s986_s16, 32 }
 0x11b   : > { %p7288_p2 = scmp.lt.s32.totalorder %s986_s16, %s986_s16  ;;  %p7289_p3 = scmp.lt.s32.totalorder %s7287_s23, %s7280_s8 }
 0x11c   : > { %p7283_p13 = pnand %p7281_p12, %p7776_p6 }
 0x11d   : > { %p7290_p1 = por %p7289_p3, %p7288_p2 }
 0x11e   : > { %p7284_p0 = pneg %p7283_p13 }
 0x11f   : > { %6553 = dma.hbm_to_vmem [thread:$0]  (!%p7766_p5), %s8675_s11, 256, %s958_s6, [#allocation17], %s8674_s9, %s8674_s9, %s8673_s4  }
 0x120   : > { %p7291_p4 = pnand %p7290_p1, %p7284_p0 }
 0x122   : > { %7294 = shalt.err (!%p7291_p4)
}
 0x123   : > { %s8676_s3 = sld [smem:[#allocation62_spill]]  ;;  %s7567_s18 = smov [#allocation24]  }
 0x124   : > { %s1008_s12 = sshll.u32 %s7567_s18, 4  ;;  %s7568_s6 = smov [#allocation27]   ;;  %s1009_s12 = int_to_ptr.vmem [resolvable:$true] %s1008_s12 }
 0x125   : > { %s1034_s4 = sshll.u32 %s7568_s6, 4  ;;  %s7306_s9 = scalar_lea.vmem %s1009_s12, 64  ;;  %s1035_s4 = int_to_ptr.vmem [resolvable:$true] %s1034_s4 }
 0x126   : > { %p7307_p8 = scmp.ne.s32.totalorder %s1009_s12, %s7306_s9  ;;  %p7314_p10 = scmp.lt.s32.totalorder %s1009_s12, %s1009_s12 }
 0x127   : > { %p7315_p11 = scmp.lt.s32.totalorder %s7306_s9, %s7306_s9 }
 0x128   : > { %p7309_p7 = pnand %p7307_p8, %p7776_p6 }
 0x129   : > { %6559 = dma.hbm_to_vmem [thread:$0]  (!%p7766_p5), %s8676_s3, 16, %s986_s16, [#allocation20]  }
 0x12a   : > { %p7310_p9 = pneg %p7309_p7  ;;  %p7316_p12 = por %p7315_p11, %p7314_p10 }
 0x12c   : > { %p7317_p13 = pnand %p7316_p12, %p7310_p9 }
 0x12e   : > { %7320 = shalt.err (!%p7317_p13)
}
 0x12f   : > { %s8677_s16 = sld [smem:[#allocation64_spill]]  ;;  %s7332_s11 = scalar_lea.vmem %s1035_s4, 64 }
 0x130   : > { %p7333_p0 = scmp.ne.s32.totalorder %s1035_s4, %s7332_s11  ;;  %p7340_p1 = scmp.lt.s32.totalorder %s1035_s4, %s1035_s4 }
 0x131   : > { %p7341_p4 = scmp.lt.s32.totalorder %s7332_s11, %s7332_s11 }
 0x132   : > { %p7335_p2 = pnand %p7333_p0, %p7776_p6 }
 0x133   : > { %p7342_p8 = por %p7341_p4, %p7340_p1 }
 0x134   : > { %p7336_p3 = pneg %p7335_p2 }
 0x135   : > { %6565 = dma.hbm_to_vmem [thread:$0]  (!%p7766_p5), %s8677_s16, 64, %s1009_s12, [#allocation23], %s8664_s1, %s8664_s1, %s8671_s0  }
 0x136   : > { %p7343_p7 = pnand %p7342_p8, %p7336_p3 }
 0x138   : > { %7346 = shalt.err (!%p7343_p7)
}
 0x139   : > { %s8678_s8 = sld [smem:[#allocation65_spill]]  ;;  %s7569_s12 = smov [#allocation30]  }
 0x13a   : > { %s1063_s23 = sshll.u32 %s7569_s12, 4  ;;  %s7570_s3 = smov [#allocation33]   ;;  %s1064_s23 = int_to_ptr.vmem [resolvable:$true] %s1063_s23 }
 0x13b   : > { %s1090_s18 = sshll.u32 %s7570_s3, 4  ;;  %s7358_s6 = scalar_lea.vmem %s1064_s23, 512  ;;  %s1091_s18 = int_to_ptr.vmem [resolvable:$true] %s1090_s18 }
 0x13c   : > { %p7359_p9 = scmp.ne.s32.totalorder %s1064_s23, %s7358_s6  ;;  %p7366_p12 = scmp.lt.s32.totalorder %s1064_s23, %s1064_s23 }
 0x13d   : > { %p7367_p13 = scmp.lt.s32.totalorder %s7358_s6, %s7358_s6 }
 0x13e   : > { %p7361_p10 = pnand %p7359_p9, %p7776_p6 }
 0x13f   : > { %6571 = dma.hbm_to_vmem [thread:$0]  (!%p7766_p5), %s8678_s8, 64, %s1035_s4, [#allocation26], %s8664_s1, %s8664_s1, %s8671_s0  }
 0x140   : > { %p7362_p11 = pneg %p7361_p10  ;;  %p7368_p0 = por %p7367_p13, %p7366_p12 }
 0x142   : > { %p7369_p2 = pnand %p7368_p0, %p7362_p11 }
 0x144   : > { %7372 = shalt.err (!%p7369_p2)
}
 0x145   : > { %s8679_s1 = sld [smem:[#allocation67_spill]]  ;;  %s7384_s0 = scalar_lea.vmem %s1091_s18, 16 }
 0x146   : > { %p7385_p3 = scmp.ne.s32.totalorder %s1091_s18, %s7384_s0  ;;  %s7391_s4 = scalar_lea.vmem %s1091_s18, 32 }
 0x147   : > { %p7392_p8 = scmp.lt.s32.totalorder %s1091_s18, %s1091_s18  ;;  %p7393_p7 = scmp.lt.s32.totalorder %s7391_s4, %s7384_s0 }
 0x148   : > { %p7387_p1 = pnand %p7385_p3, %p7776_p6 }
 0x149   : > { %p7394_p9 = por %p7393_p7, %p7392_p8 }
 0x14a   : > { %p7388_p4 = pneg %p7387_p1 }
 0x14b   : > { %6577 = dma.hbm_to_vmem [thread:$0]  (!%p7766_p5), %s8679_s1, 512, %s1064_s23, [#allocation29], %s8666_s10, %s8666_s10, %s8665_s22  }
 0x14c   : > { %p7395_p10 = pnand %p7394_p9, %p7388_p4 }
 0x14e   : > { %7398 = shalt.err (!%p7395_p10)
}
 0x14f   : > { %s8680_s9 = sld [smem:[#allocation69_spill]]  ;;  %s7571_s16 = smov [#allocation36]  }
 0x150   : > { %s1114_s11 = sshll.u32 %s7571_s16, 4  ;;  %s7572_s22 = smov [#allocation37]   ;;  %s1115_s11 = int_to_ptr.vmem [resolvable:$true] %s1114_s11 }
 0x151   : > { %s1128_s10 = sshll.u32 %s7572_s22, 4  ;;  %s7410_s8 = scalar_lea.vmem %s1115_s11, 16  ;;  %s1129_s10 = int_to_ptr.vmem [resolvable:$true] %s1128_s10 }
 0x152   : > { %p7411_p11 = scmp.ne.s32.totalorder %s1115_s11, %s7410_s8  ;;  %s7417_s12 = scalar_lea.vmem %s1115_s11, 32 }
 0x153   : > { %p7418_p0 = scmp.lt.s32.totalorder %s1115_s11, %s1115_s11  ;;  %p7419_p2 = scmp.lt.s32.totalorder %s7417_s12, %s7410_s8 }
 0x154   : > { %p7413_p12 = pnand %p7411_p11, %p7776_p6 }
 0x155   : > { %6583 = dma.hbm_to_vmem [thread:$0]  (!%p7766_p5), %s8680_s9, 16, %s1091_s18, [#allocation32]  }
 0x156   : > { %p7414_p13 = pneg %p7413_p12  ;;  %p7420_p3 = por %p7419_p2, %p7418_p0 }
 0x158   : > { %p7421_p1 = pnand %p7420_p3, %p7414_p13 }
 0x15a   : > { %7424 = shalt.err (!%p7421_p1)
}
 0x15b   : > { %s8681_s23 = sld [smem:[#allocation71_spill]]  ;;  %s7436_s3 = scalar_lea.vmem %s1129_s10, 16 }
 0x15c   : > { %p7437_p4 = scmp.ne.s32.totalorder %s1129_s10, %s7436_s3  ;;  %s7443_s18 = scalar_lea.vmem %s1129_s10, 32 }
 0x15d   : > { %p7444_p9 = scmp.lt.s32.totalorder %s1129_s10, %s1129_s10  ;;  %p7445_p10 = scmp.lt.s32.totalorder %s7443_s18, %s7436_s3 }
 0x15e   : > { %p7439_p8 = pnand %p7437_p4, %p7776_p6 }
 0x15f   : > { %p7446_p11 = por %p7445_p10, %p7444_p9 }
 0x160   : > { %p7440_p7 = pneg %p7439_p8 }
 0x161   : > { %6589 = dma.hbm_to_vmem [thread:$0]  (!%p7766_p5), %s8681_s23, 16, %s1115_s11, [#allocation35]  }
 0x162   : > { %p7447_p12 = pnand %p7446_p11, %p7440_p7 }
 0x164   : > { %7450 = shalt.err (!%p7447_p12)
}
 0x165   : > { %6592 = dma.hbm_to_vmem [thread:$0]  (!%p7766_p5), %s7728_s5, 16, %s1129_s10, [#allocation38]  }
 0x166   : > { %p8682_p13 = scmp.ne.s32.totalorder %s8658_s7, 0 }
 0x167   : > { %p8683_p0 = scmp.eq.s32.totalorder (!%p8682_p13), %s7751_s2, 0 }
 0x168   : > { %1156 = sbr.rel (%p8682_p13) target bundleno = 8450 (0x2102), region = 140 }
 0x16d   : > { %7456 = dma.done.wait (%p8683_p0), [#allocation3], 1024   ;;  %p8684_p2 = pmov %p8683_p0 }
 0x16e   : > { %p8685_p6 = pmov %p8683_p0 }
 0x16f   : > { %7458 = vsyncadd (%p8684_p2), [#allocation3], 4294966272 }
 0x170   : > { %7460 = dma.done.wait (%p8685_p6), [#allocation5], 1088   ;;  %p8686_p3 = pmov %p8683_p0 }
 0x171   : > { %p8687_p1 = pmov %p8683_p0 }
 0x172   : > { %7462 = vsyncadd (%p8686_p3), [#allocation5], 4294966208 }
 0x173   : > { %7464 = dma.done.wait (%p8687_p1), [#allocation8], 1088   ;;  %p8688_p5 = pmov %p8683_p0 }
 0x174   : > { %p8689_p4 = pmov %p8683_p0 }
 0x175   : > { %7466 = vsyncadd (%p8688_p5), [#allocation8], 4294966208 }
 0x176   : > { %7468 = dma.done.wait (%p8689_p4), [#allocation11], 1088   ;;  %p8690_p8 = pmov %p8683_p0 }
 0x177   : > { %p8691_p7 = pmov %p8683_p0 }
 0x178   : > { %7470 = vsyncadd (%p8690_p8), [#allocation11], 4294966208 }
 0x179   : > { %7472 = dma.done.wait (%p8691_p7), [#allocation14], 144   ;;  %p8692_p9 = pmov %p8683_p0 }
 0x17a   : > { %p8693_p10 = pmov %p8683_p0 }
 0x17b   : > { %7474 = vsyncadd (%p8692_p9), [#allocation14], 4294967152 }
 0x17c   : > { %7476 = dma.done.wait (%p8693_p10), [#allocation17], 336   ;;  %p8694_p11 = pmov %p8683_p0 }
 0x17d   : > { %p8695_p12 = pmov %p8683_p0 }
 0x17e   : > { %7478 = vsyncadd (%p8694_p11), [#allocation17], 4294966960 }
 0x17f   : > { %7480 = dma.done.wait (%p8695_p12), [#allocation20], 32   ;;  %p8696_p13 = pmov %p8683_p0 }
 0x181   : > { %7482 = vsyncadd (%p8696_p13), [#allocation20], 4294967264 }
 0x182   : > { %7484 = dma.done.wait (%p8683_p0), [#allocation23], 2112   ;;  %p8697_p2 = pmov %p8683_p0 }
 0x183   : > { %p8698_p6 = pmov %p8683_p0 }
 0x184   : > { %7486 = vsyncadd (%p8697_p2), [#allocation23], 4294965184 }
 0x185   : > { %7488 = dma.done.wait (%p8698_p6), [#allocation26], 2112   ;;  %p8699_p3 = pmov %p8683_p0 }
 0x186   : > { %p8700_p1 = pmov %p8683_p0 }
 0x187   : > { %7490 = vsyncadd (%p8699_p3), [#allocation26], 4294965184 }
 0x188   : > { %7492 = dma.done.wait (%p8700_p1), [#allocation29], 576   ;;  %p8701_p5 = pmov %p8683_p0 }
 0x189   : > { %p8702_p4 = pmov %p8683_p0 }
 0x18a   : > { %7494 = vsyncadd (%p8701_p5), [#allocation29], 4294966720 }
 0x18b   : > { %7496 = dma.done.wait (%p8702_p4), [#allocation32], 528   ;;  %p8703_p8 = pmov %p8683_p0 }
 0x18c   : > { %p8704_p7 = pmov %p8683_p0 }
 0x18d   : > { %7498 = vsyncadd (%p8703_p8), [#allocation32], 4294966768 }
 0x18e   : > { %7500 = dma.done.wait (%p8704_p7), [#allocation35], 2064   ;;  %p8705_p9 = pmov %p8683_p0 }
 0x18f   : > { %p8706_p10 = pmov %p8683_p0 }
 0x190   : > { %7502 = vsyncadd (%p8705_p9), [#allocation35], 4294965232 }
 0x191   : > { %7504 = dma.done.wait (%p8706_p10), [#allocation38], 16   ;;  %p8707_p11 = pmov %p8683_p0 }
 0x192   : > { %s8708_s7 = sld [smem:[#allocation52_spill]]  ;;  %p1341_p12 = scmp.lt.s32.totalorder %s7751_s2, 5  ;;  %v7573_v0 = vmov 0.0   ;;  %vm7574_vm0 = vmmov 0   ;;  %v6713_v1 = vld [vmem:[#allocation6 + $0x8] sm:$0xff]   ;;  %v6715_v3 = vld [vmem:[#allocation6] sm:$0xff]  }
 0x193   : > { %7506 = vsyncadd (%p8707_p11), [#allocation38], 4294967280  ;;  %5954 = vmatprep.subr.bf16.mxu1 %v7573_v0  ;;  %5946 = vmatprep.subr.bf16.mxu0 %v7573_v0  ;;  %v6714_v2 = vld [vmem:[#allocation2 + $0x8] sm:$0xff]   ;;  %v6716_v4 = vld [vmem:[#allocation2] sm:$0xff]   ;;  %vm1428_vm1 = vcmask 261120   ;;  %vm1647_vm2 = vcmask 64512  }
 0x194   : > { %5958 = vmatprep.mubr.msk.bf16.mxu1 %vm7574_vm0, %v7573_v0  ;;  %s8715_s2 = smov (!%p1341_p12, %s7751_s2), 5  ;;  %5950 = vmatprep.mubr.msk.bf16.mxu0 %vm7574_vm0, %v7573_v0  ;;  %v5553_v7 = vld [vmem:[#allocation7] ss:$0 sm:$0xff]  ;;  %v5549_v11 = vld [vmem:[#allocation4] ss:$0 sm:$0xff]  ;;  %v6717_v22 = vld [vmem:[#allocation9 + $0x8] sm:$0xff]  }
 0x195   : > { %s5543_s15 = sshll.u32 %s8715_s2, 3  ;;  %5955 = vmatpush3.bf16.msra.mxu1 %v6713_v1  ;;  %5947 = vmatpush3.bf16.msra.mxu0 %v6714_v2  ;;  %v6718_v23 = vld [vmem:[#allocation9] sm:$0xff]   ;;  %vm1664_vm3 = vcmask 1043456   ;;  %v6719_v43 = vld [vmem:[#allocation12 + $0x8] sm:$0xff]   ;;  %s8709_s6 = sld [smem:[#allocation53_spill]]  ;;  %v6721_v62 = vld [vmem:[#allocation6 + $0x18] sm:$0xff]  }
 0x196   : > { %5956 = vmatprep.subr.bf16.mxu1 %v7573_v0  ;;  %5948 = vmatprep.subr.bf16.mxu0 %v7573_v0  ;;  %v5557_v35 = vld [vmem:[#allocation10] ss:$0 sm:$0xff]  ;;  %v6720_v48 = vld [vmem:[#allocation12] sm:$0xff]   ;;  %s8710_s1 = sld [smem:[#allocation54_spill]]  ;;  %s5705_s0 = sshll.u32 %s8715_s2, 5  ;;  %v6722_v63 = vld [vmem:[#allocation6 + $0x10] sm:$0xff]  }
 0x197   : > { %v5563_v54 = vld [vmem:[#allocation13] ss:$0 sm:$0xff]  ;;  %vm2164_vm4 = vcmask 523264   ;;  %s8711_s9 = sld [smem:[#allocation61_spill]]  ;;  %s8355_s16 = scalar_lea.vmem %s7733_s14, %s5705_s0  ;;  %vm3782_vm5 = vcmask 257024   ;;  %vm4763_vm6 = vcmask 1040384  }
 0x198   : > { %s1344_s26 = scalar_lea.vmem %s8708_s7, %s5543_s15  ;;  %s8712_s11 = sld [smem:[#allocation66_spill]]  ;;  %vm4765_vm7 = vcmask 1041408   ;;  %vm4767_vm8 = vcmask 1042432   ;;  %vm4769_vm9 = vcmask 27648   ;;  %vm5102_vm10 = vcmask 81920  }
 0x199   : > { %v8036_v5 = vld [vmem:[%s1344_s26] sm:$0xff]  ;;  %5957 = vmatpush3.bf16.msra.mxu1 %v6715_v3  ;;  %5949 = vmatpush3.bf16.msra.mxu0 %v6716_v4  ;;  %s8713_s22 = sld [smem:[#allocation72_spill]]  ;;  %s5548_s10 = sshll.u32 %s8715_s2, 2 }
 0x19a   : > { %v1404_v6 = vpack.c.bf16 %v8036_v5, %v8036_v5  ;;  %5970 = vmatprep.subr.bf16.mxu1 %v7573_v0  ;;  %5962 = vmatprep.subr.bf16.mxu0 %v7573_v0  ;;  %s1358_s8 = scalar_lea.vmem %s7738_s27, %s5548_s10  ;;  %s1361_s12 = scalar_lea.vmem %s7743_s24, %s8715_s2 }
 0x19b   : > { %s1349_s4 = scalar_lea.vmem %s8709_s6, %s5705_s0 }
 0x19c   : > { %5959 = vmatmul.mubr.msk.bf16.vlgmr.msra.gmra.mxu1 %vm1428_vm1, %v1404_v6  ;;  %5951 = vmatmul.mubr.msk.bf16.vlgmr.msra.gmra.mxu0 %vm1428_vm1, %v1404_v6  ;;  %v8073_v1 = vld [vmem:[%s1349_s4] sm:$0xff]  }
 0x19d   : > { %5972 = vmatprep.mubr.msk.bf16.mxu1 %vm7574_vm0, %v7573_v0  ;;  %5966 = vmatprep.mubr.msk.bf16.mxu0 %vm7574_vm0, %v7573_v0  ;;  %v1372_v2 = vunpack.c.l.bf16 %v8073_v1  ;;  %v1373_v3 = vunpack.c.h.bf16 %v8073_v1  ;;  %v8078_v4 = vld [vmem:[%s8710_s1] sm:$0xff]  }
 0x19e   : > { %5963 = vmatpush3.bf16.msra.mxu0 %v6717_v22 }
 0x19f   : > { %5964 = vmatprep.subr.bf16.mxu0 %v7573_v0 }
 0x1a2   : > { %5965 = vmatpush3.bf16.msra.mxu0 %v6718_v23 }
 0x1a3   : > { %5976 = vmatprep.subr.bf16.mxu0 %v7573_v0 }
 0x1a5   : > { %5967 = vmatmul.mubr.msk.bf16.vlgmr.msra.gmra.mxu0 %vm1428_vm1, %v1404_v6  ;;  %v8083_v6 = vld [vmem:[%s8710_s1 + $0x8] sm:$0xff]  }
 0x1a6   : > { %5978 = vmatprep.mubr.msk.bf16.mxu0 %vm7574_vm0, %v7573_v0 }
 0x25c   : > { %v1529_v8 = vpop.f32.mrf.mxu1  ;;  %v1466_v10 = vpop.f32.mrf.mxu0 }
 0x25d   : > { %v1530_v9 = vadd.f32 %v5553_v7, %v1529_v8  ;;  %v1467_v17 = vadd.f32 %v5549_v11, %v1466_v10  ;;  %v5717_v7 = vunpack.c.l.bf16 %v8078_v4  ;;  %v5718_v8 = vunpack.c.h.bf16 %v8078_v4  ;;  %v8089_v11 = vld [vmem:[%s1349_s4 + $0x10] sm:$0xff]  }
 0x25e   : > { %v5960_v12 = vpop.f32.mrf.mxu1  ;;  %v5952_v14 = vpop.f32.mrf.mxu0 }
 0x25f   : > { %v1599_v13 = vpack.c.bf16 %v1530_v9, %v1530_v9  ;;  %v1598_v21 = vpack.c.bf16 %v1467_v17, %v1467_v17  ;;  %v8092_v12 = vld [vmem:[%s8710_s1 + $0x10] sm:$0xff]   ;;  %v5721_v14 = vunpack.c.l.bf16 %v8083_v6  ;;  %v1377_v17 = vunpack.c.h.bf16 %v8089_v11 }
 0x260   : > { %v1532_v15 = vpop.f32.mrf.mxu1  ;;  %v1469_v18 = vpop.f32.mrf.mxu0  ;;  %v5726_v22 = vunpack.c.h.bf16 %v8092_v12 }
 0x261   : > { %v1604_v16 = vsel %vm1428_vm1, %v1599_v13, 0  ;;  %v8094_v13 = vld [vmem:[%s1349_s4 + $0x18] sm:$0xff]   ;;  %v5722_v15 = vunpack.c.h.bf16 %v8083_v6 }
 0x262   : > { %v5961_v19 = vpop.f32.mrf.mxu1  ;;  %5971 = vmatpush3.bf16.xpose.msra.mxu1 %v1604_v16  ;;  %v5953_v20 = vpop.f32.mrf.mxu0  ;;  %v1376_v16 = vunpack.c.l.bf16 %v8089_v11  ;;  %v8101_v18 = vld [vmem:[%s8710_s1 + $0x18] sm:$0xff]  }
 0x263   : > { %5982 = vmatprep.subr.bf16.mxu1 %v7573_v0  ;;  %v1396_v19 = vadd.f32 %v5717_v7, %v1372_v2  ;;  %v1397_v20 = vadd.f32 %v5718_v8, %v1373_v3 }
 0x265   : > { %v1592_v36 = vpop.f32.mrf.mxu0 }
 0x266   : > { %v1593_v37 = vadd.f32 %v5557_v35, %v1592_v36 }
 0x267   : > { %v5968_v38 = vpop.f32.mrf.mxu0 }
 0x268   : > { %v1660_v39 = vpack.c.bf16 %v1593_v37, %v1593_v37 }
 0x269   : > { %5973 = vmatmul.mubr.msk.bf16.vlgmr.msra.gmra.mxu1 %vm1428_vm1, %v1598_v21  ;;  %v1595_v40 = vpop.f32.mrf.mxu0  ;;  %v5725_v21 = vunpack.c.l.bf16 %v8092_v12 }
 0x26a   : > { %5986 = vmatprep.mubr.msk.bf16.mxu1 %vm7574_vm0, %v7573_v0  ;;  %v1666_v41 = vsel %vm1664_vm3, %v1660_v39, 0  ;;  %5983 = vmatpush3.bf16.msra.mxu1 %v6719_v43  ;;  %v6724_v43 = vld [vmem:[#allocation2 + $0x10] sm:$0xff]  }
 0x26b   : > { %v5969_v42 = vpop.f32.mrf.mxu0  ;;  %5977 = vmatpush3.bf16.msra.mxu0 %v1666_v41  ;;  %5984 = vmatprep.subr.bf16.mxu1 %v7573_v0 }
 0x26c   : > { %5990 = vmatprep.subr.bf16.mxu0 %v7573_v0  ;;  %v6723_v42 = vld [vmem:[#allocation2 + $0x18] sm:$0xff]  }
 0x26e   : > { %5985 = vmatpush3.bf16.msra.mxu1 %v6720_v48  ;;  %v5573_v48 = vld [vmem:[#allocation7 + $0x1] ss:$0 sm:$0xff] }
 0x26f   : > { %5998 = vmatprep.subr.bf16.mxu1 %v6721_v62 }
 0x329   : > { %v1640_v24 = vpop.f32.mrf.mxu1 }
 0x32a   : > { %v1646_v25 = vmul.f32 0.17677669, %v1640_v24 }
 0x32b   : > { %v5974_v26 = vpop.f32.mrf.mxu1 }
 0x32c   : > { %v1648_v27 = vsel %vm1647_vm2, %v1646_v25, -inf  ;;  %v1379_v26 = vunpack.c.h.bf16 %v8094_v13 }
 0x32d   : > { %1649 = vmax.xlane.f32.xlu0 %v1648_v27  ;;  %v1643_v28 = vpop.f32.mrf.mxu1  ;;  %v8123_v27 = vpack.c.bf16 %v1397_v20, %v1396_v19 }
 0x32e   : > { %v1400_v28 = vadd.f32 %v5725_v21, %v1376_v16 }
 0x32f   : > { %v5975_v29 = vpop.f32.mrf.mxu1 }
 0x330   : > { %v1401_v29 = vadd.f32 %v5726_v22, %v1377_v17 }
 0x3b6   : > { %v1650_v30 = vpop.xlane.xlu0 %1649 }
 0x3b7   : > { %v1651_v31 = vsub.f32 %v1646_v25, %v1650_v30  ;;  %v1378_v25 = vunpack.c.l.bf16 %v8094_v13  ;;  %v5729_v30 = vunpack.c.l.bf16 %v8101_v18 }
 0x3b9   : > { %v1652_v32 = vmul.f32 1.442695, %v1651_v31 }
 0x3bb   : > { %6759 = vpow2.f32 %v1652_v32  ;;  %v5730_v32 = vunpack.c.h.bf16 %v8101_v18 }
 0x3bd   : > { %v1403_v35 = vadd.f32 %v5730_v32, %v1379_v26 }
 0x3c8   : > { %v6760_v33 = vpop.eup %6759 }
 0x3c9   : > { %v1654_v34 = vsel %vm1647_vm2, %v6760_v33, 0.0 }
 0x3ca   : > { %1655 = vadd.xlane.f32.xlu0 %v1654_v34  ;;  %v1402_v34 = vadd.f32 %v5729_v30, %v1378_v25 }
 0x3cc   : > { %v8154_v36 = vpack.c.bf16 %v1403_v35, %v1402_v34 }
 0x453   : > { %v1656_v44 = vpop.xlane.xlu0 %1655 }
 0x454   : > { %6761 = vrcp.f32 %v1656_v44 }
 0x461   : > { %v6762_v45 = vpop.eup %6761 }
 0x462   : > { %v1658_v46 = vmul.f32 %v6762_v45, %v6760_v33  ;;  %v8139_v33 = vpack.c.bf16 %v1401_v29, %v1400_v28 }
 0x464   : > { %v1659_v47 = vpack.c.bf16 %v1658_v46, %v1658_v46 }
 0x466   : > { %5979 = vmatmul.mubr.msk.bf16.vlgmr.msra.gmra.mxu0 %vm1647_vm2, %v1659_v47 }
 0x467   : > { %5994 = vmatprep.mubr.msk.bf16.mxu0 %vm7574_vm0, %v7573_v0  ;;  %5991 = vmatpush3.bf16.msra.mxu0 %v6723_v42 }
 0x468   : > { %5992 = vmatprep.subr.bf16.mxu0 %v7573_v0 }
 0x46b   : > { %5993 = vmatpush3.bf16.msra.mxu0 %v6724_v43 }
 0x526   : > { %v1702_v49 = vpop.f32.mrf.mxu0 }
 0x527   : > { %v1708_v50 = vpack.c.bf16 %v1702_v49, %v1702_v49 }
 0x528   : > { %v5980_v51 = vpop.f32.mrf.mxu0 }
 0x529   : > { %5987 = vmatmul.mubr.msk.bf16.vlgmr.msra.gmra.mxu1 %vm1428_vm1, %v1708_v50 }
 0x52a   : > { %v1705_v52 = vpop.f32.mrf.mxu0  ;;  %5999 = vmatpush3.bf16.msra.mxu1 %v6721_v62  ;;  %6002 = vmatprep.mubr.msk.bf16.mxu1 %vm1428_vm1, %v8123_v27 }
 0x52b   : > { %6000 = vmatprep.subr.bf16.mxu1 %v6722_v63 }
 0x52c   : > { %v5981_v53 = vpop.f32.mrf.mxu0 }
 0x52e   : > { %6001 = vmatpush3.bf16.msra.mxu1 %v6722_v63 }
 0x52f   : > { %6022 = vmatprep.subr.bf16.mxu1 %v7573_v0 }
 0x5e9   : > { %v1769_v55 = vpop.f32.mrf.mxu1 }
 0x5ea   : > { %v1770_v56 = vadd.f32 %v5563_v54, %v1769_v55 }
 0x5eb   : > { %v5988_v57 = vpop.f32.mrf.mxu1 }
 0x5ec   : > { %v1775_v58 = vadd.f32 %v1770_v56, %v8036_v5  ;;  %v8080_v5 = vld [vmem:[%s1349_s4 + $0x8] sm:$0xff]  }
 0x5ed   : > { %v1772_v59 = vpop.f32.mrf.mxu1  ;;  %v1374_v9 = vunpack.c.l.bf16 %v8080_v5  ;;  %v1375_v10 = vunpack.c.h.bf16 %v8080_v5 }
 0x5ee   : > { %v1776_v60 = vsel %vm1428_vm1, %v1775_v58, 0.0 }
 0x5ef   : > { %1777 = vadd.xlane.f32.xlu1 %v1776_v60  ;;  %v5989_v61 = vpop.f32.mrf.mxu1  ;;  %v1398_v23 = vadd.f32 %v5721_v14, %v1374_v9  ;;  %v1399_v24 = vadd.f32 %v5722_v15, %v1375_v10 }
 0x5f1   : > { %v8134_v31 = vpack.c.bf16 %v1399_v24, %v1398_v23 }
 0x5f3   : > { %6003 = vmatmul.mubr.msk.bf16.vlgmr.msra.gmra.mxu1 %vm1428_vm1, %v8134_v31 }
 0x5f4   : > { %6006 = vmatprep.mubr.msk.bf16.mxu1 %vm1428_vm1, %v8139_v33 }
 0x5fb   : > { %6007 = vmatmul.mubr.msk.bf16.gmra.mxu1 %vm1428_vm1, %v8154_v36 }
 0x5fc   : > { %6030 = vmatprep.mubr.msk.bf16.mxu1 %vm7574_vm0, %v7573_v0 }
 0x678   : > { %v1778_v37 = vpop.xlane.xlu1 %1777 }
 0x679   : > { %v1780_v38 = vmul.f32 0.03125, %v1778_v37 }
 0x67b   : > { %v1781_v39 = vsub.f32 %v1775_v58, %v1780_v38  ;;  %v5567_v38 = vld [vmem:[#allocation15] ss:$0 sm:$0xff] }
 0x67d   : > { %v1782_v40 = vmul.f32 %v1781_v39, %v1781_v39 }
 0x67f   : > { %v1783_v41 = vsel %vm1428_vm1, %v1782_v40, 0.0 }
 0x680   : > { %1784 = vadd.xlane.f32.xlu1 %v1783_v41  ;;  %v5568_v41 = vld [vmem:[#allocation16] ss:$0 sm:$0xff] }
 0x6b3   : > { %v6004_v44 = vpop.f32.mrf.mxu1 }
 0x6b4   : > { %v1959_v60 = vadd.f32 %v6004_v44, %v5573_v48 }
 0x6b5   : > { %v1950_v45 = vpop.f32.mrf.mxu1 }
 0x6b6   : > { %v1951_v19 = vadd.f32 %v5573_v48, %v1950_v45  ;;  %v5569_v45 = vld [vmem:[#allocation4 + $0x1] ss:$0 sm:$0xff] }
 0x6b7   : > { %v6005_v46 = vpop.f32.mrf.mxu1 }
 0x6b8   : > { %v1962_v61 = vadd.f32 %v6005_v46, %v5573_v48 }
 0x6b9   : > { %v1953_v47 = vpop.f32.mrf.mxu1 }
 0x6ba   : > { %v2105_v63 = vpack.c.bf16 %v1962_v61, %v1959_v60  ;;  %v1954_v20 = vadd.f32 %v5573_v48, %v1953_v47 }
 0x6bb   : > { %v6008_v49 = vpop.f32.mrf.mxu1 }
 0x6bc   : > { %v1975_v51 = vadd.f32 %v6008_v49, %v5573_v48  ;;  %v2115_v23 = vsel %vm1428_vm1, %v2105_v63, 0  ;;  %v2104_v24 = vpack.c.bf16 %v1954_v20, %v1951_v19  ;;  %v5580_v63 = vld [vmem:[#allocation10 + $0x1] ss:$0 sm:$0xff] }
 0x6bd   : > { %v1966_v50 = vpop.f32.mrf.mxu1 }
 0x6be   : > { %v1967_v55 = vadd.f32 %v5573_v48, %v1966_v50  ;;  %v2112_v28 = vsel %vm1428_vm1, %v2104_v24, 0 }
 0x6bf   : > { %v6009_v52 = vpop.f32.mrf.mxu1 }
 0x6c0   : > { %v1978_v53 = vadd.f32 %v6009_v52, %v5573_v48  ;;  %v6726_v52 = vld [vmem:[#allocation9 + $0x10] sm:$0xff]  }
 0x6c1   : > { %v1969_v54 = vpop.f32.mrf.mxu1 }
 0x6c2   : > { %v2107_v56 = vpack.c.bf16 %v1978_v53, %v1975_v51  ;;  %v1970_v57 = vadd.f32 %v5573_v48, %v1969_v54 }
 0x6c4   : > { %v2121_v58 = vsel %vm1428_vm1, %v2107_v56, 0  ;;  %v2106_v59 = vpack.c.bf16 %v1970_v57, %v1967_v55 }
 0x6c5   : > { %6023 = vmatpush3.bf16.xpose.msra.mxu1 %v2121_v58 }
 0x6c6   : > { %6024 = vmatprep.subr.bf16.mxu1 %v7573_v0  ;;  %v2118_v62 = vsel %vm1428_vm1, %v2106_v59, 0 }
 0x6cd   : > { %6025 = vmatpush3.bf16.xpose.msra.mxu1 %v2118_v62 }
 0x6ce   : > { %6026 = vmatprep.subr.bf16.mxu1 %v7573_v0 }
 0x6d5   : > { %6027 = vmatpush3.bf16.xpose.msra.mxu1 %v2115_v23 }
 0x6d6   : > { %6028 = vmatprep.subr.bf16.mxu1 %v7573_v0 }
 0x6dd   : > { %6029 = vmatpush3.bf16.xpose.msra.mxu1 %v2112_v28 }
 0x6de   : > { %6062 = vmatprep.subr.bf16.mxu1 %v7573_v0 }
 0x709   : > { %v1785_v29 = vpop.xlane.xlu1 %1784 }
 0x70a   : > { %v1786_v34 = vmul.f32 0.03125, %v1785_v29 }
 0x70c   : > { %v1787_v35 = vadd.f32 1e-05, %v1786_v34 }
 0x70e   : > { %6763 = vrsqrt.f32 %v1787_v35 }
 0x71b   : > { %v6764_v37 = vpop.eup %6763 }
 0x71c   : > { %v1789_v40 = vmul.f32 %v6764_v37, %v1781_v39  ;;  %v6725_v39 = vld [vmem:[#allocation9 + $0x18] sm:$0xff]  }
 0x71d   : > { %6010 = vmatprep.subr.bf16.mxu0 %v6725_v39 }
 0x71e   : > { %v1797_v42 = vmul.f32 %v5567_v38, %v1789_v40 }
 0x720   : > { %v8170_v43 = vadd.f32 %v5568_v41, %v1797_v42 }
 0x722   : > { %v1806_v44 = vpack.c.bf16 %v8170_v43, %v8170_v43 }
 0x724   : > { %5995 = vmatmul.mubr.msk.bf16.vlgmr.msra.gmra.mxu0 %vm1428_vm1, %v1806_v44 }
 0x725   : > { %6014 = vmatprep.mubr.msk.bf16.mxu0 %vm1428_vm1, %v8073_v1  ;;  %6011 = vmatpush3.bf16.msra.mxu0 %v6725_v39 }
 0x726   : > { %6012 = vmatprep.subr.bf16.mxu0 %v6726_v52 }
 0x729   : > { %6013 = vmatpush3.bf16.msra.mxu0 %v6726_v52 }
 0x72a   : > { %6034 = vmatprep.subr.bf16.mxu0 %v7573_v0 }
 0x72c   : > { %6015 = vmatmul.mubr.msk.bf16.vlgmr.msra.gmra.mxu0 %vm1428_vm1, %v8080_v5 }
 0x72d   : > { %6018 = vmatprep.mubr.msk.bf16.mxu0 %vm1428_vm1, %v8089_v11 }
 0x734   : > { %6019 = vmatmul.mubr.msk.bf16.gmra.mxu0 %vm1428_vm1, %v8094_v13 }
 0x735   : > { %6042 = vmatprep.mubr.msk.bf16.mxu0 %vm7574_vm0, %v7573_v0 }
 0x7e4   : > { %v1869_v46 = vpop.f32.mrf.mxu0 }
 0x7e5   : > { %v1870_v47 = vadd.f32 %v5569_v45, %v1869_v46 }
 0x7e6   : > { %v5996_v48 = vpop.f32.mrf.mxu0 }
 0x7e7   : > { %v2103_v49 = vpack.c.bf16 %v1870_v47, %v1870_v47 }
 0x7e8   : > { %v1872_v50 = vpop.f32.mrf.mxu0 }
 0x7e9   : > { %6031 = vmatmul.mubr.msk.bf16.vlgmr.msra.gmra.mxu1 %vm1428_vm1, %v2103_v49 }
 0x7ea   : > { %v5997_v51 = vpop.f32.mrf.mxu0  ;;  %6070 = vmatprep.mubr.msk.bf16.mxu1 %vm7574_vm0, %v7573_v0 }
 0x7ec   : > { %v6016_v59 = vpop.f32.mrf.mxu0 }
 0x7ed   : > { %v2081_v38 = vadd.f32 %v6016_v59, %v5580_v63 }
 0x7ee   : > { %v2072_v60 = vpop.f32.mrf.mxu0 }
 0x7ef   : > { %v2073_v42 = vadd.f32 %v5580_v63, %v2072_v60 }
 0x7f0   : > { %v6017_v61 = vpop.f32.mrf.mxu0 }
 0x7f1   : > { %v2084_v40 = vadd.f32 %v6017_v61, %v5580_v63 }
 0x7f2   : > { %v2075_v62 = vpop.f32.mrf.mxu0 }
 0x7f3   : > { %v2178_v44 = vpack.c.bf16 %v2084_v40, %v2081_v38  ;;  %v2076_v45 = vadd.f32 %v5580_v63, %v2075_v62  ;;  %v5593_v62 = vld [vmem:[#allocation13 + $0x1] ss:$0 sm:$0xff] }
 0x7f4   : > { %v6020_v19 = vpop.f32.mrf.mxu0 }
 0x7f5   : > { %v2097_v23 = vadd.f32 %v6020_v19, %v5580_v63  ;;  %v2177_v46 = vpack.c.bf16 %v2076_v45, %v2073_v42  ;;  %v6734_v42 = vld [vmem:[#allocation18] sm:$0xff]  }
 0x7f6   : > { %v2088_v20 = vpop.f32.mrf.mxu0 }
 0x7f7   : > { %v2089_v28 = vadd.f32 %v5580_v63, %v2088_v20 }
 0x7f8   : > { %v6021_v24 = vpop.f32.mrf.mxu0 }
 0x7f9   : > { %v2100_v29 = vadd.f32 %v6021_v24, %v5580_v63 }
 0x7fa   : > { %v2091_v34 = vpop.f32.mrf.mxu0 }
 0x7fb   : > { %v2180_v35 = vpack.c.bf16 %v2100_v29, %v2097_v23  ;;  %v2092_v37 = vadd.f32 %v5580_v63, %v2091_v34 }
 0x7fd   : > { %v2179_v41 = vpack.c.bf16 %v2092_v37, %v2089_v28  ;;  %6035 = vmatpush3.bf16.msra.mxu0 %v2180_v35 }
 0x7fe   : > { %6036 = vmatprep.subr.bf16.mxu0 %v7573_v0 }
 0x801   : > { %6037 = vmatpush3.bf16.msra.mxu0 %v2179_v41  ;;  %v6733_v41 = vld [vmem:[#allocation18 + $0x8] sm:$0xff]  }
 0x802   : > { %6038 = vmatprep.subr.bf16.mxu0 %v7573_v0 }
 0x805   : > { %6039 = vmatpush3.bf16.msra.mxu0 %v2178_v44  ;;  %v6736_v44 = vld [vmem:[%s8711_s9 + $0x10] sm:$0xff]  }
 0x806   : > { %6040 = vmatprep.subr.bf16.mxu0 %v7573_v0 }
 0x809   : > { %6041 = vmatpush3.bf16.msra.mxu0 %v2177_v46 }
 0x80a   : > { %6046 = vmatprep.subr.bf16.mxu0 %v7573_v0 }
 0x8a9   : > { %v2157_v53 = vpop.f32.mrf.mxu1 }
 0x8aa   : > { %v2163_v54 = vmul.f32 0.17677669, %v2157_v53 }
 0x8ab   : > { %v6032_v55 = vpop.f32.mrf.mxu1 }
 0x8ac   : > { %v2165_v56 = vsel %vm2164_vm4, %v2163_v54, -inf  ;;  %v6731_v55 = vld [vmem:[#allocation12 + $0x18] sm:$0xff]  }
 0x8ad   : > { %2166 = vmax.xlane.f32.xlu0 %v2165_v56  ;;  %v2160_v57 = vpop.f32.mrf.mxu1 }
 0x8af   : > { %v6033_v58 = vpop.f32.mrf.mxu1 }
 0x936   : > { %v2167_v47 = vpop.xlane.xlu0 %2166 }
 0x937   : > { %v2168_v48 = vsub.f32 %v2163_v54, %v2167_v47  ;;  %v6732_v54 = vld [vmem:[#allocation12 + $0x10] sm:$0xff]  }
 0x939   : > { %v2169_v49 = vmul.f32 1.442695, %v2168_v48 }
 0x93b   : > { %6765 = vpow2.f32 %v2169_v49  ;;  %v5597_v49 = vld [vmem:[#allocation15 + $0x1] ss:$0 sm:$0xff] }
 0x948   : > { %v6766_v50 = vpop.eup %6765 }
 0x949   : > { %v2171_v51 = vsel %vm2164_vm4, %v6766_v50, 0.0 }
 0x94a   : > { %2172 = vadd.xlane.f32.xlu1 %v2171_v51  ;;  %v5598_v51 = vld [vmem:[#allocation16 + $0x1] ss:$0 sm:$0xff] }
 0x9d3   : > { %v2173_v39 = vpop.xlane.xlu1 %2172 }
 0x9d4   : > { %6767 = vrcp.f32 %v2173_v39 }
 0x9e1   : > { %v6768_v52 = vpop.eup %6767 }
 0x9e2   : > { %v2175_v53 = vmul.f32 %v6768_v52, %v6766_v50 }
 0x9e4   : > { %v2176_v56 = vpack.c.bf16 %v2175_v53, %v2175_v53 }
 0x9e6   : > { %6043 = vmatmul.mubr.msk.bf16.vlgmr.msra.gmra.mxu0 %vm2164_vm4, %v2176_v56  ;;  %v6738_v56 = vld [vmem:[%s8711_s9] sm:$0xff]  }
 0x9e7   : > { %6047 = vmatpush3.bf16.msra.mxu0 %v6731_v55  ;;  %6050 = vmatprep.mubr.msk.bf16.mxu0 %vm7574_vm0, %v7573_v0  ;;  %v6737_v55 = vld [vmem:[%s8711_s9 + $0x8] sm:$0xff]  }
 0x9e8   : > { %6048 = vmatprep.subr.bf16.mxu0 %v7573_v0 }
 0x9eb   : > { %6049 = vmatpush3.bf16.msra.mxu0 %v6732_v54  ;;  %v5599_v54 = vld [vmem:[#allocation19] ss:$0 sm:$0xff] }
 0x9ec   : > { %6054 = vmatprep.subr.bf16.mxu0 %v7573_v0 }
 0xaa6   : > { %v2218_v57 = vpop.f32.mrf.mxu0 }
 0xaa7   : > { %v2224_v58 = vpack.c.bf16 %v2218_v57, %v2218_v57 }
 0xaa8   : > { %v6044_v59 = vpop.f32.mrf.mxu0 }
 0xaa9   : > { %6051 = vmatmul.mubr.msk.bf16.vlgmr.msra.gmra.mxu0 %vm1428_vm1, %v2224_v58 }
 0xaaa   : > { %v2221_v60 = vpop.f32.mrf.mxu0  ;;  %6058 = vmatprep.mubr.msk.bf16.mxu0 %vm7574_vm0, %v7573_v0  ;;  %6055 = vmatpush3.bf16.msra.mxu0 %v6733_v41 }
 0xaab   : > { %6056 = vmatprep.subr.bf16.mxu0 %v7573_v0 }
 0xaac   : > { %v6045_v61 = vpop.f32.mrf.mxu0 }
 0xaae   : > { %6057 = vmatpush3.bf16.msra.mxu0 %v6734_v42  ;;  %v6739_v42 = vld [vmem:[#allocation2 + $0x28] sm:$0xff]  }
 0xaaf   : > { %6074 = vmatprep.subr.bf16.mxu0 %v6739_v42 }
 0xb69   : > { %v2287_v63 = vpop.f32.mrf.mxu0 }
 0xb6a   : > { %v2288_v19 = vadd.f32 %v5593_v62, %v2287_v63 }
 0xb6b   : > { %v6052_v20 = vpop.f32.mrf.mxu0 }
 0xb6c   : > { %v2293_v23 = vadd.f32 %v2288_v19, %v8170_v43  ;;  %v6735_v43 = vld [vmem:[%s8711_s9 + $0x18] sm:$0xff]  }
 0xb6d   : > { %v2290_v24 = vpop.f32.mrf.mxu0  ;;  %6063 = vmatpush3.bf16.msra.mxu1 %v6735_v43  ;;  %v6740_v43 = vld [vmem:[#allocation2 + $0x20] sm:$0xff]  }
 0xb6e   : > { %v2294_v28 = vsel %vm1428_vm1, %v2293_v23, 0.0  ;;  %6064 = vmatprep.subr.bf16.mxu1 %v7573_v0 }
 0xb6f   : > { %2295 = vadd.xlane.f32.xlu0 %v2294_v28  ;;  %v6053_v29 = vpop.f32.mrf.mxu0 }
 0xb71   : > { %6065 = vmatpush3.bf16.msra.mxu1 %v6736_v44  ;;  %v6741_v44 = vld [vmem:[#allocation6 + $0x28] sm:$0xff]  }
 0xb72   : > { %6066 = vmatprep.subr.bf16.mxu1 %v7573_v0 }
 0xb75   : > { %6067 = vmatpush3.bf16.msra.mxu1 %v6737_v55  ;;  %v5611_v55 = vld [vmem:[#allocation4 + $0x2] ss:$0 sm:$0xff] }
 0xb76   : > { %6068 = vmatprep.subr.bf16.mxu1 %v7573_v0 }
 0xb79   : > { %6069 = vmatpush3.bf16.msra.mxu1 %v6738_v56 }
 0xb7a   : > { %6086 = vmatprep.subr.bf16.mxu1 %v7573_v0 }
 0xbf8   : > { %v2296_v34 = vpop.xlane.xlu0 %2295 }
 0xbf9   : > { %v2297_v35 = vmul.f32 0.03125, %v2296_v34 }
 0xbfb   : > { %v2298_v37 = vsub.f32 %v2293_v23, %v2297_v35 }
 0xbfd   : > { %v2299_v38 = vmul.f32 %v2298_v37, %v2298_v37 }
 0xbff   : > { %v2300_v40 = vsel %vm1428_vm1, %v2299_v38, 0.0 }
 0xc00   : > { %2301 = vadd.xlane.f32.xlu1 %v2300_v40 }
 0xc89   : > { %v2302_v45 = vpop.xlane.xlu1 %2301 }
 0xc8a   : > { %v2303_v46 = vmul.f32 0.03125, %v2302_v45  ;;  %v6742_v45 = vld [vmem:[#allocation9 + $0x28] sm:$0xff]  }
 0xc8c   : > { %v2304_v47 = vadd.f32 1e-05, %v2303_v46  ;;  %v6743_v46 = vld [vmem:[#allocation6 + $0x20] sm:$0xff]  }
 0xc8e   : > { %6769 = vrsqrt.f32 %v2304_v47  ;;  %v6744_v47 = vld [vmem:[#allocation9 + $0x20] sm:$0xff]  }
 0xc9b   : > { %v6770_v48 = vpop.eup %6769 }
 0xc9c   : > { %v2306_v50 = vmul.f32 %v6770_v48, %v2298_v37 }
 0xc9e   : > { %v2315_v39 = vmul.f32 %v5597_v49, %v2306_v50  ;;  %v5609_v50 = vld [vmem:[#allocation15 + $0x2] ss:$0 sm:$0xff] }
 0xca0   : > { %v2324_v52 = vadd.f32 %v5598_v51, %v2315_v39  ;;  %v5610_v51 = vld [vmem:[#allocation16 + $0x2] ss:$0 sm:$0xff] }
 0xca2   : > { %v2325_v53 = vpack.c.bf16 %v2324_v52, %v2324_v52 }
 0xca4   : > { %6059 = vmatmul.mubr.msk.bf16.vlgmr.msra.gmra.mxu0 %vm1428_vm1, %v2325_v53 }
 0xca5   : > { %6078 = vmatprep.mubr.msk.bf16.mxu0 %vm1428_vm1, %v8123_v27  ;;  %v5603_v27 = vld [vmem:[#allocation21] ss:$0 sm:$0xff]  ;;  %6075 = vmatpush3.bf16.msra.mxu0 %v6739_v42 }
 0xca6   : > { %6076 = vmatprep.subr.bf16.mxu0 %v6740_v43 }
 0xca9   : > { %6077 = vmatpush3.bf16.msra.mxu0 %v6740_v43 }
 0xcaa   : > { %6094 = vmatprep.subr.bf16.mxu0 %v7573_v0 }
 0xcac   : > { %6079 = vmatmul.mubr.msk.bf16.vlgmr.msra.gmra.mxu0 %vm1428_vm1, %v8134_v31 }
 0xcad   : > { %6082 = vmatprep.mubr.msk.bf16.mxu0 %vm1428_vm1, %v8139_v33  ;;  %6095 = vmatpush3.bf16.msra.mxu0 %v6742_v45 }
 0xcae   : > { %6096 = vmatprep.subr.bf16.mxu0 %v7573_v0 }
 0xcb1   : > { %6097 = vmatpush3.bf16.msra.mxu0 %v6744_v47 }
 0xcb4   : > { %6083 = vmatmul.mubr.msk.bf16.gmra.mxu0 %vm1428_vm1, %v8154_v36 }
 0xcb5   : > { %6098 = vmatprep.mubr.msk.bf16.mxu0 %vm7574_vm0, %v7573_v0 }
 0xd64   : > { %v2386_v57 = vpop.f32.mrf.mxu0 }
 0xd65   : > { %v2387_v58 = vadd.f32 %v5599_v54, %v2386_v57 }
 0xd66   : > { %v6060_v59 = vpop.f32.mrf.mxu0 }
 0xd67   : > { %v2392_v60 = vmax.f32 %v2387_v58, 0.0 }
 0xd68   : > { %v2389_v61 = vpop.f32.mrf.mxu0 }
 0xd69   : > { %v2393_v62 = vpack.c.bf16 %v2392_v60, %v2392_v60 }
 0xd6a   : > { %v6061_v63 = vpop.f32.mrf.mxu0 }
 0xd6b   : > { %6071 = vmatmul.mubr.msk.bf16.vlgmr.msra.gmra.mxu1 %vm2164_vm4, %v2393_v62 }
 0xd6c   : > { %6090 = vmatprep.mubr.msk.bf16.mxu1 %vm7574_vm0, %v7573_v0  ;;  %6087 = vmatpush3.bf16.msra.mxu1 %v6741_v44  ;;  %v6080_v56 = vpop.f32.mrf.mxu0 }
 0xd6d   : > { %6088 = vmatprep.subr.bf16.mxu1 %v7573_v0  ;;  %v2576_v54 = vadd.f32 %v6080_v56, %v5611_v55 }
 0xd6e   : > { %v2567_v57 = vpop.f32.mrf.mxu0 }
 0xd6f   : > { %v2568_v59 = vadd.f32 %v5611_v55, %v2567_v57 }
 0xd70   : > { %6089 = vmatpush3.bf16.msra.mxu1 %v6743_v46  ;;  %v6081_v58 = vpop.f32.mrf.mxu0 }
 0xd71   : > { %v2579_v60 = vadd.f32 %v6081_v58, %v5611_v55 }
 0xd72   : > { %v2570_v61 = vpop.f32.mrf.mxu0 }
 0xd73   : > { %v2733_v62 = vpack.c.bf16 %v2579_v60, %v2576_v54  ;;  %v2571_v63 = vadd.f32 %v5611_v55, %v2570_v61 }
 0xe2b   : > { %v2470_v19 = vpop.f32.mrf.mxu1 }
 0xe2c   : > { %v2471_v20 = vadd.f32 %v5603_v27, %v2470_v19  ;;  %v2732_v27 = vpack.c.bf16 %v2571_v63, %v2568_v59  ;;  %v6084_v19 = vpop.f32.mrf.mxu0 }
 0xe2d   : > { %v6072_v23 = vpop.f32.mrf.mxu1 }
 0xe2e   : > { %v2476_v24 = vadd.f32 %v2471_v20, %v2324_v52  ;;  %v2583_v20 = vpop.f32.mrf.mxu0 }
 0xe2f   : > { %v2473_v28 = vpop.f32.mrf.mxu1 }
 0xe30   : > { %v2477_v29 = vsel %vm1428_vm1, %v2476_v24, 0.0  ;;  %v6085_v23 = vpop.f32.mrf.mxu0  ;;  %v5618_v28 = vld [vmem:[#allocation7 + $0x2] ss:$0 sm:$0xff] }
 0xe31   : > { %2478 = vadd.xlane.f32.xlu0 %v2477_v29  ;;  %v6073_v34 = vpop.f32.mrf.mxu1  ;;  %v5622_v29 = vld [vmem:[#allocation10 + $0x2] ss:$0 sm:$0xff] }
 0xeba   : > { %v2479_v35 = vpop.xlane.xlu0 %2478 }
 0xebb   : > { %v2480_v37 = vmul.f32 0.03125, %v2479_v35 }
 0xebd   : > { %v2481_v38 = vsub.f32 %v2476_v24, %v2480_v37  ;;  %v2586_v24 = vpop.f32.mrf.mxu0 }
 0xebf   : > { %v2482_v40 = vmul.f32 %v2481_v38, %v2481_v38 }
 0xec1   : > { %v2483_v41 = vsel %vm1428_vm1, %v2482_v40, 0.0 }
 0xec2   : > { %2484 = vadd.xlane.f32.xlu1 %v2483_v41 }
 0xf4b   : > { %v2485_v31 = vpop.xlane.xlu1 %2484 }
 0xf4c   : > { %v2486_v33 = vmul.f32 0.03125, %v2485_v31  ;;  %v2584_v31 = vadd.f32 %v5611_v55, %v2583_v20 }
 0xf4e   : > { %v2487_v48 = vadd.f32 1e-05, %v2486_v33  ;;  %v2587_v33 = vadd.f32 %v5611_v55, %v2586_v24 }
 0xf50   : > { %6771 = vrsqrt.f32 %v2487_v48 }
 0xf5d   : > { %v6772_v49 = vpop.eup %6771 }
 0xf5e   : > { %v2489_v36 = vmul.f32 %v6772_v49, %v2481_v38 }
 0xf60   : > { %v2498_v39 = vmul.f32 %v5609_v50, %v2489_v36  ;;  %v2734_v50 = vpack.c.bf16 %v2587_v33, %v2584_v31  ;;  %v2592_v36 = vadd.f32 %v6084_v19, %v5611_v55 }
 0xf62   : > { %v8234_v52 = vadd.f32 %v5610_v51, %v2498_v39  ;;  %v2595_v51 = vadd.f32 %v6085_v23, %v5611_v55 }
 0xf64   : > { %v8238_v53 = vpack.c.bf16 %v8234_v52, %v8234_v52  ;;  %v2735_v39 = vpack.c.bf16 %v2595_v51, %v2592_v36 }
 0xf66   : > { %6091 = vmatmul.mubr.msk.bf16.vlgmr.msra.gmra.mxu1 %vm1428_vm1, %v8238_v53  ;;  %6099 = vmatmul.mubr.msk.bf16.vlgmr.msra.gmra.mxu0 %vm1428_vm1, %v8238_v53 }
 0xf67   : > { %6104 = vmatprep.mubr.msk.bf16.mxu1 %vm1428_vm1, %v2732_v27 }
0x1026   : > { %v2661_v34 = vpop.f32.mrf.mxu1  ;;  %v2726_v35 = vpop.f32.mrf.mxu0 }
0x1027   : > { %v2662_v37 = vadd.f32 %v5618_v28, %v2661_v34  ;;  %v2727_v38 = vadd.f32 %v5622_v29, %v2726_v35 }
0x1028   : > { %v6092_v40 = vpop.f32.mrf.mxu1  ;;  %v6100_v41 = vpop.f32.mrf.mxu0 }
0x1029   : > { %v2736_v42 = vpack.c.bf16 %v2662_v37, %v2662_v37  ;;  %v2917_v43 = vpack.c.bf16 %v2727_v38, %v2727_v38 }
0x102a   : > { %v2664_v44 = vpop.f32.mrf.mxu1  ;;  %v2729_v45 = vpop.f32.mrf.mxu0 }
0x102b   : > { %v2750_v46 = vsel %vm1428_vm1, %v2736_v42, 0  ;;  %v2931_v47 = vsel %vm1664_vm3, %v2917_v43, 0  ;;  %6422 = vmatprep.subr.msk.bf16.mxu1 %vm1428_vm1, %v2736_v42  ;;  %6423 = vmatprep.subr.msk.bf16.mxu0 %vm1664_vm3, %v2917_v43 }
0x102c   : > { %v6093_v48 = vpop.f32.mrf.mxu1  ;;  %v6101_v49 = vpop.f32.mrf.mxu0  ;;  %6103 = vmatpush3.bf16.xpose.msra.mxu1 %v2750_v46  ;;  %6113 = vmatpush3.bf16.msra.mxu0 %v2931_v47 }
0x102d   : > { %6134 = vmatprep.subr.bf16.mxu0 %v7573_v0 }
0x1033   : > { %6105 = vmatmul.mubr.msk.bf16.vlgmr.msra.gmra.mxu1 %vm1428_vm1, %v2733_v62 }
0x1034   : > { %6108 = vmatprep.mubr.msk.bf16.mxu1 %vm1428_vm1, %v2734_v50 }
0x103b   : > { %6109 = vmatmul.mubr.msk.bf16.gmra.mxu1 %vm1428_vm1, %v2735_v39 }
0x10f3   : > { %v6106_v56 = vpop.f32.mrf.mxu1 }
0x10f4   : > { %v2819_v59 = vmul.f32 0.17677669, %v6106_v56 }
0x10f5   : > { %v2786_v54 = vpop.f32.mrf.mxu1 }
0x10f6   : > { %v2817_v57 = vmul.f32 0.17677669, %v2786_v54  ;;  %v2831_v62 = vsel %vm1647_vm2, %v2819_v59, -inf }
0x10f7   : > { %v6107_v58 = vpop.f32.mrf.mxu1 }
0x10f8   : > { %v2825_v60 = vsel %vm1647_vm2, %v2817_v57, -inf  ;;  %v2820_v20 = vmul.f32 0.17677669, %v6107_v58 }
0x10f9   : > { %2826 = vmax.xlane.f32.xlu0 %v2825_v60  ;;  %v2789_v61 = vpop.f32.mrf.mxu1 }
0x10fa   : > { %v2818_v63 = vmul.f32 0.17677669, %v2789_v61  ;;  %v2834_v29 = vsel %vm1647_vm2, %v2820_v20, -inf }
0x10fb   : > { %v6110_v27 = vpop.f32.mrf.mxu1 }
0x10fc   : > { %v2828_v19 = vsel %vm1647_vm2, %v2818_v63, -inf  ;;  %v2823_v28 = vmul.f32 0.17677669, %v6110_v27 }
0x10fd   : > { %2832 = vmax.xlane.f32.xlu0 %v2831_v62  ;;  %2829 = vmax.xlane.f32.xlu1 %v2828_v19  ;;  %v2802_v55 = vpop.f32.mrf.mxu1 }
0x10fe   : > { %v2821_v23 = vmul.f32 0.17677669, %v2802_v55  ;;  %v2843_v40 = vsel %vm1647_vm2, %v2823_v28, -inf }
0x10ff   : > { %v6111_v24 = vpop.f32.mrf.mxu1 }
0x1100   : > { %v2837_v34 = vsel %vm1647_vm2, %v2821_v23, -inf  ;;  %v2824_v38 = vmul.f32 0.17677669, %v6111_v24 }
0x1101   : > { %2835 = vmax.xlane.f32.xlu1 %v2834_v29  ;;  %2838 = vmax.xlane.f32.xlu0 %v2837_v34  ;;  %v2805_v35 = vpop.f32.mrf.mxu1 }
0x1102   : > { %v2822_v37 = vmul.f32 0.17677669, %v2805_v35  ;;  %v2846_v42 = vsel %vm1647_vm2, %v2824_v38, -inf }
0x1104   : > { %v2840_v41 = vsel %vm1647_vm2, %v2822_v37, -inf }
0x1105   : > { %2844 = vmax.xlane.f32.xlu0 %v2843_v40  ;;  %2841 = vmax.xlane.f32.xlu1 %v2840_v41 }
0x1109   : > { %2847 = vmax.xlane.f32.xlu1 %v2846_v42 }
0x1182   : > { %v2827_v43 = vpop.xlane.xlu0 %2826 }
0x1183   : > { %v2849_v44 = vsub.f32 %v2817_v57, %v2827_v43 }
0x1185   : > { %v2857_v45 = vmul.f32 1.442695, %v2849_v44 }
0x1186   : > { %v2833_v46 = vpop.xlane.xlu0 %2832  ;;  %v2830_v47 = vpop.xlane.xlu1 %2829 }
0x1187   : > { %6773 = vpow2.f32 %v2857_v45  ;;  %v2851_v31 = vsub.f32 %v2819_v59, %v2833_v46  ;;  %v2850_v33 = vsub.f32 %v2818_v63, %v2830_v47  ;;  %v6747_v46 = vld [vmem:[#allocation12 + $0x28] sm:$0xff]  }
0x1188   : > { %6122 = vmatprep.subr.bf16.mxu1 %v6747_v46 }
0x1189   : > { %v2861_v48 = vmul.f32 1.442695, %v2851_v31  ;;  %v2859_v49 = vmul.f32 1.442695, %v2850_v33  ;;  %6123 = vmatpush3.bf16.msra.mxu1 %v6747_v46 }
0x118a   : > { %v2836_v50 = vpop.xlane.xlu1 %2835  ;;  %v2839_v36 = vpop.xlane.xlu0 %2838 }
0x118b   : > { %6775 = vpow2.f32 %v2861_v48  ;;  %v2852_v51 = vsub.f32 %v2820_v20, %v2836_v50  ;;  %v2853_v39 = vsub.f32 %v2821_v23, %v2839_v36 }
0x118c   : > { %6777 = vpow2.f32 %v2859_v49 }
0x118d   : > { %v2863_v56 = vmul.f32 1.442695, %v2852_v51  ;;  %v2865_v54 = vmul.f32 1.442695, %v2853_v39 }
0x118e   : > { %v2845_v58 = vpop.xlane.xlu0 %2844  ;;  %v2842_v60 = vpop.xlane.xlu1 %2841 }
0x118f   : > { %6779 = vpow2.f32 %v2863_v56  ;;  %v2855_v57 = vsub.f32 %v2823_v28, %v2845_v58  ;;  %v2854_v61 = vsub.f32 %v2822_v37, %v2842_v60 }
0x1190   : > { %6781 = vpow2.f32 %v2865_v54 }
0x1191   : > { %v2869_v27 = vmul.f32 1.442695, %v2855_v57  ;;  %v2867_v62 = vmul.f32 1.442695, %v2854_v61 }
0x1192   : > { %v2848_v59 = vpop.xlane.xlu1 %2847 }
0x1193   : > { %6783 = vpow2.f32 %v2869_v27  ;;  %v2856_v63 = vsub.f32 %v2824_v38, %v2848_v59 }
0x1194   : > { %v6774_v19 = vpop.eup %6773  ;;  %6785 = vpow2.f32 %v2867_v62 }
0x1195   : > { %v2871_v55 = vmul.f32 1.442695, %v2856_v63  ;;  %v2873_v20 = vsel %vm1647_vm2, %v6774_v19, 0.0  ;;  %v6745_v63 = vld [vmem:[#allocation2 + $0x38] sm:$0xff]  }
0x1196   : > { %2874 = vadd.xlane.f32.xlu0 %v2873_v20 }
0x1197   : > { %6787 = vpow2.f32 %v2871_v55 }
0x1198   : > { %v6776_v23 = vpop.eup %6775 }
0x1199   : > { %v6778_v24 = vpop.eup %6777  ;;  %v2879_v29 = vsel %vm1647_vm2, %v6776_v23, 0.0 }
0x119a   : > { %2880 = vadd.xlane.f32.xlu0 %v2879_v29  ;;  %v2876_v28 = vsel %vm1647_vm2, %v6778_v24, 0.0 }
0x119b   : > { %2877 = vadd.xlane.f32.xlu1 %v2876_v28 }
0x119c   : > { %v6780_v34 = vpop.eup %6779 }
0x119d   : > { %v6782_v35 = vpop.eup %6781  ;;  %v2882_v37 = vsel %vm1647_vm2, %v6780_v34, 0.0 }
0x119e   : > { %v2885_v38 = vsel %vm1647_vm2, %v6782_v35, 0.0 }
0x119f   : > { %2886 = vadd.xlane.f32.xlu0 %v2885_v38  ;;  %2883 = vadd.xlane.f32.xlu1 %v2882_v37  ;;  %v6746_v38 = vld [vmem:[#allocation2 + $0x30] sm:$0xff]  }
0x11a0   : > { %v6784_v40 = vpop.eup %6783 }
0x11a1   : > { %v6786_v41 = vpop.eup %6785  ;;  %v2891_v42 = vsel %vm1647_vm2, %v6784_v40, 0.0 }
0x11a2   : > { %v2888_v43 = vsel %vm1647_vm2, %v6786_v41, 0.0 }
0x11a3   : > { %2892 = vadd.xlane.f32.xlu0 %v2891_v42  ;;  %2889 = vadd.xlane.f32.xlu1 %v2888_v43 }
0x11a4   : > { %v6788_v44 = vpop.eup %6787 }
0x11a5   : > { %v2894_v45 = vsel %vm1647_vm2, %v6788_v44, 0.0 }
0x11a7   : > { %2895 = vadd.xlane.f32.xlu1 %v2894_v45 }
0x121f   : > { %v2875_v47 = vpop.xlane.xlu0 %2874 }
0x1220   : > { %6789 = vrcp.f32 %v2875_v47 }
0x1223   : > { %v2881_v31 = vpop.xlane.xlu0 %2880 }
0x1224   : > { %v2878_v33 = vpop.xlane.xlu1 %2877 }
0x1225   : > { %6791 = vrcp.f32 %v2878_v33 }
0x1226   : > { %6793 = vrcp.f32 %v2881_v31 }
0x1228   : > { %v2887_v48 = vpop.xlane.xlu0 %2886  ;;  %v2884_v49 = vpop.xlane.xlu1 %2883 }
0x1229   : > { %6795 = vrcp.f32 %v2884_v49 }
0x122a   : > { %6797 = vrcp.f32 %v2887_v48 }
0x122c   : > { %v2893_v50 = vpop.xlane.xlu0 %2892  ;;  %v2890_v36 = vpop.xlane.xlu1 %2889 }
0x122d   : > { %6799 = vrcp.f32 %v2890_v36  ;;  %v6790_v51 = vpop.eup %6789 }
0x122e   : > { %6801 = vrcp.f32 %v2893_v50  ;;  %v2898_v54 = vmul.f32 %v6790_v51, %v6774_v19 }
0x1230   : > { %v2896_v39 = vpop.xlane.xlu1 %2895 }
0x1231   : > { %6803 = vrcp.f32 %v2896_v39 }
0x1232   : > { %v6792_v56 = vpop.eup %6791 }
0x1233   : > { %v2900_v58 = vmul.f32 %v6792_v56, %v6778_v24  ;;  %v6794_v60 = vpop.eup %6793 }
0x1234   : > { %v2902_v27 = vmul.f32 %v6794_v60, %v6776_v23 }
0x1235   : > { %v2913_v57 = vpack.c.bf16 %v2900_v58, %v2898_v54  ;;  %v5634_v54 = vld [vmem:[#allocation13 + $0x2] ss:$0 sm:$0xff] }
0x1236   : > { %v6796_v61 = vpop.eup %6795 }
0x1237   : > { %6114 = vmatprep.mubr.msk.bf16.mxu0 %vm1647_vm2, %v2913_v57  ;;  %v2904_v62 = vmul.f32 %v6796_v61, %v6780_v34  ;;  %v6798_v59 = vpop.eup %6797  ;;  %v6748_v34 = vld [vmem:[#allocation12 + $0x20] sm:$0xff]  }
0x1238   : > { %v2906_v28 = vmul.f32 %v6798_v59, %v6782_v35  ;;  %6124 = vmatprep.subr.bf16.mxu1 %v6748_v34 }
0x1239   : > { %v2914_v55 = vpack.c.bf16 %v2904_v62, %v2902_v27  ;;  %6125 = vmatpush3.bf16.msra.mxu1 %v6748_v34 }
0x123a   : > { %v6800_v20 = vpop.eup %6799 }
0x123b   : > { %v6802_v29 = vpop.eup %6801  ;;  %6115 = vmatmul.mubr.msk.bf16.vlgmr.msra.gmra.mxu0 %vm1647_vm2, %v2914_v55  ;;  %v2908_v37 = vmul.f32 %v6800_v20, %v6786_v41 }
0x123c   : > { %6135 = vmatpush3.bf16.msra.mxu0 %v6745_v63  ;;  %v2910_v42 = vmul.f32 %v6802_v29, %v6784_v40 }
0x123d   : > { %v2915_v24 = vpack.c.bf16 %v2908_v37, %v2906_v28  ;;  %6136 = vmatprep.subr.bf16.mxu0 %v7573_v0 }
0x123e   : > { %v6804_v19 = vpop.eup %6803 }
0x123f   : > { %v2912_v43 = vmul.f32 %v6804_v19, %v6788_v44  ;;  %6118 = vmatprep.mubr.msk.bf16.mxu0 %vm1647_vm2, %v2915_v24 }
0x1240   : > { %6137 = vmatpush3.bf16.msra.mxu0 %v6746_v38 }
0x1241   : > { %v2916_v23 = vpack.c.bf16 %v2912_v43, %v2910_v42 }
0x1243   : > { %6119 = vmatmul.mubr.msk.bf16.gmra.mxu0 %vm1647_vm2, %v2916_v23 }
0x1244   : > { %6138 = vmatprep.mubr.msk.bf16.mxu0 %vm7574_vm0, %v7573_v0 }
0x124b   : > { %6139 = vmatmul.mubr.msk.bf16.vlgmr.msra.gmra.mxu0 %vm1428_vm1, %v8238_v53 }
0x12fb   : > { %v6116_v35 = vpop.f32.mrf.mxu0 }
0x12fd   : > { %v2967_v41 = vpop.f32.mrf.mxu0 }
0x12ff   : > { %v6117_v45 = vpop.f32.mrf.mxu0 }
0x1300   : > { %v2999_v46 = vpack.c.bf16 %v6117_v45, %v6116_v35 }
0x1301   : > { %v2970_v40 = vpop.f32.mrf.mxu0 }
0x1302   : > { %v2998_v44 = vpack.c.bf16 %v2970_v40, %v2967_v41 }
0x1303   : > { %v6120_v47 = vpop.f32.mrf.mxu0 }
0x1304   : > { %6126 = vmatprep.mubr.msk.bf16.mxu1 %vm1428_vm1, %v2998_v44 }
0x1305   : > { %v2983_v31 = vpop.f32.mrf.mxu0  ;;  %6127 = vmatmul.mubr.msk.bf16.vlgmr.msra.gmra.mxu1 %vm1428_vm1, %v2999_v46 }
0x1307   : > { %v6121_v33 = vpop.f32.mrf.mxu0 }
0x1308   : > { %v3001_v50 = vpack.c.bf16 %v6121_v33, %v6120_v47 }
0x1309   : > { %v2986_v48 = vpop.f32.mrf.mxu0 }
0x130a   : > { %v3000_v49 = vpack.c.bf16 %v2986_v48, %v2983_v31 }
0x130b   : > { %v8280_v53 = vpop.f32.mrf.mxu0 }
0x130c   : > { %6130 = vmatprep.mubr.msk.bf16.mxu1 %vm1428_vm1, %v3000_v49 }
0x130d   : > { %6131 = vmatmul.mubr.msk.bf16.gmra.mxu1 %vm1428_vm1, %v3001_v50  ;;  %v6140_v36 = vpop.f32.mrf.mxu0 }
0x130f   : > { %v3318_v51 = vpop.f32.mrf.mxu0 }
0x1311   : > { %v6141_v39 = vpop.f32.mrf.mxu0 }
0x13c5   : > { %v6128_v56 = vpop.f32.mrf.mxu1 }
0x13c6   : > { %v3082_v60 = vadd.f32 %v6128_v56, %v5634_v54 }
0x13c7   : > { %v3073_v58 = vpop.f32.mrf.mxu1 }
0x13c8   : > { %v3074_v57 = vadd.f32 %v5634_v54, %v3073_v58  ;;  %v3106_v20 = vadd.f32 %v3082_v60, %v1374_v9 }
0x13c9   : > { %v6129_v61 = vpop.f32.mrf.mxu1 }
0x13ca   : > { %v3104_v27 = vadd.f32 %v3074_v57, %v1372_v2  ;;  %v3085_v62 = vadd.f32 %v6129_v61, %v5634_v54  ;;  %v3118_v42 = vsel %vm1428_vm1, %v3106_v20, 0.0 }
0x13cb   : > { %v3076_v59 = vpop.f32.mrf.mxu1 }
0x13cc   : > { %v3077_v63 = vadd.f32 %v5634_v54, %v3076_v59  ;;  %v3112_v55 = vsel %vm1428_vm1, %v3104_v27, 0.0  ;;  %v3107_v38 = vadd.f32 %v3085_v62, %v1375_v10 }
0x13cd   : > { %3113 = vadd.xlane.f32.xlu0 %v3112_v55  ;;  %v6132_v29 = vpop.f32.mrf.mxu1 }
0x13ce   : > { %v3105_v28 = vadd.f32 %v3077_v63, %v1373_v3  ;;  %v3098_v19 = vadd.f32 %v6132_v29, %v5634_v54  ;;  %v3121_v1 = vsel %vm1428_vm1, %v3107_v38, 0.0 }
0x13cf   : > { %v3089_v37 = vpop.f32.mrf.mxu1 }
0x13d0   : > { %v3090_v24 = vadd.f32 %v5634_v54, %v3089_v37  ;;  %v3115_v2 = vsel %vm1428_vm1, %v3105_v28, 0.0  ;;  %v3110_v10 = vadd.f32 %v3098_v19, %v1378_v25 }
0x13d1   : > { %3116 = vadd.xlane.f32.xlu1 %v3115_v2  ;;  %3119 = vadd.xlane.f32.xlu0 %v3118_v42  ;;  %v6133_v43 = vpop.f32.mrf.mxu1 }
0x13d2   : > { %v3108_v9 = vadd.f32 %v3090_v24, %v1376_v16  ;;  %v3101_v3 = vadd.f32 %v6133_v43, %v5634_v54  ;;  %v3130_v45 = vsel %vm1428_vm1, %v3110_v10, 0.0 }
0x13d3   : > { %v3092_v23 = vpop.f32.mrf.mxu1 }
0x13d4   : > { %v3093_v34 = vadd.f32 %v5634_v54, %v3092_v23  ;;  %v3124_v5 = vsel %vm1428_vm1, %v3108_v9, 0.0  ;;  %v3111_v16 = vadd.f32 %v3101_v3, %v1379_v26  ;;  %v6749_v3 = vld [vmem:[#allocation9 + $0x38] sm:$0xff]  }
0x13d5   : > { %3122 = vadd.xlane.f32.xlu1 %v3121_v1  ;;  %3125 = vadd.xlane.f32.xlu0 %v3124_v5  ;;  %v6751_v5 = vld [vmem:[#allocation9 + $0x30] sm:$0xff]  }
0x13d6   : > { %v3109_v35 = vadd.f32 %v3093_v34, %v1377_v17  ;;  %v3133_v40 = vsel %vm1428_vm1, %v3111_v16, 0.0  ;;  %6154 = vmatprep.subr.bf16.mxu1 %v6749_v3  ;;  %v6750_v34 = vld [vmem:[#allocation6 + $0x38] sm:$0xff]  }
0x13d7   : > { %6155 = vmatpush3.bf16.msra.mxu1 %v6749_v3  ;;  %6142 = vmatprep.subr.bf16.mxu0 %v6750_v34 }
0x13d8   : > { %v3127_v41 = vsel %vm1428_vm1, %v3109_v35, 0.0  ;;  %6143 = vmatpush3.bf16.msra.mxu0 %v6750_v34  ;;  %6156 = vmatprep.subr.bf16.mxu1 %v6751_v5 }
0x13d9   : > { %3128 = vadd.xlane.f32.xlu1 %v3127_v41  ;;  %3131 = vadd.xlane.f32.xlu0 %v3130_v45 }
0x13db   : > { %6157 = vmatpush3.bf16.msra.mxu1 %v6751_v5 }
0x13dc   : > { %6178 = vmatprep.subr.bf16.mxu1 %v7573_v0 }
0x13dd   : > { %3134 = vadd.xlane.f32.xlu1 %v3133_v40 }
0x1456   : > { %v3114_v44 = vpop.xlane.xlu0 %3113 }
0x1457   : > { %v3136_v46 = vmul.f32 0.03125, %v3114_v44 }
0x1459   : > { %v8308_v25 = vsub.f32 %v3104_v27, %v3136_v46 }
0x145a   : > { %v3120_v47 = vpop.xlane.xlu0 %3119  ;;  %v3117_v31 = vpop.xlane.xlu1 %3116 }
0x145b   : > { %v3138_v11 = vmul.f32 0.03125, %v3120_v47  ;;  %v3137_v17 = vmul.f32 0.03125, %v3117_v31  ;;  %v3152_v33 = vmul.f32 %v8308_v25, %v8308_v25 }
0x145d   : > { %v8312_v48 = vsub.f32 %v3106_v20, %v3138_v11  ;;  %v8314_v13 = vsub.f32 %v3105_v28, %v3137_v17  ;;  %v3160_v26 = vsel %vm1428_vm1, %v3152_v33, 0.0 }
0x145e   : > { %3161 = vadd.xlane.f32.xlu0 %v3160_v26  ;;  %v3126_v49 = vpop.xlane.xlu0 %3125  ;;  %v3123_v50 = vpop.xlane.xlu1 %3122 }
0x145f   : > { %v3140_v36 = vmul.f32 0.03125, %v3126_v49  ;;  %v3139_v51 = vmul.f32 0.03125, %v3123_v50  ;;  %v3154_v39 = vmul.f32 %v8312_v48, %v8312_v48  ;;  %v3153_v56 = vmul.f32 %v8314_v13, %v8314_v13 }
0x1461   : > { %v8321_v54 = vsub.f32 %v3108_v9, %v3140_v36  ;;  %v8323_v58 = vsub.f32 %v3107_v38, %v3139_v51  ;;  %v3166_v60 = vsel %vm1428_vm1, %v3154_v39, 0.0  ;;  %v3163_v57 = vsel %vm1428_vm1, %v3153_v56, 0.0 }
0x1462   : > { %3167 = vadd.xlane.f32.xlu0 %v3166_v60  ;;  %v3132_v61 = vpop.xlane.xlu0 %3131  ;;  %3164 = vadd.xlane.f32.xlu1 %v3163_v57  ;;  %v3129_v27 = vpop.xlane.xlu1 %3128 }
0x1463   : > { %v3142_v62 = vmul.f32 0.03125, %v3132_v61  ;;  %v3141_v59 = vmul.f32 0.03125, %v3129_v27  ;;  %v3156_v63 = vmul.f32 %v8321_v54, %v8321_v54  ;;  %v3155_v55 = vmul.f32 %v8323_v58, %v8323_v58 }
0x1465   : > { %v8331_v20 = vsub.f32 %v3110_v10, %v3142_v62  ;;  %v8333_v29 = vsub.f32 %v3109_v35, %v3141_v59  ;;  %v3172_v28 = vsel %vm1428_vm1, %v3156_v63, 0.0  ;;  %v3169_v37 = vsel %vm1428_vm1, %v3155_v55, 0.0  ;;  %v6752_v10 = vld [vmem:[#allocation6 + $0x30] sm:$0xff]   ;;  %v5641_v59 = vld [vmem:[#allocation15 + $0x3] ss:$0 sm:$0xff] }
0x1466   : > { %3173 = vadd.xlane.f32.xlu0 %v3172_v28  ;;  %3170 = vadd.xlane.f32.xlu1 %v3169_v37  ;;  %v3135_v38 = vpop.xlane.xlu1 %3134  ;;  %v5642_v28 = vld [vmem:[#allocation16 + $0x3] ss:$0 sm:$0xff] }
0x1467   : > { %v3143_v19 = vmul.f32 0.03125, %v3135_v38  ;;  %v3158_v24 = vmul.f32 %v8331_v20, %v8331_v20  ;;  %v3157_v2 = vmul.f32 %v8333_v29, %v8333_v29  ;;  %6144 = vmatprep.subr.bf16.mxu0 %v6752_v10 }
0x1468   : > { %6145 = vmatpush3.bf16.msra.mxu0 %v6752_v10 }
0x1469   : > { %v8341_v42 = vsub.f32 %v3111_v16, %v3143_v19  ;;  %v3178_v43 = vsel %vm1428_vm1, %v3158_v24, 0.0  ;;  %v3175_v9 = vsel %vm1428_vm1, %v3157_v2, 0.0  ;;  %6166 = vmatprep.subr.bf16.mxu0 %v7573_v0 }
0x146a   : > { %3179 = vadd.xlane.f32.xlu0 %v3178_v43  ;;  %3176 = vadd.xlane.f32.xlu1 %v3175_v9 }
0x146b   : > { %v3159_v23 = vmul.f32 %v8341_v42, %v8341_v42 }
0x146d   : > { %v3181_v1 = vsel %vm1428_vm1, %v3159_v23, 0.0 }
0x146e   : > { %3182 = vadd.xlane.f32.xlu1 %v3181_v1 }
0x14e7   : > { %v3162_v35 = vpop.xlane.xlu0 %3161 }
0x14e8   : > { %v3184_v41 = vmul.f32 0.03125, %v3162_v35 }
0x14ea   : > { %v3192_v45 = vadd.f32 1e-05, %v3184_v41 }
0x14eb   : > { %v3168_v16 = vpop.xlane.xlu0 %3167  ;;  %v3165_v40 = vpop.xlane.xlu1 %3164 }
0x14ec   : > { %6805 = vrsqrt.f32 %v3192_v45  ;;  %v3186_v44 = vmul.f32 0.03125, %v3168_v16  ;;  %v3185_v46 = vmul.f32 0.03125, %v3165_v40 }
0x14ee   : > { %v3194_v47 = vadd.f32 1e-05, %v3186_v44  ;;  %v3193_v31 = vadd.f32 1e-05, %v3185_v46 }
0x14ef   : > { %v3174_v11 = vpop.xlane.xlu0 %3173  ;;  %v3171_v17 = vpop.xlane.xlu1 %3170 }
0x14f0   : > { %6807 = vrsqrt.f32 %v3194_v47  ;;  %v3188_v33 = vmul.f32 0.03125, %v3174_v11  ;;  %v3187_v26 = vmul.f32 0.03125, %v3171_v17 }
0x14f1   : > { %6809 = vrsqrt.f32 %v3193_v31 }
0x14f2   : > { %v3196_v49 = vadd.f32 1e-05, %v3188_v33  ;;  %v3195_v50 = vadd.f32 1e-05, %v3187_v26 }
0x14f3   : > { %v3180_v36 = vpop.xlane.xlu0 %3179  ;;  %v3177_v51 = vpop.xlane.xlu1 %3176 }
0x14f4   : > { %6811 = vrsqrt.f32 %v3196_v49  ;;  %v3190_v39 = vmul.f32 0.03125, %v3180_v36  ;;  %v3189_v56 = vmul.f32 0.03125, %v3177_v51 }
0x14f5   : > { %6813 = vrsqrt.f32 %v3195_v50 }
0x14f6   : > { %v3198_v60 = vadd.f32 1e-05, %v3190_v39  ;;  %v3197_v57 = vadd.f32 1e-05, %v3189_v56 }
0x14f7   : > { %v3183_v61 = vpop.xlane.xlu1 %3182 }
0x14f8   : > { %6815 = vrsqrt.f32 %v3198_v60  ;;  %v3191_v27 = vmul.f32 0.03125, %v3183_v61 }
0x14f9   : > { %v6806_v62 = vpop.eup %6805  ;;  %6817 = vrsqrt.f32 %v3197_v57 }
0x14fa   : > { %v3208_v63 = vmul.f32 %v6806_v62, %v8308_v25  ;;  %v3199_v55 = vadd.f32 1e-05, %v3191_v27 }
0x14fc   : > { %6819 = vrsqrt.f32 %v3199_v55  ;;  %v3224_v37 = vmul.f32 %v5641_v59, %v3208_v63 }
0x14fd   : > { %v6808_v38 = vpop.eup %6807 }
0x14fe   : > { %v6810_v19 = vpop.eup %6809  ;;  %v3210_v24 = vmul.f32 %v6808_v38, %v8312_v48  ;;  %v3240_v2 = vadd.f32 %v5642_v28, %v3224_v37 }
0x14ff   : > { %v3209_v43 = vmul.f32 %v6810_v19, %v8314_v13 }
0x1500   : > { %v3226_v9 = vmul.f32 %v5641_v59, %v3210_v24  ;;  %v5707_v23 = vpack.c.bf16 %v3240_v2, %v3240_v2  ;;  %v3248_v41 = vadd.f32 %v5717_v7, %v3240_v2 }
0x1501   : > { %v6812_v1 = vpop.eup %6811  ;;  %v3225_v25 = vmul.f32 %v5641_v59, %v3209_v43 }
0x1502   : > { %v6814_v3 = vpop.eup %6813  ;;  %v3242_v34 = vadd.f32 %v5642_v28, %v3226_v9  ;;  %v3212_v5 = vmul.f32 %v6812_v1, %v8321_v54  ;;  %3783 = vst.msk [vmem:[%s8355_s16] sm:$0xf] %vm3782_vm5, %v5707_v23 }
0x1503   : > { %v3211_v48 = vmul.f32 %v6814_v3, %v8323_v58  ;;  %v3241_v10 = vadd.f32 %v5642_v28, %v3225_v25  ;;  %v5647_v25 = vld [vmem:[#allocation7 + $0x3] ss:$0 sm:$0xff] }
0x1504   : > { %v5709_v35 = vpack.c.bf16 %v3242_v34, %v3242_v34  ;;  %v3228_v13 = vmul.f32 %v5641_v59, %v3212_v5  ;;  %v3250_v4 = vadd.f32 %v5721_v14, %v3242_v34 }
0x1505   : > { %v6816_v45 = vpop.eup %6815  ;;  %v3227_v16 = vmul.f32 %v5641_v59, %v3211_v48  ;;  %v3427_v40 = vpack.c.bf16 %v3241_v10, %v3240_v2  ;;  %v5708_v44 = vpack.c.bf16 %v3241_v10, %v3241_v10  ;;  %v3249_v46 = vadd.f32 %v5718_v8, %v3241_v10  ;;  %v5654_v2 = vld [vmem:[#allocation10 + $0x3] ss:$0 sm:$0xff] }
0x1506   : > { %v6818_v47 = vpop.eup %6817  ;;  %3785 = vst.msk [vmem:[%s8355_s16 + $0x8] sm:$0xf] %vm3782_vm5, %v5709_v35  ;;  %v3214_v54 = vmul.f32 %v6816_v45, %v8331_v20  ;;  %v3244_v58 = vadd.f32 %v5642_v28, %v3228_v13 }
0x1507   : > { %v3243_v31 = vadd.f32 %v5642_v28, %v3227_v16  ;;  %v3213_v11 = vmul.f32 %v6818_v47, %v8333_v29  ;;  %6158 = vmatprep.mubr.msk.bf16.mxu1 %vm1428_vm1, %v3427_v40  ;;  %3784 = vst.msk [vmem:[%s8355_s16 + $0x4] sm:$0xf] %vm3782_vm5, %v5708_v44  ;;  %v3321_v7 = vpack.c.bf16 %v3249_v46, %v3248_v41 }
0x1508   : > { %v5711_v8 = vpack.c.bf16 %v3244_v58, %v3244_v58  ;;  %v3230_v17 = vmul.f32 %v5641_v59, %v3214_v54 }
0x1509   : > { %v6820_v33 = vpop.eup %6819  ;;  %v5710_v26 = vpack.c.bf16 %v3243_v31, %v3243_v31  ;;  %6146 = vmatprep.mubr.msk.bf16.mxu0 %vm1428_vm1, %v3321_v7  ;;  %v3428_v20 = vpack.c.bf16 %v3243_v31, %v3242_v34  ;;  %v3251_v49 = vadd.f32 %v5722_v15, %v3243_v31  ;;  %v3229_v29 = vmul.f32 %v5641_v59, %v3213_v11 }
0x150a   : > { %v3215_v50 = vmul.f32 %v6820_v33, %v8341_v42  ;;  %3787 = vst.msk [vmem:[%s8355_s16 + $0x10] sm:$0xf] %vm3782_vm5, %v5711_v8  ;;  %v3246_v36 = vadd.f32 %v5642_v28, %v3230_v17  ;;  %v3252_v42 = vadd.f32 %v5725_v21, %v3244_v58 }
0x150b   : > { %3786 = vst.msk [vmem:[%s8355_s16 + $0xc] sm:$0xf] %vm3782_vm5, %v5710_v26  ;;  %6159 = vmatmul.mubr.msk.bf16.vlgmr.msra.gmra.mxu1 %vm1428_vm1, %v3428_v20  ;;  %v3322_v14 = vpack.c.bf16 %v3251_v49, %v3250_v4  ;;  %v3245_v51 = vadd.f32 %v5642_v28, %v3229_v29 }
0x150c   : > { %v3231_v39 = vmul.f32 %v5641_v59, %v3215_v50  ;;  %v5713_v56 = vpack.c.bf16 %v3246_v36, %v3246_v36  ;;  %v3254_v59 = vadd.f32 %v5729_v30, %v3246_v36 }
0x150d   : > { %6147 = vmatmul.mubr.msk.bf16.vlgmr.msra.gmra.mxu0 %vm1428_vm1, %v3322_v14  ;;  %v3429_v6 = vpack.c.bf16 %v3245_v51, %v3244_v58  ;;  %v5712_v15 = vpack.c.bf16 %v3245_v51, %v3245_v51  ;;  %v3253_v60 = vadd.f32 %v5726_v22, %v3245_v51 }
0x150e   : > { %v3247_v57 = vadd.f32 %v5642_v28, %v3231_v39  ;;  %3789 = vst.msk [vmem:[%s8355_s16 + $0x18] sm:$0xf] %vm3782_vm5, %v5713_v56 }
0x150f   : > { %6162 = vmatprep.mubr.msk.bf16.mxu1 %vm1428_vm1, %v3429_v6  ;;  %3788 = vst.msk [vmem:[%s8355_s16 + $0x14] sm:$0xf] %vm3782_vm5, %v5712_v15  ;;  %v3323_v61 = vpack.c.bf16 %v3253_v60, %v3252_v42 }
0x1510   : > { %v3430_v27 = vpack.c.bf16 %v3247_v57, %v3246_v36  ;;  %v5714_v62 = vpack.c.bf16 %v3247_v57, %v3247_v57  ;;  %v3255_v63 = vadd.f32 %v5730_v32, %v3247_v57  ;;  %v5643_v36 = vld [vmem:[#allocation4 + $0x3] ss:$0 sm:$0xff] }
0x1511   : > { %6150 = vmatprep.mubr.msk.bf16.mxu0 %vm1428_vm1, %v3323_v61  ;;  %v3316_v51 = vadd.f32 %v5643_v36, %v8280_v53 }
0x1512   : > { %3790 = vst.msk [vmem:[%s8355_s16 + $0x1c] sm:$0xf] %vm3782_vm5, %v5714_v62  ;;  %v3324_v12 = vpack.c.bf16 %v3255_v63, %v3254_v59 }
0x1513   : > { %6163 = vmatmul.mubr.msk.bf16.gmra.mxu1 %vm1428_vm1, %v3430_v27  ;;  %v3533_v39 = vpack.c.bf16 %v3316_v51, %v3316_v51  ;;  %v4031_v51 = vld [vmem:[#allocation22 + $0x30] sm:$0xff] }
0x1514   : > { %6186 = vmatprep.mubr.msk.bf16.mxu1 %vm7574_vm0, %v7573_v0 }
0x1515   : > { %6151 = vmatmul.mubr.msk.bf16.gmra.mxu0 %vm1428_vm1, %v3324_v12 }
0x1516   : > { %6174 = vmatprep.mubr.msk.bf16.mxu0 %vm7574_vm0, %v7573_v0 }
0x15cb   : > { %v6160_v21 = vpop.f32.mrf.mxu1 }
0x15cc   : > { %v3511_v47 = vadd.f32 %v6160_v21, %v5654_v2 }
0x15cd   : > { %v6148_v22 = vpop.f32.mrf.mxu0  ;;  %v3502_v30 = vpop.f32.mrf.mxu1 }
0x15ce   : > { %v3503_v7 = vadd.f32 %v5654_v2, %v3502_v30  ;;  %v3405_v33 = vadd.f32 %v6148_v22, %v5647_v25  ;;  %v6753_v22 = vld [vmem:[#allocation12 + $0x38] sm:$0xff]  }
0x15cf   : > { %v3396_v18 = vpop.f32.mrf.mxu0  ;;  %v6161_v32 = vpop.f32.mrf.mxu1 }
0x15d0   : > { %v3514_v16 = vadd.f32 %v6161_v32, %v5654_v2  ;;  %v3397_v29 = vadd.f32 %v5647_v25, %v3396_v18  ;;  %v6754_v18 = vld [vmem:[#allocation12 + $0x30] sm:$0xff]  }
0x15d1   : > { %v6149_v55 = vpop.f32.mrf.mxu0  ;;  %v3505_v28 = vpop.f32.mrf.mxu1 }
0x15d2   : > { %v3607_v58 = vpack.c.bf16 %v3514_v16, %v3511_v47  ;;  %v3506_v31 = vadd.f32 %v5654_v2, %v3505_v28  ;;  %v3408_v4 = vadd.f32 %v6149_v55, %v5647_v25  ;;  %v3873_v16 = vld [vmem:[#allocation25 + $0x10] sm:$0xff] }
0x15d3   : > { %v3399_v37 = vpop.f32.mrf.mxu0  ;;  %v6164_v38 = vpop.f32.mrf.mxu1 }
0x15d4   : > { %v3527_v23 = vadd.f32 %v6164_v38, %v5654_v2  ;;  %v3606_v8 = vpack.c.bf16 %v3506_v31, %v3503_v7  ;;  %v3535_v26 = vpack.c.bf16 %v3408_v4, %v3405_v33  ;;  %v3400_v20 = vadd.f32 %v5647_v25, %v3399_v37  ;;  %v5668_v31 = vld [vmem:[#allocation16 + $0x4] ss:$0 sm:$0xff] }
0x15d5   : > { %v6152_v19 = vpop.f32.mrf.mxu0  ;;  %v3518_v24 = vpop.f32.mrf.mxu1  ;;  %v3953_v33 = vld [vmem:[%s8712_s11 + $0x18] sm:$0xff] }
0x15d6   : > { %v3421_v5 = vadd.f32 %v6152_v19, %v5647_v25  ;;  %v3519_v13 = vadd.f32 %v5654_v2, %v3518_v24  ;;  %v3545_v49 = vsel %vm1428_vm1, %v3535_v26, 0  ;;  %v3534_v50 = vpack.c.bf16 %v3400_v20, %v3397_v29  ;;  %v5663_v19 = vld [vmem:[#allocation13 + $0x3] ss:$0 sm:$0xff]  ;;  %v3952_v26 = vld [vmem:[%s8712_s11 + $0x10] sm:$0xff] }
0x15d7   : > { %v3412_v43 = vpop.f32.mrf.mxu0  ;;  %v6165_v9 = vpop.f32.mrf.mxu1  ;;  %v3795_v20 = vld [vmem:[#allocation24] sm:$0x1] }
0x15d8   : > { %v3530_v1 = vadd.f32 %v6165_v9, %v5654_v2  ;;  %v3413_v54 = vadd.f32 %v5647_v25, %v3412_v43  ;;  %v3542_v14 = vsel %vm1428_vm1, %v3534_v50, 0 }
0x15d9   : > { %v6153_v3 = vpop.f32.mrf.mxu0  ;;  %v3521_v34 = vpop.f32.mrf.mxu1 }
0x15da   : > { %v3609_v48 = vpack.c.bf16 %v3530_v1, %v3527_v23  ;;  %v3424_v10 = vadd.f32 %v6153_v3, %v5647_v25  ;;  %v3522_v35 = vadd.f32 %v5654_v2, %v3521_v34 }
0x15db   : > { %v3415_v41 = vpop.f32.mrf.mxu0 }
0x15dc   : > { %v3537_v45 = vpack.c.bf16 %v3424_v10, %v3421_v5  ;;  %6179 = vmatpush3.bf16.msra.mxu1 %v3609_v48  ;;  %v3608_v40 = vpack.c.bf16 %v3522_v35, %v3519_v13  ;;  %v3416_v44 = vadd.f32 %v5647_v25, %v3415_v41  ;;  %v3794_v35 = vld [vmem:[#allocation22 + $0x18] sm:$0xff]  ;;  %v3793_v41 = vld [vmem:[#allocation22 + $0x10] sm:$0xff]  ;;  %v3791_v13 = vld [vmem:[#allocation22] sm:$0xff] }
0x15dd   : > { %6180 = vmatprep.subr.bf16.mxu1 %v7573_v0 }
0x15de   : > { %v3551_v46 = vsel %vm1428_vm1, %v3537_v45, 0  ;;  %v3536_v11 = vpack.c.bf16 %v3416_v44, %v3413_v54  ;;  %v3874_v45 = vld [vmem:[#allocation25 + $0x18] sm:$0xff]  ;;  %v5667_v54 = vld [vmem:[#allocation15 + $0x4] ss:$0 sm:$0xff] }
0x15df   : > { %6167 = vmatpush3.bf16.xpose.msra.mxu0 %v3551_v46 }
0x15e0   : > { %6181 = vmatpush3.bf16.msra.mxu1 %v3608_v40  ;;  %6168 = vmatprep.subr.bf16.mxu0 %v7573_v0  ;;  %v3548_v17 = vsel %vm1428_vm1, %v3536_v11, 0 }
0x15e1   : > { %6182 = vmatprep.subr.bf16.mxu1 %v7573_v0 }
0x15e4   : > { %6183 = vmatpush3.bf16.msra.mxu1 %v3607_v58 }
0x15e5   : > { %6184 = vmatprep.subr.bf16.mxu1 %v7573_v0 }
0x15e7   : > { %6169 = vmatpush3.bf16.xpose.msra.mxu0 %v3548_v17  ;;  %v3871_v17 = vld [vmem:[#allocation25] sm:$0xff] }
0x15e8   : > { %6185 = vmatpush3.bf16.msra.mxu1 %v3606_v8  ;;  %6170 = vmatprep.subr.bf16.mxu0 %v7573_v0  ;;  %v3872_v8 = vld [vmem:[#allocation25 + $0x8] sm:$0xff] }
0x15e9   : > { %6190 = vmatprep.subr.bf16.mxu1 %v7573_v0 }
0x15ef   : > { %6171 = vmatpush3.bf16.xpose.msra.mxu0 %v3545_v49 }
0x15f0   : > { %6172 = vmatprep.subr.bf16.mxu0 %v7573_v0 }
0x15f7   : > { %6173 = vmatpush3.bf16.xpose.msra.mxu0 %v3542_v14  ;;  %v4032_v14 = vld [vmem:[#allocation22 + $0x38] sm:$0xff] }
0x15f8   : > { %6209 = vmatprep.subr.mxu0 %v7573_v0 }
0x15fe   : > { %6175 = vmatmul.mubr.msk.bf16.vlgmr.msra.gmra.mxu0 %vm1428_vm1, %v3533_v39  ;;  %v4030_v39 = vld [vmem:[#allocation22 + $0x28] sm:$0xff] }
0x15ff   : > { %6217 = vmatprep.mubr.msk.f32.mxu0 %vm7574_vm0, %v7573_v0  ;;  %6210 = vmatpush3.msra.mxu0 %v3874_v45 }
0x1600   : > { %6211 = vmatprep.subr.mxu0 %v7573_v0 }
0x1601   : > { %6212 = vmatpush3.msra.mxu0 %v3873_v16  ;;  %v4352_v16 = vld [vmem:[#allocation25 + $0x40] sm:$0xff] }
0x1602   : > { %6213 = vmatprep.subr.mxu0 %v7573_v0 }
0x1603   : > { %6214 = vmatpush3.msra.mxu0 %v3872_v8  ;;  %v5690_v8 = vld [vmem:[%s8712_s11 + $0x48] sm:$0xff] }
0x1604   : > { %6215 = vmatprep.subr.mxu0 %v7573_v0 }
0x1605   : > { %6216 = vmatpush3.msra.mxu0 %v3871_v17  ;;  %v5689_v17 = vld [vmem:[%s8712_s11 + $0x40] sm:$0xff] }
0x1606   : > { %6231 = vmatprep.subr.mxu0 %v7573_v0 }
0x16be   : > { %v3587_v56 = vpop.f32.mrf.mxu0 }
0x16bf   : > { %v3593_v6 = vmul.f32 0.17677669, %v3587_v56  ;;  %v4029_v56 = vld [vmem:[#allocation22 + $0x20] sm:$0xff] }
0x16c0   : > { %v6176_v15 = vpop.f32.mrf.mxu0 }
0x16c1   : > { %v3594_v42 = vsel %vm2164_vm4, %v3593_v6, -inf  ;;  %v3951_v15 = vld [vmem:[%s8712_s11 + $0x8] sm:$0xff] }
0x16c2   : > { %3595 = vmax.xlane.f32.xlu0 %v3594_v42  ;;  %v3590_v60 = vpop.f32.mrf.mxu0  ;;  %v3950_v42 = vld [vmem:[%s8712_s11] sm:$0xff] }
0x16c3   : > { %v3875_v60 = vld [vmem:[#allocation27] sm:$0x1] }
0x16c4   : > { %v6177_v57 = vpop.f32.mrf.mxu0 }
0x174b   : > { %v3596_v61 = vpop.xlane.xlu0 %3595 }
0x174c   : > { %v3597_v27 = vsub.f32 %v3593_v6, %v3596_v61 }
0x174e   : > { %v3598_v62 = vmul.f32 1.442695, %v3597_v27 }
0x1750   : > { %6821 = vpow2.f32 %v3598_v62 }
0x175d   : > { %v6822_v53 = vpop.eup %6821 }
0x175e   : > { %v3600_v59 = vsel %vm2164_vm4, %v6822_v53, 0.0 }
0x175f   : > { %3601 = vadd.xlane.f32.xlu1 %v3600_v59  ;;  %v4112_v59 = vld [vmem:[#allocation25 + $0x30] sm:$0xff] }
0x17e8   : > { %v3602_v63 = vpop.xlane.xlu1 %3601 }
0x17e9   : > { %6823 = vrcp.f32 %v3602_v63  ;;  %v4034_v63 = vld [vmem:[#allocation24 + $0x1] sm:$0x1] }
0x17f6   : > { %v6824_v12 = vpop.eup %6823 }
0x17f7   : > { %v3604_v21 = vmul.f32 %v6824_v12, %v6822_v53  ;;  %v4113_v53 = vld [vmem:[#allocation25 + $0x38] sm:$0xff]  ;;  %v4111_v12 = vld [vmem:[#allocation25 + $0x28] sm:$0xff] }
0x17f9   : > { %v3605_v30 = vpack.c.bf16 %v3604_v21, %v3604_v21 }
0x17fb   : > { %6187 = vmatmul.mubr.msk.bf16.vlgmr.msra.gmra.mxu1 %vm2164_vm4, %v3605_v30  ;;  %v4110_v30 = vld [vmem:[#allocation25 + $0x20] sm:$0xff] }
0x17fc   : > { %6191 = vmatpush3.bf16.msra.mxu1 %v6753_v22  ;;  %6194 = vmatprep.mubr.msk.bf16.mxu1 %vm7574_vm0, %v7573_v0 }
0x17fd   : > { %6192 = vmatprep.subr.bf16.mxu1 %v7573_v0 }
0x1800   : > { %6193 = vmatpush3.bf16.msra.mxu1 %v6754_v18 }
0x1801   : > { %6198 = vmatprep.subr.mxu1 %v7573_v0 }
0x18bb   : > { %v3647_v32 = vpop.f32.mrf.mxu1 }
0x18bc   : > { %v3653_v55 = vpack.c.bf16 %v3647_v32, %v3647_v32 }
0x18bd   : > { %v6188_v28 = vpop.f32.mrf.mxu1 }
0x18be   : > { %6195 = vmatmul.mubr.msk.bf16.vlgmr.msra.gmra.mxu1 %vm1428_vm1, %v3653_v55  ;;  %v4274_v55 = vld [vmem:[#allocation22 + $0x58] sm:$0xff]  ;;  %v4273_v28 = vld [vmem:[#allocation22 + $0x50] sm:$0xff] }
0x18bf   : > { %v3650_v37 = vpop.f32.mrf.mxu1  ;;  %6206 = vmatprep.mubr.msk.f32.mxu1 %vm7574_vm0, %v7573_v0  ;;  %6199 = vmatpush3.msra.mxu1 %v3794_v35  ;;  %v4354_v35 = vld [vmem:[#allocation25 + $0x50] sm:$0xff] }
0x18c0   : > { %6200 = vmatprep.subr.mxu1 %v7573_v0  ;;  %v4272_v37 = vld [vmem:[#allocation22 + $0x48] sm:$0xff] }
0x18c1   : > { %v6189_v38 = vpop.f32.mrf.mxu1  ;;  %6201 = vmatpush3.msra.mxu1 %v3793_v41  ;;  %v4276_v41 = vld [vmem:[#allocation24 + $0x2] sm:$0x1] }
0x18c2   : > { %6202 = vmatprep.subr.mxu1 %v7573_v0  ;;  %v4271_v38 = vld [vmem:[#allocation22 + $0x40] sm:$0xff] }
0x197e   : > { %v3716_v24 = vpop.f32.mrf.mxu1 }
0x197f   : > { %v3717_v2 = vadd.f32 %v5663_v19, %v3716_v24  ;;  %v5685_v24 = vld [vmem:[%s8712_s11 + $0x38] sm:$0xff] }
0x1980   : > { %v6196_v43 = vpop.f32.mrf.mxu1 }
0x1981   : > { %v3722_v9 = vadd.f32 %v3717_v2, %v8234_v52  ;;  %v3792_v52 = vld [vmem:[#allocation22 + $0x8] sm:$0xff]  ;;  %v5684_v2 = vld [vmem:[%s8712_s11 + $0x30] sm:$0xff]  ;;  %v5683_v43 = vld [vmem:[%s8712_s11 + $0x28] sm:$0xff] }
0x1982   : > { %v3719_v23 = vpop.f32.mrf.mxu1  ;;  %6203 = vmatpush3.msra.mxu1 %v3792_v52  ;;  %v4353_v52 = vld [vmem:[#allocation25 + $0x48] sm:$0xff] }
0x1983   : > { %v3723_v1 = vsel %vm1428_vm1, %v3722_v9, 0.0  ;;  %6204 = vmatprep.subr.mxu1 %v7573_v0 }
0x1984   : > { %3724 = vadd.xlane.f32.xlu0 %v3723_v1  ;;  %v6197_v25 = vpop.f32.mrf.mxu1  ;;  %6205 = vmatpush3.msra.mxu1 %v3791_v13 }
0x1985   : > { %6220 = vmatprep.subr.mxu1 %v7573_v0  ;;  %v4115_v25 = vld [vmem:[#allocation27 + $0x1] sm:$0x1] }
0x1a0d   : > { %v3725_v3 = vpop.xlane.xlu0 %3724 }
0x1a0e   : > { %v3726_v34 = vmul.f32 0.03125, %v3725_v3 }
0x1a10   : > { %v3727_v5 = vsub.f32 %v3722_v9, %v3726_v34  ;;  %v5682_v9 = vld [vmem:[%s8712_s11 + $0x20] sm:$0xff] }
0x1a12   : > { %v3728_v48 = vmul.f32 %v3727_v5, %v3727_v5 }
0x1a14   : > { %v3729_v10 = vsel %vm1428_vm1, %v3728_v48, 0.0 }
0x1a15   : > { %3730 = vadd.xlane.f32.xlu1 %v3729_v10  ;;  %v4355_v10 = vld [vmem:[#allocation25 + $0x58] sm:$0xff] }
0x1a9e   : > { %v3731_v40 = vpop.xlane.xlu1 %3730 }
0x1a9f   : > { %v3732_v44 = vmul.f32 0.03125, %v3731_v40 }
0x1aa1   : > { %v3733_v46 = vadd.f32 1e-05, %v3732_v44 }
0x1aa3   : > { %6825 = vrsqrt.f32 %v3733_v46  ;;  %v4516_v46 = vld [vmem:[#allocation22 + $0x78] sm:$0xff] }
0x1ab0   : > { %v6826_v47 = vpop.eup %6825 }
0x1ab1   : > { %v3735_v58 = vmul.f32 %v6826_v47, %v3727_v5  ;;  %v4515_v47 = vld [vmem:[#allocation22 + $0x70] sm:$0xff] }
0x1ab3   : > { %v3744_v11 = vmul.f32 %v5667_v54, %v3735_v58  ;;  %v4514_v54 = vld [vmem:[#allocation22 + $0x68] sm:$0xff]  ;;  %v4513_v58 = vld [vmem:[#allocation22 + $0x60] sm:$0xff] }
0x1ab5   : > { %v8442_v7 = vadd.f32 %v5668_v31, %v3744_v11  ;;  %v5692_v11 = vld [vmem:[%s8712_s11 + $0x58] sm:$0xff] }
0x1ab7   : > { %v3797_v4 = vrot.slane %v8442_v7, 1  ;;  %v4035_v6 = vrot.slane %v8442_v7, 2  ;;  %v4277_v19 = vrot.slane %v8442_v7, 3  ;;  %v4519_v31 = vrot.slane %v8442_v7, 4 }
0x1ab9   : > { %6207 = vmatmul.mubr.msk.f32.vlgmr.msra.gmra.mxu1 %vm1428_vm1, %v3797_v4  ;;  %v5691_v4 = vld [vmem:[%s8712_s11 + $0x50] sm:$0xff] }
0x1aba   : > { %6228 = vmatprep.mubr.msk.f32.mxu1 %vm7574_vm0, %v7573_v0  ;;  %6221 = vmatpush3.msra.mxu1 %v3953_v33  ;;  %v4196_v33 = vld [vmem:[#allocation28 + $0x1] sm:$0x1] }
0x1abb   : > { %6222 = vmatprep.subr.mxu1 %v7573_v0 }
0x1abc   : > { %6223 = vmatpush3.msra.mxu1 %v3952_v26  ;;  %v3954_v26 = vld [vmem:[#allocation28] sm:$0x1] }
0x1abd   : > { %6224 = vmatprep.subr.mxu1 %v7573_v0 }
0x1abe   : > { %6225 = vmatpush3.msra.mxu1 %v3951_v15 }
0x1abf   : > { %6226 = vmatprep.subr.mxu1 %v7573_v0 }
0x1ac0   : > { %6227 = vmatpush3.msra.mxu1 %v3950_v42  ;;  %v4597_v42 = vld [vmem:[#allocation25 + $0x78] sm:$0xff] }
0x1ac1   : > { %6242 = vmatprep.subr.mxu1 %v7573_v0 }
0x1b79   : > { %v3866_v49 = vpop.f32.mrf.mxu1 }
0x1b7a   : > { %v3867_v29 = vadd.f32 %v3866_v49, %v3795_v20 }
0x1b7b   : > { %v6208_v50 = vpop.f32.mrf.mxu1 }
0x1b7c   : > { %v3870_v36 = vmax.f32 %v3867_v29, 0.0 }
0x1b7e   : > { %6218 = vmatmul.mubr.msk.f32.vlgmr.msra.gmra.mxu0 %vm1428_vm1, %v3870_v36 }
0x1b7f   : > { %6232 = vmatpush3.msra.mxu0 %v4032_v14  ;;  %6239 = vmatprep.mubr.msk.f32.mxu0 %vm7574_vm0, %v7573_v0 }
0x1b80   : > { %6233 = vmatprep.subr.mxu0 %v7573_v0 }
0x1b81   : > { %6234 = vmatpush3.msra.mxu0 %v4031_v51  ;;  %v4357_v51 = vld [vmem:[#allocation27 + $0x2] sm:$0x1] }
0x1b82   : > { %6235 = vmatprep.subr.mxu0 %v7573_v0 }
0x1b83   : > { %6236 = vmatpush3.msra.mxu0 %v4030_v39 }
0x1b84   : > { %6237 = vmatprep.subr.mxu0 %v7573_v0 }
0x1b85   : > { %6238 = vmatpush3.msra.mxu0 %v4029_v56 }
0x1b86   : > { %6240 = vmatmul.mubr.msk.f32.vlgmr.msra.gmra.mxu0 %vm1428_vm1, %v4035_v6  ;;  %6253 = vmatprep.subr.mxu0 %v7573_v0 }
0x1b87   : > { %6261 = vmatprep.mubr.msk.f32.mxu0 %vm7574_vm0, %v7573_v0  ;;  %6254 = vmatpush3.msra.mxu0 %v5685_v24  ;;  %v4940_v24 = vld [vmem:[#allocation34 + $0x68] sm:$0xff] }
0x1b88   : > { %6255 = vmatprep.subr.mxu0 %v7573_v0 }
0x1b89   : > { %6256 = vmatpush3.msra.mxu0 %v5684_v2  ;;  %v4939_v2 = vld [vmem:[#allocation34 + $0x60] sm:$0xff] }
0x1b8a   : > { %6257 = vmatprep.subr.mxu0 %v7573_v0 }
0x1b8b   : > { %6258 = vmatpush3.msra.mxu0 %v5683_v43  ;;  %v4938_v43 = vld [vmem:[#allocation34 + $0x58] sm:$0xff] }
0x1b8c   : > { %6259 = vmatprep.subr.mxu0 %v7573_v0 }
0x1b8d   : > { %6260 = vmatpush3.msra.mxu0 %v5682_v9  ;;  %v4937_v9 = vld [vmem:[#allocation34 + $0x50] sm:$0xff] }
0x1b8e   : > { %6275 = vmatprep.subr.mxu0 %v7573_v0 }
0x1c3e   : > { %v3945_v57 = vpop.f32.mrf.mxu0 }
0x1c3f   : > { %v3946_v61 = vadd.f32 %v3945_v57, %v3875_v60  ;;  %v4596_v60 = vld [vmem:[#allocation25 + $0x70] sm:$0xff]  ;;  %v4518_v57 = vld [vmem:[#allocation24 + $0x3] sm:$0x1] }
0x1c40   : > { %v6219_v27 = vpop.f32.mrf.mxu0 }
0x1c41   : > { %v3949_v62 = vmax.f32 %v3946_v61, 0.0  ;;  %v4595_v61 = vld [vmem:[#allocation25 + $0x68] sm:$0xff] }
0x1c43   : > { %6229 = vmatmul.mubr.msk.f32.vlgmr.msra.gmra.mxu1 %vm1428_vm1, %v3949_v62 }
0x1c44   : > { %6243 = vmatpush3.msra.mxu1 %v4113_v53  ;;  %6250 = vmatprep.mubr.msk.f32.mxu1 %vm7574_vm0, %v7573_v0  ;;  %v4594_v53 = vld [vmem:[#allocation25 + $0x60] sm:$0xff] }
0x1c45   : > { %6244 = vmatprep.subr.mxu1 %v7573_v0 }
0x1c46   : > { %v4104_v21 = vpop.f32.mrf.mxu0  ;;  %6245 = vmatpush3.msra.mxu1 %v4112_v59 }
0x1c47   : > { %v4105_v22 = vadd.f32 %v4104_v21, %v4034_v63  ;;  %6246 = vmatprep.subr.mxu1 %v7573_v0  ;;  %v4777_v21 = vld [vmem:[#allocation31 + $0x10] sm:$0xff] }
0x1c48   : > { %v6241_v18 = vpop.f32.mrf.mxu0  ;;  %6247 = vmatpush3.msra.mxu1 %v4111_v12  ;;  %v4778_v12 = vld [vmem:[#allocation31 + $0x18] sm:$0xff] }
0x1c49   : > { %v4108_v32 = vmax.f32 %v4105_v22, 0.0  ;;  %6248 = vmatprep.subr.mxu1 %v7573_v0  ;;  %v4776_v22 = vld [vmem:[#allocation31 + $0x8] sm:$0xff]  ;;  %v4779_v18 = vrot.slane %v8442_v7, 5 }
0x1c4a   : > { %6249 = vmatpush3.msra.mxu1 %v4110_v30  ;;  %v4775_v30 = vld [vmem:[#allocation31] sm:$0xff] }
0x1c4b   : > { %6251 = vmatmul.mubr.msk.f32.vlgmr.msra.gmra.mxu1 %vm1428_vm1, %v4108_v32  ;;  %6264 = vmatprep.subr.mxu1 %v7573_v0  ;;  %v5699_v32 = vld [vmem:[%s8712_s11 + $0x78] sm:$0xff] }
0x1c4c   : > { %6265 = vmatpush3.msra.mxu1 %v4274_v55  ;;  %6272 = vmatprep.mubr.msk.f32.mxu1 %vm7574_vm0, %v7573_v0  ;;  %v5698_v55 = vld [vmem:[%s8712_s11 + $0x70] sm:$0xff] }
0x1c4d   : > { %6266 = vmatprep.subr.mxu1 %v7573_v0 }
0x1c4e   : > { %6267 = vmatpush3.msra.mxu1 %v4273_v28  ;;  %v5697_v28 = vld [vmem:[%s8712_s11 + $0x68] sm:$0xff] }
0x1c4f   : > { %6268 = vmatprep.subr.mxu1 %v7573_v0 }
0x1c50   : > { %6269 = vmatpush3.msra.mxu1 %v4272_v37  ;;  %v5696_v37 = vld [vmem:[%s8712_s11 + $0x60] sm:$0xff] }
0x1c51   : > { %6270 = vmatprep.subr.mxu1 %v7573_v0 }
0x1c52   : > { %6271 = vmatpush3.msra.mxu1 %v4271_v38  ;;  %v4942_v38 = vld [vmem:[#allocation34 + $0x78] sm:$0xff] }
0x1c53   : > { %6273 = vmatmul.mubr.msk.f32.vlgmr.msra.gmra.mxu1 %vm1428_vm1, %v4277_v19  ;;  %6286 = vmatprep.subr.mxu1 %v7573_v0  ;;  %v4941_v19 = vld [vmem:[#allocation34 + $0x70] sm:$0xff] }
0x1c54   : > { %6294 = vmatprep.mubr.msk.f32.mxu1 %vm7574_vm0, %v7573_v0  ;;  %6287 = vmatpush3.msra.mxu1 %v5692_v11  ;;  %v4932_v11 = vld [vmem:[#allocation34 + $0x28] sm:$0xff] }
0x1c55   : > { %6288 = vmatprep.subr.mxu1 %v7573_v0 }
0x1c56   : > { %6289 = vmatpush3.msra.mxu1 %v5691_v4  ;;  %v4931_v4 = vld [vmem:[#allocation34 + $0x20] sm:$0xff] }
0x1c57   : > { %6290 = vmatprep.subr.mxu1 %v7573_v0 }
0x1c58   : > { %6291 = vmatpush3.msra.mxu1 %v5690_v8  ;;  %v4929_v8 = vld [vmem:[#allocation34 + $0x10] sm:$0xff] }
0x1c59   : > { %6292 = vmatprep.subr.mxu1 %v7573_v0 }
0x1c5a   : > { %6293 = vmatpush3.msra.mxu1 %v5689_v17  ;;  %v4928_v17 = vld [vmem:[#allocation34 + $0x8] sm:$0xff] }
0x1c5b   : > { %6308 = vmatprep.subr.mxu1 %v7573_v0 }
0x1d03   : > { %v4024_v23 = vpop.f32.mrf.mxu1 }
0x1d04   : > { %v4025_v50 = vadd.f32 %v4024_v23, %v3954_v26  ;;  %v4936_v23 = vld [vmem:[#allocation34 + $0x48] sm:$0xff]  ;;  %v5030_v26 = vld [vmem:[%s8713_s22 + $0x78] sm:$0xff] }
0x1d05   : > { %v6230_v1 = vpop.f32.mrf.mxu1 }
0x1d06   : > { %v4935_v1 = vld [vmem:[#allocation34 + $0x40] sm:$0xff] }
0x1d0b   : > { %v4185_v3 = vpop.f32.mrf.mxu1 }
0x1d0c   : > { %v4186_v34 = vadd.f32 %v4185_v3, %v4115_v25  ;;  %v4934_v25 = vld [vmem:[#allocation34 + $0x38] sm:$0xff] }
0x1d0d   : > { %v6252_v5 = vpop.f32.mrf.mxu1  ;;  %v4438_v3 = vld [vmem:[#allocation28 + $0x2] sm:$0x1] }
0x1d0e   : > { %v4189_v48 = vmax.f32 %v4186_v34, 0.0 }
0x1d10   : > { %6262 = vmatmul.mubr.msk.f32.vlgmr.msra.gmra.mxu0 %vm1428_vm1, %v4189_v48 }
0x1d11   : > { %6276 = vmatpush3.msra.mxu0 %v4355_v10  ;;  %6283 = vmatprep.mubr.msk.f32.mxu0 %vm7574_vm0, %v7573_v0 }
0x1d12   : > { %6277 = vmatprep.subr.mxu0 %v7573_v0 }
0x1d13   : > { %6278 = vmatpush3.msra.mxu0 %v4354_v35  ;;  %v4346_v13 = vpop.f32.mrf.mxu1 }
0x1d14   : > { %v4347_v45 = vadd.f32 %v4346_v13, %v4276_v41  ;;  %6279 = vmatprep.subr.mxu0 %v7573_v0  ;;  %v4599_v41 = vld [vmem:[#allocation27 + $0x3] sm:$0x1] }
0x1d15   : > { %6280 = vmatpush3.msra.mxu0 %v4353_v52  ;;  %v6274_v40 = vpop.f32.mrf.mxu1 }
0x1d16   : > { %v4350_v44 = vmax.f32 %v4347_v45, 0.0  ;;  %6281 = vmatprep.subr.mxu0 %v7573_v0  ;;  %v4774_v40 = vld [vmem:[#allocation30 + $0x18] sm:$0xff] }
0x1d17   : > { %6282 = vmatpush3.msra.mxu0 %v4352_v16 }
0x1d18   : > { %6297 = vmatprep.subr.mxu0 %v7573_v0  ;;  %6284 = vmatmul.mubr.msk.f32.vlgmr.msra.gmra.mxu0 %vm1428_vm1, %v4350_v44  ;;  %v4773_v44 = vld [vmem:[#allocation30 + $0x10] sm:$0xff] }
0x1d19   : > { %6298 = vmatpush3.msra.mxu0 %v4516_v46  ;;  %6305 = vmatprep.mubr.msk.f32.mxu0 %vm7574_vm0, %v7573_v0  ;;  %v4772_v46 = vld [vmem:[#allocation30 + $0x8] sm:$0xff] }
0x1d1a   : > { %6299 = vmatprep.subr.mxu0 %v7573_v0 }
0x1d1b   : > { %6300 = vmatpush3.msra.mxu0 %v4515_v47 }
0x1d1c   : > { %6301 = vmatprep.subr.mxu0 %v7573_v0 }
0x1d1d   : > { %6302 = vmatpush3.msra.mxu0 %v4514_v54  ;;  %v4771_v54 = vld [vmem:[#allocation30] sm:$0xff] }
0x1d1e   : > { %6303 = vmatprep.subr.mxu0 %v7573_v0 }
0x1d1f   : > { %6304 = vmatpush3.msra.mxu0 %v4513_v58 }
0x1d20   : > { %6306 = vmatmul.mubr.msk.f32.vlgmr.msra.gmra.mxu0 %vm1428_vm1, %v4519_v31  ;;  %6319 = vmatprep.subr.mxu0 %v7573_v0  ;;  %v4933_v31 = vld [vmem:[#allocation34 + $0x30] sm:$0xff] }
0x1d21   : > { %6327 = vmatprep.mubr.msk.f32.mxu0 %vm7574_vm0, %v7573_v0  ;;  %6320 = vmatpush3.msra.mxu0 %v5699_v32  ;;  %v5016_v32 = vld [vmem:[%s8713_s22 + $0x8] sm:$0xff] }
0x1d22   : > { %6321 = vmatprep.subr.mxu0 %v7573_v0 }
0x1d23   : > { %6322 = vmatpush3.msra.mxu0 %v5698_v55  ;;  %v5015_v55 = vld [vmem:[%s8713_s22] sm:$0xff] }
0x1d24   : > { %6323 = vmatprep.subr.mxu0 %v7573_v0 }
0x1d25   : > { %6324 = vmatpush3.msra.mxu0 %v5697_v28  ;;  %v4943_v28 = vld [vmem:[#allocation36] sm:$0x1] }
0x1d26   : > { %6325 = vmatprep.subr.mxu0 %v7573_v0 }
0x1d27   : > { %6326 = vmatpush3.msra.mxu0 %v5696_v37 }
0x1d28   : > { %6341 = vmatprep.subr.mxu0 %v7573_v0 }
0x1dd0   : > { %v4266_v20 = vpop.f32.mrf.mxu0 }
0x1dd1   : > { %v4267_v49 = vadd.f32 %v4266_v20, %v4196_v33  ;;  %v4927_v33 = vld [vmem:[#allocation34] sm:$0xff]  ;;  %v5029_v20 = vld [vmem:[%s8713_s22 + $0x70] sm:$0xff] }
0x1dd2   : > { %v6263_v29 = vpop.f32.mrf.mxu0 }
0x1dd3   : > { %v4755_v36 = vrot.slane %v4267_v49, 7  ;;  %v5028_v49 = vld [vmem:[%s8713_s22 + $0x68] sm:$0xff]  ;;  %v5027_v29 = vld [vmem:[%s8713_s22 + $0x60] sm:$0xff] }
0x1dd5   : > { %v8521_v14 = vsel %vm4763_vm6, %v4025_v50, %v4755_v36  ;;  %v5026_v50 = vld [vmem:[%s8713_s22 + $0x58] sm:$0xff]  ;;  %v5025_v36 = vld [vmem:[%s8713_s22 + $0x50] sm:$0xff] }
0x1dd8   : > { %v4427_v39 = vpop.f32.mrf.mxu0 }
0x1dd9   : > { %v4428_v56 = vadd.f32 %v4427_v39, %v4357_v51  ;;  %v5023_v51 = vld [vmem:[%s8713_s22 + $0x40] sm:$0xff]  ;;  %v5022_v39 = vld [vmem:[%s8713_s22 + $0x38] sm:$0xff] }
0x1dda   : > { %v6285_v6 = vpop.f32.mrf.mxu0 }
0x1ddb   : > { %v4431_v15 = vmax.f32 %v4428_v56, 0.0  ;;  %v5021_v56 = vld [vmem:[%s8713_s22 + $0x30] sm:$0xff]  ;;  %v5020_v6 = vld [vmem:[%s8713_s22 + $0x28] sm:$0xff] }
0x1ddd   : > { %6295 = vmatmul.mubr.msk.f32.vlgmr.msra.gmra.mxu1 %vm1428_vm1, %v4431_v15  ;;  %v5019_v15 = vld [vmem:[%s8713_s22 + $0x20] sm:$0xff] }
0x1dde   : > { %6309 = vmatpush3.msra.mxu1 %v4597_v42  ;;  %6316 = vmatprep.mubr.msk.f32.mxu1 %vm7574_vm0, %v7573_v0  ;;  %v5018_v42 = vld [vmem:[%s8713_s22 + $0x18] sm:$0xff] }
0x1ddf   : > { %6310 = vmatprep.subr.mxu1 %v7573_v0 }
0x1de0   : > { %v4588_v27 = vpop.f32.mrf.mxu0  ;;  %6311 = vmatpush3.msra.mxu1 %v4596_v60  ;;  %v4680_v60 = vld [vmem:[#allocation28 + $0x3] sm:$0x1] }
0x1de1   : > { %v4589_v62 = vadd.f32 %v4588_v27, %v4518_v57  ;;  %6312 = vmatprep.subr.mxu1 %v7573_v0 }
0x1de2   : > { %v6307_v59 = vpop.f32.mrf.mxu0  ;;  %6313 = vmatpush3.msra.mxu1 %v4595_v61 }
0x1de3   : > { %v4592_v63 = vmax.f32 %v4589_v62, 0.0  ;;  %6314 = vmatprep.subr.mxu1 %v7573_v0 }
0x1de4   : > { %6315 = vmatpush3.msra.mxu1 %v4594_v53 }
0x1de5   : > { %6317 = vmatmul.mubr.msk.f32.vlgmr.msra.gmra.mxu1 %vm1428_vm1, %v4592_v63  ;;  %6330 = vmatprep.subr.mxu1 %v7573_v0  ;;  %v4924_v63 = vld [vmem:[#allocation33] sm:$0x1] }
0x1de6   : > { %6331 = vmatpush3.msra.mxu1 %v4778_v12  ;;  %6338 = vmatprep.mubr.msk.f32.mxu1 %vm7574_vm0, %v7573_v0 }
0x1de7   : > { %6332 = vmatprep.subr.mxu1 %v7573_v0 }
0x1de8   : > { %6333 = vmatpush3.msra.mxu1 %v4777_v21 }
0x1de9   : > { %6334 = vmatprep.subr.mxu1 %v7573_v0 }
0x1dea   : > { %6335 = vmatpush3.msra.mxu1 %v4776_v22 }
0x1deb   : > { %6336 = vmatprep.subr.mxu1 %v7573_v0 }
0x1dec   : > { %6337 = vmatpush3.msra.mxu1 %v4775_v30 }
0x1ded   : > { %6339 = vmatmul.mubr.msk.f32.vlgmr.msra.gmra.mxu1 %vm1428_vm1, %v4779_v18  ;;  %6352 = vmatprep.subr.mxu1 %v7573_v0  ;;  %v5017_v18 = vld [vmem:[%s8713_s22 + $0x10] sm:$0xff] }
0x1dee   : > { %6384 = vmatprep.mubr.msk.f32.mxu1 %vm7574_vm0, %v7573_v0  ;;  %6353 = vmatpush3.msra.mxu1 %v4942_v38 }
0x1def   : > { %6354 = vmatprep.subr.mxu1 %v7573_v0 }
0x1df0   : > { %6355 = vmatpush3.msra.mxu1 %v4941_v19 }
0x1df1   : > { %6356 = vmatprep.subr.mxu1 %v7573_v0 }
0x1df2   : > { %6357 = vmatpush3.msra.mxu1 %v4940_v24 }
0x1df3   : > { %6358 = vmatprep.subr.mxu1 %v7573_v0 }
0x1df4   : > { %6359 = vmatpush3.msra.mxu1 %v4939_v2  ;;  %v5031_v2 = vld [vmem:[#allocation37] sm:$0x1] }
0x1df5   : > { %6360 = vmatprep.subr.mxu1 %v7573_v0 }
0x1df6   : > { %6361 = vmatpush3.msra.mxu1 %v4938_v43 }
0x1df7   : > { %6362 = vmatprep.subr.mxu1 %v7573_v0 }
0x1df8   : > { %6363 = vmatpush3.msra.mxu1 %v4937_v9 }
0x1df9   : > { %6364 = vmatprep.subr.mxu1 %v7573_v0 }
0x1dfa   : > { %6365 = vmatpush3.msra.mxu1 %v4936_v23 }
0x1dfb   : > { %6366 = vmatprep.subr.mxu1 %v7573_v0 }
0x1dfc   : > { %6367 = vmatpush3.msra.mxu1 %v4935_v1 }
0x1dfd   : > { %6368 = vmatprep.subr.mxu1 %v7573_v0 }
0x1dfe   : > { %6369 = vmatpush3.msra.mxu1 %v4934_v25 }
0x1dff   : > { %6370 = vmatprep.subr.mxu1 %v7573_v0 }
0x1e00   : > { %6371 = vmatpush3.msra.mxu1 %v4933_v31 }
0x1e01   : > { %6372 = vmatprep.subr.mxu1 %v7573_v0 }
0x1e02   : > { %6373 = vmatpush3.msra.mxu1 %v4932_v11 }
0x1e03   : > { %6374 = vmatprep.subr.mxu1 %v7573_v0 }
0x1e04   : > { %6375 = vmatpush3.msra.mxu1 %v4931_v4 }
0x1e05   : > { %6376 = vmatprep.subr.mxu1 %v7573_v0 }
0x1e9d   : > { %v4508_v34 = vpop.f32.mrf.mxu1 }
0x1e9e   : > { %v4509_v5 = vadd.f32 %v4508_v34, %v4438_v3 }
0x1e9f   : > { %v6296_v48 = vpop.f32.mrf.mxu1 }
0x1ea0   : > { %v4758_v10 = vrot.slane %v4509_v5, 6 }
0x1ea2   : > { %v8559_v35 = vsel %vm4765_vm7, %v8521_v14, %v4758_v10  ;;  %v5024_v14 = vld [vmem:[%s8713_s22 + $0x48] sm:$0xff] }
0x1ea5   : > { %v4669_v52 = vpop.f32.mrf.mxu1 }
0x1ea6   : > { %v4670_v13 = vadd.f32 %v4669_v52, %v4599_v41 }
0x1ea7   : > { %v6318_v45 = vpop.f32.mrf.mxu1 }
0x1ea8   : > { %v4673_v16 = vmax.f32 %v4670_v13, 0.0 }
0x1eaa   : > { %6328 = vmatmul.mubr.msk.f32.vlgmr.msra.gmra.mxu0 %vm1428_vm1, %v4673_v16 }
0x1eab   : > { %6342 = vmatpush3.msra.mxu0 %v4774_v40  ;;  %6349 = vmatprep.mubr.msk.f32.mxu0 %vm7574_vm0, %v7573_v0 }
0x1eac   : > { %6343 = vmatprep.subr.mxu0 %v7573_v0 }
0x1ead   : > { %6344 = vmatpush3.msra.mxu0 %v4773_v44  ;;  %v8565_v47 = vpop.f32.mrf.mxu1 }
0x1eae   : > { %6345 = vmatprep.subr.mxu0 %v7573_v0 }
0x1eaf   : > { %6346 = vmatpush3.msra.mxu0 %v4772_v46  ;;  %v6340_v58 = vpop.f32.mrf.mxu1 }
0x1eb0   : > { %6347 = vmatprep.subr.mxu0 %v7573_v0 }
0x1eb1   : > { %6348 = vmatpush3.msra.mxu0 %v4771_v54 }
0x1eb2   : > { %6350 = vmatmul.mubr.msk.f32.vlgmr.msra.gmra.mxu0 %vm1428_vm1, %v8442_v7  ;;  %6387 = vmatprep.subr.mxu0 %v7573_v0  ;;  %v4930_v7 = vld [vmem:[#allocation34 + $0x18] sm:$0xff] }
0x1eb3   : > { %6419 = vmatprep.mubr.msk.f32.mxu0 %vm7574_vm0, %v7573_v0  ;;  %6377 = vmatpush3.msra.mxu1 %v4930_v7 }
0x1eb4   : > { %6378 = vmatprep.subr.mxu1 %v7573_v0  ;;  %6388 = vmatpush3.msra.mxu0 %v5030_v26 }
0x1eb5   : > { %6379 = vmatpush3.msra.mxu1 %v4929_v8  ;;  %6389 = vmatprep.subr.mxu0 %v7573_v0 }
0x1eb6   : > { %6380 = vmatprep.subr.mxu1 %v7573_v0  ;;  %6390 = vmatpush3.msra.mxu0 %v5029_v20 }
0x1eb7   : > { %6381 = vmatpush3.msra.mxu1 %v4928_v17  ;;  %6391 = vmatprep.subr.mxu0 %v7573_v0 }
0x1eb8   : > { %6382 = vmatprep.subr.mxu1 %v7573_v0  ;;  %6392 = vmatpush3.msra.mxu0 %v5028_v49 }
0x1eb9   : > { %6383 = vmatpush3.msra.mxu1 %v4927_v33  ;;  %6393 = vmatprep.subr.mxu0 %v7573_v0 }
0x1eba   : > { %6394 = vmatpush3.msra.mxu0 %v5027_v29 }
0x1ebb   : > { %6395 = vmatprep.subr.mxu0 %v7573_v0 }
0x1ebc   : > { %6396 = vmatpush3.msra.mxu0 %v5026_v50 }
0x1ebd   : > { %6397 = vmatprep.subr.mxu0 %v7573_v0 }
0x1ebe   : > { %6398 = vmatpush3.msra.mxu0 %v5025_v36 }
0x1ebf   : > { %6399 = vmatprep.subr.mxu0 %v7573_v0 }
0x1ec0   : > { %6400 = vmatpush3.msra.mxu0 %v5024_v14 }
0x1ec1   : > { %6401 = vmatprep.subr.mxu0 %v7573_v0 }
0x1ec2   : > { %6402 = vmatpush3.msra.mxu0 %v5023_v51 }
0x1ec3   : > { %6403 = vmatprep.subr.mxu0 %v7573_v0 }
0x1ec4   : > { %6404 = vmatpush3.msra.mxu0 %v5022_v39 }
0x1ec5   : > { %6405 = vmatprep.subr.mxu0 %v7573_v0 }
0x1ec6   : > { %6406 = vmatpush3.msra.mxu0 %v5021_v56 }
0x1ec7   : > { %6407 = vmatprep.subr.mxu0 %v7573_v0 }
0x1ec8   : > { %6408 = vmatpush3.msra.mxu0 %v5020_v6 }
0x1ec9   : > { %6409 = vmatprep.subr.mxu0 %v7573_v0 }
0x1eca   : > { %6410 = vmatpush3.msra.mxu0 %v5019_v15 }
0x1ecb   : > { %6411 = vmatprep.subr.mxu0 %v7573_v0 }
0x1ecc   : > { %6412 = vmatpush3.msra.mxu0 %v5018_v42 }
0x1ecd   : > { %6413 = vmatprep.subr.mxu0 %v7573_v0 }
0x1ece   : > { %6414 = vmatpush3.msra.mxu0 %v5017_v18 }
0x1ecf   : > { %6415 = vmatprep.subr.mxu0 %v7573_v0 }
0x1ed0   : > { %6416 = vmatpush3.msra.mxu0 %v5016_v32 }
0x1ed1   : > { %6417 = vmatprep.subr.mxu0 %v7573_v0 }
0x1ed2   : > { %6418 = vmatpush3.msra.mxu0 %v5015_v55 }
0x1f6a   : > { %v4750_v57 = vpop.f32.mrf.mxu0 }
0x1f6b   : > { %v4751_v61 = vadd.f32 %v4750_v57, %v4680_v60 }
0x1f6c   : > { %v6329_v27 = vpop.f32.mrf.mxu0 }
0x1f6d   : > { %v4761_v62 = vrot.slane %v4751_v61, 5 }
0x1f6f   : > { %v4768_v53 = vsel %vm4767_vm8, %v8559_v35, %v4761_v62 }
0x1f70   : > { %4770 = vst.msk [vmem:[%s1358_s8] sm:$0xf] %vm4769_vm9, %v4768_v53 }
0x1f72   : > { %v4920_v59 = vpop.f32.mrf.mxu0 }
0x1f73   : > { %v4921_v12 = vadd.f32 %v4920_v59, %v8565_v47 }
0x1f74   : > { %v6351_v21 = vpop.f32.mrf.mxu0 }
0x1f75   : > { %v4925_v22 = vadd.f32 %v4924_v63, %v4921_v12 }
0x1f77   : > { %v4926_v30 = vmax.f32 %v4925_v22, 0.0 }
0x1f79   : > { %6385 = vmatmul.mubr.f32.vlgmr.msra.gmra.mxu1 %v4926_v30 }
0x2039   : > { %v5010_v37 = vpop.f32.mrf.mxu1 }
0x203a   : > { %v5011_v38 = vadd.f32 %v5010_v37, %v4943_v28 }
0x203b   : > { %v6386_v19 = vpop.f32.mrf.mxu1 }
0x203c   : > { %v5014_v24 = vmax.f32 %v5011_v38, 0.0 }
0x203e   : > { %6420 = vmatmul.mubr.f32.vlgmr.msra.gmra.mxu0 %v5014_v24 }
0x20fe   : > { %v5098_v43 = vpop.f32.mrf.mxu0 }
0x20ff   : > { %v5099_v9 = vadd.f32 %v5098_v43, %v5031_v2 }
0x2100   : > { %v6421_v23 = vpop.f32.mrf.mxu0 }
0x2101   : > { %5103 = vst.msk [vmem:[%s1361_s12] sm:$0x1] %vm5102_vm10, %v5099_v9 }
0x2102 PF: > { %s89_s28 = sadd.s32 1, %s7509_s28  }
0x2103   : > { %p86_p13 = scmp.ge.s32.totalorder %s89_s28, 8  }
0x2105   :  { %88 = sbr.rel (!%p86_p13) target bundleno = 69 (0x45), region = 376 }
0x210a   :  { %5151 = vsyncpa [#allocation3], 1 }
0x210b   :  { %5153 = vsyncpa [#allocation3 + $0x1], 1 }
0x210c   :  { %5154 = vsyncpa [#allocation5], 1 }
0x210d   :  { %5155 = vsyncpa [#allocation8], 1 }
0x210e   :  { %5156 = vsyncpa [#allocation11], 1 }
0x210f   :  { %5157 = vsyncpa [#allocation14], 1 }
0x2110   :  { %5158 = vsyncpa [#allocation17], 1 }
0x2111   :  { %5159 = vsyncpa [#allocation20], 1 }
0x2112   :  { %5160 = vsyncpa [#allocation23], 1 }
0x2113   :  { %5161 = vsyncpa [#allocation26], 1 }
0x2114   :  { %5162 = vsyncpa [#allocation29], 1 }
0x2115   :  { %5163 = vsyncpa [#allocation32], 1 }
0x2116   :  { %5164 = vsyncpa [#allocation35], 1 }
0x2117   :  { %5165 = vsyncpa [#allocation38], 1 }

</bundles_post_ra>
